<compile_context>
chip_gen: v6e
topology: v6e:2x2x1
jax: 0.10.0
libtpu: 0.0.40
codegen_flags: <defaults>
</compile_context>

<pallas_src>
import functools
import math

import jax
import jax.numpy as jnp
import numpy as np
from jax.experimental import pallas as pl
from jax.experimental.pallas import tpu as pltpu


PARAM_ORDER = ("wq", "bq", "wk", "bk", "wv", "bv", "wo", "bo")
PACKED_ORDER = ("wq", "bq", "wkv", "bkv", "wo", "bo")


# ----------------------------------------------------------------------------
# In-kernel MAB block (operates on VMEM values + one VMEM scratch ref)
# ----------------------------------------------------------------------------
def _mab_block(q, k, wq, bq, wkv, bkv, wo, bo, o_scr, *, num_heads, dim_V):
    """One MAB block (ln=False path).

    q: (Nq, Dq) [batch-shared, e.g. inducing points] or (Bt, Nq, Dq).
    k: (Bt, Nk, Dk).  o_scr: VMEM scratch (Bt, Nq, dim_V) f32.
    Returns (Bt, Nq, dim_V) in f32.
    """
    f32, bf16 = jnp.float32, jnp.bfloat16
    Bt, Nk, Dk = k.shape
    q_shared = (q.ndim == 2)
    Nq = q.shape[-2]
    dh = dim_V // num_heads
    scale = 1.0 / math.sqrt(dim_V)

    # ---- fused K/V projection: one wide (Bt*Nk, Dk) @ (Dk, 2*dim_V) matmul ----
    k2 = k.reshape(Bt * Nk, Dk).astype(bf16)
    kv = jnp.dot(k2, wkv, preferred_element_type=f32) + bkv        # (Bt*Nk, 2*dim_V)
    Kb = kv[:, :dim_V].reshape(Bt, Nk, dim_V).astype(bf16)
    Vb = kv[:, dim_V:].reshape(Bt, Nk, dim_V).astype(bf16)

    # ---- Q projection (computed once when the query is batch-shared) ----
    if q_shared:
        Qp = jnp.dot(q.astype(bf16), wq, preferred_element_type=f32) + bq   # (Nq, dim_V)
        Qp = jnp.broadcast_to(Qp[None], (Bt, Nq, dim_V))
    else:
        q2 = q.reshape(Bt * Nq, q.shape[-1]).astype(bf16)
        Qp = (jnp.dot(q2, wq, preferred_element_type=f32) + bq
              ).reshape(Bt, Nq, dim_V)
    # Fold the 1/sqrt(dim_V) scale into the small query tensor (not the scores).
    Qs = (Qp * scale).astype(bf16)

    # ---- per-head attention, batched over the Bt batch elements ----
    for h in range(num_heads):                       # static unrolled head loop
        sl = slice(h * dh, (h + 1) * dh)
        s = jnp.einsum('bqd,bkd->bqk', Qs[:, :, sl], Kb[:, :, sl],
                       preferred_element_type=f32)               # (Bt, Nq, Nk)
        s = s - jnp.max(s, axis=-1, keepdims=True)
        p = jnp.exp(s)
        inv = pl.reciprocal(jnp.sum(p, axis=-1, keepdims=True), approx=True)
        a = (p * inv).astype(bf16)                   # softmax via EUP reciprocal
        # Head outputs go into a VMEM scratch slab (no lane-axis concatenate).
        o_scr[:, :, sl] = Qp[:, :, sl] + jnp.einsum(
            'bqk,bkd->bqd', a, Vb[:, :, sl], preferred_element_type=f32)

    # ---- O + relu(fc_o(O)) as one (Bt*Nq, dim_V) matmul ----
    O2 = o_scr[...].reshape(Bt * Nq, dim_V)
    ff = jnp.dot(O2.astype(bf16), wo, preferred_element_type=f32) + bo
    return (O2 + jnp.maximum(ff, 0.0)).reshape(Bt, Nq, dim_V)


# ----------------------------------------------------------------------------
# Fused SetTransformer kernel: all layers + final mean, Bt batch elems / step
# ----------------------------------------------------------------------------
def set_transformer_kernel(
        x_ref, i_ref,
        wq0_ref, bq0_ref, wkv0_ref, bkv0_ref, wo0_ref, bo0_ref,
        wq1_ref, bq1_ref, wkv1_ref, bkv1_ref, wo1_ref, bo1_ref,
        o_ref, h_scr, x_scr, *, num_heads):
    """x_ref: (Bt, N, D).  i_ref: (L, M, D) bf16.  Weights layer-stacked (L, ...).
    o_ref: (Bt, D) -- mean over the sequence axis of the last layer's output."""
    num_layers = i_ref.shape[0]
    dim_V = wq0_ref.shape[-1]

    x = x_ref[...].astype(jnp.float32)               # (Bt, N, D) master copy, f32
    for l in range(num_layers):                      # static layer loop, fully fused
        ind = i_ref[l]                               # (M, D) bf16, batch-shared
        h = _mab_block(ind, x,
                       wq0_ref[l], bq0_ref[l], wkv0_ref[l], bkv0_ref[l],
                       wo0_ref[l], bo0_ref[l], h_scr,
                       num_heads=num_heads, dim_V=dim_V)          # mab0(I, X)
        x = _mab_block(x, h,
                       wq1_ref[l], bq1_ref[l], wkv1_ref[l], bkv1_ref[l],
                       wo1_ref[l], bo1_ref[l], x_scr,
                       num_heads=num_heads, dim_V=dim_V)          # mab1(X, H)

    inv_n = 1.0 / x.shape[1]
    o_ref[...] = (jnp.sum(x, axis=1) * inv_n).astype(o_ref.dtype)


# ----------------------------------------------------------------------------
# Batch-block size heuristic
# ----------------------------------------------------------------------------
def _pick_block_b(B, N, target_rows=256):
    """Batch elements per grid step.  Preferences, in order:
       (1) even grid extent so both v7x TensorCores get work,
       (2) Bt sublane-aligned (multiple of 8, or trivial) for a dense output vst,
       (3) Bt*N near an MXU-friendly row count without ballooning VMEM."""
    divisors = [d for d in range(1, B + 1) if B % d == 0]

    def pref(d):
        return ((B // d) % 2 == 0,                   # keep both v7x cores busy
                d % 8 == 0 or d == 1 or d == B,      # sublane-dense / full output rows
                -abs(d * N - target_rows))           # rows near the MXU target
    return max(divisors, key=pref)


# ----------------------------------------------------------------------------
# Wrapper: one pallas_call for the whole forward pass
# ----------------------------------------------------------------------------
def set_transformer_forward(X, mask, params, num_heads, block_b=None):
    del mask                                   # unused by the torch forward too
    B, N, D = X.shape
    L, M, _ = params["I"].shape
    dim_V = params["mab0"]["wq"].shape[-1]
    assert N % 8 == 0 and M % 8 == 0, "seq / num_inds must be sublane multiples"

    Bt = block_b or _pick_block_b(B, N)
    assert B % Bt == 0

    bf16, f32 = jnp.bfloat16, jnp.float32

    def pack_mab(m):
        # Fuse K/V weights once in the wrapper; pre-cast matrices to bf16
        # (MXU operands), keep biases f32 (added to f32 accumulators).
        return dict(
            wq=m["wq"].astype(bf16),
            bq=m["bq"].astype(f32),
            wkv=jnp.concatenate([m["wk"], m["wv"]], axis=-1).astype(bf16),
            bkv=jnp.concatenate([m["bk"], m["bv"]], axis=-1).astype(f32),
            wo=m["wo"].astype(bf16),
            bo=m["bo"].astype(f32),
        )

    m0, m1 = pack_mab(params["mab0"]), pack_mab(params["mab1"])
    I_bf = params["I"].astype(bf16)
    weight_args = [m0[k] for k in PACKED_ORDER] + [m1[k] for k in PACKED_ORDER]

    def resident(arr):
        # Full-array block + constant index_map: stays resident in VMEM for the
        # whole batch grid (no re-DMA, no broadcast materialization).
        return pl.BlockSpec(arr.shape, lambda b: (0,) * arr.ndim)

    kernel = functools.partial(set_transformer_kernel, num_heads=num_heads)

    return pl.pallas_call(
        kernel,
        out_shape=jax.ShapeDtypeStruct((B, dim_V), X.dtype),
        grid=(B // Bt,),
        in_specs=[pl.BlockSpec((Bt, N, D), lambda b: (b, 0, 0)),
                  resident(I_bf)] + [resident(w) for w in weight_args],
        out_specs=pl.BlockSpec((Bt, dim_V), lambda b: (b, 0)),
        scratch_shapes=[pltpu.VMEM((Bt, M, dim_V), jnp.float32),   # mab0 head slab
                        pltpu.VMEM((Bt, N, dim_V), jnp.float32)],  # mab1 head slab
        compiler_params=pltpu.CompilerParams(
            dimension_semantics=("parallel",),       # batch axis shards across TCs
            vmem_limit_bytes=32 * 1024 * 1024),
    )(X, I_bf, *weight_args)


# ----------------------------------------------------------------------------
# Deterministic parameter init (synthetic; mirrors torch shapes, layer-stacked)
# ----------------------------------------------------------------------------
def init_linear(key, din, dout):
    kw, kb = jax.random.split(key)
    bound = 1.0 / math.sqrt(din)
    w = jax.random.uniform(kw, (din, dout), jnp.float32, -bound, bound)
    b = jax.random.uniform(kb, (1, dout), jnp.float32, -bound, bound)
    return w, b


def init_mab(key, dim_Q, dim_K, dim_V):
    ks = jax.random.split(key, 4)
    wq, bq = init_linear(ks[0], dim_Q, dim_V)
    wk, bk = init_linear(ks[1], dim_K, dim_V)
    wv, bv = init_linear(ks[2], dim_K, dim_V)
    wo, bo = init_linear(ks[3], dim_V, dim_V)
    return dict(wq=wq, bq=bq, wk=wk, bk=bk, wv=wv, bv=bv, wo=wo, bo=bo)


def init_set_transformer(key, num_layers, num_inds, dim_hidden):
    Is, m0s, m1s = [], [], []
    for _ in range(num_layers):
        key, k_i, k_m0, k_m1 = jax.random.split(key, 4)
        bound = math.sqrt(6.0 / (num_inds + dim_hidden))          # xavier_uniform
        Is.append(jax.random.uniform(k_i, (num_inds, dim_hidden),
                                     jnp.float32, -bound, bound))
        m0s.append(init_mab(k_m0, dim_hidden, dim_hidden, dim_hidden))
        m1s.append(init_mab(k_m1, dim_hidden, dim_hidden, dim_hidden))

    def stack(dicts):
        return {k: jnp.stack([d[k] for d in dicts]) for k in PARAM_ORDER}

    return dict(I=jnp.stack(Is), mab0=stack(m0s), mab1=stack(m1s))


# ----------------------------------------------------------------------------
# Pure-JAX f32 reference (mirrors the torch code path exactly) for verification
# ----------------------------------------------------------------------------
def mab_ref(Q, K, p, num_heads):
    dim_V = p["wq"].shape[1]
    Qp = Q @ p["wq"] + p["bq"]
    Kp = K @ p["wk"] + p["bk"]
    Vp = K @ p["wv"] + p["bv"]
    Qh = jnp.concatenate(jnp.split(Qp, num_heads, axis=2), axis=0)
    Kh = jnp.concatenate(jnp.split(Kp, num_heads, axis=2), axis=0)
    Vh = jnp.concatenate(jnp.split(Vp, num_heads, axis=2), axis=0)
    A = jax.nn.softmax(Qh @ jnp.swapaxes(Kh, 1, 2) / math.sqrt(dim_V), axis=2)
    O = jnp.concatenate(jnp.split(Qh + A @ Vh, num_heads, axis=0), axis=2)
    return O + jax.nn.relu(O @ p["wo"] + p["bo"])


def set_transformer_ref(X, params, num_heads):
    L = params["I"].shape[0]
    for l in range(L):
        B = X.shape[0]
        I = jnp.broadcast_to(params["I"][l][None], (B,) + params["I"].shape[1:])
        m0 = {k: v[l] for k, v in params["mab0"].items()}
        m1 = {k: v[l] for k, v in params["mab1"].items()}
        H = mab_ref(I, X, m0, num_heads)
        X = mab_ref(X, H, m1, num_heads)
    return X.mean(axis=-2)


# ----------------------------------------------------------------------------
if __name__ == "__main__":
    # Small shapes consistent with the module.  B=16 so the batch-blocking path
    # is actually exercised (Bt=8 per grid step, grid=(2,), sublane-dense store).
    B, N = 16, 8
    dim_hidden, num_heads, num_inds, num_layers = 32, 4, 8, 2

    key = jax.random.PRNGKey(0)
    key, kx, kp = jax.random.split(key, 3)
    X = jax.random.normal(kx, (B, N, dim_hidden), jnp.float32)
    mask = jnp.ones((B, N), jnp.float32)   # unused by the forward pass (as in torch)
    params = init_set_transformer(kp, num_layers, num_inds, dim_hidden)

    out = jax.block_until_ready(set_transformer_forward(X, mask, params, num_heads))

    ref = set_transformer_ref(X, params, num_heads)
    # Tolerance covers bf16 MXU operands (weights + activations, f32 accumulation)
    # compounded over 2 ISAB layers plus the approximate EUP reciprocal in the
    # softmax; typical error is ~1e-3, worst-case tails ~1e-2 — a real indexing
    # or head-ordering bug would produce O(1) deviations.
    np.testing.assert_allclose(np.asarray(out), np.asarray(ref), rtol=5e-2, atol=5e-2)

    print("KERNEL_OK")
</pallas_src>

<mosaic_0001>
module attributes {stable_mosaic.version = 11 : i64} {
  func.func @set_transformer_kernel(%arg0: i32, %arg1: memref<8x8x32xf32, #tpu.memory_space<vmem>>, %arg2: memref<2x8x32xbf16, #tpu.memory_space<vmem>>, %arg3: memref<2x32x32xbf16, #tpu.memory_space<vmem>>, %arg4: memref<2x1x32xf32, #tpu.memory_space<vmem>>, %arg5: memref<2x32x64xbf16, #tpu.memory_space<vmem>>, %arg6: memref<2x1x64xf32, #tpu.memory_space<vmem>>, %arg7: memref<2x32x32xbf16, #tpu.memory_space<vmem>>, %arg8: memref<2x1x32xf32, #tpu.memory_space<vmem>>, %arg9: memref<2x32x32xbf16, #tpu.memory_space<vmem>>, %arg10: memref<2x1x32xf32, #tpu.memory_space<vmem>>, %arg11: memref<2x32x64xbf16, #tpu.memory_space<vmem>>, %arg12: memref<2x1x64xf32, #tpu.memory_space<vmem>>, %arg13: memref<2x32x32xbf16, #tpu.memory_space<vmem>>, %arg14: memref<2x1x32xf32, #tpu.memory_space<vmem>>, %arg15: memref<8x32xf32, #tpu.memory_space<vmem>>, %arg16: memref<8x8x32xf32, #tpu.memory_space<vmem>>, %arg17: memref<8x8x32xf32, #tpu.memory_space<vmem>>) attributes {dimension_semantics = [#tpu.dimension_semantics<parallel>], iteration_bounds = array<i64: 2>, scalar_prefetch = 0 : i64, scratch_operands = 2 : i64, tpu.core_type = #tpu.core_type<tc>, window_params = [{transform_indices = @transform_0, window_bounds = array<i64: 8, 8, 32>}, {pipeline_mode = #tpu.pipeline_mode<synchronous>, transform_indices = @transform_1, window_bounds = array<i64: 2, 8, 32>}, {pipeline_mode = #tpu.pipeline_mode<synchronous>, transform_indices = @transform_2, window_bounds = array<i64: 2, 32, 32>}, {pipeline_mode = #tpu.pipeline_mode<synchronous>, transform_indices = @transform_3, window_bounds = array<i64: 2, 1, 32>}, {pipeline_mode = #tpu.pipeline_mode<synchronous>, transform_indices = @transform_4, window_bounds = array<i64: 2, 32, 64>}, {pipeline_mode = #tpu.pipeline_mode<synchronous>, transform_indices = @transform_5, window_bounds = array<i64: 2, 1, 64>}, {pipeline_mode = #tpu.pipeline_mode<synchronous>, transform_indices = @transform_6, window_bounds = array<i64: 2, 32, 32>}, {pipeline_mode = #tpu.pipeline_mode<synchronous>, transform_indices = @transform_7, window_bounds = array<i64: 2, 1, 32>}, {pipeline_mode = #tpu.pipeline_mode<synchronous>, transform_indices = @transform_8, window_bounds = array<i64: 2, 32, 32>}, {pipeline_mode = #tpu.pipeline_mode<synchronous>, transform_indices = @transform_9, window_bounds = array<i64: 2, 1, 32>}, {pipeline_mode = #tpu.pipeline_mode<synchronous>, transform_indices = @transform_10, window_bounds = array<i64: 2, 32, 64>}, {pipeline_mode = #tpu.pipeline_mode<synchronous>, transform_indices = @transform_11, window_bounds = array<i64: 2, 1, 64>}, {pipeline_mode = #tpu.pipeline_mode<synchronous>, transform_indices = @transform_12, window_bounds = array<i64: 2, 32, 32>}, {pipeline_mode = #tpu.pipeline_mode<synchronous>, transform_indices = @transform_13, window_bounds = array<i64: 2, 1, 32>}, {transform_indices = @transform_14, window_bounds = array<i64: 8, 32>}]} {
    %c0 = arith.constant 0 : index
    %c0_0 = arith.constant 0 : index
    %c0_1 = arith.constant 0 : index
    %0 = vector.load %arg1[%c0, %c0_0, %c0_1] : memref<8x8x32xf32, #tpu.memory_space<vmem>>, vector<8x8x32xf32>
    %c0_2 = arith.constant 0 : index
    %c0_3 = arith.constant 0 : index
    %c0_4 = arith.constant 0 : index
    %1 = vector.load %arg2[%c0_2, %c0_3, %c0_4] : memref<2x8x32xbf16, #tpu.memory_space<vmem>>, vector<1x8x32xbf16>
    %2 = vector.shape_cast %1 : vector<1x8x32xbf16> to vector<8x32xbf16>
    %c0_5 = arith.constant 0 : index
    %c0_6 = arith.constant 0 : index
    %c0_7 = arith.constant 0 : index
    %3 = vector.load %arg3[%c0_5, %c0_6, %c0_7] : memref<2x32x32xbf16, #tpu.memory_space<vmem>>, vector<1x32x32xbf16>
    %4 = vector.shape_cast %3 : vector<1x32x32xbf16> to vector<32x32xbf16>
    %c0_8 = arith.constant 0 : index
    %c0_9 = arith.constant 0 : index
    %c0_10 = arith.constant 0 : index
    %5 = vector.load %arg4[%c0_8, %c0_9, %c0_10] : memref<2x1x32xf32, #tpu.memory_space<vmem>>, vector<1x1x32xf32>
    %6 = vector.shape_cast %5 : vector<1x1x32xf32> to vector<1x32xf32>
    %c0_11 = arith.constant 0 : index
    %c0_12 = arith.constant 0 : index
    %c0_13 = arith.constant 0 : index
    %7 = vector.load %arg5[%c0_11, %c0_12, %c0_13] : memref<2x32x64xbf16, #tpu.memory_space<vmem>>, vector<1x32x64xbf16>
    %8 = vector.shape_cast %7 : vector<1x32x64xbf16> to vector<32x64xbf16>
    %c0_14 = arith.constant 0 : index
    %c0_15 = arith.constant 0 : index
    %c0_16 = arith.constant 0 : index
    %9 = vector.load %arg6[%c0_14, %c0_15, %c0_16] : memref<2x1x64xf32, #tpu.memory_space<vmem>>, vector<1x1x64xf32>
    %10 = vector.shape_cast %9 : vector<1x1x64xf32> to vector<1x64xf32>
    %c0_17 = arith.constant 0 : index
    %c0_18 = arith.constant 0 : index
    %c0_19 = arith.constant 0 : index
    %11 = vector.load %arg7[%c0_17, %c0_18, %c0_19] : memref<2x32x32xbf16, #tpu.memory_space<vmem>>, vector<1x32x32xbf16>
    %12 = vector.shape_cast %11 : vector<1x32x32xbf16> to vector<32x32xbf16>
    %c0_20 = arith.constant 0 : index
    %c0_21 = arith.constant 0 : index
    %c0_22 = arith.constant 0 : index
    %13 = vector.load %arg8[%c0_20, %c0_21, %c0_22] : memref<2x1x32xf32, #tpu.memory_space<vmem>>, vector<1x1x32xf32>
    %14 = vector.shape_cast %13 : vector<1x1x32xf32> to vector<1x32xf32>
    %15 = vector.shape_cast %0 : vector<8x8x32xf32> to vector<64x32xf32>
    %16 = arith.truncf %15 : vector<64x32xf32> to vector<64x32xbf16>
    %cst = arith.constant dense<0.000000e+00> : vector<64x64xf32>
    %17 = tpu.matmul %16, %8, %cst {dimension_numbers = #tpu.dot_dimension_numbers<[1], [0], [0], [1], [0, 0, 1, 1], [], []>} : vector<64x32xbf16>, vector<32x64xbf16>, vector<64x64xf32> -> vector<64x64xf32>
    %18 = vector.broadcast %10 : vector<1x64xf32> to vector<64x64xf32>
    %19 = arith.addf %17, %18 : vector<64x64xf32>
    %20 = vector.extract_strided_slice %19 {offsets = [0, 0], sizes = [64, 32], strides = [1, 1]} : vector<64x64xf32> to vector<64x32xf32>
    %21 = vector.shape_cast %20 : vector<64x32xf32> to vector<8x8x32xf32>
    %22 = arith.truncf %21 : vector<8x8x32xf32> to vector<8x8x32xbf16>
    %23 = vector.extract_strided_slice %19 {offsets = [0, 32], sizes = [64, 32], strides = [1, 1]} : vector<64x64xf32> to vector<64x32xf32>
    %24 = vector.shape_cast %23 : vector<64x32xf32> to vector<8x8x32xf32>
    %25 = arith.truncf %24 : vector<8x8x32xf32> to vector<8x8x32xbf16>
    %cst_23 = arith.constant dense<0.000000e+00> : vector<8x32xf32>
    %26 = tpu.matmul %2, %4, %cst_23 {dimension_numbers = #tpu.dot_dimension_numbers<[1], [0], [0], [1], [0, 0, 1, 1], [], []>} : vector<8x32xbf16>, vector<32x32xbf16>, vector<8x32xf32> -> vector<8x32xf32>
    %27 = vector.broadcast %6 : vector<1x32xf32> to vector<8x32xf32>
    %28 = arith.addf %26, %27 : vector<8x32xf32>
    %29 = vector.shape_cast %28 : vector<8x32xf32> to vector<1x8x32xf32>
    %30 = vector.shape_cast %29 : vector<1x8x32xf32> to vector<1x8x32xf32>
    %31 = vector.broadcast %30 : vector<1x8x32xf32> to vector<8x8x32xf32>
    %cst_24 = arith.constant 0.176776692 : f32
    %32 = vector.broadcast %cst_24 : f32 to vector<8x8x32xf32>
    %33 = arith.mulf %31, %32 : vector<8x8x32xf32>
    %34 = arith.truncf %33 : vector<8x8x32xf32> to vector<8x8x32xbf16>
    %35 = vector.extract_strided_slice %34 {offsets = [0, 0, 0], sizes = [8, 8, 8], strides = [1, 1, 1]} : vector<8x8x32xbf16> to vector<8x8x8xbf16>
    %36 = vector.extract_strided_slice %22 {offsets = [0, 0, 0], sizes = [8, 8, 8], strides = [1, 1, 1]} : vector<8x8x32xbf16> to vector<8x8x8xbf16>
    "tpu.trace_start"() <{level = 10 : i32, message = "bqd,bkd->bqk"}> : () -> ()
    %cst_25 = arith.constant dense<0.000000e+00> : vector<8x8x8xf32>
    %37 = tpu.matmul %35, %36, %cst_25 {dimension_numbers = #tpu.dot_dimension_numbers<[2], [2], [1], [1], [0, 0, 0, 1, 1, 1], [0], [0]>} : vector<8x8x8xbf16>, vector<8x8x8xbf16>, vector<8x8x8xf32> -> vector<8x8x8xf32>
    "tpu.trace_stop"() : () -> ()
    %cst_26 = arith.constant dense<0xFF800000> : vector<8x8xf32>
    %38 = vector.multi_reduction <maximumf>, %37, %cst_26 [2] : vector<8x8x8xf32> to vector<8x8xf32>
    %39 = vector.shape_cast %38 : vector<8x8xf32> to vector<8x8x1xf32>
    %40 = vector.broadcast %39 : vector<8x8x1xf32> to vector<8x8x8xf32>
    %41 = arith.subf %37, %40 : vector<8x8x8xf32>
    %42 = math.exp %41 : vector<8x8x8xf32>
    %cst_27 = arith.constant dense<0.000000e+00> : vector<8x8xf32>
    %43 = vector.multi_reduction <add>, %42, %cst_27 [2] : vector<8x8x8xf32> to vector<8x8xf32>
    %44 = vector.shape_cast %43 : vector<8x8xf32> to vector<8x8x1xf32>
    %45 = tpu.reciprocal %44 {approx = true} : vector<8x8x1xf32> -> vector<8x8x1xf32>
    %46 = vector.broadcast %45 : vector<8x8x1xf32> to vector<8x8x8xf32>
    %47 = arith.mulf %42, %46 : vector<8x8x8xf32>
    %48 = arith.truncf %47 : vector<8x8x8xf32> to vector<8x8x8xbf16>
    %49 = vector.extract_strided_slice %31 {offsets = [0, 0, 0], sizes = [8, 8, 8], strides = [1, 1, 1]} : vector<8x8x32xf32> to vector<8x8x8xf32>
    %50 = vector.extract_strided_slice %25 {offsets = [0, 0, 0], sizes = [8, 8, 8], strides = [1, 1, 1]} : vector<8x8x32xbf16> to vector<8x8x8xbf16>
    "tpu.trace_start"() <{level = 10 : i32, message = "bqk,bkd->bqd"}> : () -> ()
    %cst_28 = arith.constant dense<0.000000e+00> : vector<8x8x8xf32>
    %51 = tpu.matmul %48, %50, %cst_28 {dimension_numbers = #tpu.dot_dimension_numbers<[2], [1], [1], [2], [0, 0, 0, 1, 1, 2], [0], [0]>} : vector<8x8x8xbf16>, vector<8x8x8xbf16>, vector<8x8x8xf32> -> vector<8x8x8xf32>
    "tpu.trace_stop"() : () -> ()
    %52 = arith.addf %49, %51 : vector<8x8x8xf32>
    %c0_29 = arith.constant 0 : index
    %c0_30 = arith.constant 0 : index
    %c0_31 = arith.constant 0 : index
    %53 = vector.load %arg16[%c0_29, %c0_30, %c0_31] : memref<8x8x32xf32, #tpu.memory_space<vmem>>, vector<8x8x8xf32>
    tpu.vector_store %arg16[%c0_29, %c0_30, %c0_31], %52 {strides = array<i32>} : memref<8x8x32xf32, #tpu.memory_space<vmem>>, vector<8x8x8xf32>,
    %54 = vector.extract_strided_slice %34 {offsets = [0, 0, 8], sizes = [8, 8, 8], strides = [1, 1, 1]} : vector<8x8x32xbf16> to vector<8x8x8xbf16>
    %55 = vector.extract_strided_slice %22 {offsets = [0, 0, 8], sizes = [8, 8, 8], strides = [1, 1, 1]} : vector<8x8x32xbf16> to vector<8x8x8xbf16>
    "tpu.trace_start"() <{level = 10 : i32, message = "bqd,bkd->bqk"}> : () -> ()
    %cst_32 = arith.constant dense<0.000000e+00> : vector<8x8x8xf32>
    %56 = tpu.matmul %54, %55, %cst_32 {dimension_numbers = #tpu.dot_dimension_numbers<[2], [2], [1], [1], [0, 0, 0, 1, 1, 1], [0], [0]>} : vector<8x8x8xbf16>, vector<8x8x8xbf16>, vector<8x8x8xf32> -> vector<8x8x8xf32>
    "tpu.trace_stop"() : () -> ()
    %cst_33 = arith.constant dense<0xFF800000> : vector<8x8xf32>
    %57 = vector.multi_reduction <maximumf>, %56, %cst_33 [2] : vector<8x8x8xf32> to vector<8x8xf32>
    %58 = vector.shape_cast %57 : vector<8x8xf32> to vector<8x8x1xf32>
    %59 = vector.broadcast %58 : vector<8x8x1xf32> to vector<8x8x8xf32>
    %60 = arith.subf %56, %59 : vector<8x8x8xf32>
    %61 = math.exp %60 : vector<8x8x8xf32>
    %cst_34 = arith.constant dense<0.000000e+00> : vector<8x8xf32>
    %62 = vector.multi_reduction <add>, %61, %cst_34 [2] : vector<8x8x8xf32> to vector<8x8xf32>
    %63 = vector.shape_cast %62 : vector<8x8xf32> to vector<8x8x1xf32>
    %64 = tpu.reciprocal %63 {approx = true} : vector<8x8x1xf32> -> vector<8x8x1xf32>
    %65 = vector.broadcast %64 : vector<8x8x1xf32> to vector<8x8x8xf32>
    %66 = arith.mulf %61, %65 : vector<8x8x8xf32>
    %67 = arith.truncf %66 : vector<8x8x8xf32> to vector<8x8x8xbf16>
    %68 = vector.extract_strided_slice %31 {offsets = [0, 0, 8], sizes = [8, 8, 8], strides = [1, 1, 1]} : vector<8x8x32xf32> to vector<8x8x8xf32>
    %69 = vector.extract_strided_slice %25 {offsets = [0, 0, 8], sizes = [8, 8, 8], strides = [1, 1, 1]} : vector<8x8x32xbf16> to vector<8x8x8xbf16>
    "tpu.trace_start"() <{level = 10 : i32, message = "bqk,bkd->bqd"}> : () -> ()
    %cst_35 = arith.constant dense<0.000000e+00> : vector<8x8x8xf32>
    %70 = tpu.matmul %67, %69, %cst_35 {dimension_numbers = #tpu.dot_dimension_numbers<[2], [1], [1], [2], [0, 0, 0, 1, 1, 2], [0], [0]>} : vector<8x8x8xbf16>, vector<8x8x8xbf16>, vector<8x8x8xf32> -> vector<8x8x8xf32>
    "tpu.trace_stop"() : () -> ()
    %71 = arith.addf %68, %70 : vector<8x8x8xf32>
    %c0_36 = arith.constant 0 : index
    %c0_37 = arith.constant 0 : index
    %c8 = arith.constant 8 : index
    %72 = vector.load %arg16[%c0_36, %c0_37, %c8] : memref<8x8x32xf32, #tpu.memory_space<vmem>>, vector<8x8x8xf32>
    tpu.vector_store %arg16[%c0_36, %c0_37, %c8], %71 {strides = array<i32>} : memref<8x8x32xf32, #tpu.memory_space<vmem>>, vector<8x8x8xf32>,
    %73 = vector.extract_strided_slice %34 {offsets = [0, 0, 16], sizes = [8, 8, 8], strides = [1, 1, 1]} : vector<8x8x32xbf16> to vector<8x8x8xbf16>
    %74 = vector.extract_strided_slice %22 {offsets = [0, 0, 16], sizes = [8, 8, 8], strides = [1, 1, 1]} : vector<8x8x32xbf16> to vector<8x8x8xbf16>
    "tpu.trace_start"() <{level = 10 : i32, message = "bqd,bkd->bqk"}> : () -> ()
    %cst_38 = arith.constant dense<0.000000e+00> : vector<8x8x8xf32>
    %75 = tpu.matmul %73, %74, %cst_38 {dimension_numbers = #tpu.dot_dimension_numbers<[2], [2], [1], [1], [0, 0, 0, 1, 1, 1], [0], [0]>} : vector<8x8x8xbf16>, vector<8x8x8xbf16>, vector<8x8x8xf32> -> vector<8x8x8xf32>
    "tpu.trace_stop"() : () -> ()
    %cst_39 = arith.constant dense<0xFF800000> : vector<8x8xf32>
    %76 = vector.multi_reduction <maximumf>, %75, %cst_39 [2] : vector<8x8x8xf32> to vector<8x8xf32>
    %77 = vector.shape_cast %76 : vector<8x8xf32> to vector<8x8x1xf32>
    %78 = vector.broadcast %77 : vector<8x8x1xf32> to vector<8x8x8xf32>
    %79 = arith.subf %75, %78 : vector<8x8x8xf32>
    %80 = math.exp %79 : vector<8x8x8xf32>
    %cst_40 = arith.constant dense<0.000000e+00> : vector<8x8xf32>
    %81 = vector.multi_reduction <add>, %80, %cst_40 [2] : vector<8x8x8xf32> to vector<8x8xf32>
    %82 = vector.shape_cast %81 : vector<8x8xf32> to vector<8x8x1xf32>
    %83 = tpu.reciprocal %82 {approx = true} : vector<8x8x1xf32> -> vector<8x8x1xf32>
    %84 = vector.broadcast %83 : vector<8x8x1xf32> to vector<8x8x8xf32>
    %85 = arith.mulf %80, %84 : vector<8x8x8xf32>
    %86 = arith.truncf %85 : vector<8x8x8xf32> to vector<8x8x8xbf16>
    %87 = vector.extract_strided_slice %31 {offsets = [0, 0, 16], sizes = [8, 8, 8], strides = [1, 1, 1]} : vector<8x8x32xf32> to vector<8x8x8xf32>
    %88 = vector.extract_strided_slice %25 {offsets = [0, 0, 16], sizes = [8, 8, 8], strides = [1, 1, 1]} : vector<8x8x32xbf16> to vector<8x8x8xbf16>
    "tpu.trace_start"() <{level = 10 : i32, message = "bqk,bkd->bqd"}> : () -> ()
    %cst_41 = arith.constant dense<0.000000e+00> : vector<8x8x8xf32>
    %89 = tpu.matmul %86, %88, %cst_41 {dimension_numbers = #tpu.dot_dimension_numbers<[2], [1], [1], [2], [0, 0, 0, 1, 1, 2], [0], [0]>} : vector<8x8x8xbf16>, vector<8x8x8xbf16>, vector<8x8x8xf32> -> vector<8x8x8xf32>
    "tpu.trace_stop"() : () -> ()
    %90 = arith.addf %87, %89 : vector<8x8x8xf32>
    %c0_42 = arith.constant 0 : index
    %c0_43 = arith.constant 0 : index
    %c16 = arith.constant 16 : index
    %91 = vector.load %arg16[%c0_42, %c0_43, %c16] : memref<8x8x32xf32, #tpu.memory_space<vmem>>, vector<8x8x8xf32>
    tpu.vector_store %arg16[%c0_42, %c0_43, %c16], %90 {strides = array<i32>} : memref<8x8x32xf32, #tpu.memory_space<vmem>>, vector<8x8x8xf32>,
    %92 = vector.extract_strided_slice %34 {offsets = [0, 0, 24], sizes = [8, 8, 8], strides = [1, 1, 1]} : vector<8x8x32xbf16> to vector<8x8x8xbf16>
    %93 = vector.extract_strided_slice %22 {offsets = [0, 0, 24], sizes = [8, 8, 8], strides = [1, 1, 1]} : vector<8x8x32xbf16> to vector<8x8x8xbf16>
    "tpu.trace_start"() <{level = 10 : i32, message = "bqd,bkd->bqk"}> : () -> ()
    %cst_44 = arith.constant dense<0.000000e+00> : vector<8x8x8xf32>
    %94 = tpu.matmul %92, %93, %cst_44 {dimension_numbers = #tpu.dot_dimension_numbers<[2], [2], [1], [1], [0, 0, 0, 1, 1, 1], [0], [0]>} : vector<8x8x8xbf16>, vector<8x8x8xbf16>, vector<8x8x8xf32> -> vector<8x8x8xf32>
    "tpu.trace_stop"() : () -> ()
    %cst_45 = arith.constant dense<0xFF800000> : vector<8x8xf32>
    %95 = vector.multi_reduction <maximumf>, %94, %cst_45 [2] : vector<8x8x8xf32> to vector<8x8xf32>
    %96 = vector.shape_cast %95 : vector<8x8xf32> to vector<8x8x1xf32>
    %97 = vector.broadcast %96 : vector<8x8x1xf32> to vector<8x8x8xf32>
    %98 = arith.subf %94, %97 : vector<8x8x8xf32>
    %99 = math.exp %98 : vector<8x8x8xf32>
    %cst_46 = arith.constant dense<0.000000e+00> : vector<8x8xf32>
    %100 = vector.multi_reduction <add>, %99, %cst_46 [2] : vector<8x8x8xf32> to vector<8x8xf32>
    %101 = vector.shape_cast %100 : vector<8x8xf32> to vector<8x8x1xf32>
    %102 = tpu.reciprocal %101 {approx = true} : vector<8x8x1xf32> -> vector<8x8x1xf32>
    %103 = vector.broadcast %102 : vector<8x8x1xf32> to vector<8x8x8xf32>
    %104 = arith.mulf %99, %103 : vector<8x8x8xf32>
    %105 = arith.truncf %104 : vector<8x8x8xf32> to vector<8x8x8xbf16>
    %106 = vector.extract_strided_slice %31 {offsets = [0, 0, 24], sizes = [8, 8, 8], strides = [1, 1, 1]} : vector<8x8x32xf32> to vector<8x8x8xf32>
    %107 = vector.extract_strided_slice %25 {offsets = [0, 0, 24], sizes = [8, 8, 8], strides = [1, 1, 1]} : vector<8x8x32xbf16> to vector<8x8x8xbf16>
    "tpu.trace_start"() <{level = 10 : i32, message = "bqk,bkd->bqd"}> : () -> ()
    %cst_47 = arith.constant dense<0.000000e+00> : vector<8x8x8xf32>
    %108 = tpu.matmul %105, %107, %cst_47 {dimension_numbers = #tpu.dot_dimension_numbers<[2], [1], [1], [2], [0, 0, 0, 1, 1, 2], [0], [0]>} : vector<8x8x8xbf16>, vector<8x8x8xbf16>, vector<8x8x8xf32> -> vector<8x8x8xf32>
    "tpu.trace_stop"() : () -> ()
    %109 = arith.addf %106, %108 : vector<8x8x8xf32>
    %c0_48 = arith.constant 0 : index
    %c0_49 = arith.constant 0 : index
    %c24 = arith.constant 24 : index
    %110 = vector.load %arg16[%c0_48, %c0_49, %c24] : memref<8x8x32xf32, #tpu.memory_space<vmem>>, vector<8x8x8xf32>
    tpu.vector_store %arg16[%c0_48, %c0_49, %c24], %109 {strides = array<i32>} : memref<8x8x32xf32, #tpu.memory_space<vmem>>, vector<8x8x8xf32>,
    %c0_50 = arith.constant 0 : index
    %c0_51 = arith.constant 0 : index
    %c0_52 = arith.constant 0 : index
    %111 = vector.load %arg16[%c0_50, %c0_51, %c0_52] : memref<8x8x32xf32, #tpu.memory_space<vmem>>, vector<8x8x32xf32>
    %112 = vector.shape_cast %111 : vector<8x8x32xf32> to vector<64x32xf32>
    %113 = arith.truncf %112 : vector<64x32xf32> to vector<64x32xbf16>
    %cst_53 = arith.constant dense<0.000000e+00> : vector<64x32xf32>
    %114 = tpu.matmul %113, %12, %cst_53 {dimension_numbers = #tpu.dot_dimension_numbers<[1], [0], [0], [1], [0, 0, 1, 1], [], []>} : vector<64x32xbf16>, vector<32x32xbf16>, vector<64x32xf32> -> vector<64x32xf32>
    %115 = vector.broadcast %14 : vector<1x32xf32> to vector<64x32xf32>
    %116 = arith.addf %114, %115 : vector<64x32xf32>
    %cst_54 = arith.constant 0.000000e+00 : f32
    %117 = vector.broadcast %cst_54 : f32 to vector<64x32xf32>
    %118 = arith.maximumf %116, %117 : vector<64x32xf32>
    %119 = arith.addf %112, %118 : vector<64x32xf32>
    %120 = vector.shape_cast %119 : vector<64x32xf32> to vector<8x8x32xf32>
    %c0_55 = arith.constant 0 : index
    %c0_56 = arith.constant 0 : index
    %c0_57 = arith.constant 0 : index
    %121 = vector.load %arg9[%c0_55, %c0_56, %c0_57] : memref<2x32x32xbf16, #tpu.memory_space<vmem>>, vector<1x32x32xbf16>
    %122 = vector.shape_cast %121 : vector<1x32x32xbf16> to vector<32x32xbf16>
    %c0_58 = arith.constant 0 : index
    %c0_59 = arith.constant 0 : index
    %c0_60 = arith.constant 0 : index
    %123 = vector.load %arg10[%c0_58, %c0_59, %c0_60] : memref<2x1x32xf32, #tpu.memory_space<vmem>>, vector<1x1x32xf32>
    %124 = vector.shape_cast %123 : vector<1x1x32xf32> to vector<1x32xf32>
    %c0_61 = arith.constant 0 : index
    %c0_62 = arith.constant 0 : index
    %c0_63 = arith.constant 0 : index
    %125 = vector.load %arg11[%c0_61, %c0_62, %c0_63] : memref<2x32x64xbf16, #tpu.memory_space<vmem>>, vector<1x32x64xbf16>
    %126 = vector.shape_cast %125 : vector<1x32x64xbf16> to vector<32x64xbf16>
    %c0_64 = arith.constant 0 : index
    %c0_65 = arith.constant 0 : index
    %c0_66 = arith.constant 0 : index
    %127 = vector.load %arg12[%c0_64, %c0_65, %c0_66] : memref<2x1x64xf32, #tpu.memory_space<vmem>>, vector<1x1x64xf32>
    %128 = vector.shape_cast %127 : vector<1x1x64xf32> to vector<1x64xf32>
    %c0_67 = arith.constant 0 : index
    %c0_68 = arith.constant 0 : index
    %c0_69 = arith.constant 0 : index
    %129 = vector.load %arg13[%c0_67, %c0_68, %c0_69] : memref<2x32x32xbf16, #tpu.memory_space<vmem>>, vector<1x32x32xbf16>
    %130 = vector.shape_cast %129 : vector<1x32x32xbf16> to vector<32x32xbf16>
    %c0_70 = arith.constant 0 : index
    %c0_71 = arith.constant 0 : index
    %c0_72 = arith.constant 0 : index
    %131 = vector.load %arg14[%c0_70, %c0_71, %c0_72] : memref<2x1x32xf32, #tpu.memory_space<vmem>>, vector<1x1x32xf32>
    %132 = vector.shape_cast %131 : vector<1x1x32xf32> to vector<1x32xf32>
    %133 = vector.shape_cast %120 : vector<8x8x32xf32> to vector<64x32xf32>
    %134 = arith.truncf %133 : vector<64x32xf32> to vector<64x32xbf16>
    %cst_73 = arith.constant dense<0.000000e+00> : vector<64x64xf32>
    %135 = tpu.matmul %134, %126, %cst_73 {dimension_numbers = #tpu.dot_dimension_numbers<[1], [0], [0], [1], [0, 0, 1, 1], [], []>} : vector<64x32xbf16>, vector<32x64xbf16>, vector<64x64xf32> -> vector<64x64xf32>
    %136 = vector.broadcast %128 : vector<1x64xf32> to vector<64x64xf32>
    %137 = arith.addf %135, %136 : vector<64x64xf32>
    %138 = vector.extract_strided_slice %137 {offsets = [0, 0], sizes = [64, 32], strides = [1, 1]} : vector<64x64xf32> to vector<64x32xf32>
    %139 = vector.shape_cast %138 : vector<64x32xf32> to vector<8x8x32xf32>
    %140 = arith.truncf %139 : vector<8x8x32xf32> to vector<8x8x32xbf16>
    %141 = vector.extract_strided_slice %137 {offsets = [0, 32], sizes = [64, 32], strides = [1, 1]} : vector<64x64xf32> to vector<64x32xf32>
    %142 = vector.shape_cast %141 : vector<64x32xf32> to vector<8x8x32xf32>
    %143 = arith.truncf %142 : vector<8x8x32xf32> to vector<8x8x32xbf16>
    %144 = vector.shape_cast %0 : vector<8x8x32xf32> to vector<64x32xf32>
    %145 = arith.truncf %144 : vector<64x32xf32> to vector<64x32xbf16>
    %cst_74 = arith.constant dense<0.000000e+00> : vector<64x32xf32>
    %146 = tpu.matmul %145, %122, %cst_74 {dimension_numbers = #tpu.dot_dimension_numbers<[1], [0], [0], [1], [0, 0, 1, 1], [], []>} : vector<64x32xbf16>, vector<32x32xbf16>, vector<64x32xf32> -> vector<64x32xf32>
    %147 = vector.broadcast %124 : vector<1x32xf32> to vector<64x32xf32>
    %148 = arith.addf %146, %147 : vector<64x32xf32>
    %149 = vector.shape_cast %148 : vector<64x32xf32> to vector<8x8x32xf32>
    %cst_75 = arith.constant 0.176776692 : f32
    %150 = vector.broadcast %cst_75 : f32 to vector<8x8x32xf32>
    %151 = arith.mulf %149, %150 : vector<8x8x32xf32>
    %152 = arith.truncf %151 : vector<8x8x32xf32> to vector<8x8x32xbf16>
    %153 = vector.extract_strided_slice %152 {offsets = [0, 0, 0], sizes = [8, 8, 8], strides = [1, 1, 1]} : vector<8x8x32xbf16> to vector<8x8x8xbf16>
    %154 = vector.extract_strided_slice %140 {offsets = [0, 0, 0], sizes = [8, 8, 8], strides = [1, 1, 1]} : vector<8x8x32xbf16> to vector<8x8x8xbf16>
    "tpu.trace_start"() <{level = 10 : i32, message = "bqd,bkd->bqk"}> : () -> ()
    %cst_76 = arith.constant dense<0.000000e+00> : vector<8x8x8xf32>
    %155 = tpu.matmul %153, %154, %cst_76 {dimension_numbers = #tpu.dot_dimension_numbers<[2], [2], [1], [1], [0, 0, 0, 1, 1, 1], [0], [0]>} : vector<8x8x8xbf16>, vector<8x8x8xbf16>, vector<8x8x8xf32> -> vector<8x8x8xf32>
    "tpu.trace_stop"() : () -> ()
    %cst_77 = arith.constant dense<0xFF800000> : vector<8x8xf32>
    %156 = vector.multi_reduction <maximumf>, %155, %cst_77 [2] : vector<8x8x8xf32> to vector<8x8xf32>
    %157 = vector.shape_cast %156 : vector<8x8xf32> to vector<8x8x1xf32>
    %158 = vector.broadcast %157 : vector<8x8x1xf32> to vector<8x8x8xf32>
    %159 = arith.subf %155, %158 : vector<8x8x8xf32>
    %160 = math.exp %159 : vector<8x8x8xf32>
    %cst_78 = arith.constant dense<0.000000e+00> : vector<8x8xf32>
    %161 = vector.multi_reduction <add>, %160, %cst_78 [2] : vector<8x8x8xf32> to vector<8x8xf32>
    %162 = vector.shape_cast %161 : vector<8x8xf32> to vector<8x8x1xf32>
    %163 = tpu.reciprocal %162 {approx = true} : vector<8x8x1xf32> -> vector<8x8x1xf32>
    %164 = vector.broadcast %163 : vector<8x8x1xf32> to vector<8x8x8xf32>
    %165 = arith.mulf %160, %164 : vector<8x8x8xf32>
    %166 = arith.truncf %165 : vector<8x8x8xf32> to vector<8x8x8xbf16>
    %167 = vector.extract_strided_slice %149 {offsets = [0, 0, 0], sizes = [8, 8, 8], strides = [1, 1, 1]} : vector<8x8x32xf32> to vector<8x8x8xf32>
    %168 = vector.extract_strided_slice %143 {offsets = [0, 0, 0], sizes = [8, 8, 8], strides = [1, 1, 1]} : vector<8x8x32xbf16> to vector<8x8x8xbf16>
    "tpu.trace_start"() <{level = 10 : i32, message = "bqk,bkd->bqd"}> : () -> ()
    %cst_79 = arith.constant dense<0.000000e+00> : vector<8x8x8xf32>
    %169 = tpu.matmul %166, %168, %cst_79 {dimension_numbers = #tpu.dot_dimension_numbers<[2], [1], [1], [2], [0, 0, 0, 1, 1, 2], [0], [0]>} : vector<8x8x8xbf16>, vector<8x8x8xbf16>, vector<8x8x8xf32> -> vector<8x8x8xf32>
    "tpu.trace_stop"() : () -> ()
    %170 = arith.addf %167, %169 : vector<8x8x8xf32>
    %c0_80 = arith.constant 0 : index
    %c0_81 = arith.constant 0 : index
    %c0_82 = arith.constant 0 : index
    %171 = vector.load %arg17[%c0_80, %c0_81, %c0_82] : memref<8x8x32xf32, #tpu.memory_space<vmem>>, vector<8x8x8xf32>
    tpu.vector_store %arg17[%c0_80, %c0_81, %c0_82], %170 {strides = array<i32>} : memref<8x8x32xf32, #tpu.memory_space<vmem>>, vector<8x8x8xf32>,
    %172 = vector.extract_strided_slice %152 {offsets = [0, 0, 8], sizes = [8, 8, 8], strides = [1, 1, 1]} : vector<8x8x32xbf16> to vector<8x8x8xbf16>
    %173 = vector.extract_strided_slice %140 {offsets = [0, 0, 8], sizes = [8, 8, 8], strides = [1, 1, 1]} : vector<8x8x32xbf16> to vector<8x8x8xbf16>
    "tpu.trace_start"() <{level = 10 : i32, message = "bqd,bkd->bqk"}> : () -> ()
    %cst_83 = arith.constant dense<0.000000e+00> : vector<8x8x8xf32>
    %174 = tpu.matmul %172, %173, %cst_83 {dimension_numbers = #tpu.dot_dimension_numbers<[2], [2], [1], [1], [0, 0, 0, 1, 1, 1], [0], [0]>} : vector<8x8x8xbf16>, vector<8x8x8xbf16>, vector<8x8x8xf32> -> vector<8x8x8xf32>
    "tpu.trace_stop"() : () -> ()
    %cst_84 = arith.constant dense<0xFF800000> : vector<8x8xf32>
    %175 = vector.multi_reduction <maximumf>, %174, %cst_84 [2] : vector<8x8x8xf32> to vector<8x8xf32>
    %176 = vector.shape_cast %175 : vector<8x8xf32> to vector<8x8x1xf32>
    %177 = vector.broadcast %176 : vector<8x8x1xf32> to vector<8x8x8xf32>
    %178 = arith.subf %174, %177 : vector<8x8x8xf32>
    %179 = math.exp %178 : vector<8x8x8xf32>
    %cst_85 = arith.constant dense<0.000000e+00> : vector<8x8xf32>
    %180 = vector.multi_reduction <add>, %179, %cst_85 [2] : vector<8x8x8xf32> to vector<8x8xf32>
    %181 = vector.shape_cast %180 : vector<8x8xf32> to vector<8x8x1xf32>
    %182 = tpu.reciprocal %181 {approx = true} : vector<8x8x1xf32> -> vector<8x8x1xf32>
    %183 = vector.broadcast %182 : vector<8x8x1xf32> to vector<8x8x8xf32>
    %184 = arith.mulf %179, %183 : vector<8x8x8xf32>
    %185 = arith.truncf %184 : vector<8x8x8xf32> to vector<8x8x8xbf16>
    %186 = vector.extract_strided_slice %149 {offsets = [0, 0, 8], sizes = [8, 8, 8], strides = [1, 1, 1]} : vector<8x8x32xf32> to vector<8x8x8xf32>
    %187 = vector.extract_strided_slice %143 {offsets = [0, 0, 8], sizes = [8, 8, 8], strides = [1, 1, 1]} : vector<8x8x32xbf16> to vector<8x8x8xbf16>
    "tpu.trace_start"() <{level = 10 : i32, message = "bqk,bkd->bqd"}> : () -> ()
    %cst_86 = arith.constant dense<0.000000e+00> : vector<8x8x8xf32>
    %188 = tpu.matmul %185, %187, %cst_86 {dimension_numbers = #tpu.dot_dimension_numbers<[2], [1], [1], [2], [0, 0, 0, 1, 1, 2], [0], [0]>} : vector<8x8x8xbf16>, vector<8x8x8xbf16>, vector<8x8x8xf32> -> vector<8x8x8xf32>
    "tpu.trace_stop"() : () -> ()
    %189 = arith.addf %186, %188 : vector<8x8x8xf32>
    %c0_87 = arith.constant 0 : index
    %c0_88 = arith.constant 0 : index
    %c8_89 = arith.constant 8 : index
    %190 = vector.load %arg17[%c0_87, %c0_88, %c8_89] : memref<8x8x32xf32, #tpu.memory_space<vmem>>, vector<8x8x8xf32>
    tpu.vector_store %arg17[%c0_87, %c0_88, %c8_89], %189 {strides = array<i32>} : memref<8x8x32xf32, #tpu.memory_space<vmem>>, vector<8x8x8xf32>,
    %191 = vector.extract_strided_slice %152 {offsets = [0, 0, 16], sizes = [8, 8, 8], strides = [1, 1, 1]} : vector<8x8x32xbf16> to vector<8x8x8xbf16>
    %192 = vector.extract_strided_slice %140 {offsets = [0, 0, 16], sizes = [8, 8, 8], strides = [1, 1, 1]} : vector<8x8x32xbf16> to vector<8x8x8xbf16>
    "tpu.trace_start"() <{level = 10 : i32, message = "bqd,bkd->bqk"}> : () -> ()
    %cst_90 = arith.constant dense<0.000000e+00> : vector<8x8x8xf32>
    %193 = tpu.matmul %191, %192, %cst_90 {dimension_numbers = #tpu.dot_dimension_numbers<[2], [2], [1], [1], [0, 0, 0, 1, 1, 1], [0], [0]>} : vector<8x8x8xbf16>, vector<8x8x8xbf16>, vector<8x8x8xf32> -> vector<8x8x8xf32>
    "tpu.trace_stop"() : () -> ()
    %cst_91 = arith.constant dense<0xFF800000> : vector<8x8xf32>
    %194 = vector.multi_reduction <maximumf>, %193, %cst_91 [2] : vector<8x8x8xf32> to vector<8x8xf32>
    %195 = vector.shape_cast %194 : vector<8x8xf32> to vector<8x8x1xf32>
    %196 = vector.broadcast %195 : vector<8x8x1xf32> to vector<8x8x8xf32>
    %197 = arith.subf %193, %196 : vector<8x8x8xf32>
    %198 = math.exp %197 : vector<8x8x8xf32>
    %cst_92 = arith.constant dense<0.000000e+00> : vector<8x8xf32>
    %199 = vector.multi_reduction <add>, %198, %cst_92 [2] : vector<8x8x8xf32> to vector<8x8xf32>
    %200 = vector.shape_cast %199 : vector<8x8xf32> to vector<8x8x1xf32>
    %201 = tpu.reciprocal %200 {approx = true} : vector<8x8x1xf32> -> vector<8x8x1xf32>
    %202 = vector.broadcast %201 : vector<8x8x1xf32> to vector<8x8x8xf32>
    %203 = arith.mulf %198, %202 : vector<8x8x8xf32>
    %204 = arith.truncf %203 : vector<8x8x8xf32> to vector<8x8x8xbf16>
    %205 = vector.extract_strided_slice %149 {offsets = [0, 0, 16], sizes = [8, 8, 8], strides = [1, 1, 1]} : vector<8x8x32xf32> to vector<8x8x8xf32>
    %206 = vector.extract_strided_slice %143 {offsets = [0, 0, 16], sizes = [8, 8, 8], strides = [1, 1, 1]} : vector<8x8x32xbf16> to vector<8x8x8xbf16>
    "tpu.trace_start"() <{level = 10 : i32, message = "bqk,bkd->bqd"}> : () -> ()
    %cst_93 = arith.constant dense<0.000000e+00> : vector<8x8x8xf32>
    %207 = tpu.matmul %204, %206, %cst_93 {dimension_numbers = #tpu.dot_dimension_numbers<[2], [1], [1], [2], [0, 0, 0, 1, 1, 2], [0], [0]>} : vector<8x8x8xbf16>, vector<8x8x8xbf16>, vector<8x8x8xf32> -> vector<8x8x8xf32>
    "tpu.trace_stop"() : () -> ()
    %208 = arith.addf %205, %207 : vector<8x8x8xf32>
    %c0_94 = arith.constant 0 : index
    %c0_95 = arith.constant 0 : index
    %c16_96 = arith.constant 16 : index
    %209 = vector.load %arg17[%c0_94, %c0_95, %c16_96] : memref<8x8x32xf32, #tpu.memory_space<vmem>>, vector<8x8x8xf32>
    tpu.vector_store %arg17[%c0_94, %c0_95, %c16_96], %208 {strides = array<i32>} : memref<8x8x32xf32, #tpu.memory_space<vmem>>, vector<8x8x8xf32>,
    %210 = vector.extract_strided_slice %152 {offsets = [0, 0, 24], sizes = [8, 8, 8], strides = [1, 1, 1]} : vector<8x8x32xbf16> to vector<8x8x8xbf16>
    %211 = vector.extract_strided_slice %140 {offsets = [0, 0, 24], sizes = [8, 8, 8], strides = [1, 1, 1]} : vector<8x8x32xbf16> to vector<8x8x8xbf16>
    "tpu.trace_start"() <{level = 10 : i32, message = "bqd,bkd->bqk"}> : () -> ()
    %cst_97 = arith.constant dense<0.000000e+00> : vector<8x8x8xf32>
    %212 = tpu.matmul %210, %211, %cst_97 {dimension_numbers = #tpu.dot_dimension_numbers<[2], [2], [1], [1], [0, 0, 0, 1, 1, 1], [0], [0]>} : vector<8x8x8xbf16>, vector<8x8x8xbf16>, vector<8x8x8xf32> -> vector<8x8x8xf32>
    "tpu.trace_stop"() : () -> ()
    %cst_98 = arith.constant dense<0xFF800000> : vector<8x8xf32>
    %213 = vector.multi_reduction <maximumf>, %212, %cst_98 [2] : vector<8x8x8xf32> to vector<8x8xf32>
    %214 = vector.shape_cast %213 : vector<8x8xf32> to vector<8x8x1xf32>
    %215 = vector.broadcast %214 : vector<8x8x1xf32> to vector<8x8x8xf32>
    %216 = arith.subf %212, %215 : vector<8x8x8xf32>
    %217 = math.exp %216 : vector<8x8x8xf32>
    %cst_99 = arith.constant dense<0.000000e+00> : vector<8x8xf32>
    %218 = vector.multi_reduction <add>, %217, %cst_99 [2] : vector<8x8x8xf32> to vector<8x8xf32>
    %219 = vector.shape_cast %218 : vector<8x8xf32> to vector<8x8x1xf32>
    %220 = tpu.reciprocal %219 {approx = true} : vector<8x8x1xf32> -> vector<8x8x1xf32>
    %221 = vector.broadcast %220 : vector<8x8x1xf32> to vector<8x8x8xf32>
    %222 = arith.mulf %217, %221 : vector<8x8x8xf32>
    %223 = arith.truncf %222 : vector<8x8x8xf32> to vector<8x8x8xbf16>
    %224 = vector.extract_strided_slice %149 {offsets = [0, 0, 24], sizes = [8, 8, 8], strides = [1, 1, 1]} : vector<8x8x32xf32> to vector<8x8x8xf32>
    %225 = vector.extract_strided_slice %143 {offsets = [0, 0, 24], sizes = [8, 8, 8], strides = [1, 1, 1]} : vector<8x8x32xbf16> to vector<8x8x8xbf16>
    "tpu.trace_start"() <{level = 10 : i32, message = "bqk,bkd->bqd"}> : () -> ()
    %cst_100 = arith.constant dense<0.000000e+00> : vector<8x8x8xf32>
    %226 = tpu.matmul %223, %225, %cst_100 {dimension_numbers = #tpu.dot_dimension_numbers<[2], [1], [1], [2], [0, 0, 0, 1, 1, 2], [0], [0]>} : vector<8x8x8xbf16>, vector<8x8x8xbf16>, vector<8x8x8xf32> -> vector<8x8x8xf32>
    "tpu.trace_stop"() : () -> ()
    %227 = arith.addf %224, %226 : vector<8x8x8xf32>
    %c0_101 = arith.constant 0 : index
    %c0_102 = arith.constant 0 : index
    %c24_103 = arith.constant 24 : index
    %228 = vector.load %arg17[%c0_101, %c0_102, %c24_103] : memref<8x8x32xf32, #tpu.memory_space<vmem>>, vector<8x8x8xf32>
    tpu.vector_store %arg17[%c0_101, %c0_102, %c24_103], %227 {strides = array<i32>} : memref<8x8x32xf32, #tpu.memory_space<vmem>>, vector<8x8x8xf32>,
    %c0_104 = arith.constant 0 : index
    %c0_105 = arith.constant 0 : index
    %c0_106 = arith.constant 0 : index
    %229 = vector.load %arg17[%c0_104, %c0_105, %c0_106] : memref<8x8x32xf32, #tpu.memory_space<vmem>>, vector<8x8x32xf32>
    %230 = vector.shape_cast %229 : vector<8x8x32xf32> to vector<64x32xf32>
    %231 = arith.truncf %230 : vector<64x32xf32> to vector<64x32xbf16>
    %cst_107 = arith.constant dense<0.000000e+00> : vector<64x32xf32>
    %232 = tpu.matmul %231, %130, %cst_107 {dimension_numbers = #tpu.dot_dimension_numbers<[1], [0], [0], [1], [0, 0, 1, 1], [], []>} : vector<64x32xbf16>, vector<32x32xbf16>, vector<64x32xf32> -> vector<64x32xf32>
    %233 = vector.broadcast %132 : vector<1x32xf32> to vector<64x32xf32>
    %234 = arith.addf %232, %233 : vector<64x32xf32>
    %cst_108 = arith.constant 0.000000e+00 : f32
    %235 = vector.broadcast %cst_108 : f32 to vector<64x32xf32>
    %236 = arith.maximumf %234, %235 : vector<64x32xf32>
    %237 = arith.addf %230, %236 : vector<64x32xf32>
    %238 = vector.shape_cast %237 : vector<64x32xf32> to vector<8x8x32xf32>
    %c1 = arith.constant 1 : index
    %c0_109 = arith.constant 0 : index
    %c0_110 = arith.constant 0 : index
    %239 = vector.load %arg2[%c1, %c0_109, %c0_110] : memref<2x8x32xbf16, #tpu.memory_space<vmem>>, vector<1x8x32xbf16>
    %240 = vector.shape_cast %239 : vector<1x8x32xbf16> to vector<8x32xbf16>
    %c1_111 = arith.constant 1 : index
    %c0_112 = arith.constant 0 : index
    %c0_113 = arith.constant 0 : index
    %241 = vector.load %arg3[%c1_111, %c0_112, %c0_113] : memref<2x32x32xbf16, #tpu.memory_space<vmem>>, vector<1x32x32xbf16>
    %242 = vector.shape_cast %241 : vector<1x32x32xbf16> to vector<32x32xbf16>
    %c1_114 = arith.constant 1 : index
    %c0_115 = arith.constant 0 : index
    %c0_116 = arith.constant 0 : index
    %243 = vector.load %arg4[%c1_114, %c0_115, %c0_116] : memref<2x1x32xf32, #tpu.memory_space<vmem>>, vector<1x1x32xf32>
    %244 = vector.shape_cast %243 : vector<1x1x32xf32> to vector<1x32xf32>
    %c1_117 = arith.constant 1 : index
    %c0_118 = arith.constant 0 : index
    %c0_119 = arith.constant 0 : index
    %245 = vector.load %arg5[%c1_117, %c0_118, %c0_119] : memref<2x32x64xbf16, #tpu.memory_space<vmem>>, vector<1x32x64xbf16>
    %246 = vector.shape_cast %245 : vector<1x32x64xbf16> to vector<32x64xbf16>
    %c1_120 = arith.constant 1 : index
    %c0_121 = arith.constant 0 : index
    %c0_122 = arith.constant 0 : index
    %247 = vector.load %arg6[%c1_120, %c0_121, %c0_122] : memref<2x1x64xf32, #tpu.memory_space<vmem>>, vector<1x1x64xf32>
    %248 = vector.shape_cast %247 : vector<1x1x64xf32> to vector<1x64xf32>
    %c1_123 = arith.constant 1 : index
    %c0_124 = arith.constant 0 : index
    %c0_125 = arith.constant 0 : index
    %249 = vector.load %arg7[%c1_123, %c0_124, %c0_125] : memref<2x32x32xbf16, #tpu.memory_space<vmem>>, vector<1x32x32xbf16>
    %250 = vector.shape_cast %249 : vector<1x32x32xbf16> to vector<32x32xbf16>
    %c1_126 = arith.constant 1 : index
    %c0_127 = arith.constant 0 : index
    %c0_128 = arith.constant 0 : index
    %251 = vector.load %arg8[%c1_126, %c0_127, %c0_128] : memref<2x1x32xf32, #tpu.memory_space<vmem>>, vector<1x1x32xf32>
    %252 = vector.shape_cast %251 : vector<1x1x32xf32> to vector<1x32xf32>
    %253 = vector.shape_cast %238 : vector<8x8x32xf32> to vector<64x32xf32>
    %254 = arith.truncf %253 : vector<64x32xf32> to vector<64x32xbf16>
    %cst_129 = arith.constant dense<0.000000e+00> : vector<64x64xf32>
    %255 = tpu.matmul %254, %246, %cst_129 {dimension_numbers = #tpu.dot_dimension_numbers<[1], [0], [0], [1], [0, 0, 1, 1], [], []>} : vector<64x32xbf16>, vector<32x64xbf16>, vector<64x64xf32> -> vector<64x64xf32>
    %256 = vector.broadcast %248 : vector<1x64xf32> to vector<64x64xf32>
    %257 = arith.addf %255, %256 : vector<64x64xf32>
    %258 = vector.extract_strided_slice %257 {offsets = [0, 0], sizes = [64, 32], strides = [1, 1]} : vector<64x64xf32> to vector<64x32xf32>
    %259 = vector.shape_cast %258 : vector<64x32xf32> to vector<8x8x32xf32>
    %260 = arith.truncf %259 : vector<8x8x32xf32> to vector<8x8x32xbf16>
    %261 = vector.extract_strided_slice %257 {offsets = [0, 32], sizes = [64, 32], strides = [1, 1]} : vector<64x64xf32> to vector<64x32xf32>
    %262 = vector.shape_cast %261 : vector<64x32xf32> to vector<8x8x32xf32>
    %263 = arith.truncf %262 : vector<8x8x32xf32> to vector<8x8x32xbf16>
    %cst_130 = arith.constant dense<0.000000e+00> : vector<8x32xf32>
    %264 = tpu.matmul %240, %242, %cst_130 {dimension_numbers = #tpu.dot_dimension_numbers<[1], [0], [0], [1], [0, 0, 1, 1], [], []>} : vector<8x32xbf16>, vector<32x32xbf16>, vector<8x32xf32> -> vector<8x32xf32>
    %265 = vector.broadcast %244 : vector<1x32xf32> to vector<8x32xf32>
    %266 = arith.addf %264, %265 : vector<8x32xf32>
    %267 = vector.shape_cast %266 : vector<8x32xf32> to vector<1x8x32xf32>
    %268 = vector.shape_cast %267 : vector<1x8x32xf32> to vector<1x8x32xf32>
    %269 = vector.broadcast %268 : vector<1x8x32xf32> to vector<8x8x32xf32>
    %cst_131 = arith.constant 0.176776692 : f32
    %270 = vector.broadcast %cst_131 : f32 to vector<8x8x32xf32>
    %271 = arith.mulf %269, %270 : vector<8x8x32xf32>
    %272 = arith.truncf %271 : vector<8x8x32xf32> to vector<8x8x32xbf16>
    %273 = vector.extract_strided_slice %272 {offsets = [0, 0, 0], sizes = [8, 8, 8], strides = [1, 1, 1]} : vector<8x8x32xbf16> to vector<8x8x8xbf16>
    %274 = vector.extract_strided_slice %260 {offsets = [0, 0, 0], sizes = [8, 8, 8], strides = [1, 1, 1]} : vector<8x8x32xbf16> to vector<8x8x8xbf16>
    "tpu.trace_start"() <{level = 10 : i32, message = "bqd,bkd->bqk"}> : () -> ()
    %cst_132 = arith.constant dense<0.000000e+00> : vector<8x8x8xf32>
    %275 = tpu.matmul %273, %274, %cst_132 {dimension_numbers = #tpu.dot_dimension_numbers<[2], [2], [1], [1], [0, 0, 0, 1, 1, 1], [0], [0]>} : vector<8x8x8xbf16>, vector<8x8x8xbf16>, vector<8x8x8xf32> -> vector<8x8x8xf32>
    "tpu.trace_stop"() : () -> ()
    %cst_133 = arith.constant dense<0xFF800000> : vector<8x8xf32>
    %276 = vector.multi_reduction <maximumf>, %275, %cst_133 [2] : vector<8x8x8xf32> to vector<8x8xf32>
    %277 = vector.shape_cast %276 : vector<8x8xf32> to vector<8x8x1xf32>
    %278 = vector.broadcast %277 : vector<8x8x1xf32> to vector<8x8x8xf32>
    %279 = arith.subf %275, %278 : vector<8x8x8xf32>
    %280 = math.exp %279 : vector<8x8x8xf32>
    %cst_134 = arith.constant dense<0.000000e+00> : vector<8x8xf32>
    %281 = vector.multi_reduction <add>, %280, %cst_134 [2] : vector<8x8x8xf32> to vector<8x8xf32>
    %282 = vector.shape_cast %281 : vector<8x8xf32> to vector<8x8x1xf32>
    %283 = tpu.reciprocal %282 {approx = true} : vector<8x8x1xf32> -> vector<8x8x1xf32>
    %284 = vector.broadcast %283 : vector<8x8x1xf32> to vector<8x8x8xf32>
    %285 = arith.mulf %280, %284 : vector<8x8x8xf32>
    %286 = arith.truncf %285 : vector<8x8x8xf32> to vector<8x8x8xbf16>
    %287 = vector.extract_strided_slice %269 {offsets = [0, 0, 0], sizes = [8, 8, 8], strides = [1, 1, 1]} : vector<8x8x32xf32> to vector<8x8x8xf32>
    %288 = vector.extract_strided_slice %263 {offsets = [0, 0, 0], sizes = [8, 8, 8], strides = [1, 1, 1]} : vector<8x8x32xbf16> to vector<8x8x8xbf16>
    "tpu.trace_start"() <{level = 10 : i32, message = "bqk,bkd->bqd"}> : () -> ()
    %cst_135 = arith.constant dense<0.000000e+00> : vector<8x8x8xf32>
    %289 = tpu.matmul %286, %288, %cst_135 {dimension_numbers = #tpu.dot_dimension_numbers<[2], [1], [1], [2], [0, 0, 0, 1, 1, 2], [0], [0]>} : vector<8x8x8xbf16>, vector<8x8x8xbf16>, vector<8x8x8xf32> -> vector<8x8x8xf32>
    "tpu.trace_stop"() : () -> ()
    %290 = arith.addf %287, %289 : vector<8x8x8xf32>
    %c0_136 = arith.constant 0 : index
    %c0_137 = arith.constant 0 : index
    %c0_138 = arith.constant 0 : index
    %291 = vector.load %arg16[%c0_136, %c0_137, %c0_138] : memref<8x8x32xf32, #tpu.memory_space<vmem>>, vector<8x8x8xf32>
    tpu.vector_store %arg16[%c0_136, %c0_137, %c0_138], %290 {strides = array<i32>} : memref<8x8x32xf32, #tpu.memory_space<vmem>>, vector<8x8x8xf32>,
    %292 = vector.extract_strided_slice %272 {offsets = [0, 0, 8], sizes = [8, 8, 8], strides = [1, 1, 1]} : vector<8x8x32xbf16> to vector<8x8x8xbf16>
    %293 = vector.extract_strided_slice %260 {offsets = [0, 0, 8], sizes = [8, 8, 8], strides = [1, 1, 1]} : vector<8x8x32xbf16> to vector<8x8x8xbf16>
    "tpu.trace_start"() <{level = 10 : i32, message = "bqd,bkd->bqk"}> : () -> ()
    %cst_139 = arith.constant dense<0.000000e+00> : vector<8x8x8xf32>
    %294 = tpu.matmul %292, %293, %cst_139 {dimension_numbers = #tpu.dot_dimension_numbers<[2], [2], [1], [1], [0, 0, 0, 1, 1, 1], [0], [0]>} : vector<8x8x8xbf16>, vector<8x8x8xbf16>, vector<8x8x8xf32> -> vector<8x8x8xf32>
    "tpu.trace_stop"() : () -> ()
    %cst_140 = arith.constant dense<0xFF800000> : vector<8x8xf32>
    %295 = vector.multi_reduction <maximumf>, %294, %cst_140 [2] : vector<8x8x8xf32> to vector<8x8xf32>
    %296 = vector.shape_cast %295 : vector<8x8xf32> to vector<8x8x1xf32>
    %297 = vector.broadcast %296 : vector<8x8x1xf32> to vector<8x8x8xf32>
    %298 = arith.subf %294, %297 : vector<8x8x8xf32>
    %299 = math.exp %298 : vector<8x8x8xf32>
    %cst_141 = arith.constant dense<0.000000e+00> : vector<8x8xf32>
    %300 = vector.multi_reduction <add>, %299, %cst_141 [2] : vector<8x8x8xf32> to vector<8x8xf32>
    %301 = vector.shape_cast %300 : vector<8x8xf32> to vector<8x8x1xf32>
    %302 = tpu.reciprocal %301 {approx = true} : vector<8x8x1xf32> -> vector<8x8x1xf32>
    %303 = vector.broadcast %302 : vector<8x8x1xf32> to vector<8x8x8xf32>
    %304 = arith.mulf %299, %303 : vector<8x8x8xf32>
    %305 = arith.truncf %304 : vector<8x8x8xf32> to vector<8x8x8xbf16>
    %306 = vector.extract_strided_slice %269 {offsets = [0, 0, 8], sizes = [8, 8, 8], strides = [1, 1, 1]} : vector<8x8x32xf32> to vector<8x8x8xf32>
    %307 = vector.extract_strided_slice %263 {offsets = [0, 0, 8], sizes = [8, 8, 8], strides = [1, 1, 1]} : vector<8x8x32xbf16> to vector<8x8x8xbf16>
    "tpu.trace_start"() <{level = 10 : i32, message = "bqk,bkd->bqd"}> : () -> ()
    %cst_142 = arith.constant dense<0.000000e+00> : vector<8x8x8xf32>
    %308 = tpu.matmul %305, %307, %cst_142 {dimension_numbers = #tpu.dot_dimension_numbers<[2], [1], [1], [2], [0, 0, 0, 1, 1, 2], [0], [0]>} : vector<8x8x8xbf16>, vector<8x8x8xbf16>, vector<8x8x8xf32> -> vector<8x8x8xf32>
    "tpu.trace_stop"() : () -> ()
    %309 = arith.addf %306, %308 : vector<8x8x8xf32>
    %c0_143 = arith.constant 0 : index
    %c0_144 = arith.constant 0 : index
    %c8_145 = arith.constant 8 : index
    %310 = vector.load %arg16[%c0_143, %c0_144, %c8_145] : memref<8x8x32xf32, #tpu.memory_space<vmem>>, vector<8x8x8xf32>
    tpu.vector_store %arg16[%c0_143, %c0_144, %c8_145], %309 {strides = array<i32>} : memref<8x8x32xf32, #tpu.memory_space<vmem>>, vector<8x8x8xf32>,
    %311 = vector.extract_strided_slice %272 {offsets = [0, 0, 16], sizes = [8, 8, 8], strides = [1, 1, 1]} : vector<8x8x32xbf16> to vector<8x8x8xbf16>
    %312 = vector.extract_strided_slice %260 {offsets = [0, 0, 16], sizes = [8, 8, 8], strides = [1, 1, 1]} : vector<8x8x32xbf16> to vector<8x8x8xbf16>
    "tpu.trace_start"() <{level = 10 : i32, message = "bqd,bkd->bqk"}> : () -> ()
    %cst_146 = arith.constant dense<0.000000e+00> : vector<8x8x8xf32>
    %313 = tpu.matmul %311, %312, %cst_146 {dimension_numbers = #tpu.dot_dimension_numbers<[2], [2], [1], [1], [0, 0, 0, 1, 1, 1], [0], [0]>} : vector<8x8x8xbf16>, vector<8x8x8xbf16>, vector<8x8x8xf32> -> vector<8x8x8xf32>
    "tpu.trace_stop"() : () -> ()
    %cst_147 = arith.constant dense<0xFF800000> : vector<8x8xf32>
    %314 = vector.multi_reduction <maximumf>, %313, %cst_147 [2] : vector<8x8x8xf32> to vector<8x8xf32>
    %315 = vector.shape_cast %314 : vector<8x8xf32> to vector<8x8x1xf32>
    %316 = vector.broadcast %315 : vector<8x8x1xf32> to vector<8x8x8xf32>
    %317 = arith.subf %313, %316 : vector<8x8x8xf32>
    %318 = math.exp %317 : vector<8x8x8xf32>
    %cst_148 = arith.constant dense<0.000000e+00> : vector<8x8xf32>
    %319 = vector.multi_reduction <add>, %318, %cst_148 [2] : vector<8x8x8xf32> to vector<8x8xf32>
    %320 = vector.shape_cast %319 : vector<8x8xf32> to vector<8x8x1xf32>
    %321 = tpu.reciprocal %320 {approx = true} : vector<8x8x1xf32> -> vector<8x8x1xf32>
    %322 = vector.broadcast %321 : vector<8x8x1xf32> to vector<8x8x8xf32>
    %323 = arith.mulf %318, %322 : vector<8x8x8xf32>
    %324 = arith.truncf %323 : vector<8x8x8xf32> to vector<8x8x8xbf16>
    %325 = vector.extract_strided_slice %269 {offsets = [0, 0, 16], sizes = [8, 8, 8], strides = [1, 1, 1]} : vector<8x8x32xf32> to vector<8x8x8xf32>
    %326 = vector.extract_strided_slice %263 {offsets = [0, 0, 16], sizes = [8, 8, 8], strides = [1, 1, 1]} : vector<8x8x32xbf16> to vector<8x8x8xbf16>
    "tpu.trace_start"() <{level = 10 : i32, message = "bqk,bkd->bqd"}> : () -> ()
    %cst_149 = arith.constant dense<0.000000e+00> : vector<8x8x8xf32>
    %327 = tpu.matmul %324, %326, %cst_149 {dimension_numbers = #tpu.dot_dimension_numbers<[2], [1], [1], [2], [0, 0, 0, 1, 1, 2], [0], [0]>} : vector<8x8x8xbf16>, vector<8x8x8xbf16>, vector<8x8x8xf32> -> vector<8x8x8xf32>
    "tpu.trace_stop"() : () -> ()
    %328 = arith.addf %325, %327 : vector<8x8x8xf32>
    %c0_150 = arith.constant 0 : index
    %c0_151 = arith.constant 0 : index
    %c16_152 = arith.constant 16 : index
    %329 = vector.load %arg16[%c0_150, %c0_151, %c16_152] : memref<8x8x32xf32, #tpu.memory_space<vmem>>, vector<8x8x8xf32>
    tpu.vector_store %arg16[%c0_150, %c0_151, %c16_152], %328 {strides = array<i32>} : memref<8x8x32xf32, #tpu.memory_space<vmem>>, vector<8x8x8xf32>,
    %330 = vector.extract_strided_slice %272 {offsets = [0, 0, 24], sizes = [8, 8, 8], strides = [1, 1, 1]} : vector<8x8x32xbf16> to vector<8x8x8xbf16>
    %331 = vector.extract_strided_slice %260 {offsets = [0, 0, 24], sizes = [8, 8, 8], strides = [1, 1, 1]} : vector<8x8x32xbf16> to vector<8x8x8xbf16>
    "tpu.trace_start"() <{level = 10 : i32, message = "bqd,bkd->bqk"}> : () -> ()
    %cst_153 = arith.constant dense<0.000000e+00> : vector<8x8x8xf32>
    %332 = tpu.matmul %330, %331, %cst_153 {dimension_numbers = #tpu.dot_dimension_numbers<[2], [2], [1], [1], [0, 0, 0, 1, 1, 1], [0], [0]>} : vector<8x8x8xbf16>, vector<8x8x8xbf16>, vector<8x8x8xf32> -> vector<8x8x8xf32>
    "tpu.trace_stop"() : () -> ()
    %cst_154 = arith.constant dense<0xFF800000> : vector<8x8xf32>
    %333 = vector.multi_reduction <maximumf>, %332, %cst_154 [2] : vector<8x8x8xf32> to vector<8x8xf32>
    %334 = vector.shape_cast %333 : vector<8x8xf32> to vector<8x8x1xf32>
    %335 = vector.broadcast %334 : vector<8x8x1xf32> to vector<8x8x8xf32>
    %336 = arith.subf %332, %335 : vector<8x8x8xf32>
    %337 = math.exp %336 : vector<8x8x8xf32>
    %cst_155 = arith.constant dense<0.000000e+00> : vector<8x8xf32>
    %338 = vector.multi_reduction <add>, %337, %cst_155 [2] : vector<8x8x8xf32> to vector<8x8xf32>
    %339 = vector.shape_cast %338 : vector<8x8xf32> to vector<8x8x1xf32>
    %340 = tpu.reciprocal %339 {approx = true} : vector<8x8x1xf32> -> vector<8x8x1xf32>
    %341 = vector.broadcast %340 : vector<8x8x1xf32> to vector<8x8x8xf32>
    %342 = arith.mulf %337, %341 : vector<8x8x8xf32>
    %343 = arith.truncf %342 : vector<8x8x8xf32> to vector<8x8x8xbf16>
    %344 = vector.extract_strided_slice %269 {offsets = [0, 0, 24], sizes = [8, 8, 8], strides = [1, 1, 1]} : vector<8x8x32xf32> to vector<8x8x8xf32>
    %345 = vector.extract_strided_slice %263 {offsets = [0, 0, 24], sizes = [8, 8, 8], strides = [1, 1, 1]} : vector<8x8x32xbf16> to vector<8x8x8xbf16>
    "tpu.trace_start"() <{level = 10 : i32, message = "bqk,bkd->bqd"}> : () -> ()
    %cst_156 = arith.constant dense<0.000000e+00> : vector<8x8x8xf32>
    %346 = tpu.matmul %343, %345, %cst_156 {dimension_numbers = #tpu.dot_dimension_numbers<[2], [1], [1], [2], [0, 0, 0, 1, 1, 2], [0], [0]>} : vector<8x8x8xbf16>, vector<8x8x8xbf16>, vector<8x8x8xf32> -> vector<8x8x8xf32>
    "tpu.trace_stop"() : () -> ()
    %347 = arith.addf %344, %346 : vector<8x8x8xf32>
    %c0_157 = arith.constant 0 : index
    %c0_158 = arith.constant 0 : index
    %c24_159 = arith.constant 24 : index
    %348 = vector.load %arg16[%c0_157, %c0_158, %c24_159] : memref<8x8x32xf32, #tpu.memory_space<vmem>>, vector<8x8x8xf32>
    tpu.vector_store %arg16[%c0_157, %c0_158, %c24_159], %347 {strides = array<i32>} : memref<8x8x32xf32, #tpu.memory_space<vmem>>, vector<8x8x8xf32>,
    %c0_160 = arith.constant 0 : index
    %c0_161 = arith.constant 0 : index
    %c0_162 = arith.constant 0 : index
    %349 = vector.load %arg16[%c0_160, %c0_161, %c0_162] : memref<8x8x32xf32, #tpu.memory_space<vmem>>, vector<8x8x32xf32>
    %350 = vector.shape_cast %349 : vector<8x8x32xf32> to vector<64x32xf32>
    %351 = arith.truncf %350 : vector<64x32xf32> to vector<64x32xbf16>
    %cst_163 = arith.constant dense<0.000000e+00> : vector<64x32xf32>
    %352 = tpu.matmul %351, %250, %cst_163 {dimension_numbers = #tpu.dot_dimension_numbers<[1], [0], [0], [1], [0, 0, 1, 1], [], []>} : vector<64x32xbf16>, vector<32x32xbf16>, vector<64x32xf32> -> vector<64x32xf32>
    %353 = vector.broadcast %252 : vector<1x32xf32> to vector<64x32xf32>
    %354 = arith.addf %352, %353 : vector<64x32xf32>
    %cst_164 = arith.constant 0.000000e+00 : f32
    %355 = vector.broadcast %cst_164 : f32 to vector<64x32xf32>
    %356 = arith.maximumf %354, %355 : vector<64x32xf32>
    %357 = arith.addf %350, %356 : vector<64x32xf32>
    %358 = vector.shape_cast %357 : vector<64x32xf32> to vector<8x8x32xf32>
    %c1_165 = arith.constant 1 : index
    %c0_166 = arith.constant 0 : index
    %c0_167 = arith.constant 0 : index
    %359 = vector.load %arg9[%c1_165, %c0_166, %c0_167] : memref<2x32x32xbf16, #tpu.memory_space<vmem>>, vector<1x32x32xbf16>
    %360 = vector.shape_cast %359 : vector<1x32x32xbf16> to vector<32x32xbf16>
    %c1_168 = arith.constant 1 : index
    %c0_169 = arith.constant 0 : index
    %c0_170 = arith.constant 0 : index
    %361 = vector.load %arg10[%c1_168, %c0_169, %c0_170] : memref<2x1x32xf32, #tpu.memory_space<vmem>>, vector<1x1x32xf32>
    %362 = vector.shape_cast %361 : vector<1x1x32xf32> to vector<1x32xf32>
    %c1_171 = arith.constant 1 : index
    %c0_172 = arith.constant 0 : index
    %c0_173 = arith.constant 0 : index
    %363 = vector.load %arg11[%c1_171, %c0_172, %c0_173] : memref<2x32x64xbf16, #tpu.memory_space<vmem>>, vector<1x32x64xbf16>
    %364 = vector.shape_cast %363 : vector<1x32x64xbf16> to vector<32x64xbf16>
    %c1_174 = arith.constant 1 : index
    %c0_175 = arith.constant 0 : index
    %c0_176 = arith.constant 0 : index
    %365 = vector.load %arg12[%c1_174, %c0_175, %c0_176] : memref<2x1x64xf32, #tpu.memory_space<vmem>>, vector<1x1x64xf32>
    %366 = vector.shape_cast %365 : vector<1x1x64xf32> to vector<1x64xf32>
    %c1_177 = arith.constant 1 : index
    %c0_178 = arith.constant 0 : index
    %c0_179 = arith.constant 0 : index
    %367 = vector.load %arg13[%c1_177, %c0_178, %c0_179] : memref<2x32x32xbf16, #tpu.memory_space<vmem>>, vector<1x32x32xbf16>
    %368 = vector.shape_cast %367 : vector<1x32x32xbf16> to vector<32x32xbf16>
    %c1_180 = arith.constant 1 : index
    %c0_181 = arith.constant 0 : index
    %c0_182 = arith.constant 0 : index
    %369 = vector.load %arg14[%c1_180, %c0_181, %c0_182] : memref<2x1x32xf32, #tpu.memory_space<vmem>>, vector<1x1x32xf32>
    %370 = vector.shape_cast %369 : vector<1x1x32xf32> to vector<1x32xf32>
    %371 = vector.shape_cast %358 : vector<8x8x32xf32> to vector<64x32xf32>
    %372 = arith.truncf %371 : vector<64x32xf32> to vector<64x32xbf16>
    %cst_183 = arith.constant dense<0.000000e+00> : vector<64x64xf32>
    %373 = tpu.matmul %372, %364, %cst_183 {dimension_numbers = #tpu.dot_dimension_numbers<[1], [0], [0], [1], [0, 0, 1, 1], [], []>} : vector<64x32xbf16>, vector<32x64xbf16>, vector<64x64xf32> -> vector<64x64xf32>
    %374 = vector.broadcast %366 : vector<1x64xf32> to vector<64x64xf32>
    %375 = arith.addf %373, %374 : vector<64x64xf32>
    %376 = vector.extract_strided_slice %375 {offsets = [0, 0], sizes = [64, 32], strides = [1, 1]} : vector<64x64xf32> to vector<64x32xf32>
    %377 = vector.shape_cast %376 : vector<64x32xf32> to vector<8x8x32xf32>
    %378 = arith.truncf %377 : vector<8x8x32xf32> to vector<8x8x32xbf16>
    %379 = vector.extract_strided_slice %375 {offsets = [0, 32], sizes = [64, 32], strides = [1, 1]} : vector<64x64xf32> to vector<64x32xf32>
    %380 = vector.shape_cast %379 : vector<64x32xf32> to vector<8x8x32xf32>
    %381 = arith.truncf %380 : vector<8x8x32xf32> to vector<8x8x32xbf16>
    %382 = vector.shape_cast %238 : vector<8x8x32xf32> to vector<64x32xf32>
    %383 = arith.truncf %382 : vector<64x32xf32> to vector<64x32xbf16>
    %cst_184 = arith.constant dense<0.000000e+00> : vector<64x32xf32>
    %384 = tpu.matmul %383, %360, %cst_184 {dimension_numbers = #tpu.dot_dimension_numbers<[1], [0], [0], [1], [0, 0, 1, 1], [], []>} : vector<64x32xbf16>, vector<32x32xbf16>, vector<64x32xf32> -> vector<64x32xf32>
    %385 = vector.broadcast %362 : vector<1x32xf32> to vector<64x32xf32>
    %386 = arith.addf %384, %385 : vector<64x32xf32>
    %387 = vector.shape_cast %386 : vector<64x32xf32> to vector<8x8x32xf32>
    %cst_185 = arith.constant 0.176776692 : f32
    %388 = vector.broadcast %cst_185 : f32 to vector<8x8x32xf32>
    %389 = arith.mulf %387, %388 : vector<8x8x32xf32>
    %390 = arith.truncf %389 : vector<8x8x32xf32> to vector<8x8x32xbf16>
    %391 = vector.extract_strided_slice %390 {offsets = [0, 0, 0], sizes = [8, 8, 8], strides = [1, 1, 1]} : vector<8x8x32xbf16> to vector<8x8x8xbf16>
    %392 = vector.extract_strided_slice %378 {offsets = [0, 0, 0], sizes = [8, 8, 8], strides = [1, 1, 1]} : vector<8x8x32xbf16> to vector<8x8x8xbf16>
    "tpu.trace_start"() <{level = 10 : i32, message = "bqd,bkd->bqk"}> : () -> ()
    %cst_186 = arith.constant dense<0.000000e+00> : vector<8x8x8xf32>
    %393 = tpu.matmul %391, %392, %cst_186 {dimension_numbers = #tpu.dot_dimension_numbers<[2], [2], [1], [1], [0, 0, 0, 1, 1, 1], [0], [0]>} : vector<8x8x8xbf16>, vector<8x8x8xbf16>, vector<8x8x8xf32> -> vector<8x8x8xf32>
    "tpu.trace_stop"() : () -> ()
    %cst_187 = arith.constant dense<0xFF800000> : vector<8x8xf32>
    %394 = vector.multi_reduction <maximumf>, %393, %cst_187 [2] : vector<8x8x8xf32> to vector<8x8xf32>
    %395 = vector.shape_cast %394 : vector<8x8xf32> to vector<8x8x1xf32>
    %396 = vector.broadcast %395 : vector<8x8x1xf32> to vector<8x8x8xf32>
    %397 = arith.subf %393, %396 : vector<8x8x8xf32>
    %398 = math.exp %397 : vector<8x8x8xf32>
    %cst_188 = arith.constant dense<0.000000e+00> : vector<8x8xf32>
    %399 = vector.multi_reduction <add>, %398, %cst_188 [2] : vector<8x8x8xf32> to vector<8x8xf32>
    %400 = vector.shape_cast %399 : vector<8x8xf32> to vector<8x8x1xf32>
    %401 = tpu.reciprocal %400 {approx = true} : vector<8x8x1xf32> -> vector<8x8x1xf32>
    %402 = vector.broadcast %401 : vector<8x8x1xf32> to vector<8x8x8xf32>
    %403 = arith.mulf %398, %402 : vector<8x8x8xf32>
    %404 = arith.truncf %403 : vector<8x8x8xf32> to vector<8x8x8xbf16>
    %405 = vector.extract_strided_slice %387 {offsets = [0, 0, 0], sizes = [8, 8, 8], strides = [1, 1, 1]} : vector<8x8x32xf32> to vector<8x8x8xf32>
    %406 = vector.extract_strided_slice %381 {offsets = [0, 0, 0], sizes = [8, 8, 8], strides = [1, 1, 1]} : vector<8x8x32xbf16> to vector<8x8x8xbf16>
    "tpu.trace_start"() <{level = 10 : i32, message = "bqk,bkd->bqd"}> : () -> ()
    %cst_189 = arith.constant dense<0.000000e+00> : vector<8x8x8xf32>
    %407 = tpu.matmul %404, %406, %cst_189 {dimension_numbers = #tpu.dot_dimension_numbers<[2], [1], [1], [2], [0, 0, 0, 1, 1, 2], [0], [0]>} : vector<8x8x8xbf16>, vector<8x8x8xbf16>, vector<8x8x8xf32> -> vector<8x8x8xf32>
    "tpu.trace_stop"() : () -> ()
    %408 = arith.addf %405, %407 : vector<8x8x8xf32>
    %c0_190 = arith.constant 0 : index
    %c0_191 = arith.constant 0 : index
    %c0_192 = arith.constant 0 : index
    %409 = vector.load %arg17[%c0_190, %c0_191, %c0_192] : memref<8x8x32xf32, #tpu.memory_space<vmem>>, vector<8x8x8xf32>
    tpu.vector_store %arg17[%c0_190, %c0_191, %c0_192], %408 {strides = array<i32>} : memref<8x8x32xf32, #tpu.memory_space<vmem>>, vector<8x8x8xf32>,
    %410 = vector.extract_strided_slice %390 {offsets = [0, 0, 8], sizes = [8, 8, 8], strides = [1, 1, 1]} : vector<8x8x32xbf16> to vector<8x8x8xbf16>
    %411 = vector.extract_strided_slice %378 {offsets = [0, 0, 8], sizes = [8, 8, 8], strides = [1, 1, 1]} : vector<8x8x32xbf16> to vector<8x8x8xbf16>
    "tpu.trace_start"() <{level = 10 : i32, message = "bqd,bkd->bqk"}> : () -> ()
    %cst_193 = arith.constant dense<0.000000e+00> : vector<8x8x8xf32>
    %412 = tpu.matmul %410, %411, %cst_193 {dimension_numbers = #tpu.dot_dimension_numbers<[2], [2], [1], [1], [0, 0, 0, 1, 1, 1], [0], [0]>} : vector<8x8x8xbf16>, vector<8x8x8xbf16>, vector<8x8x8xf32> -> vector<8x8x8xf32>
    "tpu.trace_stop"() : () -> ()
    %cst_194 = arith.constant dense<0xFF800000> : vector<8x8xf32>
    %413 = vector.multi_reduction <maximumf>, %412, %cst_194 [2] : vector<8x8x8xf32> to vector<8x8xf32>
    %414 = vector.shape_cast %413 : vector<8x8xf32> to vector<8x8x1xf32>
    %415 = vector.broadcast %414 : vector<8x8x1xf32> to vector<8x8x8xf32>
    %416 = arith.subf %412, %415 : vector<8x8x8xf32>
    %417 = math.exp %416 : vector<8x8x8xf32>
    %cst_195 = arith.constant dense<0.000000e+00> : vector<8x8xf32>
    %418 = vector.multi_reduction <add>, %417, %cst_195 [2] : vector<8x8x8xf32> to vector<8x8xf32>
    %419 = vector.shape_cast %418 : vector<8x8xf32> to vector<8x8x1xf32>
    %420 = tpu.reciprocal %419 {approx = true} : vector<8x8x1xf32> -> vector<8x8x1xf32>
    %421 = vector.broadcast %420 : vector<8x8x1xf32> to vector<8x8x8xf32>
    %422 = arith.mulf %417, %421 : vector<8x8x8xf32>
    %423 = arith.truncf %422 : vector<8x8x8xf32> to vector<8x8x8xbf16>
    %424 = vector.extract_strided_slice %387 {offsets = [0, 0, 8], sizes = [8, 8, 8], strides = [1, 1, 1]} : vector<8x8x32xf32> to vector<8x8x8xf32>
    %425 = vector.extract_strided_slice %381 {offsets = [0, 0, 8], sizes = [8, 8, 8], strides = [1, 1, 1]} : vector<8x8x32xbf16> to vector<8x8x8xbf16>
    "tpu.trace_start"() <{level = 10 : i32, message = "bqk,bkd->bqd"}> : () -> ()
    %cst_196 = arith.constant dense<0.000000e+00> : vector<8x8x8xf32>
    %426 = tpu.matmul %423, %425, %cst_196 {dimension_numbers = #tpu.dot_dimension_numbers<[2], [1], [1], [2], [0, 0, 0, 1, 1, 2], [0], [0]>} : vector<8x8x8xbf16>, vector<8x8x8xbf16>, vector<8x8x8xf32> -> vector<8x8x8xf32>
    "tpu.trace_stop"() : () -> ()
    %427 = arith.addf %424, %426 : vector<8x8x8xf32>
    %c0_197 = arith.constant 0 : index
    %c0_198 = arith.constant 0 : index
    %c8_199 = arith.constant 8 : index
    %428 = vector.load %arg17[%c0_197, %c0_198, %c8_199] : memref<8x8x32xf32, #tpu.memory_space<vmem>>, vector<8x8x8xf32>
    tpu.vector_store %arg17[%c0_197, %c0_198, %c8_199], %427 {strides = array<i32>} : memref<8x8x32xf32, #tpu.memory_space<vmem>>, vector<8x8x8xf32>,
    %429 = vector.extract_strided_slice %390 {offsets = [0, 0, 16], sizes = [8, 8, 8], strides = [1, 1, 1]} : vector<8x8x32xbf16> to vector<8x8x8xbf16>
    %430 = vector.extract_strided_slice %378 {offsets = [0, 0, 16], sizes = [8, 8, 8], strides = [1, 1, 1]} : vector<8x8x32xbf16> to vector<8x8x8xbf16>
    "tpu.trace_start"() <{level = 10 : i32, message = "bqd,bkd->bqk"}> : () -> ()
    %cst_200 = arith.constant dense<0.000000e+00> : vector<8x8x8xf32>
    %431 = tpu.matmul %429, %430, %cst_200 {dimension_numbers = #tpu.dot_dimension_numbers<[2], [2], [1], [1], [0, 0, 0, 1, 1, 1], [0], [0]>} : vector<8x8x8xbf16>, vector<8x8x8xbf16>, vector<8x8x8xf32> -> vector<8x8x8xf32>
    "tpu.trace_stop"() : () -> ()
    %cst_201 = arith.constant dense<0xFF800000> : vector<8x8xf32>
    %432 = vector.multi_reduction <maximumf>, %431, %cst_201 [2] : vector<8x8x8xf32> to vector<8x8xf32>
    %433 = vector.shape_cast %432 : vector<8x8xf32> to vector<8x8x1xf32>
    %434 = vector.broadcast %433 : vector<8x8x1xf32> to vector<8x8x8xf32>
    %435 = arith.subf %431, %434 : vector<8x8x8xf32>
    %436 = math.exp %435 : vector<8x8x8xf32>
    %cst_202 = arith.constant dense<0.000000e+00> : vector<8x8xf32>
    %437 = vector.multi_reduction <add>, %436, %cst_202 [2] : vector<8x8x8xf32> to vector<8x8xf32>
    %438 = vector.shape_cast %437 : vector<8x8xf32> to vector<8x8x1xf32>
    %439 = tpu.reciprocal %438 {approx = true} : vector<8x8x1xf32> -> vector<8x8x1xf32>
    %440 = vector.broadcast %439 : vector<8x8x1xf32> to vector<8x8x8xf32>
    %441 = arith.mulf %436, %440 : vector<8x8x8xf32>
    %442 = arith.truncf %441 : vector<8x8x8xf32> to vector<8x8x8xbf16>
    %443 = vector.extract_strided_slice %387 {offsets = [0, 0, 16], sizes = [8, 8, 8], strides = [1, 1, 1]} : vector<8x8x32xf32> to vector<8x8x8xf32>
    %444 = vector.extract_strided_slice %381 {offsets = [0, 0, 16], sizes = [8, 8, 8], strides = [1, 1, 1]} : vector<8x8x32xbf16> to vector<8x8x8xbf16>
    "tpu.trace_start"() <{level = 10 : i32, message = "bqk,bkd->bqd"}> : () -> ()
    %cst_203 = arith.constant dense<0.000000e+00> : vector<8x8x8xf32>
    %445 = tpu.matmul %442, %444, %cst_203 {dimension_numbers = #tpu.dot_dimension_numbers<[2], [1], [1], [2], [0, 0, 0, 1, 1, 2], [0], [0]>} : vector<8x8x8xbf16>, vector<8x8x8xbf16>, vector<8x8x8xf32> -> vector<8x8x8xf32>
    "tpu.trace_stop"() : () -> ()
    %446 = arith.addf %443, %445 : vector<8x8x8xf32>
    %c0_204 = arith.constant 0 : index
    %c0_205 = arith.constant 0 : index
    %c16_206 = arith.constant 16 : index
    %447 = vector.load %arg17[%c0_204, %c0_205, %c16_206] : memref<8x8x32xf32, #tpu.memory_space<vmem>>, vector<8x8x8xf32>
    tpu.vector_store %arg17[%c0_204, %c0_205, %c16_206], %446 {strides = array<i32>} : memref<8x8x32xf32, #tpu.memory_space<vmem>>, vector<8x8x8xf32>,
    %448 = vector.extract_strided_slice %390 {offsets = [0, 0, 24], sizes = [8, 8, 8], strides = [1, 1, 1]} : vector<8x8x32xbf16> to vector<8x8x8xbf16>
    %449 = vector.extract_strided_slice %378 {offsets = [0, 0, 24], sizes = [8, 8, 8], strides = [1, 1, 1]} : vector<8x8x32xbf16> to vector<8x8x8xbf16>
    "tpu.trace_start"() <{level = 10 : i32, message = "bqd,bkd->bqk"}> : () -> ()
    %cst_207 = arith.constant dense<0.000000e+00> : vector<8x8x8xf32>
    %450 = tpu.matmul %448, %449, %cst_207 {dimension_numbers = #tpu.dot_dimension_numbers<[2], [2], [1], [1], [0, 0, 0, 1, 1, 1], [0], [0]>} : vector<8x8x8xbf16>, vector<8x8x8xbf16>, vector<8x8x8xf32> -> vector<8x8x8xf32>
    "tpu.trace_stop"() : () -> ()
    %cst_208 = arith.constant dense<0xFF800000> : vector<8x8xf32>
    %451 = vector.multi_reduction <maximumf>, %450, %cst_208 [2] : vector<8x8x8xf32> to vector<8x8xf32>
    %452 = vector.shape_cast %451 : vector<8x8xf32> to vector<8x8x1xf32>
    %453 = vector.broadcast %452 : vector<8x8x1xf32> to vector<8x8x8xf32>
    %454 = arith.subf %450, %453 : vector<8x8x8xf32>
    %455 = math.exp %454 : vector<8x8x8xf32>
    %cst_209 = arith.constant dense<0.000000e+00> : vector<8x8xf32>
    %456 = vector.multi_reduction <add>, %455, %cst_209 [2] : vector<8x8x8xf32> to vector<8x8xf32>
    %457 = vector.shape_cast %456 : vector<8x8xf32> to vector<8x8x1xf32>
    %458 = tpu.reciprocal %457 {approx = true} : vector<8x8x1xf32> -> vector<8x8x1xf32>
    %459 = vector.broadcast %458 : vector<8x8x1xf32> to vector<8x8x8xf32>
    %460 = arith.mulf %455, %459 : vector<8x8x8xf32>
    %461 = arith.truncf %460 : vector<8x8x8xf32> to vector<8x8x8xbf16>
    %462 = vector.extract_strided_slice %387 {offsets = [0, 0, 24], sizes = [8, 8, 8], strides = [1, 1, 1]} : vector<8x8x32xf32> to vector<8x8x8xf32>
    %463 = vector.extract_strided_slice %381 {offsets = [0, 0, 24], sizes = [8, 8, 8], strides = [1, 1, 1]} : vector<8x8x32xbf16> to vector<8x8x8xbf16>
    "tpu.trace_start"() <{level = 10 : i32, message = "bqk,bkd->bqd"}> : () -> ()
    %cst_210 = arith.constant dense<0.000000e+00> : vector<8x8x8xf32>
    %464 = tpu.matmul %461, %463, %cst_210 {dimension_numbers = #tpu.dot_dimension_numbers<[2], [1], [1], [2], [0, 0, 0, 1, 1, 2], [0], [0]>} : vector<8x8x8xbf16>, vector<8x8x8xbf16>, vector<8x8x8xf32> -> vector<8x8x8xf32>
    "tpu.trace_stop"() : () -> ()
    %465 = arith.addf %462, %464 : vector<8x8x8xf32>
    %c0_211 = arith.constant 0 : index
    %c0_212 = arith.constant 0 : index
    %c24_213 = arith.constant 24 : index
    %466 = vector.load %arg17[%c0_211, %c0_212, %c24_213] : memref<8x8x32xf32, #tpu.memory_space<vmem>>, vector<8x8x8xf32>
    tpu.vector_store %arg17[%c0_211, %c0_212, %c24_213], %465 {strides = array<i32>} : memref<8x8x32xf32, #tpu.memory_space<vmem>>, vector<8x8x8xf32>,
    %c0_214 = arith.constant 0 : index
    %c0_215 = arith.constant 0 : index
    %c0_216 = arith.constant 0 : index
    %467 = vector.load %arg17[%c0_214, %c0_215, %c0_216] : memref<8x8x32xf32, #tpu.memory_space<vmem>>, vector<8x8x32xf32>
    %468 = vector.shape_cast %467 : vector<8x8x32xf32> to vector<64x32xf32>
    %469 = arith.truncf %468 : vector<64x32xf32> to vector<64x32xbf16>
    %cst_217 = arith.constant dense<0.000000e+00> : vector<64x32xf32>
    %470 = tpu.matmul %469, %368, %cst_217 {dimension_numbers = #tpu.dot_dimension_numbers<[1], [0], [0], [1], [0, 0, 1, 1], [], []>} : vector<64x32xbf16>, vector<32x32xbf16>, vector<64x32xf32> -> vector<64x32xf32>
    %471 = vector.broadcast %370 : vector<1x32xf32> to vector<64x32xf32>
    %472 = arith.addf %470, %471 : vector<64x32xf32>
    %cst_218 = arith.constant 0.000000e+00 : f32
    %473 = vector.broadcast %cst_218 : f32 to vector<64x32xf32>
    %474 = arith.maximumf %472, %473 : vector<64x32xf32>
    %475 = arith.addf %468, %474 : vector<64x32xf32>
    %476 = vector.shape_cast %475 : vector<64x32xf32> to vector<8x8x32xf32>
    %cst_219 = arith.constant dense<0.000000e+00> : vector<8x32xf32>
    %477 = vector.multi_reduction <add>, %476, %cst_219 [1] : vector<8x8x32xf32> to vector<8x32xf32>
    %cst_220 = arith.constant 1.250000e-01 : f32
    %478 = vector.broadcast %cst_220 : f32 to vector<8x32xf32>
    %479 = arith.mulf %477, %478 : vector<8x32xf32>
    %c0_221 = arith.constant 0 : index
    %c0_222 = arith.constant 0 : index
    %480 = vector.load %arg15[%c0_221, %c0_222] : memref<8x32xf32, #tpu.memory_space<vmem>>, vector<8x32xf32>
    tpu.vector_store %arg15[%c0_221, %c0_222], %479 {strides = array<i32>} : memref<8x32xf32, #tpu.memory_space<vmem>>, vector<8x32xf32>,
    return
  }
  func.func @transform_0(%arg0: i32) -> (i32, i32, i32) {
    %c0_i32 = arith.constant 0 : i32
    %c0_i32_0 = arith.constant 0 : i32
    %c0_i32_1 = arith.constant 0 : i32
    return %arg0, %c0_i32, %c0_i32_0 : i32, i32, i32
  }
  func.func @transform_1(%arg0: i32) -> (i32, i32, i32) {
    %c0_i32 = arith.constant 0 : i32
    %c0_i32_0 = arith.constant 0 : i32
    %c0_i32_1 = arith.constant 0 : i32
    %c0_i32_2 = arith.constant 0 : i32
    return %c0_i32, %c0_i32_0, %c0_i32_1 : i32, i32, i32
  }
  func.func @transform_2(%arg0: i32) -> (i32, i32, i32) {
    %c0_i32 = arith.constant 0 : i32
    %c0_i32_0 = arith.constant 0 : i32
    %c0_i32_1 = arith.constant 0 : i32
    %c0_i32_2 = arith.constant 0 : i32
    return %c0_i32, %c0_i32_0, %c0_i32_1 : i32, i32, i32
  }
  func.func @transform_3(%arg0: i32) -> (i32, i32, i32) {
    %c0_i32 = arith.constant 0 : i32
    %c0_i32_0 = arith.constant 0 : i32
    %c0_i32_1 = arith.constant 0 : i32
    %c0_i32_2 = arith.constant 0 : i32
    return %c0_i32, %c0_i32_0, %c0_i32_1 : i32, i32, i32
  }
  func.func @transform_4(%arg0: i32) -> (i32, i32, i32) {
    %c0_i32 = arith.constant 0 : i32
    %c0_i32_0 = arith.constant 0 : i32
    %c0_i32_1 = arith.constant 0 : i32
    %c0_i32_2 = arith.constant 0 : i32
    return %c0_i32, %c0_i32_0, %c0_i32_1 : i32, i32, i32
  }
  func.func @transform_5(%arg0: i32) -> (i32, i32, i32) {
    %c0_i32 = arith.constant 0 : i32
    %c0_i32_0 = arith.constant 0 : i32
    %c0_i32_1 = arith.constant 0 : i32
    %c0_i32_2 = arith.constant 0 : i32
    return %c0_i32, %c0_i32_0, %c0_i32_1 : i32, i32, i32
  }
  func.func @transform_6(%arg0: i32) -> (i32, i32, i32) {
    %c0_i32 = arith.constant 0 : i32
    %c0_i32_0 = arith.constant 0 : i32
    %c0_i32_1 = arith.constant 0 : i32
    %c0_i32_2 = arith.constant 0 : i32
    return %c0_i32, %c0_i32_0, %c0_i32_1 : i32, i32, i32
  }
  func.func @transform_7(%arg0: i32) -> (i32, i32, i32) {
    %c0_i32 = arith.constant 0 : i32
    %c0_i32_0 = arith.constant 0 : i32
    %c0_i32_1 = arith.constant 0 : i32
    %c0_i32_2 = arith.constant 0 : i32
    return %c0_i32, %c0_i32_0, %c0_i32_1 : i32, i32, i32
  }
  func.func @transform_8(%arg0: i32) -> (i32, i32, i32) {
    %c0_i32 = arith.constant 0 : i32
    %c0_i32_0 = arith.constant 0 : i32
    %c0_i32_1 = arith.constant 0 : i32
    %c0_i32_2 = arith.constant 0 : i32
    return %c0_i32, %c0_i32_0, %c0_i32_1 : i32, i32, i32
  }
  func.func @transform_9(%arg0: i32) -> (i32, i32, i32) {
    %c0_i32 = arith.constant 0 : i32
    %c0_i32_0 = arith.constant 0 : i32
    %c0_i32_1 = arith.constant 0 : i32
    %c0_i32_2 = arith.constant 0 : i32
    return %c0_i32, %c0_i32_0, %c0_i32_1 : i32, i32, i32
  }
  func.func @transform_10(%arg0: i32) -> (i32, i32, i32) {
    %c0_i32 = arith.constant 0 : i32
    %c0_i32_0 = arith.constant 0 : i32
    %c0_i32_1 = arith.constant 0 : i32
    %c0_i32_2 = arith.constant 0 : i32
    return %c0_i32, %c0_i32_0, %c0_i32_1 : i32, i32, i32
  }
  func.func @transform_11(%arg0: i32) -> (i32, i32, i32) {
    %c0_i32 = arith.constant 0 : i32
    %c0_i32_0 = arith.constant 0 : i32
    %c0_i32_1 = arith.constant 0 : i32
    %c0_i32_2 = arith.constant 0 : i32
    return %c0_i32, %c0_i32_0, %c0_i32_1 : i32, i32, i32
  }
  func.func @transform_12(%arg0: i32) -> (i32, i32, i32) {
    %c0_i32 = arith.constant 0 : i32
    %c0_i32_0 = arith.constant 0 : i32
    %c0_i32_1 = arith.constant 0 : i32
    %c0_i32_2 = arith.constant 0 : i32
    return %c0_i32, %c0_i32_0, %c0_i32_1 : i32, i32, i32
  }
  func.func @transform_13(%arg0: i32) -> (i32, i32, i32) {
    %c0_i32 = arith.constant 0 : i32
    %c0_i32_0 = arith.constant 0 : i32
    %c0_i32_1 = arith.constant 0 : i32
    %c0_i32_2 = arith.constant 0 : i32
    return %c0_i32, %c0_i32_0, %c0_i32_1 : i32, i32, i32
  }
  func.func @transform_14(%arg0: i32) -> (i32, i32) {
    %c0_i32 = arith.constant 0 : i32
    %c0_i32_0 = arith.constant 0 : i32
    return %arg0, %c0_i32 : i32, i32
  }
}

</mosaic_0001>

<bundles_post_ra>
// kernel: tpu_custom_call.1
= control target key start
LH: loop header
LB: loop body
LE: loop exit
PB: predicated region body
PF: predicated region fallthrough
CT: control target
= control target key end

     0   :  { %s24263_s0 = inlined_call_operand.hbm [shape: f32[16,8,32], index: 0, kind: input, shape index: {}]   ;;  %s24264_s1 = inlined_call_operand.hbm [shape: bf16[2,8,32], index: 1, kind: input, shape index: {}]   ;;  %s24265_s2 = inlined_call_operand.hbm [shape: bf16[2,32,32], index: 2, kind: input, shape index: {}]   ;;  %s24266_s3 = inlined_call_operand.vmem [shape: f32[2,1,32], index: 3, kind: input, shape index: {}]   ;;  %s24267_s4 = inlined_call_operand.hbm [shape: bf16[2,32,64], index: 4, kind: input, shape index: {}]   ;;  %s24268_s5 = inlined_call_operand.vmem [shape: f32[2,1,64], index: 5, kind: input, shape index: {}]   ;;  %s24269_s6 = inlined_call_operand.hbm [shape: bf16[2,32,32], index: 6, kind: input, shape index: {}]   ;;  %s24270_s7 = inlined_call_operand.vmem [shape: f32[2,1,32], index: 7, kind: input, shape index: {}]   ;;  %s24271_s8 = inlined_call_operand.hbm [shape: bf16[2,32,32], index: 8, kind: input, shape index: {}]   ;;  %s24272_s9 = inlined_call_operand.vmem [shape: f32[2,1,32], index: 9, kind: input, shape index: {}]   ;;  %s24273_s10 = inlined_call_operand.hbm [shape: bf16[2,32,64], index: 10, kind: input, shape index: {}]   ;;  %s24274_s11 = inlined_call_operand.vmem [shape: f32[2,1,64], index: 11, kind: input, shape index: {}]   ;;  %s24275_s12 = inlined_call_operand.hbm [shape: bf16[2,32,32], index: 12, kind: input, shape index: {}]   ;;  %s24276_s13 = inlined_call_operand.vmem [shape: f32[2,1,32], index: 13, kind: input, shape index: {}]   ;;  %s24277_s14 = inlined_call_operand.hbm [shape: f32[16,32], index: 14, kind: output, shape index: {}]  }
   0x1   :  { %24283 = sst [smem:[#allocation25_spill]] %s24264_s1 }
   0x2   :  { %24284 = sst [smem:[#allocation26_spill]] %s24265_s2 }
   0x3   :  { %24285 = sst [smem:[#allocation27_spill]] %s24267_s4 }
   0x4   :  { %24286 = sst [smem:[#allocation28_spill]] %s24269_s6 }
   0x5   :  { %24287 = sst [smem:[#allocation29_spill]] %s24271_s8 }
   0x6   :  { %24288 = sst [smem:[#allocation30_spill]] %s24273_s10 }
   0x7   :  { %24289 = sst [smem:[#allocation31_spill]] %s24275_s12 }
   0x8   :  { %24290 = sst [smem:[#allocation32_spill]] %s24277_s14 }
   0x9   :  { %19 = vsyncpa [#allocation5], 0 }
   0xa   :  { %21 = vsyncpa [#allocation5 + $0x1], 0 }
   0xb   :  { %22 = vsyncpa [#allocation8], 0 }
   0xc   :  { %23 = vsyncpa [#allocation11], 0 }
   0xd   :  { %24 = vsyncpa [#allocation14], 0 }
   0xe   :  { %25 = vsyncpa [#allocation17], 0 }
   0xf   :  { %26 = vsyncpa [#allocation6], 0 }
  0x10   :  { %28 = vsyncpa [#allocation6 + $0x1], 0  ;;  %s20235_s29 = smov 0   ;;  %s20237_s30 = smov 0  }
  0x11   :  { %s20239_s15 = smov 0   ;;  %s20241_s16 = smov 0  }
  0x12 LB: > { %s20135_s17 = smov [#allocation7]   ;;  %s20256_s19 = sadd.s32 4294967295, %s20133_s16   ;;  %s20133_s16 = sphi %s20241_s16, %s24322_s16   ;;  %s20129_s15 = sphi %s20239_s15, %s24321_s15   ;;  %s20125_s30 = sphi %s20237_s30, %s24320_s30   ;;  %s20121_s29 = sphi %s20235_s29, %s24319_s29  }
  0x13   : > { %s376_s18 = sshll.u32 %s20135_s17, 4  ;;  %p16553_p0 = scmp.ge.s32.totalorder %s20133_s16, 1  ;;  %s377_s18 = int_to_ptr.vmem [resolvable:$true] %s376_s18 }
  0x14   : > { %p24279_p1 = scmp.eq.s32.totalorder %s20256_s19, 0  ;;  %p364_p2 = scmp.lt.s32.totalorder %s20133_s16, 3 }
  0x15   : > { %s20136_s21 = smov [#allocation10]   ;;  %s20137_s24 = smov [#allocation13]  }
  0x16   : > { %p20261_p3 = pnand %p16553_p0, %p364_p2  ;;  %s405_s22 = sshll.u32 %s20136_s21, 4  ;;  %s20274_s22 = int_to_ptr.vmem [resolvable:$true] %s405_s22 }
  0x17   : > { %s437_s25 = sshll.u32 %s20137_s24, 4  ;;  %s19854_s27 = scalar_lea.vmem %s377_s18, 128  ;;  %s20276_s25 = int_to_ptr.vmem [resolvable:$true] %s437_s25 }
  0x18   : > { %s24291_s20 = scalar_select %p20261_p3, 1, 0 }
  0x19   : > { %p19206_p5 = pneg %p20261_p3  ;;  %p19855_p8 = scmp.ne.s32.totalorder %s377_s18, %s19854_s27 }
  0x1a   : > { %p19862_p11 = scmp.lt.s32.totalorder %s377_s18, %s377_s18  ;;  %p19863_p12 = scmp.lt.s32.totalorder %s19854_s27, %s19854_s27 }
  0x1b   : > { %p20270_p6 = pnand %p19206_p5, %p24279_p1 }
  0x1c   : > { %p19864_p13 = por %p19863_p12, %p19862_p11 }
  0x1d   : > { %p20280_p7 = pneg %p20270_p6 }
  0x1f   : > { %p19857_p9 = pnand %p19855_p8, %p20280_p7 }
  0x21   : > { %p19858_p10 = pneg %p19857_p9 }
  0x23   : > { %p19865_p0 = pnand %p19864_p13, %p19858_p10 }
  0x25   : > { %19868 = shalt.err (!%p19865_p0)
}
  0x26   : > { %s20138_s28 = smov 64   ;;  %s20139_s17 = smov 4  }
  0x27   : > { %s24294_s1 = sld [smem:[#allocation25_spill]]  ;;  %s19880_s14 = scalar_lea.vmem %s20274_s22, 512 }
  0x28   : > { %p19881_p2 = scmp.ne.s32.totalorder %s20274_s22, %s19880_s14  ;;  %p19888_p9 = scmp.lt.s32.totalorder %s20274_s22, %s20274_s22 }
  0x29   : > { %p19889_p10 = scmp.lt.s32.totalorder %s19880_s14, %s19880_s14 }
  0x2a   : > { %p19883_p5 = pnand %p19881_p2, %p20280_p7 }
  0x2b   : > { %p19890_p11 = por %p19889_p10, %p19888_p9 }
  0x2c   : > { %p19884_p8 = pneg %p19883_p5 }
  0x2d   : > { %19209 = dma.hbm_to_vmem [thread:$0]  (!%p20270_p6), %s24294_s1, 128, %s377_s18, [#allocation8], %s20138_s28, %s20138_s28, %s20139_s17  }
  0x2e   : > { %p19891_p12 = pnand %p19890_p11, %p19884_p8 }
  0x30   : > { %19894 = shalt.err (!%p19891_p12)
}
  0x31   : > { %s24295_s4 = sld [smem:[#allocation27_spill]]  ;;  %s19906_s18 = scalar_lea.vmem %s20276_s25, 512 }
  0x32   : > { %p19907_p13 = scmp.ne.s32.totalorder %s20276_s25, %s19906_s18  ;;  %p19914_p5 = scmp.lt.s32.totalorder %s20276_s25, %s20276_s25 }
  0x33   : > { %p19915_p8 = scmp.lt.s32.totalorder %s19906_s18, %s19906_s18 }
  0x34   : > { %p19909_p0 = pnand %p19907_p13, %p20280_p7 }
  0x35   : > { %p19916_p9 = por %p19915_p8, %p19914_p5 }
  0x36   : > { %p19910_p2 = pneg %p19909_p0 }
  0x37   : > { %19215 = dma.hbm_to_vmem [thread:$0]  (!%p20270_p6), %s24295_s4, 512, %s20274_s22, [#allocation11], %s20138_s28, %s20138_s28, %s20139_s17  }
  0x38   : > { %p19917_p10 = pnand %p19916_p9, %p19910_p2 }
  0x3a   : > { %19920 = shalt.err (!%p19917_p10)
}
  0x3b   : > { %s24296_s8 = sld [smem:[#allocation29_spill]]  ;;  %s20140_s22 = smov [#allocation9]  }
  0x3c   : > { %s389_s27 = sshll.u32 %s20140_s22, 4  ;;  %s20141_s21 = smov [#allocation12]   ;;  %s390_s27 = int_to_ptr.vmem [resolvable:$true] %s389_s27 }
  0x3d   : > { %s421_s1 = sshll.u32 %s20141_s21, 4  ;;  %s19932_s18 = scalar_lea.vmem %s390_s27, 512  ;;  %s422_s1 = int_to_ptr.vmem [resolvable:$true] %s421_s1 }
  0x3e   : > { %p19933_p11 = scmp.ne.s32.totalorder %s390_s27, %s19932_s18  ;;  %p19940_p0 = scmp.lt.s32.totalorder %s390_s27, %s390_s27 }
  0x3f   : > { %p19941_p2 = scmp.lt.s32.totalorder %s19932_s18, %s19932_s18 }
  0x40   : > { %p19935_p12 = pnand %p19933_p11, %p20280_p7 }
  0x41   : > { %19221 = dma.hbm_to_vmem [thread:$0]  (!%p20270_p6), %s24296_s8, 512, %s20276_s25, [#allocation14], %s20138_s28, %s20138_s28, %s20139_s17  }
  0x42   : > { %p19936_p13 = pneg %p19935_p12  ;;  %p19942_p5 = por %p19941_p2, %p19940_p0 }
  0x44   : > { %p19943_p8 = pnand %p19942_p5, %p19936_p13 }
  0x46   : > { %19946 = shalt.err (!%p19943_p8)
}
  0x47   : > { %s24297_s2 = sld [smem:[#allocation26_spill]]  ;;  %s19958_s24 = scalar_lea.vmem %s422_s1, 512 }
  0x48   : > { %p19959_p9 = scmp.ne.s32.totalorder %s422_s1, %s19958_s24  ;;  %p19966_p12 = scmp.lt.s32.totalorder %s422_s1, %s422_s1 }
  0x49   : > { %p19967_p0 = scmp.lt.s32.totalorder %s19958_s24, %s19958_s24 }
  0x4a   : > { %p19961_p10 = pnand %p19959_p9, %p20280_p7 }
  0x4b   : > { %p19968_p13 = por %p19967_p0, %p19966_p12 }
  0x4c   : > { %p19962_p11 = pneg %p19961_p10 }
  0x4d   : > { %19212 = dma.hbm_to_vmem [thread:$0]  (!%p20270_p6), %s24297_s2, 512, %s390_s27, [#allocation8], %s20138_s28, %s20138_s28, %s20139_s17  }
  0x4e   : > { %p19969_p2 = pnand %p19968_p13, %p19962_p11 }
  0x50   : > { %19972 = shalt.err (!%p19969_p2)
}
  0x51   : > { %s24298_s6 = sld [smem:[#allocation28_spill]]  ;;  %s20142_s27 = smov [#allocation15]  }
  0x52   : > { %s453_s18 = sshll.u32 %s20142_s27, 4  ;;  %s20143_s25 = smov [#allocation16]   ;;  %s454_s18 = int_to_ptr.vmem [resolvable:$true] %s453_s18 }
  0x53   : > { %s469_s14 = sshll.u32 %s20143_s25, 4  ;;  %s19984_s2 = scalar_lea.vmem %s454_s18, 512  ;;  %s470_s14 = int_to_ptr.vmem [resolvable:$true] %s469_s14 }
  0x54   : > { %p19985_p5 = scmp.ne.s32.totalorder %s454_s18, %s19984_s2  ;;  %p19992_p10 = scmp.lt.s32.totalorder %s454_s18, %s454_s18 }
  0x55   : > { %p19993_p11 = scmp.lt.s32.totalorder %s19984_s2, %s19984_s2 }
  0x56   : > { %p19987_p8 = pnand %p19985_p5, %p20280_p7 }
  0x57   : > { %19218 = dma.hbm_to_vmem [thread:$0]  (!%p20270_p6), %s24298_s6, 512, %s422_s1, [#allocation11], %s20138_s28, %s20138_s28, %s20139_s17  }
  0x58   : > { %p19988_p9 = pneg %p19987_p8  ;;  %p19994_p12 = por %p19993_p11, %p19992_p10 }
  0x5a   : > { %p19995_p0 = pnand %p19994_p12, %p19988_p9 }
  0x5c   : > { %19998 = shalt.err (!%p19995_p0)
}
  0x5d   : > { %s24299_s10 = sld [smem:[#allocation30_spill]]  ;;  %s20010_s22 = scalar_lea.vmem %s470_s14, 512 }
  0x5e   : > { %p20011_p13 = scmp.ne.s32.totalorder %s470_s14, %s20010_s22  ;;  %p20018_p8 = scmp.lt.s32.totalorder %s470_s14, %s470_s14 }
  0x5f   : > { %p20019_p10 = scmp.lt.s32.totalorder %s20010_s22, %s20010_s22 }
  0x60   : > { %p20013_p2 = pnand %p20011_p13, %p20280_p7 }
  0x61   : > { %p20020_p9 = por %p20019_p10, %p20018_p8 }
  0x62   : > { %p20014_p5 = pneg %p20013_p2 }
  0x63   : > { %19224 = dma.hbm_to_vmem [thread:$0]  (!%p20270_p6), %s24299_s10, 512, %s454_s18, [#allocation14], %s20138_s28, %s20138_s28, %s20139_s17  }
  0x64   : > { %p20021_p11 = pnand %p20020_p9, %p20014_p5 }
  0x66   : > { %20024 = shalt.err (!%p20021_p11)
}
  0x67   : > { %s24300_s12 = sld [smem:[#allocation31_spill]]  ;;  %s16552_s23 = sadd.s32 4294967294, %s20133_s16  }
  0x68   : > { %s20366_s26 = sadd.s32 1, %s20133_s16   ;;  %s41_s27 = sadd.s32 1, %s20129_s15 }
  0x69   : > { %s38_s18 = ssub.s32 %s20133_s16, %s20366_s26  ;;  %p48_p7 = scmp.ne.s32.totalorder %s20129_s15, %s20125_s30 }
  0x6a   : > { %p39_p12 = scmp.eq.s32.totalorder %s38_s18, 0  ;;  %p49_p0 = scmp.eq.s32.totalorder %s20133_s16, 0 }
  0x6b   : > { %p54_p13 = scmp.ne.s32.totalorder %s20125_s30, %s20121_s29  ;;  %p351_p2 = scmp.eq.s32.totalorder %s20256_s19, 1 }
  0x6c   : > { %s20378_s25 = scalar_select %p39_p12, %s20129_s15, %s41_s27  }
  0x6d   : > { %19227 = dma.hbm_to_vmem [thread:$0]  (!%p20270_p6), %s24300_s12, 512, %s470_s14, [#allocation17], %s20138_s28, %s20138_s28, %s20139_s17  }
  0x6e   : > { %p50_p5 = por %p49_p0, %p48_p7  ;;  %p20382_p8 = por %p24279_p1, %p54_p13 }
  0x6f   : > { %p20386_p6 = por %p351_p2, %p48_p7  ;;  %p357_p10 = scmp.eq.s32.totalorder %s16552_s23, 1 }
  0x70   : > { %s24301_s1 = scalar_select %p20382_p8, 1, 0 }
  0x71   : > { %s24302_s28 = scalar_select %p20386_p6, 1, 0 }
  0x72   : > { %p19243_p9 = scmp.lt.s32.totalorder %s20133_s16, 2  ;;  %s486_s17 = sand.u32 1, %s20129_s15  }
  0x73   : > { %p20392_p11 = por %p357_p10, %p54_p13  ;;  %s16562_s24 = sshll.u32 %s486_s17, 6 }
  0x74   : > { %s16919_s22 = sshll.u32 %s20133_s16, 10  ;;  %s490_s18 = scalar_lea.vmem [#allocation4], %s16562_s24 }
  0x75   : > { %s24303_s14 = scalar_select %p20392_p11, 1, 0 }
  0x76   : > { %s20400_s27 = scalar_lea.hbm %s24263_s0, %s16919_s22  ;;  %s497_s4 = sshll.u32 %s490_s18, 4  ;;  %s20406_s4 = int_to_ptr.vmem [resolvable:$true] %s497_s4 }
  0x77   : > { %p20402_p7 = pnand %p19243_p9, %p50_p5  ;;  %s20408_s6 = scalar_lea.sflag [#allocation5], %s486_s17 }
  0x78   : > { %s20025_s8 = scalar_lea.hbm %s20400_s27, 1024  ;;  %s20030_s24 = scalar_lea.hbm %s24263_s0, 2048 }
  0x79   : > { %p20026_p12 = scmp.ne.s32.totalorder %s20400_s27, %s20025_s8  ;;  %p20027_p0 = pneg %p20402_p7 }
  0x7a   : > { %p20031_p5 = scmp.lt.s32.totalorder %s20400_s27, %s24263_s0  ;;  %p20032_p10 = scmp.lt.s32.totalorder %s20030_s24, %s20025_s8 }
  0x7b   : > { %p20028_p13 = pnand %p20027_p0, %p20026_p12 }
  0x7c   : > { %p20033_p9 = por %p20032_p10, %p20031_p5 }
  0x7d   : > { %p20029_p2 = pneg %p20028_p13 }
  0x7f   : > { %p20034_p4 = pnand %p20033_p9, %p20029_p2 }
  0x81   : > { %20037 = shalt.err (!%p20034_p4)
}
  0x82   : > { %s20038_s17 = scalar_lea.vmem %s20406_s4, 1024  ;;  %s20144_s10 = smov [#allocation4]  }
  0x83   : > { %p20039_p1 = scmp.ne.s32.totalorder %s20406_s4, %s20038_s17  ;;  %s20043_s12 = sshll.u32 %s20144_s10, 4  ;;  %s20044_s12 = int_to_ptr.vmem [resolvable:$false] %s20043_s12 }
  0x84   : > { %s20045_s22 = scalar_lea.vmem %s20044_s12, 2048  ;;  %p20046_p13 = scmp.lt.s32.totalorder %s20406_s4, %s20044_s12 }
  0x85   : > { %p20041_p11 = pnand %p20039_p1, %p20027_p0  ;;  %p20047_p6 = scmp.lt.s32.totalorder %s20045_s22, %s20038_s17 }
  0x87   : > { %p20042_p12 = pneg %p20041_p11  ;;  %p20048_p8 = por %p20047_p6, %p20046_p13 }
  0x89   : > { %p20049_p3 = pnand %p20048_p8, %p20042_p12 }
  0x8b   : > { %20052 = shalt.err (!%p20049_p3)
}
  0x8c   : > { %s20145_s8 = smov 128   ;;  %s20146_s2 = smov 8  }
  0x8d   : > { %19231 = dma.hbm_to_vmem [thread:$0]  (!%p20402_p7), %s20400_s27, 1024, %s20406_s4, %s20408_s6, %s20145_s8, %s20145_s8, %s20146_s2  }
  0x8e   : > { %p24305_p1 = scmp.ne.s32.totalorder %s24291_s20, 0 }
  0x8f   : > { %s20432_s10 = sand.u32 (!%p24305_p1), 1, %s20125_s30   ;;  %p24306_p3 = scmp.ne.s32.totalorder (!%p24305_p1), %s24301_s1, 0 }
  0x90   : > { %509 = sbr.rel (%p24305_p1) target bundleno = 12570 (0x311a), region = 76  ;;  %s16566_s12 = sshll.u32 (!%p24305_p1), %s20432_s10, 6 }
  0x91   : > { %s512_s24 = scalar_lea.sflag (!%p24305_p1), [#allocation5], %s20432_s10  ;;  %s515_s21 = scalar_lea.vmem (!%p24305_p1), [#allocation4], %s16566_s12 }
  0x95   : > { %20096 = dma.done.wait (%p24306_p3), %s512_s24, 1024  }
  0x96   : > { %20098 = vsyncadd (%p24306_p3), %s512_s24, 4294966272  ;;  %p24307_p4 = scmp.eq.s32.totalorder %s20256_s19, 0 }
  0x98   : > { %20100 = dma.done.wait (%p24307_p4), [#allocation8], 640   ;;  %p24308_p8 = pmov %p24307_p4 }
  0x99   : > { %p24309_p6 = pmov %p24307_p4 }
  0x9a   : > { %20102 = vsyncadd (%p24308_p8), [#allocation8], 4294966656 }
  0x9b   : > { %20104 = dma.done.wait (%p24309_p6), [#allocation11], 1024   ;;  %p24310_p11 = pmov %p24307_p4 }
  0x9c   : > { %p24311_p7 = pmov %p24307_p4 }
  0x9d   : > { %20106 = vsyncadd (%p24310_p11), [#allocation11], 4294966272 }
  0x9e   : > { %20108 = dma.done.wait (%p24311_p7), [#allocation14], 1024   ;;  %p24312_p0 = pmov %p24307_p4 }
  0xa0   : > { %20110 = vsyncadd (%p24312_p0), [#allocation14], 4294966272  ;;  %p24313_p2 = pmov %p24312_p0 }
  0xa1   : > { %p24314_p5 = pmov %p24312_p0 }
  0xa2   : > { %20112 = dma.done.wait (%p24313_p2), [#allocation17], 512  }
  0xa3   : > { %20114 = vsyncadd (%p24314_p5), [#allocation17], 4294966784  ;;  %v19307_v0 = vld [vmem:[#allocation10 + $0x8] sm:$0xff]   ;;  %v19308_v1 = vld [vmem:[#allocation10] sm:$0xff]   ;;  %vm636_vm0 = vcmask 261120   ;;  %v20147_v15 = vmov 0.0  }
  0xa4   : > { %17498 = vmatprep.subr.bf16.mxu0 %v19307_v0  ;;  %19170 = vmatprep.subr.bf16.mxu1 %v19307_v0  ;;  %v590_v2 = vld [vmem:[%s515_s21] sm:$0xff]  ;;  %v591_v3 = vld [vmem:[%s515_s21 + $0x8] sm:$0xff]  ;;  %v592_v7 = vld [vmem:[%s515_s21 + $0x10] sm:$0xff]  ;;  %vm20148_vm1 = vmmov 0   ;;  %s20149_s20 = smov 96   ;;  %vm785_vm2 = vcmask 64512  }
  0xa5   : > { %v594_v4 = vld [vmem:[%s515_s21 + $0x20] sm:$0xff]  ;;  %17499 = vmatpush3.bf16.msra.mxu0 %v19307_v0  ;;  %19172 = vmatpush3.bf16.msra.mxu1 %v19307_v0  ;;  %v20456_v5 = vpack.c.bf16 %v591_v3, %v590_v2  ;;  %v595_v6 = vld [vmem:[%s515_s21 + $0x28] sm:$0xff]  ;;  %v593_v8 = vld [vmem:[%s515_s21 + $0x18] sm:$0xff]  ;;  %vm1235_vm3 = vcmask 1043456   ;;  %s20150_s23 = smov 120   ;;  %s20151_s18 = smov 88  }
  0xa6   : > { %17500 = vmatprep.subr.bf16.mxu0 %v19308_v1  ;;  %19171 = vmatprep.subr.bf16.mxu1 %v19308_v1  ;;  %v20458_v9 = vpack.c.bf16 %v595_v6, %v594_v4  ;;  %v596_v10 = vld [vmem:[%s515_s21 + $0x30] sm:$0xff]  ;;  %v597_v11 = vld [vmem:[%s515_s21 + $0x38] sm:$0xff]  ;;  %v20464_v12 = vpack.c.bf16 %v593_v8, %v592_v7  ;;  %v19310_v16 = vld [vmem:[#allocation9] sm:$0xff]   ;;  %s20152_s17 = smov 112   ;;  %s20153_s22 = smov 80   ;;  %vm2524_vm4 = vcmask 130112  }
  0xa7   : > { %17502 = vmatprep.mubr.msk.bf16.mxu0 %vm636_vm0, %v20456_v5  ;;  %v20466_v13 = vpack.c.bf16 %v597_v11, %v596_v10  ;;  %v19309_v14 = vld [vmem:[#allocation9 + $0x8] sm:$0xff]   ;;  %v598_v17 = vld [vmem:[#allocation7] sm:$0xf]  ;;  %s20154_s8 = smov 104   ;;  %s20155_s2 = smov 72   ;;  %vm3418_vm5 = vcmask 195712  }
  0xa8   : > { %17506 = vmatprep.mubr.msk.bf16.mxu1 %vm636_vm0, %v20458_v9  ;;  %v16575_v18 = vld [vmem:[%s24268_s5] ss:$0 sm:$0xff]  ;;  %s20156_s12 = smov 8   ;;  %s20157_s24 = smov 16   ;;  %vm4312_vm6 = vcmask 261312   ;;  %vm16385_vm7 = vcmask 1041409  }
  0xa9   : > { %17501 = vmatpush3.bf16.msra.mxu0 %v19308_v1  ;;  %19173 = vmatpush3.bf16.msra.mxu1 %v19308_v1  ;;  %v16582_v32 = vld [vmem:[%s24266_s3] ss:$0 sm:$0xff]  ;;  %s20158_s21 = smov 24   ;;  %vm16387_vm8 = vcmask 1042434   ;;  %vm16389_vm9 = vcmask 1043459   ;;  %vm16391_vm10 = vcmask 1044484  }
  0xaa   : > { %17510 = vmatprep.subr.bf16.mxu1 %v20147_v15  ;;  %17524 = vmatprep.subr.bf16.mxu0 %v20147_v15  ;;  %vm16393_vm11 = vcmask 1045509   ;;  %vm16395_vm12 = vcmask 1046534   ;;  %vm16397_vm13 = vcmask 1047559   ;;  %s16402_s1 = scalar_lea.sflag [#allocation6], %s20432_s10  ;;  %p24316_p9 = scmp.ne.s32.totalorder %s24302_s28, 0 }
  0xab   : > { %s20159_s27 = smov [#allocation18]  }
  0xac   : > { %17503 = vmatmul.mubr.msk.bf16.vlgmr.msra.gmra.mxu0 %vm636_vm0, %v20464_v12  ;;  %17507 = vmatmul.mubr.msk.bf16.vlgmr.msra.gmra.mxu1 %vm636_vm0, %v20466_v13  ;;  %s20057_s4 = sshll.u32 %s20159_s27, 4  ;;  %s20058_s4 = int_to_ptr.vmem [resolvable:$false] %s20057_s4 }
  0xad   : > { %17511 = vmatpush3.bf16.msra.mxu1 %v19309_v14  ;;  %17514 = vmatprep.mubr.msk.bf16.mxu1 %vm20148_vm1, %v20147_v15  ;;  %s20059_s6 = scalar_lea.vmem %s20058_s4, 256 }
  0xae   : > { %17512 = vmatprep.subr.bf16.mxu1 %v20147_v15  ;;  %17526 = vmatprep.mubr.msk.bf16.mxu0 %vm20148_vm1, %v20147_v15 }
  0xb1   : > { %17513 = vmatpush3.bf16.msra.mxu1 %v19310_v16 }
  0xb2   : > { %17518 = vmatprep.subr.bf16.mxu1 %v20147_v15 }
  0xb4   : > { %17515 = vmatmul.mubr.msk.bf16.vlgmr.msra.gmra.mxu1 %vm636_vm0, %v598_v17 }
  0xb5   : > { %17520 = vmatprep.mubr.msk.bf16.mxu1 %vm20148_vm1, %v20147_v15 }
 0x16c   : > { %v17504_v19 = vpop.f32.mrf.mxu0  ;;  %v17508_v20 = vpop.f32.mrf.mxu1 }
 0x16d   : > { %v692_v21 = vadd.f32 %v17504_v19, %v16575_v18  ;;  %v708_v51 = vadd.f32 %v17508_v20, %v16575_v18 }
 0x16e   : > { %v683_v22 = vpop.f32.mrf.mxu0  ;;  %v699_v23 = vpop.f32.mrf.mxu1 }
 0x16f   : > { %v20486_v24 = vpack.c.bf16 %v692_v21, %v692_v21  ;;  %v684_v25 = vadd.f32 %v16575_v18, %v683_v22  ;;  %v700_v45 = vadd.f32 %v16575_v18, %v699_v23  ;;  %v20545_v55 = vpack.c.bf16 %v708_v51, %v708_v51 }
 0x170   : > { %v17505_v26 = vpop.f32.mrf.mxu0  ;;  %v17509_v27 = vpop.f32.mrf.mxu1 }
 0x171   : > { %v20488_v28 = vpack.c.bf16 %v684_v25, %v684_v25  ;;  %v695_v29 = vadd.f32 %v17505_v26, %v16575_v18  ;;  %1329 = vrot.lane.b32.xlu1 %v20486_v24, %s20149_s20  ;;  %v876_v46 = vsel %vm785_vm2, %v20486_v24, 0  ;;  %v20527_v49 = vpack.c.bf16 %v700_v45, %v700_v45 }
 0x172   : > { %v686_v30 = vpop.f32.mrf.mxu0  ;;  %v702_v31 = vpop.f32.mrf.mxu1  ;;  %v711_v53 = vadd.f32 %v17509_v27, %v16575_v18  ;;  %v1048_v57 = vsel %vm785_vm2, %v20545_v55, 0 }
 0x173   : > { %v20495_v33 = vpack.c.bf16 %v695_v29, %v695_v29  ;;  %v687_v34 = vadd.f32 %v16575_v18, %v686_v30  ;;  %1230 = vrot.lane.b32.xlu0 %v20488_v28, %s20149_s20  ;;  %v790_v36 = vsel %vm785_vm2, %v20488_v28, 0  ;;  %v703_v47 = vadd.f32 %v16575_v18, %v702_v31 }
 0x174   : > { %v777_v35 = vpop.f32.mrf.mxu1  ;;  %17519 = vmatpush3.bf16.xpose.msra.mxu1 %v790_v36  ;;  %v962_v52 = vsel %vm785_vm2, %v20527_v49, 0  ;;  %v20550_v56 = vpack.c.bf16 %v711_v53, %v711_v53 }
 0x175   : > { %v20501_v37 = vpack.c.bf16 %v687_v34, %v687_v34  ;;  %v20503_v38 = vadd.f32 %v16582_v32, %v777_v35  ;;  %1378 = vrot.lane.b32.xlu1 %v20495_v33, %s20149_s20  ;;  %17530 = vmatprep.subr.bf16.mxu1 %v20147_v15  ;;  %v919_v48 = vsel %vm785_vm2, %v20495_v33, 0  ;;  %v20532_v50 = vpack.c.bf16 %v703_v47, %v703_v47 }
 0x176   : > { %v17516_v39 = vpop.f32.mrf.mxu1  ;;  %v1091_v58 = vsel %vm785_vm2, %v20550_v56, 0 }
 0x177   : > { %v833_v40 = vsel %vm785_vm2, %v20501_v37, 0  ;;  %v783_v41 = vmul.f32 0.17677669, %v20503_v38  ;;  %v1005_v54 = vsel %vm785_vm2, %v20532_v50, 0 }
 0x178   : > { %v780_v42 = vpop.f32.mrf.mxu1  ;;  %17525 = vmatpush3.bf16.xpose.msra.mxu0 %v833_v40 }
 0x179   : > { %1280 = vrot.lane.b32.xlu1 %v20501_v37, %s20149_s20  ;;  %v20513_v43 = vpack.c.bf16 %v783_v41, %v783_v41  ;;  %17536 = vmatprep.subr.bf16.mxu0 %v20147_v15 }
 0x17a   : > { %v17517_v44 = vpop.f32.mrf.mxu1 }
 0x17b   : > { %17521 = vmatmul.mubr.msk.bf16.vlgmr.msra.gmra.mxu1 %vm785_vm2, %v20513_v43 }
 0x17c   : > { %17531 = vmatpush3.bf16.xpose.msra.mxu1 %v876_v46  ;;  %17532 = vmatprep.mubr.msk.bf16.mxu1 %vm20148_vm1, %v20147_v15 }
 0x17d   : > { %17542 = vmatprep.subr.bf16.mxu1 %v20147_v15 }
 0x17f   : > { %17527 = vmatmul.mubr.msk.bf16.vlgmr.msra.gmra.mxu0 %vm785_vm2, %v20513_v43 }
 0x180   : > { %17537 = vmatpush3.bf16.xpose.msra.mxu0 %v919_v48  ;;  %17538 = vmatprep.mubr.msk.bf16.mxu0 %vm20148_vm1, %v20147_v15 }
 0x181   : > { %17548 = vmatprep.subr.bf16.mxu0 %v20147_v15 }
 0x183   : > { %17533 = vmatmul.mubr.msk.bf16.vlgmr.msra.gmra.mxu1 %vm785_vm2, %v20513_v43 }
 0x184   : > { %17543 = vmatpush3.bf16.xpose.msra.mxu1 %v962_v52  ;;  %17544 = vmatprep.mubr.msk.bf16.mxu1 %vm20148_vm1, %v20147_v15 }
 0x185   : > { %17554 = vmatprep.subr.bf16.mxu1 %v20147_v15 }
 0x187   : > { %17539 = vmatmul.mubr.msk.bf16.vlgmr.msra.gmra.mxu0 %vm785_vm2, %v20513_v43 }
 0x188   : > { %17549 = vmatpush3.bf16.xpose.msra.mxu0 %v1005_v54  ;;  %17550 = vmatprep.mubr.msk.bf16.mxu0 %vm20148_vm1, %v20147_v15 }
 0x189   : > { %17560 = vmatprep.subr.bf16.mxu0 %v20147_v15 }
 0x18b   : > { %17545 = vmatmul.mubr.msk.bf16.vlgmr.msra.gmra.mxu1 %vm785_vm2, %v20513_v43 }
 0x18c   : > { %17555 = vmatpush3.bf16.xpose.msra.mxu1 %v1048_v57  ;;  %17556 = vmatprep.mubr.msk.bf16.mxu1 %vm20148_vm1, %v20147_v15 }
 0x18d   : > { %17566 = vmatprep.subr.bf16.mxu1 %v20147_v15 }
 0x18f   : > { %17551 = vmatmul.mubr.msk.bf16.vlgmr.msra.gmra.mxu0 %vm785_vm2, %v20513_v43 }
 0x190   : > { %17561 = vmatpush3.bf16.xpose.msra.mxu0 %v1091_v58  ;;  %17562 = vmatprep.mubr.msk.bf16.mxu0 %vm20148_vm1, %v20147_v15 }
 0x191   : > { %17572 = vmatprep.subr.bf16.mxu0 %v20147_v15 }
 0x193   : > { %17557 = vmatmul.mubr.msk.bf16.vlgmr.msra.gmra.mxu1 %vm785_vm2, %v20513_v43 }
 0x194   : > { %17568 = vmatprep.mubr.msk.bf16.mxu1 %vm20148_vm1, %v20147_v15 }
 0x197   : > { %17563 = vmatmul.mubr.msk.bf16.vlgmr.msra.gmra.mxu0 %vm785_vm2, %v20513_v43 }
 0x198   : > { %17574 = vmatprep.mubr.msk.bf16.mxu0 %vm20148_vm1, %v20147_v15 }
 0x1e3   : > { %v20574_v59 = vpop.permute.xlu1 %1329 }
 0x1e5   : > { %v1231_v60 = vpop.permute.xlu0 %1230 }
 0x1e6   : > { %v1237_v61 = vsel %vm1235_vm3, %v1231_v60, 0 }
 0x1e7   : > { %v20577_v62 = vpop.permute.xlu1 %1378  ;;  %17567 = vmatpush3.bf16.msra.mxu1 %v1237_v61 }
 0x1e8   : > { %17578 = vmatprep.subr.bf16.mxu1 %v20147_v15 }
 0x1eb   : > { %v1281_v63 = vpop.permute.xlu1 %1280 }
 0x1ec   : > { %v1286_v0 = vsel %vm1235_vm3, %v1281_v63, 0 }
 0x1ed   : > { %17573 = vmatpush3.bf16.msra.mxu0 %v1286_v0 }
 0x1ee   : > { %17584 = vmatprep.subr.bf16.mxu0 %v20147_v15 }
 0x23b   : > { %v826_v1 = vpop.f32.mrf.mxu1 }
 0x23c   : > { %v1133_v2 = vsel %vm785_vm2, %v826_v1, -inf }
 0x23d   : > { %1134 = vmax.xlane.f32.xlu0 %v1133_v2  ;;  %v17522_v3 = vpop.f32.mrf.mxu1 }
 0x23f   : > { %v869_v4 = vpop.f32.mrf.mxu0  ;;  %v829_v6 = vpop.f32.mrf.mxu1 }
 0x240   : > { %v1136_v7 = vsel %vm785_vm2, %v869_v4, -inf }
 0x241   : > { %v17528_v8 = vpop.f32.mrf.mxu0  ;;  %1137 = vmax.xlane.f32.xlu0 %v1136_v7  ;;  %v17523_v10 = vpop.f32.mrf.mxu1 }
 0x243   : > { %v872_v11 = vpop.f32.mrf.mxu0  ;;  %v912_v14 = vpop.f32.mrf.mxu1 }
 0x244   : > { %v1139_v17 = vsel %vm785_vm2, %v912_v14, -inf }
 0x245   : > { %v17529_v16 = vpop.f32.mrf.mxu0  ;;  %1140 = vmax.xlane.f32.xlu1 %v1139_v17  ;;  %v17534_v18 = vpop.f32.mrf.mxu1 }
 0x247   : > { %v955_v19 = vpop.f32.mrf.mxu0  ;;  %v915_v20 = vpop.f32.mrf.mxu1 }
 0x248   : > { %v1142_v21 = vsel %vm785_vm2, %v955_v19, -inf }
 0x249   : > { %v17540_v22 = vpop.f32.mrf.mxu0  ;;  %1143 = vmax.xlane.f32.xlu1 %v1142_v21  ;;  %v17535_v23 = vpop.f32.mrf.mxu1 }
 0x24b   : > { %v958_v25 = vpop.f32.mrf.mxu0  ;;  %v998_v26 = vpop.f32.mrf.mxu1 }
 0x24c   : > { %v1145_v29 = vsel %vm785_vm2, %v998_v26, -inf }
 0x24d   : > { %v17541_v27 = vpop.f32.mrf.mxu0  ;;  %1146 = vmax.xlane.f32.xlu0 %v1145_v29  ;;  %v17546_v30 = vpop.f32.mrf.mxu1 }
 0x24f   : > { %v20587_v31 = vpop.f32.mrf.mxu0  ;;  %v1001_v32 = vpop.f32.mrf.mxu1 }
 0x250   : > { %v1148_v34 = vsel %vm785_vm2, %v20587_v31, -inf }
 0x251   : > { %v17552_v35 = vpop.f32.mrf.mxu0  ;;  %1149 = vmax.xlane.f32.xlu1 %v1148_v34  ;;  %v17547_v36 = vpop.f32.mrf.mxu1 }
 0x253   : > { %v1044_v39 = vpop.f32.mrf.mxu0  ;;  %v1084_v40 = vpop.f32.mrf.mxu1 }
 0x254   : > { %v1151_v42 = vsel %vm785_vm2, %v1084_v40, -inf }
 0x255   : > { %v17553_v41 = vpop.f32.mrf.mxu0  ;;  %1152 = vmax.xlane.f32.xlu0 %v1151_v42  ;;  %v17558_v44 = vpop.f32.mrf.mxu1 }
 0x257   : > { %v1127_v45 = vpop.f32.mrf.mxu0  ;;  %v1087_v46 = vpop.f32.mrf.mxu1 }
 0x258   : > { %v1154_v47 = vsel %vm785_vm2, %v1127_v45, -inf }
 0x259   : > { %v17564_v48 = vpop.f32.mrf.mxu0  ;;  %1155 = vmax.xlane.f32.xlu1 %v1154_v47  ;;  %v17559_v51 = vpop.f32.mrf.mxu1 }
 0x25b   : > { %v1130_v52 = vpop.f32.mrf.mxu0 }
 0x25d   : > { %v17565_v53 = vpop.f32.mrf.mxu0 }
 0x26a   : > { %1476 = vrot.lane.b32.xlu1 %v20532_v50, %s20149_s20 }
 0x26b   : > { %1427 = vrot.lane.b32.xlu0 %v20527_v49, %s20149_s20 }
 0x2c6   : > { %v1135_v54 = vpop.xlane.xlu0 %1134 }
 0x2c7   : > { %v1157_v57 = vsub.f32 %v826_v1, %v1135_v54 }
 0x2c9   : > { %v1165_v58 = vmul.f32 1.442695, %v1157_v57 }
 0x2ca   : > { %v1138_v60 = vpop.xlane.xlu0 %1137 }
 0x2cb   : > { %19331 = vpow2.f32 %v1165_v58  ;;  %v1158_v61 = vsub.f32 %v869_v4, %v1138_v60 }
 0x2cd   : > { %v1167_v63 = vmul.f32 1.442695, %v1158_v61  ;;  %v1335_v61 = vsel %vm1235_vm3, %v20574_v59, 0 }
 0x2ce   : > { %v1141_v0 = vpop.xlane.xlu1 %1140 }
 0x2cf   : > { %19333 = vpow2.f32 %v1167_v63  ;;  %v1159_v2 = vsub.f32 %v912_v14, %v1141_v0 }
 0x2d1   : > { %v1169_v3 = vmul.f32 1.442695, %v1159_v2 }
 0x2d2   : > { %v1144_v6 = vpop.xlane.xlu1 %1143 }
 0x2d3   : > { %19335 = vpow2.f32 %v1169_v3  ;;  %v1160_v7 = vsub.f32 %v955_v19, %v1144_v6  ;;  %v1384_v3 = vsel %vm1235_vm3, %v20577_v62, 0 }
 0x2d5   : > { %v1171_v8 = vmul.f32 1.442695, %v1160_v7 }
 0x2d6   : > { %v1147_v10 = vpop.xlane.xlu0 %1146 }
 0x2d7   : > { %19337 = vpow2.f32 %v1171_v8  ;;  %v1161_v11 = vsub.f32 %v998_v26, %v1147_v10 }
 0x2d8   : > { %v20597_v16 = vpop.eup %19331 }
 0x2d9   : > { %v1173_v17 = vmul.f32 1.442695, %v1161_v11  ;;  %v1181_v1 = vsel %vm785_vm2, %v20597_v16, 0.0 }
 0x2da   : > { %1182 = vadd.xlane.f32.xlu0 %v1181_v1  ;;  %v1150_v25 = vpop.xlane.xlu1 %1149 }
 0x2db   : > { %19339 = vpow2.f32 %v1173_v17  ;;  %v1162_v26 = vsub.f32 %v20587_v31, %v1150_v25 }
 0x2dc   : > { %v20601_v4 = vpop.eup %19333 }
 0x2dd   : > { %v1184_v14 = vsel %vm785_vm2, %v20601_v4, 0.0  ;;  %v1175_v32 = vmul.f32 1.442695, %v1162_v26 }
 0x2de   : > { %1185 = vadd.xlane.f32.xlu1 %v1184_v14  ;;  %v1153_v27 = vpop.xlane.xlu0 %1152 }
 0x2df   : > { %v1163_v30 = vsub.f32 %v1084_v40, %v1153_v27  ;;  %19341 = vpow2.f32 %v1175_v32 }
 0x2e0   : > { %v20605_v18 = vpop.eup %19335 }
 0x2e1   : > { %v1187_v19 = vsel %vm785_vm2, %v20605_v18, 0.0  ;;  %v1177_v35 = vmul.f32 1.442695, %v1163_v30 }
 0x2e2   : > { %1188 = vadd.xlane.f32.xlu0 %v1187_v19  ;;  %v1156_v29 = vpop.xlane.xlu1 %1155 }
 0x2e3   : > { %v1164_v34 = vsub.f32 %v1127_v45, %v1156_v29  ;;  %19343 = vpow2.f32 %v1177_v35  ;;  %v1428_v45 = vpop.permute.xlu0 %1427 }
 0x2e4   : > { %v20609_v20 = vpop.eup %19337  ;;  %v1433_v8 = vsel %vm1235_vm3, %v1428_v45, 0 }
 0x2e5   : > { %v1190_v21 = vsel %vm785_vm2, %v20609_v20, 0.0  ;;  %v1179_v36 = vmul.f32 1.442695, %v1164_v34 }
 0x2e6   : > { %1191 = vadd.xlane.f32.xlu1 %v1190_v21  ;;  %v1477_v46 = vpop.permute.xlu1 %1476 }
 0x2e7   : > { %19345 = vpow2.f32 %v1179_v36 }
 0x2e8   : > { %v20613_v22 = vpop.eup %19339 }
 0x2e9   : > { %v1193_v23 = vsel %vm785_vm2, %v20613_v22, 0.0 }
 0x2ea   : > { %1194 = vadd.xlane.f32.xlu0 %v1193_v23 }
 0x2ec   : > { %v20622_v39 = vpop.eup %19341 }
 0x2ed   : > { %v1196_v42 = vsel %vm785_vm2, %v20622_v39, 0.0 }
 0x2f0   : > { %v20624_v41 = vpop.eup %19343 }
 0x2f1   : > { %v1199_v40 = vsel %vm785_vm2, %v20624_v41, 0.0 }
 0x2f4   : > { %v20628_v44 = vpop.eup %19345 }
 0x2f5   : > { %v1202_v31 = vsel %vm785_vm2, %v20628_v44, 0.0 }
 0x2f7   : > { %1574 = vrot.lane.b32.xlu1 %v20550_v56, %s20149_s20 }
 0x300   : > { %1525 = vrot.lane.b32.xlu0 %v20545_v55, %s20149_s20 }
 0x31b   : > { %1197 = vadd.xlane.f32.xlu1 %v1196_v42 }
 0x31f   : > { %1203 = vadd.xlane.f32.xlu1 %v1202_v31  ;;  %1200 = vadd.xlane.f32.xlu0 %v1199_v40 }
 0x330   : > { %1689 = vrot.lane.b32.xlu1 %v20501_v37, %s20150_s23 }
 0x334   : > { %1734 = vrot.lane.b32.xlu1 %v20486_v24, %s20150_s23 }
 0x335   : > { %1641 = vrot.lane.b32.xlu0 %v20488_v28, %s20150_s23 }
 0x338   : > { %1824 = vrot.lane.b32.xlu1 %v20527_v49, %s20150_s23 }
 0x339   : > { %1639 = vrot.lane.b32.xlu0 %v20513_v43, %s20150_s23 }
 0x33c   : > { %1914 = vrot.lane.b32.xlu1 %v20545_v55, %s20150_s23 }
 0x33d   : > { %1779 = vrot.lane.b32.xlu0 %v20495_v33, %s20150_s23 }
 0x340   : > { %2100 = vrot.lane.b32.xlu1 %v20488_v28, %s20151_s18 }
 0x341   : > { %1869 = vrot.lane.b32.xlu0 %v20532_v50, %s20150_s23 }
 0x344   : > { %2196 = vrot.lane.b32.xlu1 %v20486_v24, %s20151_s18 }
 0x345   : > { %1959 = vrot.lane.b32.xlu0 %v20550_v56, %s20150_s23 }
 0x348   : > { %2244 = vrot.lane.b32.xlu1 %v20495_v33, %s20151_s18 }
 0x349   : > { %2148 = vrot.lane.b32.xlu0 %v20501_v37, %s20151_s18 }
 0x34c   : > { %2292 = vrot.lane.b32.xlu1 %v20527_v49, %s20151_s18 }
 0x363   : > { %v1183_v47 = vpop.xlane.xlu0 %1182 }
 0x364   : > { %19347 = vrcp.f32 %v1183_v47 }
 0x367   : > { %v1186_v48 = vpop.xlane.xlu1 %1185 }
 0x368   : > { %19349 = vrcp.f32 %v1186_v48 }
 0x36b   : > { %v1189_v51 = vpop.xlane.xlu0 %1188 }
 0x36c   : > { %19351 = vrcp.f32 %v1189_v51 }
 0x36f   : > { %v1192_v52 = vpop.xlane.xlu1 %1191 }
 0x370   : > { %19353 = vrcp.f32 %v1192_v52 }
 0x371   : > { %v19348_v53 = vpop.eup %19347 }
 0x372   : > { %v1213_v54 = vmul.f32 %v19348_v53, %v20597_v16  ;;  %v1482_v16 = vsel %vm1235_vm3, %v1477_v46, 0 }
 0x373   : > { %v1195_v57 = vpop.xlane.xlu0 %1194 }
 0x374   : > { %19355 = vrcp.f32 %v1195_v57  ;;  %v1221_v58 = vpack.c.bf16 %v1213_v54, %v1213_v54 }
 0x375   : > { %v19350_v60 = vpop.eup %19349 }
 0x376   : > { %17569 = vmatmul.mubr.msk.bf16.vlgmr.msra.gmra.mxu1 %vm785_vm2, %v1221_v58  ;;  %v1214_v63 = vmul.f32 %v19350_v60, %v20601_v4 }
 0x377   : > { %17579 = vmatpush3.bf16.msra.mxu1 %v1335_v61  ;;  %17580 = vmatprep.mubr.msk.bf16.mxu1 %vm20148_vm1, %v20147_v15  ;;  %v1526_v1 = vpop.permute.xlu0 %1525 }
 0x378   : > { %v1222_v0 = vpack.c.bf16 %v1214_v63, %v1214_v63  ;;  %17590 = vmatprep.subr.bf16.mxu1 %v20147_v15  ;;  %v1531_v14 = vsel %vm1235_vm3, %v1526_v1, 0 }
 0x379   : > { %v19352_v2 = vpop.eup %19351 }
 0x37a   : > { %17575 = vmatmul.mubr.msk.bf16.vlgmr.msra.gmra.mxu0 %vm785_vm2, %v1222_v0  ;;  %v1215_v6 = vmul.f32 %v19352_v2, %v20605_v18  ;;  %v1575_v18 = vpop.permute.xlu1 %1574 }
 0x37b   : > { %17585 = vmatpush3.bf16.msra.mxu0 %v1384_v3  ;;  %17586 = vmatprep.mubr.msk.bf16.mxu0 %vm20148_vm1, %v20147_v15  ;;  %v1580_v29 = vsel %vm1235_vm3, %v1575_v18, 0 }
 0x37c   : > { %v1223_v59 = vpack.c.bf16 %v1215_v6, %v1215_v6  ;;  %17596 = vmatprep.subr.bf16.mxu0 %v20147_v15 }
 0x37d   : > { %v19354_v7 = vpop.eup %19353 }
 0x37e   : > { %17581 = vmatmul.mubr.msk.bf16.vlgmr.msra.gmra.mxu1 %vm785_vm2, %v1223_v59  ;;  %v1216_v10 = vmul.f32 %v19354_v7, %v20609_v20 }
 0x37f   : > { %17591 = vmatpush3.bf16.msra.mxu1 %v1433_v8  ;;  %17592 = vmatprep.mubr.msk.bf16.mxu1 %vm20148_vm1, %v20147_v15 }
 0x380   : > { %v1224_v62 = vpack.c.bf16 %v1216_v10, %v1216_v10  ;;  %17602 = vmatprep.subr.bf16.mxu1 %v20147_v15 }
 0x381   : > { %v19356_v11 = vpop.eup %19355 }
 0x382   : > { %17587 = vmatmul.mubr.msk.bf16.vlgmr.msra.gmra.mxu0 %vm785_vm2, %v1224_v62  ;;  %v1217_v17 = vmul.f32 %v19356_v11, %v20613_v22 }
 0x383   : > { %17597 = vmatpush3.bf16.msra.mxu0 %v1482_v16  ;;  %17598 = vmatprep.mubr.msk.bf16.mxu0 %vm20148_vm1, %v20147_v15 }
 0x384   : > { %v1225_v4 = vpack.c.bf16 %v1217_v17, %v1217_v17  ;;  %17608 = vmatprep.subr.bf16.mxu0 %v20147_v15 }
 0x386   : > { %17593 = vmatmul.mubr.msk.bf16.vlgmr.msra.gmra.mxu1 %vm785_vm2, %v1225_v4 }
 0x387   : > { %17603 = vmatpush3.bf16.msra.mxu1 %v1531_v14  ;;  %17604 = vmatprep.mubr.msk.bf16.mxu1 %vm20148_vm1, %v20147_v15 }
 0x388   : > { %17614 = vmatprep.subr.bf16.mxu1 %v20147_v15 }
 0x3a4   : > { %v1198_v19 = vpop.xlane.xlu1 %1197 }
 0x3a5   : > { %19357 = vrcp.f32 %v1198_v19 }
 0x3a8   : > { %v1204_v20 = vpop.xlane.xlu1 %1203  ;;  %v1201_v21 = vpop.xlane.xlu0 %1200 }
 0x3a9   : > { %19359 = vrcp.f32 %v1204_v20 }
 0x3aa   : > { %19361 = vrcp.f32 %v1201_v21 }
 0x3ac   : > { %v1642_v30 = vpop.permute.xlu0 %1641  ;;  %v1690_v36 = vpop.permute.xlu1 %1689 }
 0x3b0   : > { %v1640_v31 = vpop.permute.xlu0 %1639 }
 0x3b2   : > { %v19358_v22 = vpop.eup %19357 }
 0x3b3   : > { %v1218_v23 = vmul.f32 %v19358_v22, %v20622_v39  ;;  %v1647_v39 = vsel %vm785_vm2, %v1642_v30, 0 }
 0x3b4   : > { %v1780_v45 = vpop.permute.xlu0 %1779 }
 0x3b5   : > { %v1226_v25 = vpack.c.bf16 %v1218_v23, %v1218_v23  ;;  %v1782_v46 = vsel %vm785_vm2, %v1780_v45, 0 }
 0x3b6   : > { %v19360_v26 = vpop.eup %19359 }
 0x3b7   : > { %v19362_v27 = vpop.eup %19361  ;;  %17599 = vmatmul.mubr.msk.bf16.vlgmr.msra.gmra.mxu0 %vm785_vm2, %v1226_v25  ;;  %v1220_v34 = vmul.f32 %v19360_v26, %v20628_v44  ;;  %v1735_v44 = vpop.permute.xlu1 %1734 }
 0x3b8   : > { %17609 = vmatpush3.bf16.msra.mxu0 %v1580_v29  ;;  %v1219_v32 = vmul.f32 %v19362_v27, %v20624_v41  ;;  %17610 = vmatprep.mubr.msk.bf16.mxu0 %vm20148_vm1, %v20147_v15  ;;  %v1692_v41 = vsel %vm785_vm2, %v1690_v36, 0  ;;  %v1737_v40 = vsel %vm785_vm2, %v1735_v44, 0  ;;  %v1870_v51 = vpop.permute.xlu0 %1869 }
 0x3b9   : > { %17620 = vmatprep.subr.bf16.mxu0 %v20147_v15  ;;  %v1228_v42 = vpack.c.bf16 %v1220_v34, %v1220_v34  ;;  %v1872_v52 = vsel %vm785_vm2, %v1870_v51, 0 }
 0x3ba   : > { %v1227_v35 = vpack.c.bf16 %v1219_v32, %v1219_v32 }
 0x3bb   : > { %v1825_v47 = vpop.permute.xlu1 %1824 }
 0x3bc   : > { %17605 = vmatmul.mubr.msk.bf16.vlgmr.msra.gmra.mxu1 %vm785_vm2, %v1227_v35  ;;  %v1827_v48 = vsel %vm785_vm2, %v1825_v47, 0  ;;  %v1960_v57 = vpop.permute.xlu0 %1959 }
 0x3bd   : > { %17615 = vmatpush3.bf16.xpose.msra.mxu1 %v1647_v39  ;;  %17616 = vmatprep.mubr.msk.bf16.mxu1 %vm20148_vm1, %v20147_v15  ;;  %v1962_v58 = vsel %vm785_vm2, %v1960_v57, 0 }
 0x3be   : > { %17626 = vmatprep.subr.bf16.mxu1 %v20147_v15 }
 0x3bf   : > { %17611 = vmatmul.mubr.msk.bf16.vlgmr.msra.gmra.mxu0 %vm785_vm2, %v1228_v42  ;;  %v1915_v53 = vpop.permute.xlu1 %1914 }
 0x3c0   : > { %17621 = vmatpush3.bf16.xpose.msra.mxu0 %v1692_v41  ;;  %17622 = vmatprep.mubr.msk.bf16.mxu0 %vm20148_vm1, %v20147_v15  ;;  %v1917_v54 = vsel %vm785_vm2, %v1915_v53, 0  ;;  %v2149_v63 = vpop.permute.xlu0 %2148 }
 0x3c1   : > { %17632 = vmatprep.subr.bf16.mxu0 %v20147_v15  ;;  %v2154_v0 = vsel %vm1235_vm3, %v2149_v63, 0 }
 0x3c3   : > { %v2101_v60 = vpop.permute.xlu1 %2100 }
 0x3c4   : > { %17617 = vmatmul.mubr.msk.bf16.vlgmr.msra.gmra.mxu1 %vm785_vm2, %v1640_v31  ;;  %v2106_v61 = vsel %vm1235_vm3, %v2101_v60, 0 }
 0x3c5   : > { %17627 = vmatpush3.bf16.xpose.msra.mxu1 %v1737_v40  ;;  %17628 = vmatprep.mubr.msk.bf16.mxu1 %vm20148_vm1, %v20147_v15 }
 0x3c6   : > { %17638 = vmatprep.subr.bf16.mxu1 %v20147_v15 }
 0x3c7   : > { %17623 = vmatmul.mubr.msk.bf16.vlgmr.msra.gmra.mxu0 %vm785_vm2, %v1640_v31 }
 0x3c8   : > { %17633 = vmatpush3.bf16.xpose.msra.mxu0 %v1782_v46  ;;  %17634 = vmatprep.mubr.msk.bf16.mxu0 %vm20148_vm1, %v20147_v15 }
 0x3c9   : > { %17644 = vmatprep.subr.bf16.mxu0 %v20147_v15 }
 0x3cc   : > { %17629 = vmatmul.mubr.msk.bf16.vlgmr.msra.gmra.mxu1 %vm785_vm2, %v1640_v31 }
 0x3cd   : > { %17639 = vmatpush3.bf16.xpose.msra.mxu1 %v1827_v48  ;;  %17640 = vmatprep.mubr.msk.bf16.mxu1 %vm20148_vm1, %v20147_v15 }
 0x3ce   : > { %17650 = vmatprep.subr.bf16.mxu1 %v20147_v15 }
 0x3cf   : > { %17635 = vmatmul.mubr.msk.bf16.vlgmr.msra.gmra.mxu0 %vm785_vm2, %v1640_v31 }
 0x3d0   : > { %17645 = vmatpush3.bf16.xpose.msra.mxu0 %v1872_v52  ;;  %17646 = vmatprep.mubr.msk.bf16.mxu0 %vm20148_vm1, %v20147_v15 }
 0x3d1   : > { %17656 = vmatprep.subr.bf16.mxu0 %v20147_v15 }
 0x3d4   : > { %17641 = vmatmul.mubr.msk.bf16.vlgmr.msra.gmra.mxu1 %vm785_vm2, %v1640_v31 }
 0x3d5   : > { %17651 = vmatpush3.bf16.xpose.msra.mxu1 %v1917_v54  ;;  %17652 = vmatprep.mubr.msk.bf16.mxu1 %vm20148_vm1, %v20147_v15 }
 0x3d6   : > { %17662 = vmatprep.subr.bf16.mxu1 %v20147_v15 }
 0x3d7   : > { %17647 = vmatmul.mubr.msk.bf16.vlgmr.msra.gmra.mxu0 %vm785_vm2, %v1640_v31 }
 0x3d8   : > { %17657 = vmatpush3.bf16.xpose.msra.mxu0 %v1962_v58  ;;  %17658 = vmatprep.mubr.msk.bf16.mxu0 %vm20148_vm1, %v20147_v15 }
 0x3d9   : > { %17668 = vmatprep.subr.bf16.mxu0 %v20147_v15 }
 0x3dc   : > { %17653 = vmatmul.mubr.msk.bf16.vlgmr.msra.gmra.mxu1 %vm785_vm2, %v1640_v31 }
 0x3dd   : > { %17663 = vmatpush3.bf16.msra.mxu1 %v2106_v61  ;;  %17664 = vmatprep.mubr.msk.bf16.mxu1 %vm20148_vm1, %v20147_v15 }
 0x3de   : > { %17674 = vmatprep.subr.bf16.mxu1 %v20147_v15 }
 0x3df   : > { %17659 = vmatmul.mubr.msk.bf16.vlgmr.msra.gmra.mxu0 %vm785_vm2, %v1640_v31 }
 0x3e0   : > { %17669 = vmatpush3.bf16.msra.mxu0 %v2154_v0  ;;  %17670 = vmatprep.mubr.msk.bf16.mxu0 %vm20148_vm1, %v20147_v15 }
 0x3e1   : > { %17680 = vmatprep.subr.bf16.mxu0 %v20147_v15 }
 0x436   : > { %v1273_v2 = vpop.f32.mrf.mxu1 }
 0x437   : > { %v1622_v3 = vadd.f32 %v1273_v2, %v20503_v38 }
 0x438   : > { %v17570_v6 = vpop.f32.mrf.mxu1 }
 0x439   : > { %1630 = vst.msk [vmem:[#allocation2] sm:$0xff] %vm785_vm2, %v1622_v3 }
 0x43a   : > { %v1276_v59 = vpop.f32.mrf.mxu1  ;;  %v1322_v7 = vpop.f32.mrf.mxu0 }
 0x43b   : > { %v1623_v8 = vadd.f32 %v1322_v7, %v20503_v38 }
 0x43c   : > { %v17571_v10 = vpop.f32.mrf.mxu1  ;;  %v17576_v62 = vpop.f32.mrf.mxu0 }
 0x43d   : > { %1631 = vst.msk [vmem:[#allocation2 + $0x8] sm:$0xff] %vm785_vm2, %v1623_v8 }
 0x43e   : > { %v1325_v11 = vpop.f32.mrf.mxu0  ;;  %v1371_v16 = vpop.f32.mrf.mxu1 }
 0x43f   : > { %v1624_v17 = vadd.f32 %v1371_v16, %v20503_v38 }
 0x440   : > { %v17577_v1 = vpop.f32.mrf.mxu0  ;;  %v17582_v4 = vpop.f32.mrf.mxu1 }
 0x441   : > { %1632 = vst.msk [vmem:[#allocation2 + $0x10] sm:$0xff] %vm785_vm2, %v1624_v17 }
 0x442   : > { %v1374_v14 = vpop.f32.mrf.mxu1  ;;  %v1420_v18 = vpop.f32.mrf.mxu0 }
 0x443   : > { %v1625_v19 = vadd.f32 %v1420_v18, %v20503_v38 }
 0x444   : > { %v17583_v20 = vpop.f32.mrf.mxu1  ;;  %v17588_v21 = vpop.f32.mrf.mxu0 }
 0x445   : > { %1633 = vst.msk [vmem:[#allocation2 + $0x18] sm:$0xff] %vm785_vm2, %v1625_v19 }
 0x446   : > { %v1423_v22 = vpop.f32.mrf.mxu0  ;;  %v1469_v23 = vpop.f32.mrf.mxu1 }
 0x447   : > { %v1626_v25 = vadd.f32 %v1469_v23, %v20503_v38 }
 0x448   : > { %v17589_v26 = vpop.f32.mrf.mxu0  ;;  %v17594_v27 = vpop.f32.mrf.mxu1 }
 0x449   : > { %1634 = vst.msk [vmem:[#allocation2 + $0x20] sm:$0xff] %vm785_vm2, %v1626_v25 }
 0x44a   : > { %v1472_v29 = vpop.f32.mrf.mxu1 }
 0x44c   : > { %v17595_v30 = vpop.f32.mrf.mxu1 }
 0x477   : > { %v1518_v32 = vpop.f32.mrf.mxu0 }
 0x478   : > { %v1627_v34 = vadd.f32 %v1518_v32, %v20503_v38 }
 0x479   : > { %v17600_v35 = vpop.f32.mrf.mxu0 }
 0x47a   : > { %1635 = vst.msk [vmem:[#allocation2 + $0x28] sm:$0xff] %vm785_vm2, %v1627_v34 }
 0x47b   : > { %v1521_v36 = vpop.f32.mrf.mxu0 }
 0x47c   : > { %v1567_v39 = vpop.f32.mrf.mxu1 }
 0x47d   : > { %v1628_v42 = vadd.f32 %v1567_v39, %v20503_v38  ;;  %v17601_v31 = vpop.f32.mrf.mxu0 }
 0x47e   : > { %v17606_v41 = vpop.f32.mrf.mxu1  ;;  %v20786_v31 = vpop.permute.xlu1 %2196 }
 0x47f   : > { %1636 = vst.msk [vmem:[#allocation2 + $0x30] sm:$0xff] %vm785_vm2, %v1628_v42  ;;  %v1616_v44 = vpop.f32.mrf.mxu0 }
 0x480   : > { %v1570_v40 = vpop.f32.mrf.mxu1  ;;  %v1629_v45 = vadd.f32 %v1616_v44, %v20503_v38 }
 0x481   : > { %v17612_v46 = vpop.f32.mrf.mxu0 }
 0x482   : > { %1637 = vst.msk [vmem:[#allocation2 + $0x38] sm:$0xff] %vm785_vm2, %v1629_v45  ;;  %v17607_v47 = vpop.f32.mrf.mxu1  ;;  %v20788_v41 = vpop.permute.xlu1 %2244 }
 0x483   : > { %v1619_v48 = vpop.f32.mrf.mxu0 }
 0x484   : > { %v1683_v51 = vpop.f32.mrf.mxu1 }
 0x485   : > { %v17613_v52 = vpop.f32.mrf.mxu0  ;;  %v2004_v53 = vsel %vm785_vm2, %v1683_v51, -inf }
 0x486   : > { %2005 = vmax.xlane.f32.xlu1 %v2004_v53  ;;  %v17618_v54 = vpop.f32.mrf.mxu1  ;;  %v20790_v44 = vpop.permute.xlu1 %2292 }
 0x487   : > { %v1728_v57 = vpop.f32.mrf.mxu0 }
 0x488   : > { %v1686_v58 = vpop.f32.mrf.mxu1  ;;  %v2007_v60 = vsel %vm785_vm2, %v1728_v57, -inf }
 0x489   : > { %2008 = vmax.xlane.f32.xlu0 %v2007_v60  ;;  %v17624_v61 = vpop.f32.mrf.mxu0 }
 0x48a   : > { %v17619_v63 = vpop.f32.mrf.mxu1 }
 0x48b   : > { %v1731_v0 = vpop.f32.mrf.mxu0 }
 0x48c   : > { %v1773_v2 = vpop.f32.mrf.mxu1 }
 0x48d   : > { %v17625_v3 = vpop.f32.mrf.mxu0  ;;  %v2010_v6 = vsel %vm785_vm2, %v1773_v2, -inf }
 0x48e   : > { %2011 = vmax.xlane.f32.xlu0 %v2010_v6  ;;  %v17630_v59 = vpop.f32.mrf.mxu1 }
 0x48f   : > { %v1818_v7 = vpop.f32.mrf.mxu0 }
 0x490   : > { %v1776_v8 = vpop.f32.mrf.mxu1  ;;  %v2013_v10 = vsel %vm785_vm2, %v1818_v7, -inf }
 0x491   : > { %v17636_v62 = vpop.f32.mrf.mxu0 }
 0x492   : > { %2014 = vmax.xlane.f32.xlu0 %v2013_v10  ;;  %v17631_v11 = vpop.f32.mrf.mxu1 }
 0x493   : > { %v1821_v16 = vpop.f32.mrf.mxu0 }
 0x494   : > { %v1863_v17 = vpop.f32.mrf.mxu1 }
 0x495   : > { %v17637_v1 = vpop.f32.mrf.mxu0  ;;  %v2016_v4 = vsel %vm785_vm2, %v1863_v17, -inf }
 0x496   : > { %2017 = vmax.xlane.f32.xlu1 %v2016_v4  ;;  %v17642_v14 = vpop.f32.mrf.mxu1 }
 0x497   : > { %v1908_v18 = vpop.f32.mrf.mxu0 }
 0x498   : > { %v1866_v19 = vpop.f32.mrf.mxu1  ;;  %v2019_v20 = vsel %vm785_vm2, %v1908_v18, -inf }
 0x499   : > { %v17648_v21 = vpop.f32.mrf.mxu0  ;;  %2020 = vmax.xlane.f32.xlu0 %v2019_v20 }
 0x49a   : > { %v17643_v22 = vpop.f32.mrf.mxu1 }
 0x49b   : > { %v1911_v23 = vpop.f32.mrf.mxu0 }
 0x49c   : > { %v20774_v25 = vpop.f32.mrf.mxu1 }
 0x49d   : > { %v17649_v26 = vpop.f32.mrf.mxu0  ;;  %v2022_v27 = vsel %vm785_vm2, %v20774_v25, -inf }
 0x49e   : > { %2023 = vmax.xlane.f32.xlu1 %v2022_v27  ;;  %v17654_v29 = vpop.f32.mrf.mxu1 }
 0x49f   : > { %v20778_v30 = vpop.f32.mrf.mxu0 }
 0x4a0   : > { %v1956_v32 = vpop.f32.mrf.mxu1  ;;  %v2025_v34 = vsel %vm785_vm2, %v20778_v30, -inf }
 0x4a1   : > { %v17660_v35 = vpop.f32.mrf.mxu0  ;;  %2026 = vmax.xlane.f32.xlu0 %v2025_v34 }
 0x4a2   : > { %v17655_v36 = vpop.f32.mrf.mxu1 }
 0x4a3   : > { %v2001_v39 = vpop.f32.mrf.mxu0 }
 0x4a5   : > { %v17661_v42 = vpop.f32.mrf.mxu0 }
 0x4af   : > { %2388 = vrot.lane.b32.xlu1 %v20545_v55, %s20151_s18 }
 0x4b7   : > { %2340 = vrot.lane.b32.xlu0 %v20532_v50, %s20151_s18 }
 0x50f   : > { %v2006_v40 = vpop.xlane.xlu1 %2005 }
 0x510   : > { %v2028_v45 = vsub.f32 %v1683_v51, %v2006_v40 }
 0x512   : > { %v2036_v46 = vmul.f32 1.442695, %v2028_v45  ;;  %v2009_v47 = vpop.xlane.xlu0 %2008 }
 0x513   : > { %v2029_v48 = vsub.f32 %v1728_v57, %v2009_v47 }
 0x514   : > { %19363 = vpow2.f32 %v2036_v46 }
 0x515   : > { %v2038_v52 = vmul.f32 1.442695, %v2029_v48 }
 0x517   : > { %19365 = vpow2.f32 %v2038_v52  ;;  %v2012_v53 = vpop.xlane.xlu0 %2011 }
 0x518   : > { %v2030_v54 = vsub.f32 %v1773_v2, %v2012_v53  ;;  %v2202_v53 = vsel %vm1235_vm3, %v20786_v31, 0 }
 0x51a   : > { %v2040_v58 = vmul.f32 1.442695, %v2030_v54 }
 0x51b   : > { %v2015_v60 = vpop.xlane.xlu0 %2014 }
 0x51c   : > { %19367 = vpow2.f32 %v2040_v58  ;;  %v2031_v61 = vsub.f32 %v1818_v7, %v2015_v60 }
 0x51e   : > { %v2042_v63 = vmul.f32 1.442695, %v2031_v61  ;;  %v2250_v61 = vsel %vm1235_vm3, %v20788_v41, 0 }
 0x51f   : > { %v2018_v0 = vpop.xlane.xlu1 %2017 }
 0x520   : > { %19369 = vpow2.f32 %v2042_v63  ;;  %v2032_v3 = vsub.f32 %v1863_v17, %v2018_v0 }
 0x521   : > { %v20792_v6 = vpop.eup %19363 }
 0x522   : > { %v2044_v59 = vmul.f32 1.442695, %v2032_v3  ;;  %v2021_v51 = vpop.xlane.xlu0 %2020  ;;  %v2052_v57 = vsel %vm785_vm2, %v20792_v6, 0.0  ;;  %v2298_v3 = vsel %vm1235_vm3, %v20790_v44, 0 }
 0x523   : > { %v2033_v8 = vsub.f32 %v1908_v18, %v2021_v51  ;;  %2053 = vadd.xlane.f32.xlu1 %v2052_v57 }
 0x524   : > { %v20796_v10 = vpop.eup %19365  ;;  %19371 = vpow2.f32 %v2044_v59 }
 0x525   : > { %v2046_v2 = vmul.f32 1.442695, %v2033_v8  ;;  %v2055_v7 = vsel %vm785_vm2, %v20796_v10, 0.0 }
 0x526   : > { %2056 = vadd.xlane.f32.xlu0 %v2055_v7 }
 0x527   : > { %19373 = vpow2.f32 %v2046_v2  ;;  %v2024_v19 = vpop.xlane.xlu1 %2023 }
 0x528   : > { %v2034_v20 = vsub.f32 %v20774_v25, %v2024_v19 }
 0x529   : > { %v20800_v62 = vpop.eup %19367 }
 0x52a   : > { %v2058_v11 = vsel %vm785_vm2, %v20800_v62, 0.0  ;;  %v2027_v21 = vpop.xlane.xlu0 %2026  ;;  %v2048_v23 = vmul.f32 1.442695, %v2034_v20 }
 0x52b   : > { %2059 = vadd.xlane.f32.xlu1 %v2058_v11  ;;  %v2035_v22 = vsub.f32 %v20778_v30, %v2027_v21  ;;  %v2389_v25 = vpop.permute.xlu1 %2388 }
 0x52c   : > { %19375 = vpow2.f32 %v2048_v23  ;;  %v2394_v2 = vsel %vm1235_vm3, %v2389_v25, 0 }
 0x52d   : > { %v20804_v16 = vpop.eup %19369  ;;  %v2050_v26 = vmul.f32 1.442695, %v2035_v22 }
 0x52e   : > { %v2061_v17 = vsel %vm785_vm2, %v20804_v16, 0.0  ;;  %v2341_v30 = vpop.permute.xlu0 %2340 }
 0x52f   : > { %2062 = vadd.xlane.f32.xlu0 %v2061_v17  ;;  %19377 = vpow2.f32 %v2050_v26  ;;  %v2346_v51 = vsel %vm1235_vm3, %v2341_v30, 0 }
 0x531   : > { %v20808_v1 = vpop.eup %19371 }
 0x532   : > { %v2064_v4 = vsel %vm785_vm2, %v20808_v1, 0.0 }
 0x533   : > { %2065 = vadd.xlane.f32.xlu1 %v2064_v4 }
 0x534   : > { %v20812_v14 = vpop.eup %19373 }
 0x535   : > { %v2067_v18 = vsel %vm785_vm2, %v20812_v14, 0.0 }
 0x536   : > { %2068 = vadd.xlane.f32.xlu0 %v2067_v18 }
 0x539   : > { %v20822_v27 = vpop.eup %19375 }
 0x53a   : > { %v2070_v32 = vsel %vm785_vm2, %v20822_v27, 0.0 }
 0x53c   : > { %v20824_v29 = vpop.eup %19377 }
 0x53d   : > { %v2073_v34 = vsel %vm785_vm2, %v20824_v29, 0.0 }
 0x544   : > { %2535 = vrot.lane.b32.xlu1 %v20488_v28, %s20152_s17 }
 0x54c   : > { %2436 = vrot.lane.b32.xlu0 %v20550_v56, %s20151_s18 }
 0x568   : > { %2071 = vadd.xlane.f32.xlu1 %v2070_v32 }
 0x56b   : > { %2074 = vadd.xlane.f32.xlu0 %v2073_v34 }
 0x579   : > { %2533 = vrot.lane.b32.xlu1 %v20513_v43, %s20152_s17 }
 0x57d   : > { %2673 = vrot.lane.b32.xlu1 %v20495_v33, %s20152_s17 }
 0x581   : > { %2763 = vrot.lane.b32.xlu1 %v20532_v50, %s20152_s17  ;;  %2583 = vrot.lane.b32.xlu0 %v20501_v37, %s20152_s17 }
 0x585   : > { %2853 = vrot.lane.b32.xlu1 %v20550_v56, %s20152_s17  ;;  %2628 = vrot.lane.b32.xlu0 %v20486_v24, %s20152_s17 }
 0x589   : > { %3042 = vrot.lane.b32.xlu1 %v20501_v37, %s20153_s22  ;;  %2718 = vrot.lane.b32.xlu0 %v20527_v49, %s20152_s17 }
 0x58d   : > { %3090 = vrot.lane.b32.xlu1 %v20486_v24, %s20153_s22  ;;  %2808 = vrot.lane.b32.xlu0 %v20545_v55, %s20152_s17 }
 0x591   : > { %3138 = vrot.lane.b32.xlu1 %v20495_v33, %s20153_s22  ;;  %2994 = vrot.lane.b32.xlu0 %v20488_v28, %s20153_s22 }
 0x5ac   : > { %v2054_v35 = vpop.xlane.xlu1 %2053 }
 0x5ad   : > { %19379 = vrcp.f32 %v2054_v35 }
 0x5af   : > { %v2057_v36 = vpop.xlane.xlu0 %2056 }
 0x5b0   : > { %19381 = vrcp.f32 %v2057_v36 }
 0x5b4   : > { %v2060_v39 = vpop.xlane.xlu1 %2059 }
 0x5b5   : > { %19383 = vrcp.f32 %v2060_v39 }
 0x5b8   : > { %v2063_v42 = vpop.xlane.xlu0 %2062 }
 0x5b9   : > { %19385 = vrcp.f32 %v2063_v42 }
 0x5ba   : > { %v19380_v40 = vpop.eup %19379 }
 0x5bb   : > { %v2084_v45 = vmul.f32 %v19380_v40, %v20792_v6 }
 0x5bc   : > { %v2066_v46 = vpop.xlane.xlu1 %2065 }
 0x5bd   : > { %v19382_v47 = vpop.eup %19381  ;;  %19387 = vrcp.f32 %v2066_v46  ;;  %v2092_v48 = vpack.c.bf16 %v2084_v45, %v2084_v45 }
 0x5be   : > { %v2085_v52 = vmul.f32 %v19382_v47, %v20796_v10 }
 0x5bf   : > { %17665 = vmatmul.mubr.msk.bf16.vlgmr.msra.gmra.mxu1 %vm785_vm2, %v2092_v48  ;;  %v2069_v54 = vpop.xlane.xlu0 %2068 }
 0x5c0   : > { %17675 = vmatpush3.bf16.msra.mxu1 %v2202_v53  ;;  %19389 = vrcp.f32 %v2069_v54  ;;  %v2093_v58 = vpack.c.bf16 %v2085_v52, %v2085_v52  ;;  %17676 = vmatprep.mubr.msk.bf16.mxu1 %vm20148_vm1, %v20147_v15 }
 0x5c1   : > { %17686 = vmatprep.subr.bf16.mxu1 %v20147_v15 }
 0x5c2   : > { %v19384_v60 = vpop.eup %19383  ;;  %17671 = vmatmul.mubr.msk.bf16.vlgmr.msra.gmra.mxu0 %vm785_vm2, %v2093_v58 }
 0x5c3   : > { %17681 = vmatpush3.bf16.msra.mxu0 %v2250_v61  ;;  %v2086_v31 = vmul.f32 %v19384_v60, %v20800_v62  ;;  %17682 = vmatprep.mubr.msk.bf16.mxu0 %vm20148_vm1, %v20147_v15  ;;  %v2437_v7 = vpop.permute.xlu0 %2436 }
 0x5c4   : > { %17692 = vmatprep.subr.bf16.mxu0 %v20147_v15  ;;  %v2442_v11 = vsel %vm1235_vm3, %v2437_v7, 0 }
 0x5c5   : > { %v2094_v63 = vpack.c.bf16 %v2086_v31, %v2086_v31 }
 0x5c6   : > { %v19386_v0 = vpop.eup %19385 }
 0x5c7   : > { %17677 = vmatmul.mubr.msk.bf16.vlgmr.msra.gmra.mxu1 %vm785_vm2, %v2094_v63  ;;  %v2087_v6 = vmul.f32 %v19386_v0, %v20804_v16  ;;  %v2536_v16 = vpop.permute.xlu1 %2535 }
 0x5c8   : > { %17687 = vmatpush3.bf16.msra.mxu1 %v2298_v3  ;;  %17688 = vmatprep.mubr.msk.bf16.mxu1 %vm20148_vm1, %v20147_v15  ;;  %v2541_v22 = vsel %vm785_vm2, %v2536_v16, 0 }
 0x5c9   : > { %v2095_v41 = vpack.c.bf16 %v2087_v6, %v2087_v6  ;;  %17698 = vmatprep.subr.bf16.mxu1 %v20147_v15 }
 0x5ca   : > { %v19388_v59 = vpop.eup %19387 }
 0x5cb   : > { %17683 = vmatmul.mubr.msk.bf16.vlgmr.msra.gmra.mxu0 %vm785_vm2, %v2095_v41  ;;  %v2088_v57 = vmul.f32 %v19388_v59, %v20808_v1 }
 0x5cc   : > { %17693 = vmatpush3.bf16.msra.mxu0 %v2346_v51  ;;  %17694 = vmatprep.mubr.msk.bf16.mxu0 %vm20148_vm1, %v20147_v15 }
 0x5cd   : > { %v19390_v44 = vpop.eup %19389  ;;  %v2096_v8 = vpack.c.bf16 %v2088_v57, %v2088_v57  ;;  %17704 = vmatprep.subr.bf16.mxu0 %v20147_v15 }
 0x5ce   : > { %v2089_v10 = vmul.f32 %v19390_v44, %v20812_v14 }
 0x5cf   : > { %17689 = vmatmul.mubr.msk.bf16.vlgmr.msra.gmra.mxu1 %vm785_vm2, %v2096_v8 }
 0x5d0   : > { %17699 = vmatpush3.bf16.msra.mxu1 %v2394_v2  ;;  %v2097_v62 = vpack.c.bf16 %v2089_v10, %v2089_v10  ;;  %17700 = vmatprep.mubr.msk.bf16.mxu1 %vm20148_vm1, %v20147_v15 }
 0x5d1   : > { %17710 = vmatprep.subr.bf16.mxu1 %v20147_v15 }
 0x5d3   : > { %17695 = vmatmul.mubr.msk.bf16.vlgmr.msra.gmra.mxu0 %vm785_vm2, %v2097_v62 }
 0x5d4   : > { %17705 = vmatpush3.bf16.msra.mxu0 %v2442_v11  ;;  %17706 = vmatprep.mubr.msk.bf16.mxu0 %vm20148_vm1, %v20147_v15 }
 0x5d5   : > { %17716 = vmatprep.subr.bf16.mxu0 %v20147_v15 }
 0x5f1   : > { %v2072_v17 = vpop.xlane.xlu1 %2071 }
 0x5f2   : > { %19391 = vrcp.f32 %v2072_v17 }
 0x5f4   : > { %v2075_v1 = vpop.xlane.xlu0 %2074 }
 0x5f5   : > { %19393 = vrcp.f32 %v2075_v1  ;;  %v2534_v26 = vpop.permute.xlu1 %2533 }
 0x5f8   : > { %v2584_v20 = vpop.permute.xlu0 %2583 }
 0x5f9   : > { %v2586_v32 = vsel %vm785_vm2, %v2584_v20, 0 }
 0x5ff   : > { %v19392_v4 = vpop.eup %19391 }
 0x600   : > { %v2090_v14 = vmul.f32 %v19392_v4, %v20822_v27  ;;  %v2629_v27 = vpop.permute.xlu0 %2628 }
 0x601   : > { %v2631_v34 = vsel %vm785_vm2, %v2629_v27, 0 }
 0x602   : > { %v19394_v18 = vpop.eup %19393  ;;  %v2098_v19 = vpack.c.bf16 %v2090_v14, %v2090_v14 }
 0x603   : > { %v2091_v21 = vmul.f32 %v19394_v18, %v20824_v29  ;;  %v2674_v29 = vpop.permute.xlu1 %2673 }
 0x604   : > { %17701 = vmatmul.mubr.msk.bf16.vlgmr.msra.gmra.mxu1 %vm785_vm2, %v2098_v19  ;;  %v2676_v25 = vsel %vm785_vm2, %v2674_v29, 0  ;;  %v2719_v30 = vpop.permute.xlu0 %2718 }
 0x605   : > { %17711 = vmatpush3.bf16.xpose.msra.mxu1 %v2541_v22  ;;  %v2099_v23 = vpack.c.bf16 %v2091_v21, %v2091_v21  ;;  %17712 = vmatprep.mubr.msk.bf16.mxu1 %vm20148_vm1, %v20147_v15  ;;  %v2721_v36 = vsel %vm785_vm2, %v2719_v30, 0 }
 0x606   : > { %17722 = vmatprep.subr.bf16.mxu1 %v20147_v15 }
 0x607   : > { %17707 = vmatmul.mubr.msk.bf16.vlgmr.msra.gmra.mxu0 %vm785_vm2, %v2099_v23  ;;  %v2764_v35 = vpop.permute.xlu1 %2763 }
 0x608   : > { %17717 = vmatpush3.bf16.xpose.msra.mxu0 %v2586_v32  ;;  %17718 = vmatprep.mubr.msk.bf16.mxu0 %vm20148_vm1, %v20147_v15  ;;  %v2766_v39 = vsel %vm785_vm2, %v2764_v35, 0  ;;  %v2809_v42 = vpop.permute.xlu0 %2808 }
 0x609   : > { %17728 = vmatprep.subr.bf16.mxu0 %v20147_v15  ;;  %v2811_v45 = vsel %vm785_vm2, %v2809_v42, 0 }
 0x60b   : > { %v2854_v40 = vpop.permute.xlu1 %2853 }
 0x60c   : > { %17713 = vmatmul.mubr.msk.bf16.vlgmr.msra.gmra.mxu1 %vm785_vm2, %v2534_v26  ;;  %v2856_v46 = vsel %vm785_vm2, %v2854_v40, 0  ;;  %v2995_v47 = vpop.permute.xlu0 %2994 }
 0x60d   : > { %17723 = vmatpush3.bf16.xpose.msra.mxu1 %v2631_v34  ;;  %17724 = vmatprep.mubr.msk.bf16.mxu1 %vm20148_vm1, %v20147_v15  ;;  %v3000_v52 = vsel %vm1235_vm3, %v2995_v47, 0 }
 0x60e   : > { %17734 = vmatprep.subr.bf16.mxu1 %v20147_v15 }
 0x60f   : > { %17719 = vmatmul.mubr.msk.bf16.vlgmr.msra.gmra.mxu0 %vm785_vm2, %v2534_v26  ;;  %v3043_v48 = vpop.permute.xlu1 %3042 }
 0x610   : > { %17729 = vmatpush3.bf16.xpose.msra.mxu0 %v2676_v25  ;;  %17730 = vmatprep.mubr.msk.bf16.mxu0 %vm20148_vm1, %v20147_v15  ;;  %v3048_v53 = vsel %vm1235_vm3, %v3043_v48, 0 }
 0x611   : > { %17740 = vmatprep.subr.bf16.mxu0 %v20147_v15 }
 0x614   : > { %17725 = vmatmul.mubr.msk.bf16.vlgmr.msra.gmra.mxu1 %vm785_vm2, %v2534_v26 }
 0x615   : > { %17735 = vmatpush3.bf16.xpose.msra.mxu1 %v2721_v36  ;;  %17736 = vmatprep.mubr.msk.bf16.mxu1 %vm20148_vm1, %v20147_v15 }
 0x616   : > { %17746 = vmatprep.subr.bf16.mxu1 %v20147_v15 }
 0x617   : > { %17731 = vmatmul.mubr.msk.bf16.vlgmr.msra.gmra.mxu0 %vm785_vm2, %v2534_v26 }
 0x618   : > { %17741 = vmatpush3.bf16.xpose.msra.mxu0 %v2766_v39  ;;  %17742 = vmatprep.mubr.msk.bf16.mxu0 %vm20148_vm1, %v20147_v15 }
 0x619   : > { %17752 = vmatprep.subr.bf16.mxu0 %v20147_v15 }
 0x61c   : > { %17737 = vmatmul.mubr.msk.bf16.vlgmr.msra.gmra.mxu1 %vm785_vm2, %v2534_v26 }
 0x61d   : > { %17747 = vmatpush3.bf16.xpose.msra.mxu1 %v2811_v45  ;;  %17748 = vmatprep.mubr.msk.bf16.mxu1 %vm20148_vm1, %v20147_v15 }
 0x61e   : > { %17758 = vmatprep.subr.bf16.mxu1 %v20147_v15 }
 0x61f   : > { %17743 = vmatmul.mubr.msk.bf16.vlgmr.msra.gmra.mxu0 %vm785_vm2, %v2534_v26 }
 0x620   : > { %17753 = vmatpush3.bf16.xpose.msra.mxu0 %v2856_v46  ;;  %17754 = vmatprep.mubr.msk.bf16.mxu0 %vm20148_vm1, %v20147_v15 }
 0x621   : > { %17764 = vmatprep.subr.bf16.mxu0 %v20147_v15 }
 0x624   : > { %17749 = vmatmul.mubr.msk.bf16.vlgmr.msra.gmra.mxu1 %vm785_vm2, %v2534_v26 }
 0x625   : > { %17759 = vmatpush3.bf16.msra.mxu1 %v3000_v52  ;;  %17760 = vmatprep.mubr.msk.bf16.mxu1 %vm20148_vm1, %v20147_v15 }
 0x626   : > { %17770 = vmatprep.subr.bf16.mxu1 %v20147_v15 }
 0x627   : > { %17755 = vmatmul.mubr.msk.bf16.vlgmr.msra.gmra.mxu0 %vm785_vm2, %v2534_v26 }
 0x628   : > { %17765 = vmatpush3.bf16.msra.mxu0 %v3048_v53  ;;  %17766 = vmatprep.mubr.msk.bf16.mxu0 %vm20148_vm1, %v20147_v15 }
 0x629   : > { %17776 = vmatprep.subr.bf16.mxu0 %v20147_v15 }
 0x67f   : > { %v20945_v54 = vpop.f32.mrf.mxu1 }
 0x681   : > { %v17666_v58 = vpop.f32.mrf.mxu1 }
 0x682   : > { %v20947_v60 = vpop.f32.mrf.mxu0 }
 0x683   : > { %v2145_v61 = vpop.f32.mrf.mxu1 }
 0x684   : > { %v17672_v31 = vpop.f32.mrf.mxu0 }
 0x685   : > { %v17667_v63 = vpop.f32.mrf.mxu1 }
 0x686   : > { %v2193_v0 = vpop.f32.mrf.mxu0 }
 0x687   : > { %v20949_v3 = vpop.f32.mrf.mxu1 }
 0x688   : > { %v17673_v6 = vpop.f32.mrf.mxu0 }
 0x689   : > { %v17678_v41 = vpop.f32.mrf.mxu1 }
 0x68b   : > { %v2241_v59 = vpop.f32.mrf.mxu1  ;;  %v20951_v51 = vpop.f32.mrf.mxu0 }
 0x68d   : > { %v17679_v57 = vpop.f32.mrf.mxu1  ;;  %v17684_v44 = vpop.f32.mrf.mxu0 }
 0x68f   : > { %v2289_v8 = vpop.f32.mrf.mxu0  ;;  %v20953_v10 = vpop.f32.mrf.mxu1 }
 0x691   : > { %v17685_v2 = vpop.f32.mrf.mxu0  ;;  %v17690_v7 = vpop.f32.mrf.mxu1 }
 0x693   : > { %v2337_v62 = vpop.f32.mrf.mxu1  ;;  %v20955_v11 = vpop.f32.mrf.mxu0 }
 0x695   : > { %v17691_v16 = vpop.f32.mrf.mxu1  ;;  %v17696_v17 = vpop.f32.mrf.mxu0 }
 0x697   : > { %v2385_v1 = vpop.f32.mrf.mxu0 }
 0x699   : > { %v17697_v4 = vpop.f32.mrf.mxu0 }
 0x6c4   : > { %v20957_v14 = vpop.f32.mrf.mxu1 }
 0x6c6   : > { %v17702_v18 = vpop.f32.mrf.mxu1 }
 0x6c7   : > { %v20959_v19 = vpop.f32.mrf.mxu0 }
 0x6c8   : > { %v2433_v20 = vpop.f32.mrf.mxu1 }
 0x6c9   : > { %v17708_v21 = vpop.f32.mrf.mxu0 }
 0x6ca   : > { %v17703_v22 = vpop.f32.mrf.mxu1 }
 0x6cb   : > { %v2481_v23 = vpop.f32.mrf.mxu0 }
 0x6cc   : > { %v2577_v26 = vpop.f32.mrf.mxu1 }
 0x6cd   : > { %v17709_v32 = vpop.f32.mrf.mxu0  ;;  %v2898_v27 = vsel %vm785_vm2, %v2577_v26, -inf }
 0x6ce   : > { %2899 = vmax.xlane.f32.xlu0 %v2898_v27  ;;  %v17714_v29 = vpop.f32.mrf.mxu1  ;;  %v20976_v32 = vpop.permute.xlu1 %3090 }
 0x6cf   : > { %v2622_v34 = vpop.f32.mrf.mxu0 }
 0x6d0   : > { %v2580_v25 = vpop.f32.mrf.mxu1  ;;  %v2901_v30 = vsel %vm785_vm2, %v2622_v34, -inf }
 0x6d1   : > { %2902 = vmax.xlane.f32.xlu1 %v2901_v30  ;;  %v17720_v35 = vpop.f32.mrf.mxu0 }
 0x6d2   : > { %v17715_v36 = vpop.f32.mrf.mxu1  ;;  %v20978_v27 = vpop.permute.xlu1 %3138 }
 0x6d3   : > { %v2625_v39 = vpop.f32.mrf.mxu0 }
 0x6d4   : > { %v2667_v42 = vpop.f32.mrf.mxu1 }
 0x6d5   : > { %v17721_v40 = vpop.f32.mrf.mxu0  ;;  %v2904_v45 = vsel %vm785_vm2, %v2667_v42, -inf }
 0x6d6   : > { %2905 = vmax.xlane.f32.xlu0 %v2904_v45  ;;  %v17726_v46 = vpop.f32.mrf.mxu1 }
 0x6d7   : > { %v2712_v47 = vpop.f32.mrf.mxu0 }
 0x6d8   : > { %v2670_v48 = vpop.f32.mrf.mxu1  ;;  %v2907_v52 = vsel %vm785_vm2, %v2712_v47, -inf }
 0x6d9   : > { %v17732_v53 = vpop.f32.mrf.mxu0 }
 0x6da   : > { %2908 = vmax.xlane.f32.xlu0 %v2907_v52  ;;  %v17727_v58 = vpop.f32.mrf.mxu1 }
 0x6db   : > { %v2715_v61 = vpop.f32.mrf.mxu0 }
 0x6dc   : > { %v2757_v31 = vpop.f32.mrf.mxu1 }
 0x6dd   : > { %v17733_v63 = vpop.f32.mrf.mxu0  ;;  %v2910_v0 = vsel %vm785_vm2, %v2757_v31, -inf }
 0x6de   : > { %2911 = vmax.xlane.f32.xlu0 %v2910_v0  ;;  %v17738_v6 = vpop.f32.mrf.mxu1 }
 0x6df   : > { %v20966_v41 = vpop.f32.mrf.mxu0 }
 0x6e0   : > { %v2760_v59 = vpop.f32.mrf.mxu1  ;;  %v2913_v57 = vsel %vm785_vm2, %v20966_v41, -inf }
 0x6e1   : > { %2914 = vmax.xlane.f32.xlu1 %v2913_v57  ;;  %v17744_v44 = vpop.f32.mrf.mxu0 }
 0x6e2   : > { %v17739_v8 = vpop.f32.mrf.mxu1 }
 0x6e3   : > { %v2805_v2 = vpop.f32.mrf.mxu0 }
 0x6e4   : > { %v2847_v7 = vpop.f32.mrf.mxu1 }
 0x6e5   : > { %v17745_v62 = vpop.f32.mrf.mxu0  ;;  %v2916_v16 = vsel %vm785_vm2, %v2847_v7, -inf }
 0x6e6   : > { %2917 = vmax.xlane.f32.xlu0 %v2916_v16  ;;  %v17750_v17 = vpop.f32.mrf.mxu1 }
 0x6e7   : > { %v2892_v1 = vpop.f32.mrf.mxu0 }
 0x6e8   : > { %v2850_v4 = vpop.f32.mrf.mxu1  ;;  %v2919_v18 = vsel %vm785_vm2, %v2892_v1, -inf }
 0x6e9   : > { %2920 = vmax.xlane.f32.xlu1 %v2919_v18  ;;  %v17756_v20 = vpop.f32.mrf.mxu0 }
 0x6ea   : > { %v17751_v21 = vpop.f32.mrf.mxu1 }
 0x6eb   : > { %v2895_v22 = vpop.f32.mrf.mxu0 }
 0x6ed   : > { %v17757_v23 = vpop.f32.mrf.mxu0 }
 0x6fa   : > { %3234 = vrot.lane.b32.xlu1 %v20532_v50, %s20153_s22 }
 0x6fc   : > { %3186 = vrot.lane.b32.xlu0 %v20527_v49, %s20153_s22 }
 0x757   : > { %v2900_v29 = vpop.xlane.xlu0 %2899 }
 0x758   : > { %v2922_v25 = vsub.f32 %v2577_v26, %v2900_v29 }
 0x75a   : > { %v2930_v30 = vmul.f32 1.442695, %v2922_v25  ;;  %v2903_v35 = vpop.xlane.xlu1 %2902 }
 0x75b   : > { %v2923_v36 = vsub.f32 %v2622_v34, %v2903_v35 }
 0x75c   : > { %19395 = vpow2.f32 %v2930_v30 }
 0x75d   : > { %v2932_v39 = vmul.f32 1.442695, %v2923_v36 }
 0x75f   : > { %19397 = vpow2.f32 %v2932_v39  ;;  %v2906_v40 = vpop.xlane.xlu0 %2905 }
 0x760   : > { %v2924_v45 = vsub.f32 %v2667_v42, %v2906_v40 }
 0x762   : > { %v2934_v46 = vmul.f32 1.442695, %v2924_v45 }
 0x763   : > { %v2909_v48 = vpop.xlane.xlu0 %2908 }
 0x764   : > { %19399 = vpow2.f32 %v2934_v46  ;;  %v2925_v52 = vsub.f32 %v2712_v47, %v2909_v48 }
 0x766   : > { %v2936_v53 = vmul.f32 1.442695, %v2925_v52 }
 0x767   : > { %v2912_v58 = vpop.xlane.xlu0 %2911 }
 0x768   : > { %19401 = vpow2.f32 %v2936_v53  ;;  %v2926_v61 = vsub.f32 %v2757_v31, %v2912_v58  ;;  %v3096_v53 = vsel %vm1235_vm3, %v20976_v32, 0 }
 0x769   : > { %v20980_v63 = vpop.eup %19395 }
 0x76a   : > { %v2938_v0 = vmul.f32 1.442695, %v2926_v61  ;;  %v2946_v26 = vsel %vm785_vm2, %v20980_v63, 0.0  ;;  %v2915_v8 = vpop.xlane.xlu1 %2914 }
 0x76b   : > { %2947 = vadd.xlane.f32.xlu0 %v2946_v26  ;;  %v2927_v2 = vsub.f32 %v20966_v41, %v2915_v8 }
 0x76c   : > { %v20984_v34 = vpop.eup %19397  ;;  %19403 = vpow2.f32 %v2938_v0 }
 0x76d   : > { %v2949_v42 = vsel %vm785_vm2, %v20984_v34, 0.0  ;;  %v2940_v4 = vmul.f32 1.442695, %v2927_v2 }
 0x76e   : > { %2950 = vadd.xlane.f32.xlu1 %v2949_v42 }
 0x76f   : > { %v2918_v62 = vpop.xlane.xlu0 %2917  ;;  %19405 = vpow2.f32 %v2940_v4 }
 0x770   : > { %v2928_v17 = vsub.f32 %v2847_v7, %v2918_v62 }
 0x771   : > { %v20988_v6 = vpop.eup %19399 }
 0x772   : > { %v2952_v47 = vsel %vm785_vm2, %v20988_v6, 0.0  ;;  %v2921_v16 = vpop.xlane.xlu1 %2920  ;;  %v2942_v20 = vmul.f32 1.442695, %v2928_v17 }
 0x773   : > { %2953 = vadd.xlane.f32.xlu0 %v2952_v47  ;;  %v2929_v18 = vsub.f32 %v2892_v1, %v2921_v16  ;;  %v3187_v1 = vpop.permute.xlu0 %3186 }
 0x774   : > { %19407 = vpow2.f32 %v2942_v20 }
 0x775   : > { %v20992_v31 = vpop.eup %19401  ;;  %v2944_v21 = vmul.f32 1.442695, %v2929_v18 }
 0x776   : > { %v2955_v59 = vsel %vm785_vm2, %v20992_v31, 0.0  ;;  %v3235_v30 = vpop.permute.xlu1 %3234 }
 0x777   : > { %2956 = vadd.xlane.f32.xlu1 %v2955_v59  ;;  %19409 = vpow2.f32 %v2944_v21  ;;  %v3240_v47 = vsel %vm1235_vm3, %v3235_v30, 0 }
 0x779   : > { %v20996_v57 = vpop.eup %19403 }
 0x77a   : > { %v2958_v44 = vsel %vm785_vm2, %v20996_v57, 0.0 }
 0x77b   : > { %2959 = vadd.xlane.f32.xlu0 %v2958_v44 }
 0x77c   : > { %v21005_v22 = vpop.eup %19405 }
 0x77d   : > { %v2961_v29 = vsel %vm785_vm2, %v21005_v22, 0.0 }
 0x781   : > { %v21007_v23 = vpop.eup %19407 }
 0x782   : > { %v2964_v7 = vsel %vm785_vm2, %v21007_v23, 0.0 }
 0x784   : > { %v21011_v25 = vpop.eup %19409 }
 0x785   : > { %v2967_v41 = vsel %vm785_vm2, %v21011_v25, 0.0 }
 0x788   : > { %3330 = vrot.lane.b32.xlu1 %v20550_v56, %s20153_s22 }
 0x791   : > { %3282 = vrot.lane.b32.xlu0 %v20545_v55, %s20153_s22 }
 0x7ac   : > { %2962 = vadd.xlane.f32.xlu1 %v2961_v29 }
 0x7b0   : > { %2968 = vadd.xlane.f32.xlu1 %v2967_v41  ;;  %2965 = vadd.xlane.f32.xlu0 %v2964_v7 }
 0x7c1   : > { %3477 = vrot.lane.b32.xlu1 %v20501_v37, %s20154_s8 }
 0x7c5   : > { %3522 = vrot.lane.b32.xlu1 %v20486_v24, %s20154_s8 }
 0x7c6   : > { %3429 = vrot.lane.b32.xlu0 %v20488_v28, %s20154_s8 }
 0x7c9   : > { %3612 = vrot.lane.b32.xlu1 %v20527_v49, %s20154_s8 }
 0x7ca   : > { %3427 = vrot.lane.b32.xlu0 %v20513_v43, %s20154_s8 }
 0x7cd   : > { %3702 = vrot.lane.b32.xlu1 %v20545_v55, %s20154_s8 }
 0x7ce   : > { %3567 = vrot.lane.b32.xlu0 %v20495_v33, %s20154_s8 }
 0x7d1   : > { %3888 = vrot.lane.b32.xlu1 %v20488_v28, %s20155_s2 }
 0x7d2   : > { %3657 = vrot.lane.b32.xlu0 %v20532_v50, %s20154_s8 }
 0x7d6   : > { %3747 = vrot.lane.b32.xlu0 %v20550_v56, %s20154_s8 }
 0x7f4   : > { %v2948_v35 = vpop.xlane.xlu0 %2947 }
 0x7f5   : > { %19411 = vrcp.f32 %v2948_v35 }
 0x7f7   : > { %v2951_v43 = vpop.xlane.xlu1 %2950 }
 0x7f8   : > { %19413 = vrcp.f32 %v2951_v43 }
 0x7fc   : > { %v2954_v36 = vpop.xlane.xlu0 %2953 }
 0x7fd   : > { %19415 = vrcp.f32 %v2954_v36 }
 0x800   : > { %v2957_v39 = vpop.xlane.xlu1 %2956 }
 0x801   : > { %19417 = vrcp.f32 %v2957_v39 }
 0x802   : > { %v19412_v40 = vpop.eup %19411 }
 0x803   : > { %v2978_v45 = vmul.f32 %v19412_v40, %v20980_v63  ;;  %v3144_v63 = vsel %vm1235_vm3, %v20978_v27, 0 }
 0x804   : > { %v2960_v28 = vpop.xlane.xlu0 %2959  ;;  %v3331_v2 = vpop.permute.xlu1 %3330 }
 0x805   : > { %v19414_v46 = vpop.eup %19413  ;;  %19419 = vrcp.f32 %v2960_v28  ;;  %v2986_v48 = vpack.c.bf16 %v2978_v45, %v2978_v45  ;;  %v3336_v29 = vsel %vm1235_vm3, %v3331_v2, 0 }
 0x806   : > { %v2979_v52 = vmul.f32 %v19414_v46, %v20984_v34  ;;  %v3192_v34 = vsel %vm1235_vm3, %v3187_v1, 0 }
 0x807   : > { %17761 = vmatmul.mubr.msk.bf16.vlgmr.msra.gmra.mxu1 %vm785_vm2, %v2986_v48 }
 0x808   : > { %17771 = vmatpush3.bf16.msra.mxu1 %v3096_v53  ;;  %v2987_v58 = vpack.c.bf16 %v2979_v52, %v2979_v52  ;;  %17772 = vmatprep.mubr.msk.bf16.mxu1 %vm20148_vm1, %v20147_v15  ;;  %v3283_v44 = vpop.permute.xlu0 %3282 }
 0x809   : > { %17782 = vmatprep.subr.bf16.mxu1 %v20147_v15  ;;  %v3288_v8 = vsel %vm1235_vm3, %v3283_v44, 0 }
 0x80a   : > { %v19416_v61 = vpop.eup %19415  ;;  %17767 = vmatmul.mubr.msk.bf16.vlgmr.msra.gmra.mxu0 %vm785_vm2, %v2987_v58 }
 0x80b   : > { %17777 = vmatpush3.bf16.msra.mxu0 %v3144_v63  ;;  %v2980_v0 = vmul.f32 %v19416_v61, %v20988_v6  ;;  %17778 = vmatprep.mubr.msk.bf16.mxu0 %vm20148_vm1, %v20147_v15 }
 0x80c   : > { %17788 = vmatprep.subr.bf16.mxu0 %v20147_v15 }
 0x80d   : > { %v2988_v32 = vpack.c.bf16 %v2980_v0, %v2980_v0 }
 0x80e   : > { %v19418_v26 = vpop.eup %19417 }
 0x80f   : > { %17773 = vmatmul.mubr.msk.bf16.vlgmr.msra.gmra.mxu1 %vm785_vm2, %v2988_v32  ;;  %v2981_v42 = vmul.f32 %v19418_v26, %v20992_v31 }
 0x810   : > { %17783 = vmatpush3.bf16.msra.mxu1 %v3192_v34  ;;  %17784 = vmatprep.mubr.msk.bf16.mxu1 %vm20148_vm1, %v20147_v15 }
 0x811   : > { %v2989_v27 = vpack.c.bf16 %v2981_v42, %v2981_v42  ;;  %17794 = vmatprep.subr.bf16.mxu1 %v20147_v15 }
 0x812   : > { %v19420_v6 = vpop.eup %19419 }
 0x813   : > { %17779 = vmatmul.mubr.msk.bf16.vlgmr.msra.gmra.mxu0 %vm785_vm2, %v2989_v27  ;;  %v2982_v59 = vmul.f32 %v19420_v6, %v20996_v57 }
 0x814   : > { %17789 = vmatpush3.bf16.msra.mxu0 %v3240_v47  ;;  %17790 = vmatprep.mubr.msk.bf16.mxu0 %vm20148_vm1, %v20147_v15 }
 0x815   : > { %v2990_v31 = vpack.c.bf16 %v2982_v59, %v2982_v59  ;;  %17800 = vmatprep.subr.bf16.mxu0 %v20147_v15 }
 0x817   : > { %17785 = vmatmul.mubr.msk.bf16.vlgmr.msra.gmra.mxu1 %vm785_vm2, %v2990_v31 }
 0x818   : > { %17795 = vmatpush3.bf16.msra.mxu1 %v3288_v8  ;;  %17796 = vmatprep.mubr.msk.bf16.mxu1 %vm20148_vm1, %v20147_v15 }
 0x819   : > { %17806 = vmatprep.subr.bf16.mxu1 %v20147_v15 }
 0x835   : > { %v2963_v57 = vpop.xlane.xlu1 %2962 }
 0x836   : > { %19421 = vrcp.f32 %v2963_v57 }
 0x839   : > { %v2969_v62 = vpop.xlane.xlu1 %2968  ;;  %v2966_v16 = vpop.xlane.xlu0 %2965 }
 0x83a   : > { %19423 = vrcp.f32 %v2969_v62 }
 0x83b   : > { %19425 = vrcp.f32 %v2966_v16 }
 0x83d   : > { %v3430_v41 = vpop.permute.xlu0 %3429 }
 0x83e   : > { %v3435_v35 = vsel %vm785_vm2, %v3430_v41, 0 }
 0x841   : > { %v3428_v36 = vpop.permute.xlu0 %3427 }
 0x843   : > { %v19422_v17 = vpop.eup %19421 }
 0x844   : > { %v2983_v4 = vmul.f32 %v19422_v17, %v21005_v22  ;;  %v3478_v22 = vpop.permute.xlu1 %3477 }
 0x845   : > { %v3568_v40 = vpop.permute.xlu0 %3567 }
 0x846   : > { %v2991_v18 = vpack.c.bf16 %v2983_v4, %v2983_v4  ;;  %v3570_v45 = vsel %vm785_vm2, %v3568_v40, 0 }
 0x847   : > { %v19424_v20 = vpop.eup %19423 }
 0x848   : > { %v19426_v21 = vpop.eup %19425  ;;  %17791 = vmatmul.mubr.msk.bf16.vlgmr.msra.gmra.mxu0 %vm785_vm2, %v2991_v18  ;;  %v2985_v1 = vmul.f32 %v19424_v20, %v21011_v25  ;;  %v3523_v25 = vpop.permute.xlu1 %3522 }
 0x849   : > { %17801 = vmatpush3.bf16.msra.mxu0 %v3336_v29  ;;  %v2984_v7 = vmul.f32 %v19426_v21, %v21007_v23  ;;  %17802 = vmatprep.mubr.msk.bf16.mxu0 %vm20148_vm1, %v20147_v15  ;;  %v3480_v23 = vsel %vm785_vm2, %v3478_v22, 0  ;;  %v3525_v39 = vsel %vm785_vm2, %v3523_v25, 0  ;;  %v3658_v48 = vpop.permute.xlu0 %3657 }
 0x84a   : > { %17812 = vmatprep.subr.bf16.mxu0 %v20147_v15  ;;  %v2993_v43 = vpack.c.bf16 %v2985_v1, %v2985_v1  ;;  %v3660_v52 = vsel %vm785_vm2, %v3658_v48, 0 }
 0x84b   : > { %v2992_v30 = vpack.c.bf16 %v2984_v7, %v2984_v7 }
 0x84c   : > { %v3613_v28 = vpop.permute.xlu1 %3612 }
 0x84d   : > { %17797 = vmatmul.mubr.msk.bf16.vlgmr.msra.gmra.mxu1 %vm785_vm2, %v2992_v30  ;;  %v3615_v46 = vsel %vm785_vm2, %v3613_v28, 0  ;;  %v3748_v61 = vpop.permute.xlu0 %3747 }
 0x84e   : > { %17807 = vmatpush3.bf16.xpose.msra.mxu1 %v3435_v35  ;;  %17808 = vmatprep.mubr.msk.bf16.mxu1 %vm20148_vm1, %v20147_v15  ;;  %v3750_v63 = vsel %vm785_vm2, %v3748_v61, 0 }
 0x84f   : > { %17818 = vmatprep.subr.bf16.mxu1 %v20147_v15 }
 0x850   : > { %17803 = vmatmul.mubr.msk.bf16.vlgmr.msra.gmra.mxu0 %vm785_vm2, %v2993_v43  ;;  %v3703_v53 = vpop.permute.xlu1 %3702 }
 0x851   : > { %17813 = vmatpush3.bf16.xpose.msra.mxu0 %v3480_v23  ;;  %17814 = vmatprep.mubr.msk.bf16.mxu0 %vm20148_vm1, %v20147_v15  ;;  %v3705_v58 = vsel %vm785_vm2, %v3703_v53, 0 }
 0x852   : > { %17824 = vmatprep.subr.bf16.mxu0 %v20147_v15 }
 0x854   : > { %v3889_v0 = vpop.permute.xlu1 %3888 }
 0x855   : > { %17809 = vmatmul.mubr.msk.bf16.vlgmr.msra.gmra.mxu1 %vm785_vm2, %v3428_v36  ;;  %v3894_v32 = vsel %vm1235_vm3, %v3889_v0, 0 }
 0x856   : > { %17819 = vmatpush3.bf16.xpose.msra.mxu1 %v3525_v39  ;;  %17820 = vmatprep.mubr.msk.bf16.mxu1 %vm20148_vm1, %v20147_v15 }
 0x857   : > { %17830 = vmatprep.subr.bf16.mxu1 %v20147_v15 }
 0x858   : > { %17815 = vmatmul.mubr.msk.bf16.vlgmr.msra.gmra.mxu0 %vm785_vm2, %v3428_v36 }
 0x859   : > { %17825 = vmatpush3.bf16.xpose.msra.mxu0 %v3570_v45  ;;  %17826 = vmatprep.mubr.msk.bf16.mxu0 %vm20148_vm1, %v20147_v15 }
 0x85a   : > { %17836 = vmatprep.subr.bf16.mxu0 %v20147_v15 }
 0x85d   : > { %17821 = vmatmul.mubr.msk.bf16.vlgmr.msra.gmra.mxu1 %vm785_vm2, %v3428_v36 }
 0x85e   : > { %17831 = vmatpush3.bf16.xpose.msra.mxu1 %v3615_v46  ;;  %17832 = vmatprep.mubr.msk.bf16.mxu1 %vm20148_vm1, %v20147_v15 }
 0x85f   : > { %17842 = vmatprep.subr.bf16.mxu1 %v20147_v15 }
 0x860   : > { %17827 = vmatmul.mubr.msk.bf16.vlgmr.msra.gmra.mxu0 %vm785_vm2, %v3428_v36 }
 0x861   : > { %17837 = vmatpush3.bf16.xpose.msra.mxu0 %v3660_v52  ;;  %17838 = vmatprep.mubr.msk.bf16.mxu0 %vm20148_vm1, %v20147_v15 }
 0x862   : > { %17848 = vmatprep.subr.bf16.mxu0 %v20147_v15 }
 0x865   : > { %17833 = vmatmul.mubr.msk.bf16.vlgmr.msra.gmra.mxu1 %vm785_vm2, %v3428_v36 }
 0x866   : > { %17843 = vmatpush3.bf16.xpose.msra.mxu1 %v3705_v58  ;;  %17844 = vmatprep.mubr.msk.bf16.mxu1 %vm20148_vm1, %v20147_v15 }
 0x867   : > { %17854 = vmatprep.subr.bf16.mxu1 %v20147_v15 }
 0x868   : > { %17839 = vmatmul.mubr.msk.bf16.vlgmr.msra.gmra.mxu0 %vm785_vm2, %v3428_v36 }
 0x869   : > { %17849 = vmatpush3.bf16.xpose.msra.mxu0 %v3750_v63  ;;  %17850 = vmatprep.mubr.msk.bf16.mxu0 %vm20148_vm1, %v20147_v15 }
 0x86a   : > { %17860 = vmatprep.subr.bf16.mxu0 %v20147_v15 }
 0x86d   : > { %17845 = vmatmul.mubr.msk.bf16.vlgmr.msra.gmra.mxu1 %vm785_vm2, %v3428_v36 }
 0x86e   : > { %17855 = vmatpush3.bf16.msra.mxu1 %v3894_v32  ;;  %17856 = vmatprep.mubr.msk.bf16.mxu1 %vm20148_vm1, %v20147_v15 }
 0x86f   : > { %17866 = vmatprep.subr.bf16.mxu1 %v20147_v15 }
 0x870   : > { %17851 = vmatmul.mubr.msk.bf16.vlgmr.msra.gmra.mxu0 %vm785_vm2, %v3428_v36 }
 0x871   : > { %17862 = vmatprep.mubr.msk.bf16.mxu0 %vm20148_vm1, %v20147_v15 }
 0x8c7   : > { %v21125_v26 = vpop.f32.mrf.mxu1 }
 0x8c9   : > { %v17762_v34 = vpop.f32.mrf.mxu1 }
 0x8ca   : > { %v21127_v42 = vpop.f32.mrf.mxu0 }
 0x8cb   : > { %v3039_v27 = vpop.f32.mrf.mxu1 }
 0x8cc   : > { %v17768_v6 = vpop.f32.mrf.mxu0 }
 0x8cd   : > { %v17763_v47 = vpop.f32.mrf.mxu1 }
 0x8ce   : > { %v3087_v59 = vpop.f32.mrf.mxu0 }
 0x8cf   : > { %v21129_v44 = vpop.f32.mrf.mxu1 }
 0x8d0   : > { %v17769_v31 = vpop.f32.mrf.mxu0 }
 0x8d1   : > { %v17774_v8 = vpop.f32.mrf.mxu1 }
 0x8d3   : > { %v3135_v2 = vpop.f32.mrf.mxu1  ;;  %v21131_v57 = vpop.f32.mrf.mxu0 }
 0x8d5   : > { %v17775_v62 = vpop.f32.mrf.mxu1  ;;  %v17780_v16 = vpop.f32.mrf.mxu0 }
 0x8d7   : > { %v3183_v17 = vpop.f32.mrf.mxu0  ;;  %v21133_v4 = vpop.f32.mrf.mxu1 }
 0x8d9   : > { %v17781_v18 = vpop.f32.mrf.mxu0  ;;  %v17786_v20 = vpop.f32.mrf.mxu1 }
 0x8db   : > { %v3231_v21 = vpop.f32.mrf.mxu1 }
 0x8dd   : > { %v17787_v29 = vpop.f32.mrf.mxu1 }
 0x908   : > { %v21135_v41 = vpop.f32.mrf.mxu0 }
 0x90a   : > { %v17792_v7 = vpop.f32.mrf.mxu0 }
 0x90c   : > { %v3279_v1 = vpop.f32.mrf.mxu0 }
 0x90d   : > { %v21137_v30 = vpop.f32.mrf.mxu1 }
 0x90e   : > { %v17793_v22 = vpop.f32.mrf.mxu0 }
 0x90f   : > { %v17798_v35 = vpop.f32.mrf.mxu1 }
 0x910   : > { %v21139_v43 = vpop.f32.mrf.mxu0 }
 0x911   : > { %v3327_v36 = vpop.f32.mrf.mxu1 }
 0x912   : > { %v17804_v23 = vpop.f32.mrf.mxu0 }
 0x913   : > { %v17799_v25 = vpop.f32.mrf.mxu1 }
 0x914   : > { %v3375_v39 = vpop.f32.mrf.mxu0 }
 0x915   : > { %v3471_v40 = vpop.f32.mrf.mxu1 }
 0x916   : > { %v17805_v45 = vpop.f32.mrf.mxu0  ;;  %v3792_v28 = vsel %vm785_vm2, %v3471_v40, -inf }
 0x917   : > { %3793 = vmax.xlane.f32.xlu1 %v3792_v28  ;;  %v17810_v46 = vpop.f32.mrf.mxu1 }
 0x918   : > { %v3516_v48 = vpop.f32.mrf.mxu0 }
 0x919   : > { %v3474_v52 = vpop.f32.mrf.mxu1  ;;  %v3795_v53 = vsel %vm785_vm2, %v3516_v48, -inf }
 0x91a   : > { %3796 = vmax.xlane.f32.xlu0 %v3795_v53  ;;  %v17816_v58 = vpop.f32.mrf.mxu0 }
 0x91b   : > { %v17811_v61 = vpop.f32.mrf.mxu1 }
 0x91c   : > { %v3519_v63 = vpop.f32.mrf.mxu0 }
 0x91d   : > { %v3561_v0 = vpop.f32.mrf.mxu1 }
 0x91e   : > { %v17817_v32 = vpop.f32.mrf.mxu0  ;;  %v3798_v34 = vsel %vm785_vm2, %v3561_v0, -inf }
 0x91f   : > { %3799 = vmax.xlane.f32.xlu0 %v3798_v34  ;;  %v17822_v27 = vpop.f32.mrf.mxu1 }
 0x920   : > { %v3606_v6 = vpop.f32.mrf.mxu0 }
 0x921   : > { %v3564_v47 = vpop.f32.mrf.mxu1  ;;  %v3801_v59 = vsel %vm785_vm2, %v3606_v6, -inf }
 0x922   : > { %v17828_v31 = vpop.f32.mrf.mxu0 }
 0x923   : > { %3802 = vmax.xlane.f32.xlu0 %v3801_v59  ;;  %v17823_v8 = vpop.f32.mrf.mxu1 }
 0x924   : > { %v3609_v2 = vpop.f32.mrf.mxu0 }
 0x925   : > { %v21145_v62 = vpop.f32.mrf.mxu1 }
 0x926   : > { %v17829_v16 = vpop.f32.mrf.mxu0  ;;  %v3804_v17 = vsel %vm785_vm2, %v21145_v62, -inf }
 0x927   : > { %3805 = vmax.xlane.f32.xlu1 %v3804_v17  ;;  %v17834_v18 = vpop.f32.mrf.mxu1 }
 0x928   : > { %v21149_v20 = vpop.f32.mrf.mxu0 }
 0x929   : > { %v3654_v21 = vpop.f32.mrf.mxu1  ;;  %v3807_v29 = vsel %vm785_vm2, %v21149_v20, -inf }
 0x92a   : > { %v17840_v7 = vpop.f32.mrf.mxu0  ;;  %3808 = vmax.xlane.f32.xlu0 %v3807_v29 }
 0x92b   : > { %v17835_v1 = vpop.f32.mrf.mxu1 }
 0x92c   : > { %v3699_v22 = vpop.f32.mrf.mxu0 }
 0x92d   : > { %v3741_v35 = vpop.f32.mrf.mxu1 }
 0x92e   : > { %v17841_v36 = vpop.f32.mrf.mxu0  ;;  %v3810_v23 = vsel %vm785_vm2, %v3741_v35, -inf }
 0x92f   : > { %3811 = vmax.xlane.f32.xlu1 %v3810_v23  ;;  %v17846_v25 = vpop.f32.mrf.mxu1 }
 0x930   : > { %v3786_v39 = vpop.f32.mrf.mxu0 }
 0x931   : > { %v3744_v45 = vpop.f32.mrf.mxu1  ;;  %v3813_v28 = vsel %vm785_vm2, %v3786_v39, -inf }
 0x932   : > { %v17852_v46 = vpop.f32.mrf.mxu0  ;;  %3814 = vmax.xlane.f32.xlu0 %v3813_v28 }
 0x933   : > { %v17847_v52 = vpop.f32.mrf.mxu1 }
 0x934   : > { %v3789_v53 = vpop.f32.mrf.mxu0 }
 0x936   : > { %v17853_v58 = vpop.f32.mrf.mxu0 }
 0x940   : > { %3984 = vrot.lane.b32.xlu1 %v20486_v24, %s20155_s2 }
 0x948   : > { %3936 = vrot.lane.b32.xlu0 %v20501_v37, %s20155_s2 }
 0x9a0   : > { %v3794_v61 = vpop.xlane.xlu1 %3793 }
 0x9a1   : > { %v3816_v63 = vsub.f32 %v3471_v40, %v3794_v61 }
 0x9a3   : > { %v3824_v32 = vmul.f32 1.442695, %v3816_v63  ;;  %v3797_v34 = vpop.xlane.xlu0 %3796 }
 0x9a4   : > { %v3817_v27 = vsub.f32 %v3516_v48, %v3797_v34 }
 0x9a5   : > { %19427 = vpow2.f32 %v3824_v32 }
 0x9a6   : > { %v3826_v47 = vmul.f32 1.442695, %v3817_v27 }
 0x9a8   : > { %19429 = vpow2.f32 %v3826_v47  ;;  %v3800_v59 = vpop.xlane.xlu0 %3799 }
 0x9a9   : > { %v3818_v31 = vsub.f32 %v3561_v0, %v3800_v59 }
 0x9ab   : > { %v3828_v8 = vmul.f32 1.442695, %v3818_v31 }
 0x9ac   : > { %v3803_v2 = vpop.xlane.xlu0 %3802 }
 0x9ad   : > { %19431 = vpow2.f32 %v3828_v8  ;;  %v3819_v16 = vsub.f32 %v3606_v6, %v3803_v2 }
 0x9af   : > { %v3830_v17 = vmul.f32 1.442695, %v3819_v16 }
 0x9b0   : > { %v3806_v36 = vpop.xlane.xlu1 %3805 }
 0x9b1   : > { %19433 = vpow2.f32 %v3830_v17  ;;  %v3820_v23 = vsub.f32 %v21145_v62, %v3806_v36 }
 0x9b2   : > { %v21159_v24 = vpop.eup %19427 }
 0x9b3   : > { %v3840_v37 = vsel %vm785_vm2, %v21159_v24, 0.0  ;;  %v3809_v18 = vpop.xlane.xlu0 %3808  ;;  %v3832_v28 = vmul.f32 1.442695, %v3820_v23 }
 0x9b4   : > { %3841 = vadd.xlane.f32.xlu1 %v3840_v37  ;;  %v3821_v25 = vsub.f32 %v21149_v20, %v3809_v18 }
 0x9b5   : > { %v21163_v40 = vpop.eup %19429  ;;  %19435 = vpow2.f32 %v3832_v28 }
 0x9b6   : > { %v3843_v48 = vsel %vm785_vm2, %v21163_v40, 0.0  ;;  %v3834_v52 = vmul.f32 1.442695, %v3821_v25 }
 0x9b7   : > { %3844 = vadd.xlane.f32.xlu0 %v3843_v48 }
 0x9b8   : > { %v3812_v45 = vpop.xlane.xlu1 %3811  ;;  %19437 = vpow2.f32 %v3834_v52 }
 0x9b9   : > { %v3822_v46 = vsub.f32 %v3741_v35, %v3812_v45 }
 0x9ba   : > { %v21167_v0 = vpop.eup %19431 }
 0x9bb   : > { %v3815_v21 = vpop.xlane.xlu0 %3814  ;;  %v3846_v6 = vsel %vm785_vm2, %v21167_v0, 0.0  ;;  %v3836_v58 = vmul.f32 1.442695, %v3822_v46 }
 0x9bc   : > { %3847 = vadd.xlane.f32.xlu1 %v3846_v6  ;;  %v3823_v53 = vsub.f32 %v3786_v39, %v3815_v21 }
 0x9bd   : > { %19439 = vpow2.f32 %v3836_v58 }
 0x9be   : > { %v21171_v29 = vpop.eup %19433 }
 0x9bf   : > { %v3849_v7 = vsel %vm785_vm2, %v21171_v29, 0.0  ;;  %v3937_v1 = vpop.permute.xlu0 %3936 }
 0x9c0   : > { %3850 = vadd.xlane.f32.xlu0 %v3849_v7  ;;  %v3942_v22 = vsel %vm1235_vm3, %v3937_v1, 0 }
 0x9c1   : > { %17861 = vmatpush3.bf16.msra.mxu0 %v3942_v22 }
 0x9c2   : > { %17872 = vmatprep.subr.bf16.mxu0 %v20147_v15 }
 0x9cd   : > { %4080 = vrot.lane.b32.xlu1 %v20527_v49, %s20155_s2  ;;  %v3838_v49 = vmul.f32 1.442695, %v3823_v53 }
 0x9cf   : > { %19441 = vpow2.f32 %v3838_v49 }
 0x9d1   : > { %4128 = vrot.lane.b32.xlu1 %v20532_v50, %s20155_s2  ;;  %v21185_v50 = vpop.eup %19435 }
 0x9d2   : > { %v21187_v61 = vpop.eup %19437  ;;  %v3852_v20 = vsel %vm785_vm2, %v21185_v50, 0.0 }
 0x9d3   : > { %v3855_v62 = vsel %vm785_vm2, %v21187_v61, 0.0 }
 0x9d6   : > { %4032 = vrot.lane.b32.xlu0 %v20495_v33, %s20155_s2  ;;  %v21189_v33 = vpop.eup %19439 }
 0x9d7   : > { %v3858_v63 = vsel %vm785_vm2, %v21189_v33, 0.0 }
 0x9dc   : > { %v21195_v35 = vpop.eup %19441 }
 0x9dd   : > { %v3861_v39 = vsel %vm785_vm2, %v21195_v35, 0.0 }
 0x9f5   : > { %3856 = vadd.xlane.f32.xlu0 %v3855_v62  ;;  %3853 = vadd.xlane.f32.xlu1 %v3852_v20 }
 0x9f9   : > { %3862 = vadd.xlane.f32.xlu0 %v3861_v39  ;;  %3859 = vadd.xlane.f32.xlu1 %v3858_v63 }
 0xa0a   : > { %4176 = vrot.lane.b32.xlu1 %v20545_v55, %s20155_s2  ;;  %v3985_v55 = vpop.permute.xlu1 %3984 }
 0xa0e   : > { %2492 = vrot.lane.b32.xlu1 %v20945_v54, %s20156_s12 }
 0xa0f   : > { %4224 = vrot.lane.b32.xlu0 %v20550_v56, %s20155_s2 }
 0xa12   : > { %2496 = vrot.lane.b32.xlu1 %v20949_v3, %s20156_s12 }
 0xa13   : > { %2494 = vrot.lane.b32.xlu0 %v20947_v60, %s20156_s12 }
 0xa16   : > { %3386 = vrot.lane.b32.xlu1 %v21125_v26, %s20157_s24 }
 0xa17   : > { %2498 = vrot.lane.b32.xlu0 %v20951_v51, %s20156_s12 }
 0xa1a   : > { %3390 = vrot.lane.b32.xlu1 %v21129_v44, %s20157_s24 }
 0xa1b   : > { %3388 = vrot.lane.b32.xlu0 %v21127_v42, %s20157_s24 }
 0xa1e   : > { %2500 = vrot.lane.b32.xlu1 %v20953_v10, %s20156_s12 }
 0xa1f   : > { %3392 = vrot.lane.b32.xlu0 %v21131_v57, %s20157_s24  ;;  %v3990_v57 = vsel %vm1235_vm3, %v3985_v55, 0 }
 0xa23   : > { %2502 = vrot.lane.b32.xlu0 %v20955_v11, %s20156_s12 }
 0xa3d   : > { %v3842_v56 = vpop.xlane.xlu1 %3841 }
 0xa3e   : > { %19443 = vrcp.f32 %v3842_v56 }
 0xa40   : > { %v3845_v54 = vpop.xlane.xlu0 %3844 }
 0xa41   : > { %19445 = vrcp.f32 %v3845_v54 }
 0xa45   : > { %v3848_v60 = vpop.xlane.xlu1 %3847 }
 0xa46   : > { %19447 = vrcp.f32 %v3848_v60 }
 0xa49   : > { %v3851_v3 = vpop.xlane.xlu0 %3850  ;;  %v4081_v27 = vpop.permute.xlu1 %4080 }
 0xa4a   : > { %19449 = vrcp.f32 %v3851_v3  ;;  %v4086_v16 = vsel %vm1235_vm3, %v4081_v27, 0 }
 0xa4b   : > { %v19444_v51 = vpop.eup %19443 }
 0xa4c   : > { %v3872_v26 = vmul.f32 %v19444_v51, %v21159_v24 }
 0xa4d   : > { %v4033_v32 = vpop.permute.xlu0 %4032  ;;  %v4129_v17 = vpop.permute.xlu1 %4128 }
 0xa4e   : > { %v19446_v42 = vpop.eup %19445  ;;  %v3880_v10 = vpack.c.bf16 %v3872_v26, %v3872_v26  ;;  %v4038_v47 = vsel %vm1235_vm3, %v4033_v32, 0  ;;  %v4134_v37 = vsel %vm1235_vm3, %v4129_v17, 0  ;;  %v19312_v17 = vld [vmem:[#allocation12] sm:$0xff]  }
 0xa4f   : > { %v3873_v44 = vmul.f32 %v19446_v42, %v21163_v40 }
 0xa50   : > { %17857 = vmatmul.mubr.msk.bf16.vlgmr.msra.gmra.mxu1 %vm785_vm2, %v3880_v10 }
 0xa51   : > { %v3881_v11 = vpack.c.bf16 %v3873_v44, %v3873_v44  ;;  %17867 = vmatpush3.bf16.msra.mxu1 %v3990_v57  ;;  %17868 = vmatprep.mubr.msk.bf16.mxu1 %vm20148_vm1, %v20147_v15 }
 0xa52   : > { %17878 = vmatprep.subr.bf16.mxu1 %v20147_v15 }
 0xa53   : > { %v19448_v34 = vpop.eup %19447  ;;  %17863 = vmatmul.mubr.msk.bf16.vlgmr.msra.gmra.mxu0 %vm785_vm2, %v3881_v11 }
 0xa54   : > { %v3874_v59 = vmul.f32 %v19448_v34, %v21167_v0  ;;  %17873 = vmatpush3.bf16.msra.mxu0 %v4038_v47  ;;  %17874 = vmatprep.mubr.msk.bf16.mxu0 %vm20148_vm1, %v20147_v15 }
 0xa55   : > { %17884 = vmatprep.subr.bf16.mxu0 %v20147_v15 }
 0xa56   : > { %v3882_v31 = vpack.c.bf16 %v3874_v59, %v3874_v59  ;;  %v19311_v59 = vld [vmem:[#allocation12 + $0x8] sm:$0xff]  }
 0xa57   : > { %v19450_v8 = vpop.eup %19449 }
 0xa58   : > { %v3875_v2 = vmul.f32 %v19450_v8, %v21171_v29  ;;  %17869 = vmatmul.mubr.msk.bf16.vlgmr.msra.gmra.mxu1 %vm785_vm2, %v3882_v31 }
 0xa59   : > { %17879 = vmatpush3.bf16.msra.mxu1 %v4086_v16  ;;  %17880 = vmatprep.mubr.msk.bf16.mxu1 %vm20148_vm1, %v20147_v15 }
 0xa5a   : > { %v3883_v24 = vpack.c.bf16 %v3875_v2, %v3875_v2  ;;  %17890 = vmatprep.subr.bf16.mxu1 %v20147_v15 }
 0xa5c   : > { %17875 = vmatmul.mubr.msk.bf16.vlgmr.msra.gmra.mxu0 %vm785_vm2, %v3883_v24 }
 0xa5d   : > { %17885 = vmatpush3.bf16.msra.mxu0 %v4134_v37  ;;  %17886 = vmatprep.mubr.msk.bf16.mxu0 %vm20148_vm1, %v20147_v15 }
 0xa5e   : > { %17896 = vmatprep.subr.bf16.mxu0 %v20147_v15 }
 0xa7e   : > { %v3857_v40 = vpop.xlane.xlu0 %3856  ;;  %v3854_v48 = vpop.xlane.xlu1 %3853 }
 0xa7f   : > { %19451 = vrcp.f32 %v3857_v40 }
 0xa80   : > { %19453 = vrcp.f32 %v3854_v48 }
 0xa82   : > { %v3863_v18 = vpop.xlane.xlu0 %3862  ;;  %v3860_v0 = vpop.xlane.xlu1 %3859 }
 0xa83   : > { %19455 = vrcp.f32 %v3863_v18 }
 0xa84   : > { %19457 = vrcp.f32 %v3860_v0 }
 0xa86   : > { %v4225_v21 = vpop.permute.xlu0 %4224  ;;  %v4177_v6 = vpop.permute.xlu1 %4176 }
 0xa87   : > { %v4230_v39 = vsel %vm1235_vm3, %v4225_v21, 0 }
 0xa8a   : > { %v2495_v29 = vpop.permute.xlu0 %2494  ;;  %v2493_v7 = vpop.permute.xlu1 %2492 }
 0xa8b   : > { %v2517_v1 = vadd.f32 %v2495_v29, %v20503_v38  ;;  %v2516_v22 = vadd.f32 %v2493_v7, %v20503_v38 }
 0xa8c   : > { %v19452_v36 = vpop.eup %19451 }
 0xa8d   : > { %v19454_v23 = vpop.eup %19453  ;;  %v3877_v25 = vmul.f32 %v19452_v36, %v21187_v61  ;;  %2526 = vst.msk [vmem:[#allocation2 + $0x8] sm:$0xff] %vm2524_vm4, %v2517_v1  ;;  %2525 = vst.msk [vmem:[#allocation2] sm:$0xff] %vm2524_vm4, %v2516_v22 }
 0xa8e   : > { %v3876_v45 = vmul.f32 %v19454_v23, %v21185_v50  ;;  %v2499_v28 = vpop.permute.xlu0 %2498  ;;  %v2497_v46 = vpop.permute.xlu1 %2496  ;;  %v4182_v50 = vsel %vm1235_vm3, %v4177_v6, 0 }
 0xa8f   : > { %v3885_v52 = vpack.c.bf16 %v3877_v25, %v3877_v25  ;;  %v2519_v53 = vadd.f32 %v2499_v28, %v20503_v38  ;;  %v2518_v58 = vadd.f32 %v2497_v46, %v20503_v38 }
 0xa90   : > { %v19456_v49 = vpop.eup %19455  ;;  %v3884_v62 = vpack.c.bf16 %v3876_v45, %v3876_v45 }
 0xa91   : > { %v19458_v20 = vpop.eup %19457  ;;  %2528 = vst.msk [vmem:[#allocation2 + $0x18] sm:$0xff] %vm2524_vm4, %v2519_v53  ;;  %2527 = vst.msk [vmem:[#allocation2 + $0x10] sm:$0xff] %vm2524_vm4, %v2518_v58  ;;  %17887 = vmatmul.mubr.msk.bf16.vlgmr.msra.gmra.mxu0 %vm785_vm2, %v3885_v52  ;;  %v3879_v55 = vmul.f32 %v19456_v49, %v21195_v35 }
 0xa92   : > { %17881 = vmatmul.mubr.msk.bf16.vlgmr.msra.gmra.mxu1 %vm785_vm2, %v3884_v62  ;;  %17897 = vmatpush3.bf16.msra.mxu0 %v4230_v39  ;;  %v3389_v61 = vpop.permute.xlu0 %3388  ;;  %v3387_v63 = vpop.permute.xlu1 %3386  ;;  %v3878_v60 = vmul.f32 %v19458_v20, %v21189_v33 }
 0xa93   : > { %17891 = vmatpush3.bf16.msra.mxu1 %v4182_v50  ;;  %v3411_v56 = vadd.f32 %v3389_v61, %v20503_v38  ;;  %v3410_v54 = vadd.f32 %v3387_v63, %v20503_v38  ;;  %17892 = vmatprep.mubr.msk.bf16.mxu1 %vm20148_vm1, %v20147_v15  ;;  %v3887_v35 = vpack.c.bf16 %v3879_v55, %v3879_v55 }
 0xa94   : > { %17898 = vmatprep.mubr.msk.bf16.mxu0 %vm20148_vm1, %v20147_v15  ;;  %v3886_v10 = vpack.c.bf16 %v3878_v60, %v3878_v60  ;;  %17902 = vmatprep.subr.bf16.mxu1 %v19311_v59 }
 0xa95   : > { %3420 = vst.msk [vmem:[#allocation2 + $0x8] sm:$0xff] %vm3418_vm5, %v3411_v56  ;;  %3419 = vst.msk [vmem:[#allocation2] sm:$0xff] %vm3418_vm5, %v3410_v54 }
 0xa96   : > { %v3393_v3 = vpop.permute.xlu0 %3392  ;;  %v3391_v51 = vpop.permute.xlu1 %3390 }
 0xa97   : > { %v3413_v26 = vadd.f32 %v3393_v3, %v20503_v38  ;;  %v3412_v42 = vadd.f32 %v3391_v51, %v20503_v38 }
 0xa99   : > { %3422 = vst.msk [vmem:[#allocation2 + $0x18] sm:$0xff] %vm3418_vm5, %v3413_v26  ;;  %3421 = vst.msk [vmem:[#allocation2 + $0x10] sm:$0xff] %vm3418_vm5, %v3412_v42  ;;  %17899 = vmatmul.mubr.msk.bf16.vlgmr.msra.gmra.mxu0 %vm785_vm2, %v3887_v35 }
 0xa9a   : > { %17893 = vmatmul.mubr.msk.bf16.vlgmr.msra.gmra.mxu1 %vm785_vm2, %v3886_v10  ;;  %v2503_v33 = vpop.permute.xlu0 %2502  ;;  %v2501_v44 = vpop.permute.xlu1 %2500 }
 0xa9b   : > { %v2521_v57 = vadd.f32 %v2503_v33, %v20503_v38  ;;  %v2520_v32 = vadd.f32 %v2501_v44, %v20503_v38  ;;  %17903 = vmatpush3.bf16.msra.mxu1 %v19311_v59 }
 0xa9c   : > { %17904 = vmatprep.subr.bf16.mxu1 %v19312_v17 }
 0xa9d   : > { %2530 = vst.msk [vmem:[#allocation2 + $0x28] sm:$0xff] %vm2524_vm4, %v2521_v57  ;;  %2529 = vst.msk [vmem:[#allocation2 + $0x20] sm:$0xff] %vm2524_vm4, %v2520_v32 }
 0xa9f   : > { %17905 = vmatpush3.bf16.msra.mxu1 %v19312_v17 }
 0xb10   : > { %v3930_v11 = vpop.f32.mrf.mxu1 }
 0xb11   : > { %4280 = vrot.lane.b32.xlu1 %v3930_v11, %s20158_s21 }
 0xb12   : > { %v17858_v34 = vpop.f32.mrf.mxu1 }
 0xb13   : > { %v3978_v27 = vpop.f32.mrf.mxu0 }
 0xb14   : > { %v3933_v47 = vpop.f32.mrf.mxu1  ;;  %4282 = vrot.lane.b32.xlu0 %v3978_v27, %s20158_s21 }
 0xb15   : > { %v17864_v31 = vpop.f32.mrf.mxu0 }
 0xb16   : > { %v17859_v8 = vpop.f32.mrf.mxu1 }
 0xb17   : > { %v3981_v2 = vpop.f32.mrf.mxu0 }
 0xb18   : > { %v4026_v16 = vpop.f32.mrf.mxu1 }
 0xb19   : > { %4284 = vrot.lane.b32.xlu1 %v4026_v16, %s20158_s21  ;;  %v17865_v24 = vpop.f32.mrf.mxu0 }
 0xb1a   : > { %v17870_v37 = vpop.f32.mrf.mxu1 }
 0xb1c   : > { %v4029_v40 = vpop.f32.mrf.mxu1  ;;  %v4074_v48 = vpop.f32.mrf.mxu0 }
 0xb1d   : > { %4286 = vrot.lane.b32.xlu0 %v4074_v48, %s20158_s21  ;;  %2504 = vrot.lane.b32.xlu1 %v20957_v14, %s20156_s12 }
 0xb1e   : > { %v17871_v18 = vpop.f32.mrf.mxu1  ;;  %v17876_v0 = vpop.f32.mrf.mxu0 }
 0xb20   : > { %v4077_v21 = vpop.f32.mrf.mxu0 }
 0xb21   : > { %2506 = vrot.lane.b32.xlu0 %v20959_v19, %s20156_s12  ;;  %3394 = vrot.lane.b32.xlu1 %v21133_v4, %s20157_s24  ;;  %v19314_v21 = vld [vmem:[#allocation15] sm:$0xff]  }
 0xb22   : > { %v17877_v6 = vpop.f32.mrf.mxu0 }
 0xb23   : > { %v19315_v6 = vld [vmem:[#allocation13 + $0x8] sm:$0xff]  }
 0xb24   : > { %17926 = vmatprep.subr.bf16.mxu1 %v19315_v6 }
 0xb25   : > { %3396 = vrot.lane.b32.xlu0 %v21135_v41, %s20157_s24  ;;  %3398 = vrot.lane.b32.xlu1 %v21137_v30, %s20157_s24 }
 0xb29   : > { %3400 = vrot.lane.b32.xlu0 %v21139_v43, %s20157_s24 }
 0xb51   : > { %v4170_v14 = vpop.f32.mrf.mxu0 }
 0xb52   : > { %v4122_v29 = vpop.f32.mrf.mxu1  ;;  %4290 = vrot.lane.b32.xlu0 %v4170_v14, %s20158_s21  ;;  %v19316_v14 = vld [vmem:[#allocation13] sm:$0xff]  }
 0xb53   : > { %4288 = vrot.lane.b32.xlu1 %v4122_v29, %s20158_s21  ;;  %v17888_v19 = vpop.f32.mrf.mxu0  ;;  %v16650_v29 = vld [vmem:[%s24270_s7] ss:$0 sm:$0xff] }
 0xb54   : > { %v17882_v7 = vpop.f32.mrf.mxu1 }
 0xb55   : > { %v4173_v1 = vpop.f32.mrf.mxu0 }
 0xb56   : > { %v4125_v4 = vpop.f32.mrf.mxu1 }
 0xb57   : > { %v17889_v22 = vpop.f32.mrf.mxu0 }
 0xb58   : > { %v17883_v36 = vpop.f32.mrf.mxu1 }
 0xb59   : > { %v4266_v23 = vpop.f32.mrf.mxu0 }
 0xb5a   : > { %v4218_v41 = vpop.f32.mrf.mxu1  ;;  %4294 = vrot.lane.b32.xlu0 %v4266_v23, %s20158_s21 }
 0xb5b   : > { %4292 = vrot.lane.b32.xlu1 %v4218_v41, %s20158_s21  ;;  %v17900_v30 = vpop.f32.mrf.mxu0 }
 0xb5c   : > { %v17894_v43 = vpop.f32.mrf.mxu1 }
 0xb5d   : > { %v4269_v25 = vpop.f32.mrf.mxu0 }
 0xb5e   : > { %v4221_v45 = vpop.f32.mrf.mxu1 }
 0xb5f   : > { %v17901_v28 = vpop.f32.mrf.mxu0 }
 0xb60   : > { %v17895_v46 = vpop.f32.mrf.mxu1 }
 0xb83   : > { %v4281_v52 = vpop.permute.xlu1 %4280 }
 0xb84   : > { %v4304_v53 = vadd.f32 %v4281_v52, %v20503_v38 }
 0xb86   : > { %4313 = vst.msk [vmem:[#allocation2] sm:$0xff] %vm4312_vm6, %v4304_v53  ;;  %v4283_v58 = vpop.permute.xlu0 %4282 }
 0xb87   : > { %v4305_v49 = vadd.f32 %v4283_v58, %v20503_v38 }
 0xb89   : > { %4314 = vst.msk [vmem:[#allocation2 + $0x8] sm:$0xff] %vm4312_vm6, %v4305_v49 }
 0xb8b   : > { %v4285_v62 = vpop.permute.xlu1 %4284 }
 0xb8c   : > { %v4306_v20 = vadd.f32 %v4285_v62, %v20503_v38 }
 0xb8d   : > { %v21311_v55 = vld [vmem:[#allocation2] sm:$0xff] }
 0xb8e   : > { %4315 = vst.msk [vmem:[#allocation2 + $0x10] sm:$0xff] %vm4312_vm6, %v4306_v20 }
 0xb8f   : > { %v4287_v39 = vpop.permute.xlu0 %4286  ;;  %v2505_v50 = vpop.permute.xlu1 %2504 }
 0xb90   : > { %v4307_v61 = vadd.f32 %v4287_v39, %v20503_v38  ;;  %v2522_v63 = vadd.f32 %v2505_v50, %v20503_v38  ;;  %v21313_v56 = vld [vmem:[#allocation2 + $0x8] sm:$0xff] }
 0xb91   : > { %v4329_v54 = vpack.c.bf16 %v21313_v56, %v21311_v55 }
 0xb92   : > { %4316 = vst.msk [vmem:[#allocation2 + $0x18] sm:$0xff] %vm4312_vm6, %v4307_v61 }
 0xb93   : > { %2531 = vst.msk [vmem:[#allocation2 + $0x30] sm:$0xff] %vm2524_vm4, %v2522_v63  ;;  %v2507_v60 = vpop.permute.xlu0 %2506  ;;  %v3395_v3 = vpop.permute.xlu1 %3394  ;;  %17906 = vmatprep.mubr.msk.bf16.mxu1 %vm636_vm0, %v4329_v54 }
 0xb94   : > { %v2523_v51 = vadd.f32 %v2507_v60, %v20503_v38  ;;  %v3414_v35 = vadd.f32 %v3395_v3, %v20503_v38 }
 0xb95   : > { %v21326_v44 = vld [vmem:[#allocation2 + $0x10] sm:$0xff] }
 0xb96   : > { %2532 = vst.msk [vmem:[#allocation2 + $0x38] sm:$0xff] %vm2524_vm4, %v2523_v51 }
 0xb97   : > { %3423 = vst.msk [vmem:[#allocation2 + $0x20] sm:$0xff] %vm3418_vm5, %v3414_v35  ;;  %v3397_v26 = vpop.permute.xlu0 %3396  ;;  %v3399_v42 = vpop.permute.xlu1 %3398 }
 0xb98   : > { %v3415_v10 = vadd.f32 %v3397_v26, %v20503_v38  ;;  %v3416_v33 = vadd.f32 %v3399_v42, %v20503_v38 }
 0xb99   : > { %v4324_v57 = vld [vmem:[#allocation2 + $0x18] sm:$0xff] }
 0xb9a   : > { %3424 = vst.msk [vmem:[#allocation2 + $0x28] sm:$0xff] %vm3418_vm5, %v3415_v10  ;;  %3425 = vst.msk [vmem:[#allocation2 + $0x30] sm:$0xff] %vm3418_vm5, %v3416_v33  ;;  %v4330_v32 = vpack.c.bf16 %v4324_v57, %v21326_v44  ;;  %v21375_v10 = vld [vmem:[%s24274_s11] ss:$0 sm:$0xff] }
 0xb9b   : > { %v3401_v11 = vpop.permute.xlu0 %3400  ;;  %v21380_v33 = vld [vmem:[%s24272_s9] ss:$0 sm:$0xff] }
 0xb9c   : > { %v3417_v34 = vadd.f32 %v3401_v11, %v20503_v38  ;;  %17907 = vmatmul.mubr.msk.bf16.vlgmr.msra.gmra.mxu1 %vm636_vm0, %v4330_v32 }
 0xb9d   : > { %17927 = vmatpush3.bf16.msra.mxu1 %v19315_v6 }
 0xb9e   : > { %3426 = vst.msk [vmem:[#allocation2 + $0x38] sm:$0xff] %vm3418_vm5, %v3417_v34  ;;  %17928 = vmatprep.subr.bf16.mxu1 %v19316_v14 }
 0xba1   : > { %17929 = vmatpush3.bf16.msra.mxu1 %v19316_v14 }
 0xba2   : > { %17950 = vmatprep.subr.bf16.mxu1 %v20147_v15 }
 0xbc4   : > { %v4291_v27 = vpop.permute.xlu0 %4290 }
 0xbc5   : > { %v4309_v47 = vadd.f32 %v4291_v27, %v20503_v38  ;;  %v4289_v59 = vpop.permute.xlu1 %4288 }
 0xbc6   : > { %v4308_v31 = vadd.f32 %v4289_v59, %v20503_v38 }
 0xbc7   : > { %4318 = vst.msk [vmem:[#allocation2 + $0x28] sm:$0xff] %vm4312_vm6, %v4309_v47 }
 0xbc8   : > { %4317 = vst.msk [vmem:[#allocation2 + $0x20] sm:$0xff] %vm4312_vm6, %v4308_v31 }
 0xbcc   : > { %v4295_v8 = vpop.permute.xlu0 %4294 }
 0xbcd   : > { %v4311_v2 = vadd.f32 %v4295_v8, %v20503_v38  ;;  %v4293_v16 = vpop.permute.xlu1 %4292 }
 0xbce   : > { %v4310_v17 = vadd.f32 %v4293_v16, %v20503_v38  ;;  %v21340_v24 = vld [vmem:[#allocation2 + $0x28] sm:$0xff]  ;;  %v19313_v38 = vld [vmem:[#allocation15 + $0x8] sm:$0xff]  }
 0xbcf   : > { %4320 = vst.msk [vmem:[#allocation2 + $0x38] sm:$0xff] %vm4312_vm6, %v4311_v2  ;;  %v4325_v37 = vld [vmem:[#allocation2 + $0x20] sm:$0xff]  ;;  %17914 = vmatprep.subr.bf16.mxu0 %v19313_v38 }
 0xbd0   : > { %4319 = vst.msk [vmem:[#allocation2 + $0x30] sm:$0xff] %vm4312_vm6, %v4310_v17  ;;  %v4331_v40 = vpack.c.bf16 %v21340_v24, %v4325_v37  ;;  %17915 = vmatpush3.bf16.msra.mxu0 %v19313_v38 }
 0xbd1   : > { %17916 = vmatprep.subr.bf16.mxu0 %v19314_v21 }
 0xbd2   : > { %17910 = vmatprep.mubr.msk.bf16.mxu1 %vm636_vm0, %v4331_v40 }
 0xbd4   : > { %17917 = vmatpush3.bf16.msra.mxu0 %v19314_v21 }
 0xbd5   : > { %17938 = vmatprep.subr.bf16.mxu0 %v20147_v15 }
 0xbd6   : > { %v4328_v48 = vld [vmem:[#allocation2 + $0x38] sm:$0xff] }
 0xbd7   : > { %v4327_v18 = vld [vmem:[#allocation2 + $0x30] sm:$0xff] }
 0xbd8   : > { %v4332_v0 = vpack.c.bf16 %v4328_v48, %v4327_v18 }
 0xbda   : > { %17911 = vmatmul.mubr.msk.bf16.gmra.mxu1 %vm636_vm0, %v4332_v0 }
 0xbdb   : > { %17930 = vmatprep.mubr.msk.bf16.mxu1 %vm636_vm0, %v20456_v5 }
 0xbe2   : > { %17931 = vmatmul.mubr.msk.bf16.vlgmr.msra.gmra.mxu1 %vm636_vm0, %v20464_v12 }
 0xbe3   : > { %17934 = vmatprep.mubr.msk.bf16.mxu1 %vm636_vm0, %v20458_v9 }
 0xbea   : > { %17935 = vmatmul.mubr.msk.bf16.gmra.mxu1 %vm636_vm0, %v20466_v13 }
 0xbeb   : > { %17952 = vmatprep.mubr.msk.bf16.mxu1 %vm20148_vm1, %v20147_v15 }
 0xc5c   : > { %v17908_v5 = vpop.f32.mrf.mxu1 }
 0xc5d   : > { %v4406_v1 = vadd.f32 %v17908_v5, %v16650_v29 }
 0xc5e   : > { %v4397_v19 = vpop.f32.mrf.mxu1 }
 0xc5f   : > { %v4398_v7 = vadd.f32 %v16650_v29, %v4397_v19  ;;  %v4430_v41 = vmax.f32 %v4406_v1, 0.0 }
 0xc60   : > { %v17909_v4 = vpop.f32.mrf.mxu1 }
 0xc61   : > { %v4409_v22 = vadd.f32 %v17909_v4, %v16650_v29  ;;  %v4428_v36 = vmax.f32 %v4398_v7, 0.0  ;;  %v4438_v45 = vadd.f32 %v4430_v41, %v21326_v44 }
 0xc62   : > { %v4400_v12 = vpop.f32.mrf.mxu1 }
 0xc63   : > { %v4431_v23 = vmax.f32 %v4409_v22, 0.0  ;;  %v4401_v9 = vadd.f32 %v16650_v29, %v4400_v12  ;;  %v4436_v43 = vadd.f32 %v4428_v36, %v21311_v55 }
 0xc65   : > { %v4429_v30 = vmax.f32 %v4401_v9, 0.0  ;;  %v4439_v13 = vadd.f32 %v4431_v23, %v4324_v57 }
 0xc67   : > { %v4437_v25 = vadd.f32 %v4429_v30, %v21313_v56  ;;  %v4460_v46 = vpack.c.bf16 %v4439_v13, %v4438_v45 }
 0xc69   : > { %v4459_v28 = vpack.c.bf16 %v4437_v25, %v4436_v43 }
 0xc6b   : > { %17918 = vmatprep.mubr.msk.bf16.mxu0 %vm636_vm0, %v4459_v28 }
 0xc6c   : > { %17919 = vmatmul.mubr.msk.bf16.vlgmr.msra.gmra.mxu0 %vm636_vm0, %v4460_v46 }
 0xc9a   : > { %v17912_v52 = vpop.f32.mrf.mxu1 }
 0xc9b   : > { %v4422_v49 = vadd.f32 %v17912_v52, %v16650_v29 }
 0xc9c   : > { %v4413_v53 = vpop.f32.mrf.mxu1 }
 0xc9d   : > { %v4414_v58 = vadd.f32 %v16650_v29, %v4413_v53  ;;  %v4434_v55 = vmax.f32 %v4422_v49, 0.0 }
 0xc9e   : > { %v17913_v62 = vpop.f32.mrf.mxu1 }
 0xc9f   : > { %v4425_v20 = vadd.f32 %v17913_v62, %v16650_v29  ;;  %v4432_v50 = vmax.f32 %v4414_v58, 0.0  ;;  %v4442_v51 = vadd.f32 %v4434_v55, %v4327_v18 }
 0xca0   : > { %v4416_v39 = vpop.f32.mrf.mxu1 }
 0xca1   : > { %v4435_v61 = vmax.f32 %v4425_v20, 0.0  ;;  %v4417_v63 = vadd.f32 %v16650_v29, %v4416_v39  ;;  %v4440_v60 = vadd.f32 %v4432_v50, %v4325_v37 }
 0xca2   : > { %v17932_v42 = vpop.f32.mrf.mxu1 }
 0xca3   : > { %v4433_v56 = vmax.f32 %v4417_v63, 0.0  ;;  %v4443_v54 = vadd.f32 %v4435_v61, %v4328_v48  ;;  %v21384_v11 = vadd.f32 %v17932_v42, %v21380_v33 }
 0xca4   : > { %v4618_v57 = vpop.f32.mrf.mxu1 }
 0xca5   : > { %v4441_v3 = vadd.f32 %v4433_v56, %v21340_v24  ;;  %v4462_v26 = vpack.c.bf16 %v4443_v54, %v4442_v51  ;;  %v21390_v59 = vadd.f32 %v21380_v33, %v4618_v57  ;;  %v4651_v16 = vmul.f32 0.17677669, %v21384_v11 }
 0xca6   : > { %v17933_v8 = vpop.f32.mrf.mxu1 }
 0xca7   : > { %v4461_v35 = vpack.c.bf16 %v4441_v3, %v4440_v60  ;;  %v4649_v48 = vmul.f32 0.17677669, %v21390_v59  ;;  %v21407_v21 = vpack.c.bf16 %v4651_v16, %v4651_v16  ;;  %v21436_v7 = vadd.f32 %v17933_v8, %v21380_v33 }
 0xca8   : > { %v4621_v0 = vpop.f32.mrf.mxu1 }
 0xca9   : > { %17922 = vmatprep.mubr.msk.bf16.mxu0 %vm636_vm0, %v4461_v35  ;;  %v21414_v14 = vpack.c.bf16 %v4649_v48, %v4649_v48  ;;  %v21419_v5 = vadd.f32 %v21380_v33, %v4621_v0  ;;  %v4652_v4 = vmul.f32 0.17677669, %v21436_v7 }
 0xcaa   : > { %17923 = vmatmul.mubr.msk.bf16.gmra.mxu0 %vm636_vm0, %v4462_v26  ;;  %v17936_v36 = vpop.f32.mrf.mxu1 }
 0xcab   : > { %17940 = vmatprep.mubr.msk.bf16.mxu0 %vm20148_vm1, %v20147_v15  ;;  %v4650_v29 = vmul.f32 0.17677669, %v21419_v5  ;;  %v21448_v12 = vpack.c.bf16 %v4652_v4, %v4652_v4  ;;  %v21479_v63 = vadd.f32 %v17936_v36, %v21380_v33 }
 0xcac   : > { %v4634_v23 = vpop.f32.mrf.mxu1 }
 0xcad   : > { %v21438_v1 = vpack.c.bf16 %v4650_v29, %v4650_v29  ;;  %v21458_v45 = vadd.f32 %v21380_v33, %v4634_v23  ;;  %v4655_v3 = vmul.f32 0.17677669, %v21479_v63 }
 0xcae   : > { %v17937_v30 = vpop.f32.mrf.mxu1 }
 0xcaf   : > { %v4653_v49 = vmul.f32 0.17677669, %v21458_v45  ;;  %v21495_v51 = vadd.f32 %v17937_v30, %v21380_v33  ;;  %v21506_v42 = vpack.c.bf16 %v4655_v3, %v4655_v3 }
 0xcb0   : > { %v4637_v46 = vpop.f32.mrf.mxu1 }
 0xcb1   : > { %v21470_v20 = vadd.f32 %v21380_v33, %v4637_v46  ;;  %v21481_v55 = vpack.c.bf16 %v4653_v49, %v4653_v49 }
 0xcb3   : > { %v4654_v56 = vmul.f32 0.17677669, %v21470_v20 }
 0xcb5   : > { %v21497_v35 = vpack.c.bf16 %v4654_v56, %v4654_v56 }
 0xd2c   : > { %v17920_v44 = vpop.f32.mrf.mxu0 }
 0xd2d   : > { %v4536_v32 = vadd.f32 %v17920_v44, %v21375_v10 }
 0xd2e   : > { %v4527_v34 = vpop.f32.mrf.mxu0 }
 0xd2f   : > { %v21386_v27 = vpack.c.bf16 %v4536_v32, %v4536_v32  ;;  %v4528_v47 = vadd.f32 %v21375_v10, %v4527_v34 }
 0xd30   : > { %v17921_v31 = vpop.f32.mrf.mxu0 }
 0xd31   : > { %v21392_v2 = vpack.c.bf16 %v4528_v47, %v4528_v47  ;;  %5228 = vrot.lane.b32.xlu1 %v21386_v27, %s20149_s20  ;;  %v4761_v17 = vsel %vm785_vm2, %v21386_v27, 0  ;;  %v4539_v37 = vadd.f32 %v17921_v31, %v21375_v10 }
 0xd32   : > { %v4530_v24 = vpop.f32.mrf.mxu0  ;;  %17951 = vmatpush3.bf16.xpose.msra.mxu1 %v4761_v17 }
 0xd33   : > { %v4531_v40 = vadd.f32 %v21375_v10, %v4530_v24  ;;  %v4669_v18 = vsel %vm785_vm2, %v21392_v2, 0  ;;  %17962 = vmatprep.subr.bf16.mxu1 %v20147_v15  ;;  %v21412_v6 = vpack.c.bf16 %v4539_v37, %v4539_v37 }
 0xd34   : > { %17939 = vmatpush3.bf16.xpose.msra.mxu0 %v4669_v18 }
 0xd35   : > { %v21405_v38 = vpack.c.bf16 %v4531_v40, %v4531_v40  ;;  %5130 = vrot.lane.b32.xlu1 %v21392_v2, %s20149_s20  ;;  %17944 = vmatprep.subr.bf16.mxu0 %v20147_v15  ;;  %v4807_v22 = vsel %vm785_vm2, %v21412_v6, 0 }
 0xd37   : > { %5179 = vrot.lane.b32.xlu0 %v21405_v38, %s20149_s20  ;;  %v4715_v19 = vsel %vm785_vm2, %v21405_v38, 0 }
 0xd39   : > { %17953 = vmatmul.mubr.msk.bf16.vlgmr.msra.gmra.mxu1 %vm785_vm2, %v21407_v21  ;;  %5277 = vrot.lane.b32.xlu1 %v21412_v6, %s20149_s20 }
 0xd3a   : > { %17964 = vmatprep.mubr.msk.bf16.mxu1 %vm20148_vm1, %v20147_v15 }
 0xd3b   : > { %17941 = vmatmul.mubr.msk.bf16.vlgmr.msra.gmra.mxu0 %vm785_vm2, %v21414_v14 }
 0xd3c   : > { %17945 = vmatpush3.bf16.xpose.msra.mxu0 %v4715_v19  ;;  %17946 = vmatprep.mubr.msk.bf16.mxu0 %vm20148_vm1, %v20147_v15 }
 0xd3d   : > { %17956 = vmatprep.subr.bf16.mxu0 %v20147_v15 }
 0xd43   : > { %17947 = vmatmul.mubr.msk.bf16.vlgmr.msra.gmra.mxu0 %vm785_vm2, %v21438_v1 }
 0xd44   : > { %17957 = vmatpush3.bf16.xpose.msra.mxu0 %v4807_v22  ;;  %17958 = vmatprep.mubr.msk.bf16.mxu0 %vm20148_vm1, %v20147_v15 }
 0xd45   : > { %17968 = vmatprep.subr.bf16.mxu0 %v20147_v15 }
 0xd4b   : > { %17959 = vmatmul.mubr.msk.bf16.vlgmr.msra.gmra.mxu0 %vm785_vm2, %v21448_v12 }
 0xd4c   : > { %17970 = vmatprep.mubr.msk.bf16.mxu0 %vm20148_vm1, %v20147_v15 }
 0xd6a   : > { %v17924_v9 = vpop.f32.mrf.mxu0 }
 0xd6b   : > { %v4552_v52 = vadd.f32 %v17924_v9, %v21375_v10 }
 0xd6c   : > { %v4543_v41 = vpop.f32.mrf.mxu0 }
 0xd6d   : > { %v4544_v13 = vadd.f32 %v21375_v10, %v4543_v41  ;;  %v21473_v39 = vpack.c.bf16 %v4552_v52, %v4552_v52 }
 0xd6e   : > { %v17925_v43 = vpop.f32.mrf.mxu0 }
 0xd6f   : > { %v21455_v25 = vpack.c.bf16 %v4544_v13, %v4544_v13  ;;  %v4555_v50 = vadd.f32 %v17925_v43, %v21375_v10  ;;  %v4945_v60 = vsel %vm785_vm2, %v21473_v39, 0 }
 0xd70   : > { %v4546_v28 = vpop.f32.mrf.mxu0 }
 0xd71   : > { %v4547_v53 = vadd.f32 %v21375_v10, %v4546_v28  ;;  %5326 = vrot.lane.b32.xlu1 %v21455_v25, %s20149_s20  ;;  %v4853_v58 = vsel %vm785_vm2, %v21455_v25, 0  ;;  %v21485_v54 = vpack.c.bf16 %v4555_v50, %v4555_v50  ;;  %v4656_v10 = vmul.f32 0.17677669, %v21495_v51 }
 0xd72   : > { %17963 = vmatpush3.bf16.xpose.msra.mxu1 %v4853_v58 }
 0xd73   : > { %v21467_v62 = vpack.c.bf16 %v4547_v53, %v4547_v53  ;;  %17974 = vmatprep.subr.bf16.mxu1 %v20147_v15  ;;  %v4991_v26 = vsel %vm785_vm2, %v21485_v54, 0  ;;  %v21514_v33 = vpack.c.bf16 %v4656_v10, %v4656_v10 }
 0xd75   : > { %v4899_v61 = vsel %vm785_vm2, %v21467_v62, 0 }
 0xd76   : > { %17969 = vmatpush3.bf16.xpose.msra.mxu0 %v4899_v61 }
 0xd77   : > { %17980 = vmatprep.subr.bf16.mxu0 %v20147_v15 }
 0xd79   : > { %17965 = vmatmul.mubr.msk.bf16.vlgmr.msra.gmra.mxu1 %vm785_vm2, %v21481_v55 }
 0xd7a   : > { %17975 = vmatpush3.bf16.xpose.msra.mxu1 %v4945_v60  ;;  %17976 = vmatprep.mubr.msk.bf16.mxu1 %vm20148_vm1, %v20147_v15 }
 0xd7b   : > { %17986 = vmatprep.subr.bf16.mxu1 %v20147_v15 }
 0xd7d   : > { %17971 = vmatmul.mubr.msk.bf16.vlgmr.msra.gmra.mxu0 %vm785_vm2, %v21497_v35 }
 0xd7e   : > { %17981 = vmatpush3.bf16.xpose.msra.mxu0 %v4991_v26  ;;  %17982 = vmatprep.mubr.msk.bf16.mxu0 %vm20148_vm1, %v20147_v15 }
 0xd7f   : > { %17992 = vmatprep.subr.bf16.mxu0 %v20147_v15 }
 0xd81   : > { %17977 = vmatmul.mubr.msk.bf16.vlgmr.msra.gmra.mxu1 %vm785_vm2, %v21506_v42 }
 0xd82   : > { %17988 = vmatprep.mubr.msk.bf16.mxu1 %vm20148_vm1, %v20147_v15 }
 0xd85   : > { %17983 = vmatmul.mubr.msk.bf16.vlgmr.msra.gmra.mxu0 %vm785_vm2, %v21514_v33 }
 0xd86   : > { %17994 = vmatprep.mubr.msk.bf16.mxu0 %vm20148_vm1, %v20147_v15 }
 0xda3   : > { %v21520_v44 = vpop.permute.xlu1 %5228 }
 0xda7   : > { %v5131_v57 = vpop.permute.xlu1 %5130 }
 0xda8   : > { %v5136_v32 = vsel %vm1235_vm3, %v5131_v57, 0 }
 0xda9   : > { %v5180_v34 = vpop.permute.xlu0 %5179  ;;  %17987 = vmatpush3.bf16.msra.mxu1 %v5136_v32 }
 0xdaa   : > { %v5185_v47 = vsel %vm1235_vm3, %v5180_v34, 0  ;;  %17998 = vmatprep.subr.bf16.mxu1 %v20147_v15 }
 0xdab   : > { %17993 = vmatpush3.bf16.msra.mxu0 %v5185_v47 }
 0xdac   : > { %18004 = vmatprep.subr.bf16.mxu0 %v20147_v15 }
 0xdf9   : > { %v4797_v31 = vpop.f32.mrf.mxu1 }
 0xdfa   : > { %v5039_v8 = vsel %vm785_vm2, %v4797_v31, -inf }
 0xdfb   : > { %5040 = vmax.xlane.f32.xlu0 %v5039_v8  ;;  %v4705_v16 = vpop.f32.mrf.mxu0  ;;  %v17954_v17 = vpop.f32.mrf.mxu1 }
 0xdfc   : > { %v5033_v24 = vsel %vm785_vm2, %v4705_v16, -inf }
 0xdfd   : > { %5034 = vmax.xlane.f32.xlu1 %v5033_v24  ;;  %v17942_v37 = vpop.f32.mrf.mxu0  ;;  %v4800_v40 = vpop.f32.mrf.mxu1 }
 0xdfe   : > { %v21541_v24 = vpop.permute.xlu1 %5277 }
 0xdff   : > { %v4708_v48 = vpop.f32.mrf.mxu0  ;;  %v17955_v18 = vpop.f32.mrf.mxu1 }
 0xe01   : > { %v17943_v0 = vpop.f32.mrf.mxu0 }
 0xe02   : > { %v21543_v37 = vpop.permute.xlu1 %5326 }
 0xe03   : > { %v4751_v29 = vpop.f32.mrf.mxu0 }
 0xe04   : > { %v5036_v19 = vsel %vm785_vm2, %v4751_v29, -inf }
 0xe05   : > { %5037 = vmax.xlane.f32.xlu0 %v5036_v19  ;;  %v17948_v4 = vpop.f32.mrf.mxu0 }
 0xe07   : > { %v4754_v22 = vpop.f32.mrf.mxu0 }
 0xe09   : > { %v17949_v36 = vpop.f32.mrf.mxu0 }
 0xe0b   : > { %v4843_v23 = vpop.f32.mrf.mxu0 }
 0xe0c   : > { %v5042_v9 = vsel %vm785_vm2, %v4843_v23, -inf }
 0xe0d   : > { %5043 = vmax.xlane.f32.xlu0 %v5042_v9  ;;  %v17960_v41 = vpop.f32.mrf.mxu0 }
 0xe0f   : > { %v4846_v30 = vpop.f32.mrf.mxu0 }
 0xe11   : > { %v17961_v13 = vpop.f32.mrf.mxu0 }
 0xe39   : > { %v4889_v43 = vpop.f32.mrf.mxu1 }
 0xe3a   : > { %v5045_v28 = vsel %vm785_vm2, %v4889_v43, -inf }
 0xe3b   : > { %v17966_v46 = vpop.f32.mrf.mxu1  ;;  %5046 = vmax.xlane.f32.xlu1 %v5045_v28 }
 0xe3d   : > { %v4892_v52 = vpop.f32.mrf.mxu1  ;;  %v4935_v53 = vpop.f32.mrf.mxu0 }
 0xe3e   : > { %v5048_v58 = vsel %vm785_vm2, %v4935_v53, -inf }
 0xe3f   : > { %v17967_v49 = vpop.f32.mrf.mxu1  ;;  %5049 = vmax.xlane.f32.xlu0 %v5048_v58  ;;  %v17972_v50 = vpop.f32.mrf.mxu0 }
 0xe41   : > { %v4938_v61 = vpop.f32.mrf.mxu0  ;;  %v21532_v56 = vpop.f32.mrf.mxu1 }
 0xe42   : > { %v5051_v60 = vsel %vm785_vm2, %v21532_v56, -inf }
 0xe43   : > { %v17978_v3 = vpop.f32.mrf.mxu1  ;;  %5052 = vmax.xlane.f32.xlu1 %v5051_v60  ;;  %v17973_v26 = vpop.f32.mrf.mxu0 }
 0xe45   : > { %v4984_v10 = vpop.f32.mrf.mxu1  ;;  %v5027_v57 = vpop.f32.mrf.mxu0 }
 0xe46   : > { %v5054_v32 = vsel %vm785_vm2, %v5027_v57, -inf }
 0xe47   : > { %v17979_v34 = vpop.f32.mrf.mxu1  ;;  %5055 = vmax.xlane.f32.xlu0 %v5054_v32  ;;  %v17984_v47 = vpop.f32.mrf.mxu0 }
 0xe49   : > { %v5030_v8 = vpop.f32.mrf.mxu0 }
 0xe4b   : > { %v17985_v17 = vpop.f32.mrf.mxu0 }
 0xe54   : > { %5424 = vrot.lane.b32.xlu1 %v21473_v39, %s20149_s20 }
 0xe5d   : > { %5375 = vrot.lane.b32.xlu0 %v21467_v62, %s20149_s20 }
 0xe84   : > { %v5041_v40 = vpop.xlane.xlu0 %5040 }
 0xe85   : > { %v5059_v48 = vsub.f32 %v4797_v31, %v5041_v40 }
 0xe86   : > { %v5035_v18 = vpop.xlane.xlu1 %5034 }
 0xe87   : > { %v5069_v0 = vmul.f32 1.442695, %v5059_v48  ;;  %v5057_v19 = vsub.f32 %v4705_v16, %v5035_v18 }
 0xe89   : > { %19459 = vpow2.f32 %v5069_v0  ;;  %v5065_v4 = vmul.f32 1.442695, %v5057_v19 }
 0xe8b   : > { %19461 = vpow2.f32 %v5065_v4 }
 0xe8e   : > { %v5038_v22 = vpop.xlane.xlu0 %5037 }
 0xe8f   : > { %v5058_v36 = vsub.f32 %v4751_v29, %v5038_v22 }
 0xe91   : > { %v5067_v9 = vmul.f32 1.442695, %v5058_v36 }
 0xe93   : > { %19463 = vpow2.f32 %v5067_v9 }
 0xe96   : > { %v21545_v41 = vpop.eup %19459  ;;  %v5044_v30 = vpop.xlane.xlu0 %5043 }
 0xe97   : > { %v5060_v13 = vsub.f32 %v4843_v23, %v5044_v30  ;;  %v5087_v28 = vsel %vm785_vm2, %v21545_v41, 0.0 }
 0xe98   : > { %v19462_v46 = vpop.eup %19461  ;;  %5088 = vadd.xlane.f32.xlu1 %v5087_v28 }
 0xe99   : > { %v5071_v31 = vmul.f32 1.442695, %v5060_v13  ;;  %v5081_v16 = vsel %vm785_vm2, %v19462_v46, 0.0 }
 0xe9b   : > { %19465 = vpow2.f32 %v5071_v31 }
 0xe9c   : > { %5082 = vadd.xlane.f32.xlu1 %v5081_v16 }
 0xea0   : > { %v21550_v52 = vpop.eup %19463 }
 0xea1   : > { %v5084_v29 = vsel %vm785_vm2, %v21550_v52, 0.0 }
 0xea2   : > { %5085 = vadd.xlane.f32.xlu0 %v5084_v29  ;;  %v5234_v29 = vsel %vm1235_vm3, %v21520_v44, 0 }
 0xea8   : > { %v21554_v58 = vpop.eup %19465 }
 0xea9   : > { %v5090_v23 = vsel %vm785_vm2, %v21554_v58, 0.0 }
 0xeaa   : > { %5091 = vadd.xlane.f32.xlu0 %v5090_v23 }
 0xec4   : > { %v5047_v49 = vpop.xlane.xlu1 %5046 }
 0xec5   : > { %v5061_v50 = vsub.f32 %v4889_v43, %v5047_v49 }
 0xec7   : > { %v5073_v61 = vmul.f32 1.442695, %v5061_v50  ;;  %v5283_v50 = vsel %vm1235_vm3, %v21541_v24, 0 }
 0xec8   : > { %v5050_v60 = vpop.xlane.xlu0 %5049 }
 0xec9   : > { %19467 = vpow2.f32 %v5073_v61  ;;  %v5062_v3 = vsub.f32 %v4935_v53, %v5050_v60 }
 0xecb   : > { %v5075_v26 = vmul.f32 1.442695, %v5062_v3 }
 0xecc   : > { %v5053_v43 = vpop.xlane.xlu1 %5052 }
 0xecd   : > { %19469 = vpow2.f32 %v5075_v26  ;;  %v5063_v53 = vsub.f32 %v21532_v56, %v5053_v43 }
 0xecf   : > { %v5077_v17 = vmul.f32 1.442695, %v5063_v53 }
 0xed0   : > { %v5056_v8 = vpop.xlane.xlu0 %5055  ;;  %v21579_v22 = vpop.permute.xlu1 %5424 }
 0xed1   : > { %v5064_v40 = vsub.f32 %v5027_v57, %v5056_v8  ;;  %19471 = vpow2.f32 %v5077_v17  ;;  %v5430_v53 = vsel %vm1235_vm3, %v21579_v22, 0 }
 0xed3   : > { %v5079_v48 = vmul.f32 1.442695, %v5064_v40 }
 0xed4   : > { %v5376_v36 = vpop.permute.xlu0 %5375 }
 0xed5   : > { %19473 = vpow2.f32 %v5079_v48  ;;  %v5381_v60 = vsel %vm1235_vm3, %v5376_v36, 0 }
 0xed6   : > { %v21558_v10 = vpop.eup %19467 }
 0xed7   : > { %v5093_v32 = vsel %vm785_vm2, %v21558_v10, 0.0 }
 0xed8   : > { %5094 = vadd.xlane.f32.xlu1 %v5093_v32 }
 0xeda   : > { %v21562_v34 = vpop.eup %19469 }
 0xedb   : > { %v5096_v47 = vsel %vm785_vm2, %v21562_v34, 0.0 }
 0xedc   : > { %5097 = vadd.xlane.f32.xlu0 %v5096_v47 }
 0xede   : > { %v21571_v18 = vpop.eup %19471 }
 0xedf   : > { %v5099_v0 = vsel %vm785_vm2, %v21571_v18, 0.0 }
 0xee2   : > { %v21575_v19 = vpop.eup %19473 }
 0xee3   : > { %v5102_v4 = vsel %vm785_vm2, %v21575_v19, 0.0 }
 0xee9   : > { %5540 = vrot.lane.b32.xlu1 %v21392_v2, %s20150_s23 }
 0xef2   : > { %5473 = vrot.lane.b32.xlu0 %v21485_v54, %s20149_s20 }
 0xf0d   : > { %5100 = vadd.xlane.f32.xlu1 %v5099_v0 }
 0xf11   : > { %5103 = vadd.xlane.f32.xlu0 %v5102_v4 }
 0xf1e   : > { %5538 = vrot.lane.b32.xlu1 %v21414_v14, %s20150_s23 }
 0xf21   : > { %v5089_v56 = vpop.xlane.xlu1 %5088 }
 0xf22   : > { %5642 = vrot.lane.b32.xlu1 %v21386_v27, %s20150_s23 }
 0xf25   : > { %v5083_v57 = vpop.xlane.xlu1 %5082 }
 0xf26   : > { %5640 = vrot.lane.b32.xlu1 %v21407_v21, %s20150_s23  ;;  %19475 = vrcp.f32 %v5083_v57 }
 0xf27   : > { %5591 = vrot.lane.b32.xlu0 %v21405_v38, %s20150_s23  ;;  %19477 = vrcp.f32 %v5089_v56 }
 0xf2a   : > { %5744 = vrot.lane.b32.xlu1 %v21455_v25, %s20150_s23 }
 0xf2b   : > { %5589 = vrot.lane.b32.xlu0 %v21438_v1, %s20150_s23  ;;  %v5086_v9 = vpop.xlane.xlu0 %5085 }
 0xf2c   : > { %19479 = vrcp.f32 %v5086_v9 }
 0xf2e   : > { %5742 = vrot.lane.b32.xlu1 %v21481_v55, %s20150_s23 }
 0xf2f   : > { %5693 = vrot.lane.b32.xlu0 %v21412_v6, %s20150_s23 }
 0xf32   : > { %5846 = vrot.lane.b32.xlu1 %v21473_v39, %s20150_s23 }
 0xf33   : > { %v19476_v30 = vpop.eup %19475  ;;  %5691 = vrot.lane.b32.xlu0 %v21448_v12, %s20150_s23  ;;  %v5092_v13 = vpop.xlane.xlu0 %5091 }
 0xf34   : > { %v5113_v28 = vmul.f32 %v19476_v30, %v19462_v46  ;;  %19481 = vrcp.f32 %v5092_v13  ;;  %v19478_v16 = vpop.eup %19477 }
 0xf35   : > { %v5115_v46 = vmul.f32 %v19478_v16, %v21545_v41  ;;  %v5332_v41 = vsel %vm1235_vm3, %v21543_v37, 0 }
 0xf36   : > { %v5121_v31 = vpack.c.bf16 %v5113_v28, %v5113_v28  ;;  %5844 = vrot.lane.b32.xlu1 %v21506_v42, %s20150_s23 }
 0xf37   : > { %5795 = vrot.lane.b32.xlu0 %v21467_v62, %s20150_s23  ;;  %v5123_v61 = vpack.c.bf16 %v5115_v46, %v5115_v46 }
 0xf38   : > { %17989 = vmatmul.mubr.msk.bf16.vlgmr.msra.gmra.mxu1 %vm785_vm2, %v5121_v31 }
 0xf39   : > { %v19480_v23 = vpop.eup %19479  ;;  %17999 = vmatpush3.bf16.msra.mxu1 %v5234_v29  ;;  %18000 = vmatprep.mubr.msk.bf16.mxu1 %vm20148_vm1, %v20147_v15 }
 0xf3a   : > { %v5114_v49 = vmul.f32 %v19480_v23, %v21550_v52  ;;  %6041 = vrot.lane.b32.xlu1 %v21392_v2, %s20151_s18  ;;  %18010 = vmatprep.subr.bf16.mxu1 %v20147_v15 }
 0xf3b   : > { %5793 = vrot.lane.b32.xlu0 %v21497_v35, %s20150_s23 }
 0xf3c   : > { %v5122_v44 = vpack.c.bf16 %v5114_v49, %v5114_v49 }
 0xf3e   : > { %6137 = vrot.lane.b32.xlu1 %v21386_v27, %s20151_s18  ;;  %17995 = vmatmul.mubr.msk.bf16.vlgmr.msra.gmra.mxu0 %vm785_vm2, %v5122_v44 }
 0xf3f   : > { %5897 = vrot.lane.b32.xlu0 %v21485_v54, %s20150_s23  ;;  %18005 = vmatpush3.bf16.msra.mxu0 %v5283_v50 }
 0xf40   : > { %18001 = vmatmul.mubr.msk.bf16.vlgmr.msra.gmra.mxu1 %vm785_vm2, %v5123_v61  ;;  %18006 = vmatprep.mubr.msk.bf16.mxu0 %vm20148_vm1, %v20147_v15 }
 0xf41   : > { %v19482_v52 = vpop.eup %19481  ;;  %18011 = vmatpush3.bf16.msra.mxu1 %v5332_v41  ;;  %18016 = vmatprep.subr.bf16.mxu0 %v20147_v15 }
 0xf42   : > { %v5116_v24 = vmul.f32 %v19482_v52, %v21554_v58  ;;  %6185 = vrot.lane.b32.xlu1 %v21412_v6, %s20151_s18  ;;  %18012 = vmatprep.mubr.msk.bf16.mxu1 %vm20148_vm1, %v20147_v15 }
 0xf43   : > { %5895 = vrot.lane.b32.xlu0 %v21514_v33, %s20150_s23  ;;  %18022 = vmatprep.subr.bf16.mxu1 %v20147_v15 }
 0xf44   : > { %v5124_v37 = vpack.c.bf16 %v5116_v24, %v5116_v24 }
 0xf46   : > { %6233 = vrot.lane.b32.xlu1 %v21455_v25, %s20151_s18  ;;  %18007 = vmatmul.mubr.msk.bf16.vlgmr.msra.gmra.mxu0 %vm785_vm2, %v5124_v37 }
 0xf47   : > { %6089 = vrot.lane.b32.xlu0 %v21405_v38, %s20151_s18  ;;  %18017 = vmatpush3.bf16.msra.mxu0 %v5381_v60 }
 0xf48   : > { %18018 = vmatprep.mubr.msk.bf16.mxu0 %vm20148_vm1, %v20147_v15  ;;  %18028 = vmatprep.subr.bf16.mxu0 %v20147_v15 }
 0xf61   : > { %v5095_v58 = vpop.xlane.xlu1 %5094 }
 0xf62   : > { %19483 = vrcp.f32 %v5095_v58 }
 0xf65   : > { %v5098_v3 = vpop.xlane.xlu0 %5097 }
 0xf66   : > { %19485 = vrcp.f32 %v5098_v3 }
 0xf69   : > { %v5474_v17 = vpop.permute.xlu0 %5473 }
 0xf6a   : > { %v5479_v48 = vsel %vm1235_vm3, %v5474_v17, 0 }
 0xf6f   : > { %v19484_v26 = vpop.eup %19483 }
 0xf70   : > { %v5117_v32 = vmul.f32 %v19484_v26, %v21558_v10  ;;  %v5541_v10 = vpop.permute.xlu1 %5540 }
 0xf71   : > { %v5546_v16 = vsel %vm785_vm2, %v5541_v10, 0 }
 0xf72   : > { %v5125_v47 = vpack.c.bf16 %v5117_v32, %v5117_v32 }
 0xf73   : > { %v19486_v43 = vpop.eup %19485 }
 0xf74   : > { %v5118_v8 = vmul.f32 %v19486_v43, %v21562_v34  ;;  %18013 = vmatmul.mubr.msk.bf16.vlgmr.msra.gmra.mxu1 %vm785_vm2, %v5125_v47 }
 0xf75   : > { %18023 = vmatpush3.bf16.msra.mxu1 %v5430_v53  ;;  %18024 = vmatprep.mubr.msk.bf16.mxu1 %vm20148_vm1, %v20147_v15 }
 0xf76   : > { %v5126_v40 = vpack.c.bf16 %v5118_v8, %v5118_v8  ;;  %18034 = vmatprep.subr.bf16.mxu1 %v20147_v15 }
 0xf78   : > { %18019 = vmatmul.mubr.msk.bf16.vlgmr.msra.gmra.mxu0 %vm785_vm2, %v5126_v40 }
 0xf79   : > { %18029 = vmatpush3.bf16.msra.mxu0 %v5479_v48  ;;  %18030 = vmatprep.mubr.msk.bf16.mxu0 %vm20148_vm1, %v20147_v15 }
 0xf7a   : > { %18040 = vmatprep.subr.bf16.mxu0 %v20147_v15 }
 0xf96   : > { %v5101_v34 = vpop.xlane.xlu1 %5100 }
 0xf97   : > { %19487 = vrcp.f32 %v5101_v34 }
 0xf9a   : > { %v5104_v0 = vpop.xlane.xlu0 %5103  ;;  %v5539_v4 = vpop.permute.xlu1 %5538 }
 0xf9b   : > { %19489 = vrcp.f32 %v5104_v0 }
 0xf9e   : > { %v5592_v22 = vpop.permute.xlu0 %5591  ;;  %v5643_v56 = vpop.permute.xlu1 %5642 }
 0xfa2   : > { %v5590_v57 = vpop.permute.xlu0 %5589  ;;  %v5641_v31 = vpop.permute.xlu1 %5640 }
 0xfa4   : > { %v19488_v36 = vpop.eup %19487 }
 0xfa5   : > { %v5119_v9 = vmul.f32 %v19488_v36, %v21571_v18  ;;  %v5597_v18 = vsel %vm785_vm2, %v5592_v22, 0 }
 0xfa6   : > { %v5694_v30 = vpop.permute.xlu0 %5693  ;;  %v5745_v49 = vpop.permute.xlu1 %5744 }
 0xfa7   : > { %v5127_v13 = vpack.c.bf16 %v5119_v9, %v5119_v9  ;;  %v5699_v61 = vsel %vm785_vm2, %v5694_v30, 0  ;;  %v5750_v52 = vsel %vm785_vm2, %v5745_v49, 0 }
 0xfa8   : > { %v19490_v28 = vpop.eup %19489 }
 0xfa9   : > { %v5120_v29 = vmul.f32 %v19490_v28, %v21575_v19  ;;  %18025 = vmatmul.mubr.msk.bf16.vlgmr.msra.gmra.mxu1 %vm785_vm2, %v5127_v13  ;;  %v5648_v19 = vsel %vm785_vm2, %v5643_v56, 0 }
 0xfaa   : > { %18035 = vmatpush3.bf16.xpose.msra.mxu1 %v5546_v16  ;;  %18036 = vmatprep.mubr.msk.bf16.mxu1 %vm20148_vm1, %v20147_v15  ;;  %v5692_v46 = vpop.permute.xlu0 %5691  ;;  %v5743_v50 = vpop.permute.xlu1 %5742 }
 0xfab   : > { %v5128_v23 = vpack.c.bf16 %v5120_v29, %v5120_v29  ;;  %18046 = vmatprep.subr.bf16.mxu1 %v20147_v15 }
 0xfad   : > { %18031 = vmatmul.mubr.msk.bf16.vlgmr.msra.gmra.mxu0 %vm785_vm2, %v5128_v23 }
 0xfae   : > { %18041 = vmatpush3.bf16.xpose.msra.mxu0 %v5597_v18  ;;  %18042 = vmatprep.mubr.msk.bf16.mxu0 %vm20148_vm1, %v20147_v15  ;;  %v5796_v44 = vpop.permute.xlu0 %5795  ;;  %v5847_v24 = vpop.permute.xlu1 %5846 }
 0xfaf   : > { %18052 = vmatprep.subr.bf16.mxu0 %v20147_v15  ;;  %v5801_v37 = vsel %vm785_vm2, %v5796_v44, 0  ;;  %v5852_v3 = vsel %vm785_vm2, %v5847_v24, 0 }
 0xfb1   : > { %18037 = vmatmul.mubr.msk.bf16.vlgmr.msra.gmra.mxu1 %vm785_vm2, %v5539_v4 }
 0xfb2   : > { %18047 = vmatpush3.bf16.xpose.msra.mxu1 %v5648_v19  ;;  %18048 = vmatprep.mubr.msk.bf16.mxu1 %vm20148_vm1, %v20147_v15  ;;  %v5794_v41 = vpop.permute.xlu0 %5793  ;;  %v5845_v58 = vpop.permute.xlu1 %5844 }
 0xfb3   : > { %18058 = vmatprep.subr.bf16.mxu1 %v20147_v15 }
 0xfb5   : > { %18043 = vmatmul.mubr.msk.bf16.vlgmr.msra.gmra.mxu0 %vm785_vm2, %v5590_v57 }
 0xfb6   : > { %18053 = vmatpush3.bf16.xpose.msra.mxu0 %v5699_v61  ;;  %18054 = vmatprep.mubr.msk.bf16.mxu0 %vm20148_vm1, %v20147_v15  ;;  %v5898_v60 = vpop.permute.xlu0 %5897  ;;  %v6042_v47 = vpop.permute.xlu1 %6041 }
 0xfb7   : > { %18064 = vmatprep.subr.bf16.mxu0 %v20147_v15  ;;  %v5903_v32 = vsel %vm785_vm2, %v5898_v60, 0  ;;  %v6047_v43 = vsel %vm1235_vm3, %v6042_v47, 0 }
 0xfb9   : > { %18049 = vmatmul.mubr.msk.bf16.vlgmr.msra.gmra.mxu1 %vm785_vm2, %v5641_v31 }
 0xfba   : > { %18059 = vmatpush3.bf16.xpose.msra.mxu1 %v5750_v52  ;;  %18060 = vmatprep.mubr.msk.bf16.mxu1 %vm20148_vm1, %v20147_v15  ;;  %v5896_v26 = vpop.permute.xlu0 %5895 }
 0xfbb   : > { %18070 = vmatprep.subr.bf16.mxu1 %v20147_v15 }
 0xfbd   : > { %18055 = vmatmul.mubr.msk.bf16.vlgmr.msra.gmra.mxu0 %vm785_vm2, %v5692_v46 }
 0xfbe   : > { %18065 = vmatpush3.bf16.xpose.msra.mxu0 %v5801_v37  ;;  %18066 = vmatprep.mubr.msk.bf16.mxu0 %vm20148_vm1, %v20147_v15  ;;  %v6090_v53 = vpop.permute.xlu0 %6089 }
 0xfbf   : > { %18076 = vmatprep.subr.bf16.mxu0 %v20147_v15  ;;  %v6095_v8 = vsel %vm1235_vm3, %v6090_v53, 0 }
 0xfc1   : > { %18061 = vmatmul.mubr.msk.bf16.vlgmr.msra.gmra.mxu1 %vm785_vm2, %v5743_v50 }
 0xfc2   : > { %18071 = vmatpush3.bf16.xpose.msra.mxu1 %v5852_v3  ;;  %18072 = vmatprep.mubr.msk.bf16.mxu1 %vm20148_vm1, %v20147_v15 }
 0xfc3   : > { %18082 = vmatprep.subr.bf16.mxu1 %v20147_v15 }
 0xfc5   : > { %18067 = vmatmul.mubr.msk.bf16.vlgmr.msra.gmra.mxu0 %vm785_vm2, %v5794_v41 }
 0xfc6   : > { %18077 = vmatpush3.bf16.xpose.msra.mxu0 %v5903_v32  ;;  %18078 = vmatprep.mubr.msk.bf16.mxu0 %vm20148_vm1, %v20147_v15 }
 0xfc7   : > { %18088 = vmatprep.subr.bf16.mxu0 %v20147_v15 }
 0xfc9   : > { %18073 = vmatmul.mubr.msk.bf16.vlgmr.msra.gmra.mxu1 %vm785_vm2, %v5845_v58 }
 0xfca   : > { %18083 = vmatpush3.bf16.msra.mxu1 %v6047_v43  ;;  %18084 = vmatprep.mubr.msk.bf16.mxu1 %vm20148_vm1, %v20147_v15 }
 0xfcb   : > { %18094 = vmatprep.subr.bf16.mxu1 %v20147_v15 }
 0xfcd   : > { %18079 = vmatmul.mubr.msk.bf16.vlgmr.msra.gmra.mxu0 %vm785_vm2, %v5896_v26 }
 0xfce   : > { %18089 = vmatpush3.bf16.msra.mxu0 %v6095_v8  ;;  %18090 = vmatprep.mubr.msk.bf16.mxu0 %vm20148_vm1, %v20147_v15 }
 0xfcf   : > { %18100 = vmatprep.subr.bf16.mxu0 %v20147_v15 }
 0xff8   : > { %v5172_v17 = vpop.f32.mrf.mxu1 }
 0xff9   : > { %v5521_v40 = vadd.f32 %v5172_v17, %v21390_v59 }
 0xffa   : > { %v17990_v48 = vpop.f32.mrf.mxu1 }
 0xffb   : > { %5529 = vst.msk [vmem:[#allocation3] sm:$0xff] %vm785_vm2, %v5521_v40 }
 0xffc   : > { %v5175_v10 = vpop.f32.mrf.mxu1 }
 0xffe   : > { %v17991_v34 = vpop.f32.mrf.mxu1  ;;  %v5221_v0 = vpop.f32.mrf.mxu0 }
 0xfff   : > { %v5522_v4 = vadd.f32 %v5221_v0, %v21419_v5 }
0x1000   : > { %v17996_v22 = vpop.f32.mrf.mxu0  ;;  %v5270_v56 = vpop.f32.mrf.mxu1 }
0x1001   : > { %5530 = vst.msk [vmem:[#allocation3 + $0x8] sm:$0xff] %vm785_vm2, %v5522_v4  ;;  %v5523_v57 = vadd.f32 %v5270_v56, %v21384_v11 }
0x1002   : > { %v5224_v36 = vpop.f32.mrf.mxu0  ;;  %v18002_v9 = vpop.f32.mrf.mxu1 }
0x1003   : > { %5531 = vst.msk [vmem:[#allocation3 + $0x10] sm:$0xff] %vm785_vm2, %v5523_v57 }
0x1004   : > { %v17997_v30 = vpop.f32.mrf.mxu0  ;;  %v5273_v13 = vpop.f32.mrf.mxu1 }
0x1006   : > { %v18003_v28 = vpop.f32.mrf.mxu1  ;;  %v5319_v31 = vpop.f32.mrf.mxu0 }
0x1007   : > { %v5524_v16 = vadd.f32 %v5319_v31, %v21436_v7 }
0x1008   : > { %v18008_v29 = vpop.f32.mrf.mxu0 }
0x1009   : > { %5532 = vst.msk [vmem:[#allocation3 + $0x18] sm:$0xff] %vm785_vm2, %v5524_v16 }
0x100a   : > { %v5322_v23 = vpop.f32.mrf.mxu0 }
0x100c   : > { %v18009_v46 = vpop.f32.mrf.mxu0 }
0x1034   : > { %v5368_v18 = vpop.f32.mrf.mxu1 }
0x1035   : > { %v5525_v49 = vadd.f32 %v5368_v18, %v21458_v45 }
0x1036   : > { %v18014_v19 = vpop.f32.mrf.mxu1 }
0x1037   : > { %5533 = vst.msk [vmem:[#allocation3 + $0x20] sm:$0xff] %vm785_vm2, %v5525_v49 }
0x1038   : > { %v5371_v44 = vpop.f32.mrf.mxu1  ;;  %v5417_v50 = vpop.f32.mrf.mxu0 }
0x1039   : > { %v5526_v61 = vadd.f32 %v5417_v50, %v21470_v20 }
0x103a   : > { %v18015_v41 = vpop.f32.mrf.mxu1  ;;  %v18020_v52 = vpop.f32.mrf.mxu0 }
0x103b   : > { %5534 = vst.msk [vmem:[#allocation3 + $0x28] sm:$0xff] %vm785_vm2, %v5526_v61 }
0x103c   : > { %v5420_v24 = vpop.f32.mrf.mxu0 }
0x103e   : > { %v18021_v37 = vpop.f32.mrf.mxu0 }
0x1069   : > { %v5466_v60 = vpop.f32.mrf.mxu1 }
0x106a   : > { %v5527_v58 = vadd.f32 %v5466_v60, %v21479_v63 }
0x106b   : > { %v18026_v3 = vpop.f32.mrf.mxu1 }
0x106c   : > { %5535 = vst.msk [vmem:[#allocation3 + $0x30] sm:$0xff] %vm785_vm2, %v5527_v58 }
0x106d   : > { %v5469_v26 = vpop.f32.mrf.mxu1  ;;  %v5515_v32 = vpop.f32.mrf.mxu0 }
0x106e   : > { %v5528_v47 = vadd.f32 %v5515_v32, %v21495_v51 }
0x106f   : > { %v18027_v43 = vpop.f32.mrf.mxu1  ;;  %v18032_v53 = vpop.f32.mrf.mxu0 }
0x1070   : > { %5536 = vst.msk [vmem:[#allocation3 + $0x38] sm:$0xff] %vm785_vm2, %v5528_v47 }
0x1071   : > { %v5518_v8 = vpop.f32.mrf.mxu0  ;;  %v5582_v17 = vpop.f32.mrf.mxu1 }
0x1072   : > { %v5945_v40 = vsel %vm785_vm2, %v5582_v17, -inf }
0x1073   : > { %5946 = vmax.xlane.f32.xlu1 %v5945_v40  ;;  %v18033_v48 = vpop.f32.mrf.mxu0  ;;  %v18038_v10 = vpop.f32.mrf.mxu1 }
0x1074   : > { %v21743_v10 = vpop.permute.xlu1 %6137 }
0x1075   : > { %v5585_v34 = vpop.f32.mrf.mxu1  ;;  %v5633_v0 = vpop.f32.mrf.mxu0 }
0x1076   : > { %v5948_v4 = vsel %vm785_vm2, %v5633_v0, -inf }
0x1077   : > { %v18039_v22 = vpop.f32.mrf.mxu1  ;;  %5949 = vmax.xlane.f32.xlu0 %v5948_v4  ;;  %v18044_v56 = vpop.f32.mrf.mxu0 }
0x1078   : > { %v21745_v34 = vpop.permute.xlu1 %6185 }
0x1079   : > { %v5636_v57 = vpop.f32.mrf.mxu0  ;;  %v5684_v36 = vpop.f32.mrf.mxu1 }
0x107a   : > { %v5951_v9 = vsel %vm785_vm2, %v5684_v36, -inf }
0x107b   : > { %v18050_v30 = vpop.f32.mrf.mxu1  ;;  %5952 = vmax.xlane.f32.xlu0 %v5951_v9  ;;  %v18045_v13 = vpop.f32.mrf.mxu0 }
0x107c   : > { %v21747_v4 = vpop.permute.xlu1 %6233 }
0x107d   : > { %v5687_v28 = vpop.f32.mrf.mxu1  ;;  %v5735_v31 = vpop.f32.mrf.mxu0 }
0x107e   : > { %v5954_v16 = vsel %vm785_vm2, %v5735_v31, -inf }
0x107f   : > { %v18051_v29 = vpop.f32.mrf.mxu1  ;;  %5955 = vmax.xlane.f32.xlu0 %v5954_v16  ;;  %v18056_v23 = vpop.f32.mrf.mxu0 }
0x1081   : > { %v5738_v46 = vpop.f32.mrf.mxu0  ;;  %v5786_v18 = vpop.f32.mrf.mxu1 }
0x1082   : > { %v5957_v49 = vsel %vm785_vm2, %v5786_v18, -inf }
0x1083   : > { %5958 = vmax.xlane.f32.xlu1 %v5957_v49  ;;  %v18057_v19 = vpop.f32.mrf.mxu0  ;;  %v18062_v44 = vpop.f32.mrf.mxu1 }
0x1085   : > { %v5789_v50 = vpop.f32.mrf.mxu1  ;;  %v5837_v61 = vpop.f32.mrf.mxu0 }
0x1086   : > { %v5960_v41 = vsel %vm785_vm2, %v5837_v61, -inf }
0x1087   : > { %v18063_v52 = vpop.f32.mrf.mxu1  ;;  %5961 = vmax.xlane.f32.xlu0 %v5960_v41  ;;  %v18068_v24 = vpop.f32.mrf.mxu0 }
0x1089   : > { %v5840_v37 = vpop.f32.mrf.mxu0  ;;  %v21734_v60 = vpop.f32.mrf.mxu1 }
0x108a   : > { %v5963_v58 = vsel %vm785_vm2, %v21734_v60, -inf }
0x108b   : > { %5964 = vmax.xlane.f32.xlu1 %v5963_v58  ;;  %v18069_v3 = vpop.f32.mrf.mxu0  ;;  %v18074_v26 = vpop.f32.mrf.mxu1 }
0x108d   : > { %v5891_v32 = vpop.f32.mrf.mxu1  ;;  %v5939_v47 = vpop.f32.mrf.mxu0 }
0x108e   : > { %v5966_v43 = vsel %vm785_vm2, %v5939_v47, -inf }
0x108f   : > { %v18075_v53 = vpop.f32.mrf.mxu1  ;;  %5967 = vmax.xlane.f32.xlu0 %v5966_v43  ;;  %v18080_v8 = vpop.f32.mrf.mxu0 }
0x1091   : > { %v5942_v40 = vpop.f32.mrf.mxu0 }
0x1093   : > { %v18081_v48 = vpop.f32.mrf.mxu0 }
0x109c   : > { %6329 = vrot.lane.b32.xlu1 %v21473_v39, %s20151_s18 }
0x10a5   : > { %6281 = vrot.lane.b32.xlu0 %v21467_v62, %s20151_s18 }
0x10fc   : > { %v5947_v22 = vpop.xlane.xlu1 %5946 }
0x10fd   : > { %v5969_v56 = vsub.f32 %v5582_v17, %v5947_v22 }
0x10ff   : > { %v5977_v57 = vmul.f32 1.442695, %v5969_v56 }
0x1100   : > { %v5950_v9 = vpop.xlane.xlu0 %5949 }
0x1101   : > { %19491 = vpow2.f32 %v5977_v57  ;;  %v5970_v30 = vsub.f32 %v5633_v0, %v5950_v9 }
0x1103   : > { %v5979_v13 = vmul.f32 1.442695, %v5970_v30 }
0x1104   : > { %v5953_v28 = vpop.xlane.xlu0 %5952 }
0x1105   : > { %19493 = vpow2.f32 %v5979_v13  ;;  %v5971_v16 = vsub.f32 %v5684_v36, %v5953_v28 }
0x1107   : > { %v5981_v29 = vmul.f32 1.442695, %v5971_v16 }
0x1108   : > { %v5956_v23 = vpop.xlane.xlu0 %5955 }
0x1109   : > { %19495 = vpow2.f32 %v5981_v29  ;;  %v5972_v46 = vsub.f32 %v5735_v31, %v5956_v23 }
0x110b   : > { %v5983_v49 = vmul.f32 1.442695, %v5972_v46 }
0x110c   : > { %v5959_v19 = vpop.xlane.xlu1 %5958 }
0x110d   : > { %19497 = vpow2.f32 %v5983_v49  ;;  %v5973_v44 = vsub.f32 %v5786_v18, %v5959_v19 }
0x110e   : > { %v21749_v50 = vpop.eup %19491 }
0x110f   : > { %v5985_v41 = vmul.f32 1.442695, %v5973_v44  ;;  %v5993_v17 = vsel %vm785_vm2, %v21749_v50, 0.0 }
0x1110   : > { %5994 = vadd.xlane.f32.xlu1 %v5993_v17  ;;  %v5962_v0 = vpop.xlane.xlu0 %5961  ;;  %v6143_v17 = vsel %vm1235_vm3, %v21743_v10, 0 }
0x1111   : > { %19499 = vpow2.f32 %v5985_v41  ;;  %v5974_v52 = vsub.f32 %v5837_v61, %v5962_v0 }
0x1112   : > { %v21753_v24 = vpop.eup %19493 }
0x1113   : > { %v5987_v36 = vmul.f32 1.442695, %v5974_v52  ;;  %v5996_v31 = vsel %vm785_vm2, %v21753_v24, 0.0 }
0x1114   : > { %5997 = vadd.xlane.f32.xlu0 %v5996_v31  ;;  %v5965_v53 = vpop.xlane.xlu1 %5964  ;;  %v6191_v31 = vsel %vm1235_vm3, %v21745_v34, 0 }
0x1115   : > { %19501 = vpow2.f32 %v5987_v36  ;;  %v5975_v8 = vsub.f32 %v21734_v60, %v5965_v53 }
0x1116   : > { %v21757_v37 = vpop.eup %19495 }
0x1117   : > { %v5999_v18 = vsel %vm785_vm2, %v21757_v37, 0.0  ;;  %v5989_v48 = vmul.f32 1.442695, %v5975_v8 }
0x1118   : > { %6000 = vadd.xlane.f32.xlu1 %v5999_v18  ;;  %v5968_v40 = vpop.xlane.xlu0 %5967  ;;  %v6330_v60 = vpop.permute.xlu1 %6329 }
0x1119   : > { %v5976_v22 = vsub.f32 %v5939_v47, %v5968_v40  ;;  %19503 = vpow2.f32 %v5989_v48  ;;  %v6335_v8 = vsel %vm1235_vm3, %v6330_v60, 0 }
0x111a   : > { %v21761_v58 = vpop.eup %19497 }
0x111b   : > { %v6002_v3 = vsel %vm785_vm2, %v21761_v58, 0.0  ;;  %v5991_v56 = vmul.f32 1.442695, %v5976_v22 }
0x111c   : > { %6003 = vadd.xlane.f32.xlu0 %v6002_v3  ;;  %v6282_v47 = vpop.permute.xlu0 %6281  ;;  %v6239_v3 = vsel %vm1235_vm3, %v21747_v4, 0 }
0x111d   : > { %19505 = vpow2.f32 %v5991_v56 }
0x111e   : > { %v21765_v61 = vpop.eup %19499 }
0x111f   : > { %v6005_v26 = vsel %vm785_vm2, %v21765_v61, 0.0 }
0x1120   : > { %6006 = vadd.xlane.f32.xlu1 %v6005_v26 }
0x1122   : > { %v21769_v32 = vpop.eup %19501 }
0x1123   : > { %v6008_v43 = vsel %vm785_vm2, %v21769_v32, 0.0 }
0x1124   : > { %6009 = vadd.xlane.f32.xlu0 %v6008_v43  ;;  %v6287_v43 = vsel %vm1235_vm3, %v6282_v47, 0 }
0x1126   : > { %v21778_v57 = vpop.eup %19503 }
0x1127   : > { %v6011_v9 = vsel %vm785_vm2, %v21778_v57, 0.0 }
0x112a   : > { %v21782_v30 = vpop.eup %19505 }
0x112b   : > { %v6014_v13 = vsel %vm785_vm2, %v21782_v30, 0.0 }
0x1131   : > { %6475 = vrot.lane.b32.xlu1 %v21392_v2, %s20152_s17 }
0x113a   : > { %6377 = vrot.lane.b32.xlu0 %v21485_v54, %s20151_s18 }
0x1155   : > { %6012 = vadd.xlane.f32.xlu1 %v6011_v9 }
0x1159   : > { %6015 = vadd.xlane.f32.xlu0 %v6014_v13 }
0x1166   : > { %6473 = vrot.lane.b32.xlu1 %v21414_v14, %s20152_s17 }
0x116a   : > { %6575 = vrot.lane.b32.xlu1 %v21386_v27, %s20152_s17 }
0x116e   : > { %6573 = vrot.lane.b32.xlu1 %v21407_v21, %s20152_s17 }
0x116f   : > { %6525 = vrot.lane.b32.xlu0 %v21405_v38, %s20152_s17 }
0x1172   : > { %6675 = vrot.lane.b32.xlu1 %v21455_v25, %s20152_s17 }
0x1173   : > { %6523 = vrot.lane.b32.xlu0 %v21438_v1, %s20152_s17 }
0x1176   : > { %6673 = vrot.lane.b32.xlu1 %v21481_v55, %s20152_s17 }
0x1177   : > { %6625 = vrot.lane.b32.xlu0 %v21412_v6, %s20152_s17 }
0x117a   : > { %6775 = vrot.lane.b32.xlu1 %v21473_v39, %s20152_s17 }
0x117b   : > { %6623 = vrot.lane.b32.xlu0 %v21448_v12, %s20152_s17 }
0x117e   : > { %6773 = vrot.lane.b32.xlu1 %v21506_v42, %s20152_s17 }
0x117f   : > { %6725 = vrot.lane.b32.xlu0 %v21467_v62, %s20152_s17 }
0x1182   : > { %6969 = vrot.lane.b32.xlu1 %v21392_v2, %s20153_s22 }
0x1183   : > { %6723 = vrot.lane.b32.xlu0 %v21497_v35, %s20152_s17 }
0x1186   : > { %7065 = vrot.lane.b32.xlu1 %v21386_v27, %s20153_s22 }
0x1187   : > { %6825 = vrot.lane.b32.xlu0 %v21485_v54, %s20152_s17 }
0x118a   : > { %7113 = vrot.lane.b32.xlu1 %v21412_v6, %s20153_s22 }
0x118b   : > { %6823 = vrot.lane.b32.xlu0 %v21514_v33, %s20152_s17 }
0x118e   : > { %7161 = vrot.lane.b32.xlu1 %v21455_v25, %s20153_s22 }
0x118f   : > { %7017 = vrot.lane.b32.xlu0 %v21405_v38, %s20153_s22 }
0x1199   : > { %v5995_v28 = vpop.xlane.xlu1 %5994 }
0x119a   : > { %19507 = vrcp.f32 %v5995_v28 }
0x119d   : > { %v5998_v16 = vpop.xlane.xlu0 %5997 }
0x119e   : > { %19509 = vrcp.f32 %v5998_v16 }
0x11a1   : > { %v6001_v29 = vpop.xlane.xlu1 %6000 }
0x11a2   : > { %19511 = vrcp.f32 %v6001_v29 }
0x11a5   : > { %v6004_v23 = vpop.xlane.xlu0 %6003 }
0x11a6   : > { %19513 = vrcp.f32 %v6004_v23 }
0x11a7   : > { %v19508_v46 = vpop.eup %19507 }
0x11a8   : > { %v6025_v49 = vmul.f32 %v19508_v46, %v21749_v50 }
0x11a9   : > { %v6007_v19 = vpop.xlane.xlu1 %6006 }
0x11aa   : > { %v6033_v44 = vpack.c.bf16 %v6025_v49, %v6025_v49  ;;  %19515 = vrcp.f32 %v6007_v19 }
0x11ab   : > { %v19510_v41 = vpop.eup %19509 }
0x11ac   : > { %v6026_v0 = vmul.f32 %v19510_v41, %v21753_v24  ;;  %18085 = vmatmul.mubr.msk.bf16.vlgmr.msra.gmra.mxu1 %vm785_vm2, %v6033_v44 }
0x11ad   : > { %18095 = vmatpush3.bf16.msra.mxu1 %v6143_v17  ;;  %v6010_v52 = vpop.xlane.xlu0 %6009  ;;  %18096 = vmatprep.mubr.msk.bf16.mxu1 %vm20148_vm1, %v20147_v15 }
0x11ae   : > { %v6034_v36 = vpack.c.bf16 %v6026_v0, %v6026_v0  ;;  %19517 = vrcp.f32 %v6010_v52  ;;  %18106 = vmatprep.subr.bf16.mxu1 %v20147_v15 }
0x11af   : > { %v19512_v50 = vpop.eup %19511 }
0x11b0   : > { %v6027_v18 = vmul.f32 %v19512_v50, %v21757_v37  ;;  %18091 = vmatmul.mubr.msk.bf16.vlgmr.msra.gmra.mxu0 %vm785_vm2, %v6034_v36 }
0x11b1   : > { %18101 = vmatpush3.bf16.msra.mxu0 %v6191_v31  ;;  %18102 = vmatprep.mubr.msk.bf16.mxu0 %vm20148_vm1, %v20147_v15  ;;  %v6378_v48 = vpop.permute.xlu0 %6377 }
0x11b2   : > { %v6035_v10 = vpack.c.bf16 %v6027_v18, %v6027_v18  ;;  %18112 = vmatprep.subr.bf16.mxu0 %v20147_v15  ;;  %v6383_v22 = vsel %vm1235_vm3, %v6378_v48, 0 }
0x11b3   : > { %v19514_v24 = vpop.eup %19513 }
0x11b4   : > { %v6028_v26 = vmul.f32 %v19514_v24, %v21761_v58  ;;  %18097 = vmatmul.mubr.msk.bf16.vlgmr.msra.gmra.mxu1 %vm785_vm2, %v6035_v10 }
0x11b5   : > { %18107 = vmatpush3.bf16.msra.mxu1 %v6239_v3  ;;  %18108 = vmatprep.mubr.msk.bf16.mxu1 %vm20148_vm1, %v20147_v15 }
0x11b6   : > { %v6036_v34 = vpack.c.bf16 %v6028_v26, %v6028_v26  ;;  %18118 = vmatprep.subr.bf16.mxu1 %v20147_v15 }
0x11b7   : > { %v19516_v37 = vpop.eup %19515 }
0x11b8   : > { %v6029_v53 = vmul.f32 %v19516_v37, %v21765_v61  ;;  %18103 = vmatmul.mubr.msk.bf16.vlgmr.msra.gmra.mxu0 %vm785_vm2, %v6036_v34 }
0x11b9   : > { %18113 = vmatpush3.bf16.msra.mxu0 %v6287_v43  ;;  %18114 = vmatprep.mubr.msk.bf16.mxu0 %vm20148_vm1, %v20147_v15 }
0x11ba   : > { %v6037_v4 = vpack.c.bf16 %v6029_v53, %v6029_v53  ;;  %18124 = vmatprep.subr.bf16.mxu0 %v20147_v15 }
0x11bb   : > { %v19518_v58 = vpop.eup %19517 }
0x11bc   : > { %v6030_v40 = vmul.f32 %v19518_v58, %v21769_v32  ;;  %18109 = vmatmul.mubr.msk.bf16.vlgmr.msra.gmra.mxu1 %vm785_vm2, %v6037_v4  ;;  %v6476_v32 = vpop.permute.xlu1 %6475 }
0x11bd   : > { %18119 = vmatpush3.bf16.msra.mxu1 %v6335_v8  ;;  %18120 = vmatprep.mubr.msk.bf16.mxu1 %vm20148_vm1, %v20147_v15  ;;  %v6481_v44 = vsel %vm785_vm2, %v6476_v32, 0 }
0x11be   : > { %v6038_v61 = vpack.c.bf16 %v6030_v40, %v6030_v40  ;;  %18130 = vmatprep.subr.bf16.mxu1 %v20147_v15 }
0x11c0   : > { %18115 = vmatmul.mubr.msk.bf16.vlgmr.msra.gmra.mxu0 %vm785_vm2, %v6038_v61 }
0x11c1   : > { %18125 = vmatpush3.bf16.msra.mxu0 %v6383_v22  ;;  %18126 = vmatprep.mubr.msk.bf16.mxu0 %vm20148_vm1, %v20147_v15 }
0x11c2   : > { %18136 = vmatprep.subr.bf16.mxu0 %v20147_v15 }
0x11de   : > { %v6013_v56 = vpop.xlane.xlu1 %6012 }
0x11df   : > { %19519 = vrcp.f32 %v6013_v56 }
0x11e2   : > { %v6016_v9 = vpop.xlane.xlu0 %6015  ;;  %v6474_v13 = vpop.permute.xlu1 %6473 }
0x11e3   : > { %19521 = vrcp.f32 %v6016_v9 }
0x11e6   : > { %v6526_v60 = vpop.permute.xlu0 %6525  ;;  %v6576_v47 = vpop.permute.xlu1 %6575 }
0x11ea   : > { %v6524_v28 = vpop.permute.xlu0 %6523  ;;  %v6574_v19 = vpop.permute.xlu1 %6573 }
0x11ec   : > { %v19520_v16 = vpop.eup %19519 }
0x11ed   : > { %v6031_v29 = vmul.f32 %v19520_v16, %v21778_v57  ;;  %v6531_v57 = vsel %vm785_vm2, %v6526_v60, 0 }
0x11ee   : > { %v6626_v23 = vpop.permute.xlu0 %6625  ;;  %v6676_v52 = vpop.permute.xlu1 %6675 }
0x11ef   : > { %v6039_v46 = vpack.c.bf16 %v6031_v29, %v6031_v29  ;;  %v6631_v31 = vsel %vm785_vm2, %v6626_v23, 0  ;;  %v6681_v10 = vsel %vm785_vm2, %v6676_v52, 0 }
0x11f0   : > { %v19522_v49 = vpop.eup %19521 }
0x11f1   : > { %v6032_v41 = vmul.f32 %v19522_v49, %v21782_v30  ;;  %18121 = vmatmul.mubr.msk.bf16.vlgmr.msra.gmra.mxu1 %vm785_vm2, %v6039_v46  ;;  %v6581_v30 = vsel %vm785_vm2, %v6576_v47, 0 }
0x11f2   : > { %18131 = vmatpush3.bf16.xpose.msra.mxu1 %v6481_v44  ;;  %18132 = vmatprep.mubr.msk.bf16.mxu1 %vm20148_vm1, %v20147_v15  ;;  %v6624_v0 = vpop.permute.xlu0 %6623  ;;  %v6674_v50 = vpop.permute.xlu1 %6673 }
0x11f3   : > { %v6040_v17 = vpack.c.bf16 %v6032_v41, %v6032_v41  ;;  %18142 = vmatprep.subr.bf16.mxu1 %v20147_v15 }
0x11f5   : > { %18127 = vmatmul.mubr.msk.bf16.vlgmr.msra.gmra.mxu0 %vm785_vm2, %v6040_v17 }
0x11f6   : > { %18137 = vmatpush3.bf16.xpose.msra.mxu0 %v6531_v57  ;;  %18138 = vmatprep.mubr.msk.bf16.mxu0 %vm20148_vm1, %v20147_v15  ;;  %v6726_v36 = vpop.permute.xlu0 %6725  ;;  %v6776_v24 = vpop.permute.xlu1 %6775 }
0x11f7   : > { %18148 = vmatprep.subr.bf16.mxu0 %v20147_v15  ;;  %v6731_v3 = vsel %vm785_vm2, %v6726_v36, 0  ;;  %v6781_v37 = vsel %vm785_vm2, %v6776_v24, 0 }
0x11f9   : > { %18133 = vmatmul.mubr.msk.bf16.vlgmr.msra.gmra.mxu1 %vm785_vm2, %v6474_v13 }
0x11fa   : > { %18143 = vmatpush3.bf16.xpose.msra.mxu1 %v6581_v30  ;;  %18144 = vmatprep.mubr.msk.bf16.mxu1 %vm20148_vm1, %v20147_v15  ;;  %v6724_v18 = vpop.permute.xlu0 %6723  ;;  %v6774_v34 = vpop.permute.xlu1 %6773 }
0x11fb   : > { %18154 = vmatprep.subr.bf16.mxu1 %v20147_v15 }
0x11fd   : > { %18139 = vmatmul.mubr.msk.bf16.vlgmr.msra.gmra.mxu0 %vm785_vm2, %v6524_v28 }
0x11fe   : > { %18149 = vmatpush3.bf16.xpose.msra.mxu0 %v6631_v31  ;;  %18150 = vmatprep.mubr.msk.bf16.mxu0 %vm20148_vm1, %v20147_v15  ;;  %v6826_v26 = vpop.permute.xlu0 %6825  ;;  %v6970_v4 = vpop.permute.xlu1 %6969 }
0x11ff   : > { %18160 = vmatprep.subr.bf16.mxu0 %v20147_v15  ;;  %v6831_v53 = vsel %vm785_vm2, %v6826_v26, 0  ;;  %v6975_v58 = vsel %vm1235_vm3, %v6970_v4, 0 }
0x1201   : > { %18145 = vmatmul.mubr.msk.bf16.vlgmr.msra.gmra.mxu1 %vm785_vm2, %v6574_v19 }
0x1202   : > { %18155 = vmatpush3.bf16.xpose.msra.mxu1 %v6681_v10  ;;  %18156 = vmatprep.mubr.msk.bf16.mxu1 %vm20148_vm1, %v20147_v15  ;;  %v6824_v43 = vpop.permute.xlu0 %6823 }
0x1203   : > { %18166 = vmatprep.subr.bf16.mxu1 %v20147_v15 }
0x1205   : > { %18151 = vmatmul.mubr.msk.bf16.vlgmr.msra.gmra.mxu0 %vm785_vm2, %v6624_v0 }
0x1206   : > { %18161 = vmatpush3.bf16.xpose.msra.mxu0 %v6731_v3  ;;  %18162 = vmatprep.mubr.msk.bf16.mxu0 %vm20148_vm1, %v20147_v15  ;;  %v7018_v8 = vpop.permute.xlu0 %7017 }
0x1207   : > { %18172 = vmatprep.subr.bf16.mxu0 %v20147_v15  ;;  %v7023_v40 = vsel %vm1235_vm3, %v7018_v8, 0 }
0x1209   : > { %18157 = vmatmul.mubr.msk.bf16.vlgmr.msra.gmra.mxu1 %vm785_vm2, %v6674_v50 }
0x120a   : > { %18167 = vmatpush3.bf16.xpose.msra.mxu1 %v6781_v37  ;;  %18168 = vmatprep.mubr.msk.bf16.mxu1 %vm20148_vm1, %v20147_v15 }
0x120b   : > { %18178 = vmatprep.subr.bf16.mxu1 %v20147_v15 }
0x120d   : > { %18163 = vmatmul.mubr.msk.bf16.vlgmr.msra.gmra.mxu0 %vm785_vm2, %v6724_v18 }
0x120e   : > { %18173 = vmatpush3.bf16.xpose.msra.mxu0 %v6831_v53  ;;  %18174 = vmatprep.mubr.msk.bf16.mxu0 %vm20148_vm1, %v20147_v15 }
0x120f   : > { %18184 = vmatprep.subr.bf16.mxu0 %v20147_v15 }
0x1211   : > { %18169 = vmatmul.mubr.msk.bf16.vlgmr.msra.gmra.mxu1 %vm785_vm2, %v6774_v34 }
0x1212   : > { %18179 = vmatpush3.bf16.msra.mxu1 %v6975_v58  ;;  %18180 = vmatprep.mubr.msk.bf16.mxu1 %vm20148_vm1, %v20147_v15 }
0x1213   : > { %18190 = vmatprep.subr.bf16.mxu1 %v20147_v15 }
0x1215   : > { %18175 = vmatmul.mubr.msk.bf16.vlgmr.msra.gmra.mxu0 %vm785_vm2, %v6824_v43 }
0x1216   : > { %18185 = vmatpush3.bf16.msra.mxu0 %v7023_v40  ;;  %18186 = vmatprep.mubr.msk.bf16.mxu0 %vm20148_vm1, %v20147_v15 }
0x1217   : > { %18196 = vmatprep.subr.bf16.mxu0 %v20147_v15 }
0x126c   : > { %v21917_v48 = vpop.f32.mrf.mxu1 }
0x126e   : > { %v18086_v61 = vpop.f32.mrf.mxu1 }
0x1270   : > { %v6086_v22 = vpop.f32.mrf.mxu1  ;;  %v21919_v32 = vpop.f32.mrf.mxu0 }
0x1272   : > { %v18087_v56 = vpop.f32.mrf.mxu1  ;;  %v18092_v9 = vpop.f32.mrf.mxu0 }
0x1274   : > { %v6134_v13 = vpop.f32.mrf.mxu0  ;;  %v21921_v60 = vpop.f32.mrf.mxu1 }
0x1276   : > { %v18093_v47 = vpop.f32.mrf.mxu0  ;;  %v18098_v28 = vpop.f32.mrf.mxu1 }
0x1278   : > { %v6182_v16 = vpop.f32.mrf.mxu1  ;;  %v21923_v29 = vpop.f32.mrf.mxu0 }
0x127a   : > { %v18099_v23 = vpop.f32.mrf.mxu1  ;;  %v18104_v46 = vpop.f32.mrf.mxu0 }
0x127c   : > { %v6230_v49 = vpop.f32.mrf.mxu0  ;;  %v21925_v19 = vpop.f32.mrf.mxu1 }
0x127e   : > { %v18105_v44 = vpop.f32.mrf.mxu0  ;;  %v18110_v41 = vpop.f32.mrf.mxu1 }
0x1280   : > { %v6278_v17 = vpop.f32.mrf.mxu1  ;;  %v21927_v0 = vpop.f32.mrf.mxu0 }
0x1282   : > { %v18111_v57 = vpop.f32.mrf.mxu1  ;;  %v18116_v52 = vpop.f32.mrf.mxu0 }
0x1284   : > { %v6326_v30 = vpop.f32.mrf.mxu0 }
0x1286   : > { %v18117_v36 = vpop.f32.mrf.mxu0 }
0x12b1   : > { %v21929_v50 = vpop.f32.mrf.mxu1 }
0x12b3   : > { %v18122_v31 = vpop.f32.mrf.mxu1 }
0x12b5   : > { %v6374_v18 = vpop.f32.mrf.mxu1  ;;  %v21931_v10 = vpop.f32.mrf.mxu0 }
0x12b7   : > { %v18123_v24 = vpop.f32.mrf.mxu1  ;;  %v18128_v3 = vpop.f32.mrf.mxu0 }
0x12b9   : > { %v6422_v26 = vpop.f32.mrf.mxu0  ;;  %v6517_v34 = vpop.f32.mrf.mxu1 }
0x12ba   : > { %v6873_v37 = vsel %vm785_vm2, %v6517_v34, -inf }
0x12bb   : > { %6874 = vmax.xlane.f32.xlu1 %v6873_v37  ;;  %v18129_v43 = vpop.f32.mrf.mxu0  ;;  %v18134_v53 = vpop.f32.mrf.mxu1 }
0x12bd   : > { %v6520_v4 = vpop.f32.mrf.mxu1  ;;  %v6567_v58 = vpop.f32.mrf.mxu0 }
0x12be   : > { %v6876_v8 = vsel %vm785_vm2, %v6567_v58, -inf }
0x12bf   : > { %v18135_v40 = vpop.f32.mrf.mxu1  ;;  %6877 = vmax.xlane.f32.xlu0 %v6876_v8  ;;  %v18140_v61 = vpop.f32.mrf.mxu0 }
0x12c1   : > { %v6570_v22 = vpop.f32.mrf.mxu0  ;;  %v6617_v56 = vpop.f32.mrf.mxu1 }
0x12c2   : > { %v6879_v9 = vsel %vm785_vm2, %v6617_v56, -inf }
0x12c3   : > { %v18146_v13 = vpop.f32.mrf.mxu1  ;;  %6880 = vmax.xlane.f32.xlu0 %v6879_v9  ;;  %v18141_v47 = vpop.f32.mrf.mxu0 }
0x12c4   : > { %v21948_v47 = vpop.permute.xlu1 %7065 }
0x12c5   : > { %v6620_v28 = vpop.f32.mrf.mxu1  ;;  %v6667_v16 = vpop.f32.mrf.mxu0 }
0x12c6   : > { %v6882_v23 = vsel %vm785_vm2, %v6667_v16, -inf }
0x12c7   : > { %v18147_v46 = vpop.f32.mrf.mxu1  ;;  %6883 = vmax.xlane.f32.xlu0 %v6882_v23  ;;  %v18152_v49 = vpop.f32.mrf.mxu0 }
0x12c8   : > { %v21950_v28 = vpop.permute.xlu1 %7113 }
0x12c9   : > { %v6670_v44 = vpop.f32.mrf.mxu0  ;;  %v6717_v41 = vpop.f32.mrf.mxu1 }
0x12ca   : > { %v6885_v17 = vsel %vm785_vm2, %v6717_v41, -inf }
0x12cb   : > { %6886 = vmax.xlane.f32.xlu1 %v6885_v17  ;;  %v18153_v57 = vpop.f32.mrf.mxu0  ;;  %v18158_v52 = vpop.f32.mrf.mxu1 }
0x12cc   : > { %v21952_v23 = vpop.permute.xlu1 %7161 }
0x12cd   : > { %v6720_v30 = vpop.f32.mrf.mxu1  ;;  %v6767_v36 = vpop.f32.mrf.mxu0 }
0x12ce   : > { %v6888_v31 = vsel %vm785_vm2, %v6767_v36, -inf }
0x12cf   : > { %v18159_v18 = vpop.f32.mrf.mxu1  ;;  %6889 = vmax.xlane.f32.xlu0 %v6888_v31  ;;  %v18164_v24 = vpop.f32.mrf.mxu0 }
0x12d1   : > { %v6770_v3 = vpop.f32.mrf.mxu0  ;;  %v21939_v26 = vpop.f32.mrf.mxu1 }
0x12d2   : > { %v6891_v37 = vsel %vm785_vm2, %v21939_v26, -inf }
0x12d3   : > { %6892 = vmax.xlane.f32.xlu1 %v6891_v37  ;;  %v18165_v43 = vpop.f32.mrf.mxu0  ;;  %v18170_v53 = vpop.f32.mrf.mxu1 }
0x12d5   : > { %v6820_v4 = vpop.f32.mrf.mxu1  ;;  %v6867_v8 = vpop.f32.mrf.mxu0 }
0x12d6   : > { %v6894_v40 = vsel %vm785_vm2, %v6867_v8, -inf }
0x12d7   : > { %v18171_v61 = vpop.f32.mrf.mxu1  ;;  %6895 = vmax.xlane.f32.xlu0 %v6894_v40  ;;  %v18176_v22 = vpop.f32.mrf.mxu0 }
0x12d9   : > { %v6870_v9 = vpop.f32.mrf.mxu0 }
0x12db   : > { %v18177_v13 = vpop.f32.mrf.mxu0 }
0x12e4   : > { %7257 = vrot.lane.b32.xlu1 %v21473_v39, %s20153_s22 }
0x12ed   : > { %7209 = vrot.lane.b32.xlu0 %v21467_v62, %s20153_s22 }
0x1344   : > { %v6875_v46 = vpop.xlane.xlu1 %6874 }
0x1345   : > { %v6897_v49 = vsub.f32 %v6517_v34, %v6875_v46 }
0x1347   : > { %v6905_v44 = vmul.f32 1.442695, %v6897_v49 }
0x1348   : > { %v6878_v17 = vpop.xlane.xlu0 %6877 }
0x1349   : > { %19523 = vpow2.f32 %v6905_v44  ;;  %v6898_v57 = vsub.f32 %v6567_v58, %v6878_v17 }
0x134b   : > { %v6907_v52 = vmul.f32 1.442695, %v6898_v57 }
0x134c   : > { %v6881_v30 = vpop.xlane.xlu0 %6880 }
0x134d   : > { %19525 = vpow2.f32 %v6907_v52  ;;  %v6899_v31 = vsub.f32 %v6617_v56, %v6881_v30 }
0x134f   : > { %v6909_v18 = vmul.f32 1.442695, %v6899_v31 }
0x1350   : > { %v6884_v24 = vpop.xlane.xlu0 %6883 }
0x1351   : > { %19527 = vpow2.f32 %v6909_v18  ;;  %v6900_v3 = vsub.f32 %v6667_v16, %v6884_v24 }
0x1353   : > { %v6911_v37 = vmul.f32 1.442695, %v6900_v3 }
0x1354   : > { %v6887_v43 = vpop.xlane.xlu1 %6886 }
0x1355   : > { %19529 = vpow2.f32 %v6911_v37  ;;  %v6901_v53 = vsub.f32 %v6717_v41, %v6887_v43 }
0x1356   : > { %v21954_v4 = vpop.eup %19523 }
0x1357   : > { %v6913_v40 = vmul.f32 1.442695, %v6901_v53  ;;  %v6921_v34 = vsel %vm785_vm2, %v21954_v4, 0.0 }
0x1358   : > { %6922 = vadd.xlane.f32.xlu1 %v6921_v34  ;;  %v6890_v58 = vpop.xlane.xlu0 %6889 }
0x1359   : > { %19531 = vpow2.f32 %v6913_v40  ;;  %v6902_v61 = vsub.f32 %v6767_v36, %v6890_v58 }
0x135a   : > { %v21958_v22 = vpop.eup %19525 }
0x135b   : > { %v6915_v56 = vmul.f32 1.442695, %v6902_v61  ;;  %v6924_v16 = vsel %vm785_vm2, %v21958_v22, 0.0 }
0x135c   : > { %6925 = vadd.xlane.f32.xlu0 %v6924_v16  ;;  %v6893_v57 = vpop.xlane.xlu1 %6892 }
0x135d   : > { %19533 = vpow2.f32 %v6915_v56  ;;  %v6903_v52 = vsub.f32 %v21939_v26, %v6893_v57  ;;  %v7119_v56 = vsel %vm1235_vm3, %v21950_v28, 0 }
0x135e   : > { %v21962_v9 = vpop.eup %19527 }
0x135f   : > { %v6927_v41 = vsel %vm785_vm2, %v21962_v9, 0.0  ;;  %v6917_v31 = vmul.f32 1.442695, %v6903_v52 }
0x1360   : > { %6928 = vadd.xlane.f32.xlu1 %v6927_v41  ;;  %v6896_v30 = vpop.xlane.xlu0 %6895  ;;  %v7167_v41 = vsel %vm1235_vm3, %v21952_v23, 0 }
0x1361   : > { %v6904_v18 = vsub.f32 %v6867_v8, %v6896_v30  ;;  %19535 = vpow2.f32 %v6917_v31 }
0x1362   : > { %v21966_v13 = vpop.eup %19529 }
0x1363   : > { %v6930_v46 = vsel %vm785_vm2, %v21966_v13, 0.0  ;;  %v6919_v24 = vmul.f32 1.442695, %v6904_v18 }
0x1364   : > { %6931 = vadd.xlane.f32.xlu0 %v6930_v46 }
0x1365   : > { %19537 = vpow2.f32 %v6919_v24 }
0x1366   : > { %v21970_v36 = vpop.eup %19531 }
0x1367   : > { %v6933_v49 = vsel %vm785_vm2, %v21970_v36, 0.0 }
0x1368   : > { %6934 = vadd.xlane.f32.xlu1 %v6933_v49 }
0x136a   : > { %v21974_v44 = vpop.eup %19533 }
0x136b   : > { %v6936_v17 = vsel %vm785_vm2, %v21974_v44, 0.0 }
0x136c   : > { %6937 = vadd.xlane.f32.xlu0 %v6936_v17 }
0x136e   : > { %v21983_v3 = vpop.eup %19535 }
0x136f   : > { %v6939_v37 = vsel %vm785_vm2, %v21983_v3, 0.0 }
0x1372   : > { %v21987_v43 = vpop.eup %19537 }
0x1373   : > { %v6942_v53 = vsel %vm785_vm2, %v21987_v43, 0.0 }
0x1379   : > { %7403 = vrot.lane.b32.xlu1 %v21392_v2, %s20154_s8 }
0x1382   : > { %7305 = vrot.lane.b32.xlu0 %v21485_v54, %s20153_s22 }
0x139d   : > { %6940 = vadd.xlane.f32.xlu1 %v6939_v37 }
0x13a1   : > { %6943 = vadd.xlane.f32.xlu0 %v6942_v53 }
0x13ae   : > { %7401 = vrot.lane.b32.xlu1 %v21414_v14, %s20154_s8  ;;  %v7210_v14 = vpop.permute.xlu0 %7209 }
0x13af   : > { %v7215_v49 = vsel %vm1235_vm3, %v7210_v14, 0 }
0x13b2   : > { %7503 = vrot.lane.b32.xlu1 %v21386_v27, %s20154_s8 }
0x13b6   : > { %7501 = vrot.lane.b32.xlu1 %v21407_v21, %s20154_s8  ;;  %v7258_v21 = vpop.permute.xlu1 %7257 }
0x13b7   : > { %7453 = vrot.lane.b32.xlu0 %v21405_v38, %s20154_s8  ;;  %v7263_v57 = vsel %vm1235_vm3, %v7258_v21, 0 }
0x13ba   : > { %7603 = vrot.lane.b32.xlu1 %v21455_v25, %s20154_s8 }
0x13bb   : > { %7451 = vrot.lane.b32.xlu0 %v21438_v1, %s20154_s8 }
0x13be   : > { %7601 = vrot.lane.b32.xlu1 %v21481_v55, %s20154_s8 }
0x13bf   : > { %7553 = vrot.lane.b32.xlu0 %v21412_v6, %s20154_s8 }
0x13c2   : > { %7703 = vrot.lane.b32.xlu1 %v21473_v39, %s20154_s8 }
0x13c3   : > { %7551 = vrot.lane.b32.xlu0 %v21448_v12, %s20154_s8 }
0x13c6   : > { %7701 = vrot.lane.b32.xlu1 %v21506_v42, %s20154_s8 }
0x13c7   : > { %7653 = vrot.lane.b32.xlu0 %v21467_v62, %s20154_s8 }
0x13ca   : > { %7897 = vrot.lane.b32.xlu1 %v21392_v2, %s20155_s2 }
0x13cb   : > { %7651 = vrot.lane.b32.xlu0 %v21497_v35, %s20154_s8 }
0x13cf   : > { %7753 = vrot.lane.b32.xlu0 %v21485_v54, %s20154_s8 }
0x13d3   : > { %7751 = vrot.lane.b32.xlu0 %v21514_v33, %s20154_s8  ;;  %v7071_v33 = vsel %vm1235_vm3, %v21948_v47, 0 }
0x13e1   : > { %v6923_v1 = vpop.xlane.xlu1 %6922 }
0x13e2   : > { %19539 = vrcp.f32 %v6923_v1 }
0x13e5   : > { %v6926_v12 = vpop.xlane.xlu0 %6925 }
0x13e6   : > { %19541 = vrcp.f32 %v6926_v12 }
0x13e9   : > { %v6929_v55 = vpop.xlane.xlu1 %6928 }
0x13ea   : > { %19543 = vrcp.f32 %v6929_v55 }
0x13ed   : > { %v6932_v42 = vpop.xlane.xlu0 %6931 }
0x13ee   : > { %19545 = vrcp.f32 %v6932_v42 }
0x13ef   : > { %v19540_v2 = vpop.eup %19539 }
0x13f0   : > { %v6953_v26 = vmul.f32 %v19540_v2, %v21954_v4 }
0x13f1   : > { %v6935_v35 = vpop.xlane.xlu1 %6934 }
0x13f2   : > { %v6961_v8 = vpack.c.bf16 %v6953_v26, %v6953_v26  ;;  %19547 = vrcp.f32 %v6935_v35 }
0x13f3   : > { %v19542_v40 = vpop.eup %19541 }
0x13f4   : > { %v6954_v34 = vmul.f32 %v19542_v40, %v21958_v22  ;;  %18181 = vmatmul.mubr.msk.bf16.vlgmr.msra.gmra.mxu1 %vm785_vm2, %v6961_v8 }
0x13f5   : > { %18191 = vmatpush3.bf16.msra.mxu1 %v7071_v33  ;;  %v6938_v58 = vpop.xlane.xlu0 %6937  ;;  %18192 = vmatprep.mubr.msk.bf16.mxu1 %vm20148_vm1, %v20147_v15 }
0x13f6   : > { %v6962_v61 = vpack.c.bf16 %v6954_v34, %v6954_v34  ;;  %19549 = vrcp.f32 %v6938_v58  ;;  %18202 = vmatprep.subr.bf16.mxu1 %v20147_v15 }
0x13f7   : > { %v19544_v4 = vpop.eup %19543 }
0x13f8   : > { %v6955_v16 = vmul.f32 %v19544_v4, %v21962_v9  ;;  %18187 = vmatmul.mubr.msk.bf16.vlgmr.msra.gmra.mxu0 %vm785_vm2, %v6962_v61 }
0x13f9   : > { %18197 = vmatpush3.bf16.msra.mxu0 %v7119_v56  ;;  %18198 = vmatprep.mubr.msk.bf16.mxu0 %vm20148_vm1, %v20147_v15  ;;  %v7306_v30 = vpop.permute.xlu0 %7305 }
0x13fa   : > { %v6963_v47 = vpack.c.bf16 %v6955_v16, %v6955_v16  ;;  %18208 = vmatprep.subr.bf16.mxu0 %v20147_v15  ;;  %v7311_v31 = vsel %vm1235_vm3, %v7306_v30, 0 }
0x13fb   : > { %v19546_v22 = vpop.eup %19545 }
0x13fc   : > { %v6956_v46 = vmul.f32 %v19546_v22, %v21966_v13  ;;  %18193 = vmatmul.mubr.msk.bf16.vlgmr.msra.gmra.mxu1 %vm785_vm2, %v6963_v47 }
0x13fd   : > { %18203 = vmatpush3.bf16.msra.mxu1 %v7167_v41  ;;  %18204 = vmatprep.mubr.msk.bf16.mxu1 %vm20148_vm1, %v20147_v15 }
0x13fe   : > { %v6964_v28 = vpack.c.bf16 %v6956_v46, %v6956_v46  ;;  %18214 = vmatprep.subr.bf16.mxu1 %v20147_v15 }
0x13ff   : > { %v19548_v9 = vpop.eup %19547 }
0x1400   : > { %v6957_v17 = vmul.f32 %v19548_v9, %v21970_v36  ;;  %18199 = vmatmul.mubr.msk.bf16.vlgmr.msra.gmra.mxu0 %vm785_vm2, %v6964_v28 }
0x1401   : > { %18209 = vmatpush3.bf16.msra.mxu0 %v7215_v49  ;;  %18210 = vmatprep.mubr.msk.bf16.mxu0 %vm20148_vm1, %v20147_v15 }
0x1402   : > { %v6965_v23 = vpack.c.bf16 %v6957_v17, %v6957_v17  ;;  %18220 = vmatprep.subr.bf16.mxu0 %v20147_v15 }
0x1403   : > { %v19550_v13 = vpop.eup %19549 }
0x1404   : > { %v6958_v52 = vmul.f32 %v19550_v13, %v21974_v44  ;;  %18205 = vmatmul.mubr.msk.bf16.vlgmr.msra.gmra.mxu1 %vm785_vm2, %v6965_v23  ;;  %v7404_v44 = vpop.permute.xlu1 %7403 }
0x1405   : > { %18215 = vmatpush3.bf16.msra.mxu1 %v7263_v57  ;;  %18216 = vmatprep.mubr.msk.bf16.mxu1 %vm20148_vm1, %v20147_v15  ;;  %v7409_v26 = vsel %vm785_vm2, %v7404_v44, 0 }
0x1406   : > { %v6966_v36 = vpack.c.bf16 %v6958_v52, %v6958_v52  ;;  %18226 = vmatprep.subr.bf16.mxu1 %v20147_v15 }
0x1408   : > { %18211 = vmatmul.mubr.msk.bf16.vlgmr.msra.gmra.mxu0 %vm785_vm2, %v6966_v36 }
0x1409   : > { %18221 = vmatpush3.bf16.msra.mxu0 %v7311_v31  ;;  %18222 = vmatprep.mubr.msk.bf16.mxu0 %vm20148_vm1, %v20147_v15 }
0x140a   : > { %18232 = vmatprep.subr.bf16.mxu0 %v20147_v15 }
0x1426   : > { %v6941_v18 = vpop.xlane.xlu1 %6940 }
0x1427   : > { %19551 = vrcp.f32 %v6941_v18 }
0x142a   : > { %v6944_v24 = vpop.xlane.xlu0 %6943  ;;  %v7402_v37 = vpop.permute.xlu1 %7401 }
0x142b   : > { %19553 = vrcp.f32 %v6944_v24 }
0x142e   : > { %v7454_v53 = vpop.permute.xlu0 %7453  ;;  %v7504_v21 = vpop.permute.xlu1 %7503 }
0x142f   : > { %v7459_v33 = vsel %vm785_vm2, %v7454_v53, 0  ;;  %v7509_v34 = vsel %vm785_vm2, %v7504_v21, 0 }
0x1432   : > { %v7452_v1 = vpop.permute.xlu0 %7451  ;;  %v7502_v2 = vpop.permute.xlu1 %7501 }
0x1434   : > { %v19552_v14 = vpop.eup %19551 }
0x1435   : > { %v6959_v12 = vmul.f32 %v19552_v14, %v21983_v3 }
0x1436   : > { %v7554_v8 = vpop.permute.xlu0 %7553  ;;  %v7604_v3 = vpop.permute.xlu1 %7603 }
0x1437   : > { %v6967_v55 = vpack.c.bf16 %v6959_v12, %v6959_v12  ;;  %v7559_v61 = vsel %vm785_vm2, %v7554_v8, 0  ;;  %v7609_v56 = vsel %vm785_vm2, %v7604_v3, 0 }
0x1438   : > { %v19554_v42 = vpop.eup %19553 }
0x1439   : > { %v6960_v35 = vmul.f32 %v19554_v42, %v21987_v43  ;;  %18217 = vmatmul.mubr.msk.bf16.vlgmr.msra.gmra.mxu1 %vm785_vm2, %v6967_v55 }
0x143a   : > { %18227 = vmatpush3.bf16.xpose.msra.mxu1 %v7409_v26  ;;  %18228 = vmatprep.mubr.msk.bf16.mxu1 %vm20148_vm1, %v20147_v15  ;;  %v7552_v43 = vpop.permute.xlu0 %7551  ;;  %v7602_v58 = vpop.permute.xlu1 %7601 }
0x143b   : > { %v6968_v40 = vpack.c.bf16 %v6960_v35, %v6960_v35  ;;  %18238 = vmatprep.subr.bf16.mxu1 %v20147_v15 }
0x143d   : > { %18223 = vmatmul.mubr.msk.bf16.vlgmr.msra.gmra.mxu0 %vm785_vm2, %v6968_v40 }
0x143e   : > { %18233 = vmatpush3.bf16.xpose.msra.mxu0 %v7459_v33  ;;  %18234 = vmatprep.mubr.msk.bf16.mxu0 %vm20148_vm1, %v20147_v15  ;;  %v7654_v4 = vpop.permute.xlu0 %7653  ;;  %v7704_v16 = vpop.permute.xlu1 %7703 }
0x143f   : > { %18244 = vmatprep.subr.bf16.mxu0 %v20147_v15  ;;  %v7659_v22 = vsel %vm785_vm2, %v7654_v4, 0  ;;  %v7709_v46 = vsel %vm785_vm2, %v7704_v16, 0 }
0x1441   : > { %18229 = vmatmul.mubr.msk.bf16.vlgmr.msra.gmra.mxu1 %vm785_vm2, %v7402_v37 }
0x1442   : > { %18239 = vmatpush3.bf16.xpose.msra.mxu1 %v7509_v34  ;;  %18240 = vmatprep.mubr.msk.bf16.mxu1 %vm20148_vm1, %v20147_v15  ;;  %v7652_v47 = vpop.permute.xlu0 %7651  ;;  %v7702_v41 = vpop.permute.xlu1 %7701 }
0x1443   : > { %18250 = vmatprep.subr.bf16.mxu1 %v20147_v15 }
0x1445   : > { %18235 = vmatmul.mubr.msk.bf16.vlgmr.msra.gmra.mxu0 %vm785_vm2, %v7452_v1 }
0x1446   : > { %18245 = vmatpush3.bf16.xpose.msra.mxu0 %v7559_v61  ;;  %18246 = vmatprep.mubr.msk.bf16.mxu0 %vm20148_vm1, %v20147_v15  ;;  %v7754_v28 = vpop.permute.xlu0 %7753  ;;  %v7898_v49 = vpop.permute.xlu1 %7897 }
0x1447   : > { %18256 = vmatprep.subr.bf16.mxu0 %v20147_v15  ;;  %v7759_v9 = vsel %vm785_vm2, %v7754_v28, 0  ;;  %v7903_v17 = vsel %vm1235_vm3, %v7898_v49, 0 }
0x1449   : > { %18241 = vmatmul.mubr.msk.bf16.vlgmr.msra.gmra.mxu1 %vm785_vm2, %v7502_v2 }
0x144a   : > { %18251 = vmatpush3.bf16.xpose.msra.mxu1 %v7609_v56  ;;  %18252 = vmatprep.mubr.msk.bf16.mxu1 %vm20148_vm1, %v20147_v15  ;;  %v7752_v23 = vpop.permute.xlu0 %7751 }
0x144b   : > { %18262 = vmatprep.subr.bf16.mxu1 %v20147_v15 }
0x144d   : > { %18247 = vmatmul.mubr.msk.bf16.vlgmr.msra.gmra.mxu0 %vm785_vm2, %v7552_v43 }
0x144e   : > { %18257 = vmatpush3.bf16.xpose.msra.mxu0 %v7659_v22  ;;  %18258 = vmatprep.mubr.msk.bf16.mxu0 %vm20148_vm1, %v20147_v15 }
0x144f   : > { %18268 = vmatprep.subr.bf16.mxu0 %v20147_v15 }
0x1451   : > { %18253 = vmatmul.mubr.msk.bf16.vlgmr.msra.gmra.mxu1 %vm785_vm2, %v7602_v58 }
0x1452   : > { %18263 = vmatpush3.bf16.xpose.msra.mxu1 %v7709_v46  ;;  %18264 = vmatprep.mubr.msk.bf16.mxu1 %vm20148_vm1, %v20147_v15 }
0x1453   : > { %18274 = vmatprep.subr.bf16.mxu1 %v20147_v15 }
0x1455   : > { %18259 = vmatmul.mubr.msk.bf16.vlgmr.msra.gmra.mxu0 %vm785_vm2, %v7652_v47 }
0x1456   : > { %18269 = vmatpush3.bf16.xpose.msra.mxu0 %v7759_v9  ;;  %18270 = vmatprep.mubr.msk.bf16.mxu0 %vm20148_vm1, %v20147_v15 }
0x1457   : > { %18280 = vmatprep.subr.bf16.mxu0 %v20147_v15 }
0x1459   : > { %18265 = vmatmul.mubr.msk.bf16.vlgmr.msra.gmra.mxu1 %vm785_vm2, %v7702_v41 }
0x145a   : > { %18275 = vmatpush3.bf16.msra.mxu1 %v7903_v17  ;;  %18276 = vmatprep.mubr.msk.bf16.mxu1 %vm20148_vm1, %v20147_v15 }
0x145b   : > { %18286 = vmatprep.subr.bf16.mxu1 %v20147_v15 }
0x145d   : > { %18271 = vmatmul.mubr.msk.bf16.vlgmr.msra.gmra.mxu0 %vm785_vm2, %v7752_v23 }
0x145e   : > { %18282 = vmatprep.mubr.msk.bf16.mxu0 %vm20148_vm1, %v20147_v15 }
0x14b4   : > { %v22112_v13 = vpop.f32.mrf.mxu1 }
0x14b6   : > { %v18182_v57 = vpop.f32.mrf.mxu1 }
0x14b8   : > { %v7014_v52 = vpop.f32.mrf.mxu1  ;;  %v22114_v30 = vpop.f32.mrf.mxu0 }
0x14ba   : > { %v18183_v36 = vpop.f32.mrf.mxu1  ;;  %v18188_v31 = vpop.f32.mrf.mxu0 }
0x14bc   : > { %v7062_v44 = vpop.f32.mrf.mxu0  ;;  %v22116_v18 = vpop.f32.mrf.mxu1 }
0x14be   : > { %v18189_v24 = vpop.f32.mrf.mxu0  ;;  %v18194_v37 = vpop.f32.mrf.mxu1 }
0x14c0   : > { %v7110_v53 = vpop.f32.mrf.mxu1  ;;  %v22118_v21 = vpop.f32.mrf.mxu0 }
0x14c2   : > { %v18195_v14 = vpop.f32.mrf.mxu1  ;;  %v18200_v1 = vpop.f32.mrf.mxu0 }
0x14c4   : > { %v7158_v12 = vpop.f32.mrf.mxu0  ;;  %v22120_v55 = vpop.f32.mrf.mxu1 }
0x14c6   : > { %v18201_v42 = vpop.f32.mrf.mxu0  ;;  %v18206_v2 = vpop.f32.mrf.mxu1 }
0x14c8   : > { %v7206_v26 = vpop.f32.mrf.mxu1  ;;  %v22122_v35 = vpop.f32.mrf.mxu0 }
0x14ca   : > { %v18207_v8 = vpop.f32.mrf.mxu1  ;;  %v18212_v40 = vpop.f32.mrf.mxu0 }
0x14cc   : > { %v7254_v33 = vpop.f32.mrf.mxu0 }
0x14ce   : > { %v18213_v3 = vpop.f32.mrf.mxu0 }
0x14f9   : > { %v22124_v43 = vpop.f32.mrf.mxu1 }
0x14fb   : > { %v18218_v34 = vpop.f32.mrf.mxu1 }
0x14fd   : > { %v7302_v58 = vpop.f32.mrf.mxu1  ;;  %v22126_v61 = vpop.f32.mrf.mxu0 }
0x14ff   : > { %v18219_v4 = vpop.f32.mrf.mxu1  ;;  %v18224_v56 = vpop.f32.mrf.mxu0 }
0x1501   : > { %v7350_v16 = vpop.f32.mrf.mxu0  ;;  %v7445_v47 = vpop.f32.mrf.mxu1 }
0x1502   : > { %v7801_v22 = vsel %vm785_vm2, %v7445_v47, -inf }
0x1503   : > { %7802 = vmax.xlane.f32.xlu1 %v7801_v22  ;;  %v18225_v41 = vpop.f32.mrf.mxu0  ;;  %v18230_v46 = vpop.f32.mrf.mxu1 }
0x1505   : > { %v7448_v28 = vpop.f32.mrf.mxu1  ;;  %v7495_v9 = vpop.f32.mrf.mxu0 }
0x1506   : > { %v7804_v49 = vsel %vm785_vm2, %v7495_v9, -inf }
0x1507   : > { %v18231_v17 = vpop.f32.mrf.mxu1  ;;  %7805 = vmax.xlane.f32.xlu0 %v7804_v49  ;;  %v18236_v23 = vpop.f32.mrf.mxu0 }
0x1509   : > { %v7498_v57 = vpop.f32.mrf.mxu0  ;;  %v22130_v52 = vpop.f32.mrf.mxu1 }
0x150a   : > { %v7807_v36 = vsel %vm785_vm2, %v22130_v52, -inf }
0x150b   : > { %v18242_v31 = vpop.f32.mrf.mxu1  ;;  %7808 = vmax.xlane.f32.xlu0 %v7807_v36  ;;  %v18237_v44 = vpop.f32.mrf.mxu0 }
0x150d   : > { %v7548_v24 = vpop.f32.mrf.mxu1  ;;  %v7595_v37 = vpop.f32.mrf.mxu0 }
0x150e   : > { %v7810_v53 = vsel %vm785_vm2, %v7595_v37, -inf }
0x150f   : > { %v18243_v14 = vpop.f32.mrf.mxu1  ;;  %7811 = vmax.xlane.f32.xlu0 %v7810_v53  ;;  %v18248_v1 = vpop.f32.mrf.mxu0 }
0x1511   : > { %v7598_v12 = vpop.f32.mrf.mxu0  ;;  %v22135_v42 = vpop.f32.mrf.mxu1 }
0x1512   : > { %v7813_v2 = vsel %vm785_vm2, %v22135_v42, -inf }
0x1513   : > { %7814 = vmax.xlane.f32.xlu1 %v7813_v2  ;;  %v18249_v26 = vpop.f32.mrf.mxu0  ;;  %v18254_v8 = vpop.f32.mrf.mxu1 }
0x1515   : > { %v7648_v40 = vpop.f32.mrf.mxu1  ;;  %v22139_v33 = vpop.f32.mrf.mxu0 }
0x1516   : > { %v7816_v3 = vsel %vm785_vm2, %v22139_v33, -inf }
0x1517   : > { %v18255_v34 = vpop.f32.mrf.mxu1  ;;  %7817 = vmax.xlane.f32.xlu0 %v7816_v3  ;;  %v18260_v58 = vpop.f32.mrf.mxu0 }
0x1519   : > { %v7698_v4 = vpop.f32.mrf.mxu0  ;;  %v7745_v56 = vpop.f32.mrf.mxu1 }
0x151a   : > { %v7819_v16 = vsel %vm785_vm2, %v7745_v56, -inf }
0x151b   : > { %7820 = vmax.xlane.f32.xlu1 %v7819_v16  ;;  %v18261_v22 = vpop.f32.mrf.mxu0  ;;  %v18266_v41 = vpop.f32.mrf.mxu1 }
0x151d   : > { %v7748_v46 = vpop.f32.mrf.mxu1  ;;  %v7795_v28 = vpop.f32.mrf.mxu0 }
0x151e   : > { %v7822_v49 = vsel %vm785_vm2, %v7795_v28, -inf }
0x151f   : > { %v18267_v17 = vpop.f32.mrf.mxu1  ;;  %7823 = vmax.xlane.f32.xlu0 %v7822_v49  ;;  %v18272_v23 = vpop.f32.mrf.mxu0 }
0x1521   : > { %v7798_v57 = vpop.f32.mrf.mxu0 }
0x1523   : > { %v18273_v36 = vpop.f32.mrf.mxu0 }
0x152c   : > { %7993 = vrot.lane.b32.xlu1 %v21386_v27, %s20155_s2 }
0x1530   : > { %8041 = vrot.lane.b32.xlu1 %v21412_v6, %s20155_s2 }
0x1535   : > { %7945 = vrot.lane.b32.xlu0 %v21405_v38, %s20155_s2 }
0x158c   : > { %v7803_v31 = vpop.xlane.xlu1 %7802 }
0x158d   : > { %v7825_v44 = vsub.f32 %v7445_v47, %v7803_v31 }
0x158f   : > { %v7833_v24 = vmul.f32 1.442695, %v7825_v44 }
0x1590   : > { %v7806_v53 = vpop.xlane.xlu0 %7805 }
0x1591   : > { %19555 = vpow2.f32 %v7833_v24  ;;  %v7826_v14 = vsub.f32 %v7495_v9, %v7806_v53 }
0x1593   : > { %v7835_v1 = vmul.f32 1.442695, %v7826_v14 }
0x1594   : > { %v7809_v12 = vpop.xlane.xlu0 %7808 }
0x1595   : > { %19557 = vpow2.f32 %v7835_v1  ;;  %v7827_v4 = vsub.f32 %v22130_v52, %v7809_v12 }
0x1597   : > { %v7837_v22 = vmul.f32 1.442695, %v7827_v4 }
0x1598   : > { %v7812_v2 = vpop.xlane.xlu0 %7811 }
0x1599   : > { %v7828_v26 = vsub.f32 %v7595_v37, %v7812_v2 }
0x159b   : > { %v7839_v8 = vmul.f32 1.442695, %v7828_v26 }
0x159c   : > { %v7815_v16 = vpop.xlane.xlu1 %7814 }
0x159d   : > { %19559 = vpow2.f32 %v7839_v8  ;;  %v7829_v41 = vsub.f32 %v22135_v42, %v7815_v16 }
0x159e   : > { %v22151_v27 = vpop.eup %19555  ;;  %19561 = vpow2.f32 %v7837_v22 }
0x159f   : > { %v7849_v6 = vsel %vm785_vm2, %v22151_v27, 0.0  ;;  %v7841_v49 = vmul.f32 1.442695, %v7829_v41 }
0x15a0   : > { %7850 = vadd.xlane.f32.xlu1 %v7849_v6  ;;  %v7818_v40 = vpop.xlane.xlu0 %7817 }
0x15a1   : > { %19563 = vpow2.f32 %v7841_v49  ;;  %v7830_v23 = vsub.f32 %v22139_v33, %v7818_v40 }
0x15a2   : > { %v22155_v38 = vpop.eup %19557 }
0x15a3   : > { %v7852_v47 = vsel %vm785_vm2, %v22155_v38, 0.0  ;;  %v7843_v36 = vmul.f32 1.442695, %v7830_v23 }
0x15a4   : > { %7853 = vadd.xlane.f32.xlu0 %v7852_v47  ;;  %v7821_v46 = vpop.xlane.xlu1 %7820 }
0x15a5   : > { %v7831_v17 = vsub.f32 %v7745_v56, %v7821_v46 }
0x15a7   : > { %v7845_v57 = vmul.f32 1.442695, %v7831_v17 }
0x15a8   : > { %v7824_v9 = vpop.xlane.xlu0 %7823 }
0x15a9   : > { %19565 = vpow2.f32 %v7845_v57 }
0x15aa   : > { %v22159_v3 = vpop.eup %19559  ;;  %19567 = vpow2.f32 %v7843_v36 }
0x15ab   : > { %v7858_v37 = vsel %vm785_vm2, %v22159_v3, 0.0  ;;  %v22172_v31 = vpop.eup %19561 }
0x15ac   : > { %7859 = vadd.xlane.f32.xlu0 %v7858_v37  ;;  %v7946_v34 = vpop.permute.xlu0 %7945  ;;  %v7855_v42 = vsel %vm785_vm2, %v22172_v31, 0.0 }
0x15ad   : > { %v7951_v58 = vsel %vm1235_vm3, %v7946_v34, 0 }
0x15ae   : > { %18281 = vmatpush3.bf16.msra.mxu0 %v7951_v58  ;;  %v22176_v44 = vpop.eup %19563 }
0x15af   : > { %18292 = vmatprep.subr.bf16.mxu0 %v20147_v15 }
0x15b1   : > { %8089 = vrot.lane.b32.xlu1 %v21455_v25, %s20155_s2  ;;  %v7832_v25 = vsub.f32 %v7795_v28, %v7824_v9 }
0x15b3   : > { %v7847_v52 = vmul.f32 1.442695, %v7832_v25 }
0x15b5   : > { %19569 = vpow2.f32 %v7847_v52 }
0x15b6   : > { %v22180_v56 = vpop.eup %19565 }
0x15b7   : > { %v7867_v33 = vsel %vm785_vm2, %v22180_v56, 0.0  ;;  %v22184_v28 = vpop.eup %19567 }
0x15b8   : > { %v7864_v24 = vsel %vm785_vm2, %v22184_v28, 0.0 }
0x15c2   : > { %8137 = vrot.lane.b32.xlu0 %v21467_v62, %s20155_s2  ;;  %v7861_v62 = vsel %vm785_vm2, %v22176_v44, 0.0  ;;  %v22188_v53 = vpop.eup %19569 }
0x15c3   : > { %v7870_v14 = vsel %vm785_vm2, %v22188_v53, 0.0 }
0x15d5   : > { %7856 = vadd.xlane.f32.xlu1 %v7855_v42 }
0x15d9   : > { %7862 = vadd.xlane.f32.xlu1 %v7861_v62 }
0x15dd   : > { %7868 = vadd.xlane.f32.xlu1 %v7867_v33 }
0x15e1   : > { %7865 = vadd.xlane.f32.xlu0 %v7864_v24 }
0x15e5   : > { %7871 = vadd.xlane.f32.xlu0 %v7870_v14 }
0x15ee   : > { %8185 = vrot.lane.b32.xlu1 %v21473_v39, %s20155_s2  ;;  %v7994_v39 = vpop.permute.xlu1 %7993 }
0x15f2   : > { %6433 = vrot.lane.b32.xlu1 %v21917_v48, %s20156_s12 }
0x15f6   : > { %6437 = vrot.lane.b32.xlu1 %v21921_v60, %s20156_s12 }
0x15fa   : > { %7361 = vrot.lane.b32.xlu1 %v22112_v13, %s20157_s24 }
0x15fb   : > { %8233 = vrot.lane.b32.xlu0 %v21485_v54, %s20155_s2  ;;  %v8042_v54 = vpop.permute.xlu1 %8041 }
0x15fe   : > { %7365 = vrot.lane.b32.xlu1 %v22116_v18, %s20157_s24  ;;  %v8047_v18 = vsel %vm1235_vm3, %v8042_v54, 0 }
0x15ff   : > { %6435 = vrot.lane.b32.xlu0 %v21919_v32, %s20156_s12 }
0x1602   : > { %6441 = vrot.lane.b32.xlu1 %v21925_v19, %s20156_s12 }
0x1603   : > { %6439 = vrot.lane.b32.xlu0 %v21923_v29, %s20156_s12 }
0x1606   : > { %6445 = vrot.lane.b32.xlu1 %v21929_v50, %s20156_s12 }
0x1607   : > { %7363 = vrot.lane.b32.xlu0 %v22114_v30, %s20157_s24  ;;  %v7999_v30 = vsel %vm1235_vm3, %v7994_v39, 0 }
0x160b   : > { %7367 = vrot.lane.b32.xlu0 %v22118_v21, %s20157_s24 }
0x160f   : > { %6443 = vrot.lane.b32.xlu0 %v21927_v0, %s20156_s12 }
0x1613   : > { %6447 = vrot.lane.b32.xlu0 %v21931_v10, %s20156_s12 }
0x1629   : > { %v7851_v48 = vpop.xlane.xlu1 %7850 }
0x162a   : > { %19571 = vrcp.f32 %v7851_v48 }
0x162d   : > { %v7854_v32 = vpop.xlane.xlu0 %7853  ;;  %v8090_v8 = vpop.permute.xlu1 %8089 }
0x162e   : > { %19573 = vrcp.f32 %v7854_v32  ;;  %v8095_v22 = vsel %vm1235_vm3, %v8090_v8, 0 }
0x1635   : > { %v7860_v60 = vpop.xlane.xlu0 %7859 }
0x1636   : > { %19575 = vrcp.f32 %v7860_v60 }
0x1637   : > { %v19572_v29 = vpop.eup %19571 }
0x1638   : > { %v7881_v19 = vmul.f32 %v19572_v29, %v22151_v27 }
0x1639   : > { %v8138_v12 = vpop.permute.xlu0 %8137 }
0x163a   : > { %v7889_v50 = vpack.c.bf16 %v7881_v19, %v7881_v19  ;;  %v8143_v26 = vsel %vm1235_vm3, %v8138_v12, 0 }
0x163b   : > { %v19574_v13 = vpop.eup %19573 }
0x163c   : > { %v7882_v0 = vmul.f32 %v19574_v13, %v22155_v38  ;;  %18277 = vmatmul.mubr.msk.bf16.vlgmr.msra.gmra.mxu1 %vm785_vm2, %v7889_v50 }
0x163d   : > { %18287 = vmatpush3.bf16.msra.mxu1 %v7999_v30  ;;  %18288 = vmatprep.mubr.msk.bf16.mxu1 %vm20148_vm1, %v20147_v15 }
0x163e   : > { %v7890_v10 = vpack.c.bf16 %v7882_v0, %v7882_v0  ;;  %18298 = vmatprep.subr.bf16.mxu1 %v20147_v15 }
0x1640   : > { %18283 = vmatmul.mubr.msk.bf16.vlgmr.msra.gmra.mxu0 %vm785_vm2, %v7890_v10 }
0x1641   : > { %18293 = vmatpush3.bf16.msra.mxu0 %v8047_v18  ;;  %18294 = vmatprep.mubr.msk.bf16.mxu0 %vm20148_vm1, %v20147_v15 }
0x1642   : > { %18304 = vmatprep.subr.bf16.mxu0 %v20147_v15 }
0x1643   : > { %v19576_v21 = vpop.eup %19575 }
0x1644   : > { %v7884_v1 = vmul.f32 %v19576_v21, %v22159_v3 }
0x1646   : > { %v7892_v2 = vpack.c.bf16 %v7884_v1, %v7884_v1 }
0x1648   : > { %18295 = vmatmul.mubr.msk.bf16.vlgmr.msra.gmra.mxu0 %vm785_vm2, %v7892_v2 }
0x1649   : > { %18305 = vmatpush3.bf16.msra.mxu0 %v8143_v26  ;;  %18306 = vmatprep.mubr.msk.bf16.mxu0 %vm20148_vm1, %v20147_v15 }
0x164a   : > { %18316 = vmatprep.subr.bf16.mxu0 %v20147_v15 }
0x165e   : > { %v7857_v27 = vpop.xlane.xlu1 %7856 }
0x165f   : > { %19577 = vrcp.f32 %v7857_v27 }
0x1662   : > { %v7863_v6 = vpop.xlane.xlu1 %7862 }
0x1663   : > { %19579 = vrcp.f32 %v7863_v6 }
0x1666   : > { %v7869_v38 = vpop.xlane.xlu1 %7868 }
0x1667   : > { %19581 = vrcp.f32 %v7869_v38 }
0x166a   : > { %v8186_v47 = vpop.permute.xlu1 %8185  ;;  %v7866_v40 = vpop.xlane.xlu0 %7865 }
0x166b   : > { %19583 = vrcp.f32 %v7866_v40  ;;  %v8191_v62 = vsel %vm1235_vm3, %v8186_v47, 0 }
0x166c   : > { %v19578_v9 = vpop.eup %19577 }
0x166d   : > { %v7883_v3 = vmul.f32 %v19578_v9, %v22172_v31 }
0x166e   : > { %v6434_v37 = vpop.permute.xlu1 %6433  ;;  %v7872_v34 = vpop.xlane.xlu0 %7871 }
0x166f   : > { %v7891_v58 = vpack.c.bf16 %v7883_v3, %v7883_v3  ;;  %v6457_v4 = vadd.f32 %v6434_v37, %v21390_v59  ;;  %19585 = vrcp.f32 %v7872_v34 }
0x1670   : > { %v19580_v16 = vpop.eup %19579 }
0x1671   : > { %6465 = vst.msk [vmem:[#allocation3] sm:$0xff] %vm2524_vm4, %v6457_v4  ;;  %18289 = vmatmul.mubr.msk.bf16.vlgmr.msra.gmra.mxu1 %vm785_vm2, %v7891_v58  ;;  %v7885_v49 = vmul.f32 %v19580_v16, %v22176_v44  ;;  %v19317_v4 = vld [vmem:[#allocation16 + $0x8] sm:$0xff]   ;;  %v19318_v16 = vld [vmem:[#allocation16] sm:$0xff]  }
0x1672   : > { %18299 = vmatpush3.bf16.msra.mxu1 %v8095_v22  ;;  %v6438_v41 = vpop.permute.xlu1 %6437  ;;  %v8234_v46 = vpop.permute.xlu0 %8233  ;;  %18300 = vmatprep.mubr.msk.bf16.mxu1 %vm20148_vm1, %v20147_v15 }
0x1673   : > { %v6459_v17 = vadd.f32 %v6438_v41, %v21384_v11  ;;  %18310 = vmatprep.subr.bf16.mxu1 %v20147_v15  ;;  %v7893_v25 = vpack.c.bf16 %v7885_v49, %v7885_v49  ;;  %v8239_v32 = vsel %vm1235_vm3, %v8234_v46, 0 }
0x1674   : > { %v19582_v36 = vpop.eup %19581 }
0x1675   : > { %6467 = vst.msk [vmem:[#allocation3 + $0x10] sm:$0xff] %vm2524_vm4, %v6459_v17  ;;  %v7887_v14 = vmul.f32 %v19582_v36, %v22180_v56 }
0x1676   : > { %v7362_v23 = vpop.permute.xlu1 %7361  ;;  %v6436_v57 = vpop.permute.xlu0 %6435 }
0x1677   : > { %v7385_v52 = vadd.f32 %v7362_v23, %v21390_v59  ;;  %v6458_v31 = vadd.f32 %v6436_v57, %v21419_v5  ;;  %v7895_v56 = vpack.c.bf16 %v7887_v14, %v7887_v14 }
0x1678   : > { %v19584_v42 = vpop.eup %19583 }
0x1679   : > { %v7886_v33 = vmul.f32 %v19584_v42, %v22184_v28  ;;  %7393 = vst.msk [vmem:[#allocation3] sm:$0xff] %vm3418_vm5, %v7385_v52  ;;  %18301 = vmatmul.mubr.msk.bf16.vlgmr.msra.gmra.mxu1 %vm785_vm2, %v7893_v25 }
0x167a   : > { %6466 = vst.msk [vmem:[#allocation3 + $0x8] sm:$0xff] %vm2524_vm4, %v6458_v31  ;;  %18311 = vmatpush3.bf16.msra.mxu1 %v8191_v62  ;;  %v7366_v44 = vpop.permute.xlu1 %7365  ;;  %v6440_v24 = vpop.permute.xlu0 %6439  ;;  %18312 = vmatprep.mubr.msk.bf16.mxu1 %vm20148_vm1, %v20147_v15 }
0x167b   : > { %v7894_v39 = vpack.c.bf16 %v7886_v33, %v7886_v33  ;;  %v7387_v54 = vadd.f32 %v7366_v44, %v21384_v11  ;;  %v6460_v48 = vadd.f32 %v6440_v24, %v21436_v7  ;;  %18322 = vmatprep.subr.bf16.mxu1 %v19317_v4 }
0x167c   : > { %v19586_v28 = vpop.eup %19585 }
0x167d   : > { %7395 = vst.msk [vmem:[#allocation3 + $0x10] sm:$0xff] %vm3418_vm5, %v7387_v54  ;;  %18307 = vmatmul.mubr.msk.bf16.vlgmr.msra.gmra.mxu0 %vm785_vm2, %v7894_v39  ;;  %v7888_v19 = vmul.f32 %v19586_v28, %v22188_v53 }
0x167e   : > { %6468 = vst.msk [vmem:[#allocation3 + $0x18] sm:$0xff] %vm2524_vm4, %v6460_v48  ;;  %18317 = vmatpush3.bf16.msra.mxu0 %v8239_v32  ;;  %v6442_v60 = vpop.permute.xlu1 %6441  ;;  %v7364_v29 = vpop.permute.xlu0 %7363  ;;  %18318 = vmatprep.mubr.msk.bf16.mxu0 %vm20148_vm1, %v20147_v15 }
0x167f   : > { %v6461_v50 = vadd.f32 %v6442_v60, %v21458_v45  ;;  %v7386_v13 = vadd.f32 %v7364_v29, %v21419_v5  ;;  %v7896_v10 = vpack.c.bf16 %v7888_v19, %v7888_v19 }
0x1681   : > { %6469 = vst.msk [vmem:[#allocation3 + $0x20] sm:$0xff] %vm2524_vm4, %v6461_v50  ;;  %18313 = vmatmul.mubr.msk.bf16.vlgmr.msra.gmra.mxu1 %vm785_vm2, %v7895_v56 }
0x1682   : > { %7394 = vst.msk [vmem:[#allocation3 + $0x8] sm:$0xff] %vm3418_vm5, %v7386_v13  ;;  %v6446_v30 = vpop.permute.xlu1 %6445  ;;  %v7368_v0 = vpop.permute.xlu0 %7367  ;;  %18323 = vmatpush3.bf16.msra.mxu1 %v19317_v4 }
0x1683   : > { %v6463_v18 = vadd.f32 %v6446_v30, %v21479_v63  ;;  %v7388_v21 = vadd.f32 %v7368_v0, %v21436_v7  ;;  %18324 = vmatprep.subr.bf16.mxu1 %v19318_v16 }
0x1685   : > { %6471 = vst.msk [vmem:[#allocation3 + $0x30] sm:$0xff] %vm2524_vm4, %v6463_v18  ;;  %18319 = vmatmul.mubr.msk.bf16.vlgmr.msra.gmra.mxu0 %vm785_vm2, %v7896_v10 }
0x1686   : > { %7396 = vst.msk [vmem:[#allocation3 + $0x18] sm:$0xff] %vm3418_vm5, %v7388_v21  ;;  %v6444_v53 = vpop.permute.xlu0 %6443  ;;  %18325 = vmatpush3.bf16.msra.mxu1 %v19318_v16  ;;  %v16735_v16 = vld [vmem:[%s24276_s13] ss:$0 sm:$0xff] }
0x1687   : > { %v6462_v1 = vadd.f32 %v6444_v53, %v21470_v20  ;;  %18346 = vmatprep.subr.bf16.mxu1 %v20147_v15 }
0x1689   : > { %6470 = vst.msk [vmem:[#allocation3 + $0x28] sm:$0xff] %vm2524_vm4, %v6462_v1 }
0x168a   : > { %v6448_v12 = vpop.permute.xlu0 %6447 }
0x168b   : > { %v6464_v2 = vadd.f32 %v6448_v12, %v21495_v51 }
0x168d   : > { %6472 = vst.msk [vmem:[#allocation3 + $0x38] sm:$0xff] %vm2524_vm4, %v6464_v2 }
0x16fc   : > { %v7939_v26 = vpop.f32.mrf.mxu1 }
0x16fd   : > { %8289 = vrot.lane.b32.xlu1 %v7939_v26, %s20158_s21 }
0x16fe   : > { %v18278_v8 = vpop.f32.mrf.mxu1 }
0x1700   : > { %v7942_v27 = vpop.f32.mrf.mxu1  ;;  %v7987_v6 = vpop.f32.mrf.mxu0 }
0x1701   : > { %8291 = vrot.lane.b32.xlu0 %v7987_v6, %s20158_s21 }
0x1702   : > { %v18279_v38 = vpop.f32.mrf.mxu1  ;;  %v18284_v47 = vpop.f32.mrf.mxu0 }
0x1704   : > { %v7990_v40 = vpop.f32.mrf.mxu0 }
0x1706   : > { %v18285_v9 = vpop.f32.mrf.mxu0 }
0x1708   : > { %v8083_v3 = vpop.f32.mrf.mxu0 }
0x1709   : > { %8295 = vrot.lane.b32.xlu0 %v8083_v3, %s20158_s21 }
0x170a   : > { %v18296_v37 = vpop.f32.mrf.mxu0 }
0x170b   : > { %v19320_v37 = vld [vmem:[#allocation10 + $0x10] sm:$0xff]  }
0x170c   : > { %v8086_v34 = vpop.f32.mrf.mxu0 }
0x170d   : > { %7371 = vrot.lane.b32.xlu0 %v22122_v35, %s20157_s24  ;;  %v19322_v34 = vld [vmem:[#allocation9 + $0x10] sm:$0xff]  }
0x170e   : > { %v18297_v58 = vpop.f32.mrf.mxu0 }
0x170f   : > { %v8453_v58 = vld [vmem:[#allocation7 + $0x4] sm:$0xf] }
0x1711   : > { %7375 = vrot.lane.b32.xlu0 %v22126_v61, %s20157_s24 }
0x1731   : > { %v8035_v22 = vpop.f32.mrf.mxu1 }
0x1732   : > { %8293 = vrot.lane.b32.xlu1 %v8035_v22, %s20158_s21 }
0x1733   : > { %v18290_v41 = vpop.f32.mrf.mxu1 }
0x1735   : > { %v8038_v46 = vpop.f32.mrf.mxu1 }
0x1736   : > { %7369 = vrot.lane.b32.xlu1 %v22120_v55, %s20157_s24 }
0x1737   : > { %v18291_v35 = vpop.f32.mrf.mxu1 }
0x1739   : > { %v8131_v49 = vpop.f32.mrf.mxu1 }
0x173a   : > { %7373 = vrot.lane.b32.xlu1 %v22124_v43, %s20157_s24 }
0x173b   : > { %v18302_v61 = vpop.f32.mrf.mxu1 }
0x173d   : > { %v8134_v17 = vpop.f32.mrf.mxu1  ;;  %v8179_v23 = vpop.f32.mrf.mxu0 }
0x173e   : > { %8297 = vrot.lane.b32.xlu1 %v8131_v49, %s20158_s21  ;;  %8299 = vrot.lane.b32.xlu0 %v8179_v23, %s20158_s21 }
0x173f   : > { %v18303_v57 = vpop.f32.mrf.mxu1  ;;  %v18308_v36 = vpop.f32.mrf.mxu0 }
0x1741   : > { %v8182_v25 = vpop.f32.mrf.mxu0  ;;  %v8227_v52 = vpop.f32.mrf.mxu1 }
0x1742   : > { %8301 = vrot.lane.b32.xlu1 %v8227_v52, %s20158_s21 }
0x1743   : > { %v18309_v31 = vpop.f32.mrf.mxu0  ;;  %v18314_v55 = vpop.f32.mrf.mxu1 }
0x1745   : > { %v8230_v42 = vpop.f32.mrf.mxu1  ;;  %v8275_v62 = vpop.f32.mrf.mxu0 }
0x1746   : > { %8303 = vrot.lane.b32.xlu0 %v8275_v62, %s20158_s21 }
0x1747   : > { %v18315_v43 = vpop.f32.mrf.mxu1  ;;  %v18320_v33 = vpop.f32.mrf.mxu0 }
0x1749   : > { %v8278_v44 = vpop.f32.mrf.mxu0 }
0x174b   : > { %v18321_v24 = vpop.f32.mrf.mxu0 }
0x176f   : > { %v8290_v14 = vpop.permute.xlu1 %8289 }
0x1770   : > { %v8313_v39 = vadd.f32 %v8290_v14, %v21390_v59 }
0x1772   : > { %8321 = vst.msk [vmem:[#allocation3] sm:$0xff] %vm4312_vm6, %v8313_v39 }
0x1773   : > { %v8292_v54 = vpop.permute.xlu0 %8291 }
0x1774   : > { %v8314_v48 = vadd.f32 %v8292_v54, %v21419_v5 }
0x1776   : > { %8322 = vst.msk [vmem:[#allocation3 + $0x8] sm:$0xff] %vm4312_vm6, %v8314_v48 }
0x1779   : > { %v22304_v60 = vld [vmem:[#allocation3] sm:$0xff] }
0x177b   : > { %v8296_v28 = vpop.permute.xlu0 %8295 }
0x177c   : > { %v8316_v32 = vadd.f32 %v8296_v28, %v21436_v7 }
0x177d   : > { %v22306_v29 = vld [vmem:[#allocation3 + $0x8] sm:$0xff] }
0x177e   : > { %8324 = vst.msk [vmem:[#allocation3 + $0x18] sm:$0xff] %vm4312_vm6, %v8316_v32  ;;  %v8337_v56 = vpack.c.bf16 %v22306_v29, %v22304_v60 }
0x177f   : > { %v7372_v59 = vpop.permute.xlu0 %7371 }
0x1780   : > { %v7390_v19 = vadd.f32 %v7372_v59, %v21470_v20  ;;  %18326 = vmatprep.mubr.msk.bf16.mxu1 %vm636_vm0, %v8337_v56 }
0x1782   : > { %7398 = vst.msk [vmem:[#allocation3 + $0x28] sm:$0xff] %vm3418_vm5, %v7390_v19 }
0x1783   : > { %v7376_v5 = vpop.permute.xlu0 %7375 }
0x1784   : > { %v7392_v50 = vadd.f32 %v7376_v5, %v21495_v51 }
0x1785   : > { %v8332_v53 = vld [vmem:[#allocation3 + $0x18] sm:$0xff] }
0x1786   : > { %7400 = vst.msk [vmem:[#allocation3 + $0x38] sm:$0xff] %vm3418_vm5, %v7392_v50 }
0x17a4   : > { %v8294_v7 = vpop.permute.xlu1 %8293 }
0x17a5   : > { %v8315_v13 = vadd.f32 %v8294_v7, %v21384_v11 }
0x17a7   : > { %8323 = vst.msk [vmem:[#allocation3 + $0x10] sm:$0xff] %vm4312_vm6, %v8315_v13 }
0x17a8   : > { %v7370_v30 = vpop.permute.xlu1 %7369 }
0x17a9   : > { %v7389_v0 = vadd.f32 %v7370_v30, %v21458_v45 }
0x17ab   : > { %7397 = vst.msk [vmem:[#allocation3 + $0x20] sm:$0xff] %vm3418_vm5, %v7389_v0 }
0x17ac   : > { %v7374_v10 = vpop.permute.xlu1 %7373 }
0x17ad   : > { %v7391_v18 = vadd.f32 %v7374_v10, %v21479_v63 }
0x17ae   : > { %v8331_v21 = vld [vmem:[#allocation3 + $0x10] sm:$0xff] }
0x17af   : > { %7399 = vst.msk [vmem:[#allocation3 + $0x30] sm:$0xff] %vm3418_vm5, %v7391_v18  ;;  %v8338_v1 = vpack.c.bf16 %v8332_v53, %v8331_v21 }
0x17b0   : > { %v8298_v12 = vpop.permute.xlu1 %8297  ;;  %v8300_v2 = vpop.permute.xlu0 %8299 }
0x17b1   : > { %v8317_v26 = vadd.f32 %v8298_v12, %v21458_v45  ;;  %v8318_v11 = vadd.f32 %v8300_v2, %v21470_v20  ;;  %18327 = vmatmul.mubr.msk.bf16.vlgmr.msra.gmra.mxu1 %vm636_vm0, %v8338_v1  ;;  %v16752_v1 = vld [vmem:[%s24266_s3 + $0x1] ss:$0 sm:$0xff] }
0x17b3   : > { %8325 = vst.msk [vmem:[#allocation3 + $0x20] sm:$0xff] %vm4312_vm6, %v8317_v26  ;;  %8326 = vst.msk [vmem:[#allocation3 + $0x28] sm:$0xff] %vm4312_vm6, %v8318_v11 }
0x17b4   : > { %v8302_v8 = vpop.permute.xlu1 %8301 }
0x17b5   : > { %v8319_v27 = vadd.f32 %v8302_v8, %v21479_v63  ;;  %v19319_v63 = vld [vmem:[#allocation10 + $0x18] sm:$0xff]  }
0x17b6   : > { %18334 = vmatprep.subr.bf16.mxu0 %v19319_v63 }
0x17b7   : > { %8327 = vst.msk [vmem:[#allocation3 + $0x30] sm:$0xff] %vm4312_vm6, %v8319_v27  ;;  %18335 = vmatpush3.bf16.msra.mxu0 %v19319_v63 }
0x17b8   : > { %v8304_v6 = vpop.permute.xlu0 %8303  ;;  %18336 = vmatprep.subr.bf16.mxu0 %v19320_v37 }
0x17b9   : > { %v8320_v38 = vadd.f32 %v8304_v6, %v21495_v51  ;;  %v19321_v51 = vld [vmem:[#allocation9 + $0x18] sm:$0xff]  }
0x17ba   : > { %v8333_v47 = vld [vmem:[#allocation3 + $0x20] sm:$0xff]  ;;  %v8334_v40 = vld [vmem:[#allocation3 + $0x28] sm:$0xff]  ;;  %18347 = vmatpush3.bf16.msra.mxu1 %v19321_v51 }
0x17bb   : > { %8328 = vst.msk [vmem:[#allocation3 + $0x38] sm:$0xff] %vm4312_vm6, %v8320_v38  ;;  %v8339_v45 = vpack.c.bf16 %v8334_v40, %v8333_v47  ;;  %18337 = vmatpush3.bf16.msra.mxu0 %v19320_v37  ;;  %18348 = vmatprep.subr.bf16.mxu1 %v20147_v15 }
0x17bc   : > { %18354 = vmatprep.subr.bf16.mxu0 %v20147_v15 }
0x17bd   : > { %18330 = vmatprep.mubr.msk.bf16.mxu1 %vm636_vm0, %v8339_v45 }
0x17be   : > { %v8335_v20 = vld [vmem:[#allocation3 + $0x30] sm:$0xff]  ;;  %18349 = vmatpush3.bf16.msra.mxu1 %v19322_v34 }
0x17bf   : > { %18360 = vmatprep.subr.bf16.mxu1 %v20147_v15 }
0x17c2   : > { %v8336_v9 = vld [vmem:[#allocation3 + $0x38] sm:$0xff] }
0x17c3   : > { %v8340_v3 = vpack.c.bf16 %v8336_v9, %v8335_v20 }
0x17c5   : > { %18331 = vmatmul.mubr.msk.bf16.gmra.mxu1 %vm636_vm0, %v8340_v3 }
0x17c6   : > { %18350 = vmatprep.mubr.msk.bf16.mxu1 %vm20148_vm1, %v20147_v15 }
0x17cd   : > { %18351 = vmatmul.mubr.msk.bf16.vlgmr.msra.gmra.mxu1 %vm636_vm0, %v8453_v58 }
0x17ce   : > { %18362 = vmatprep.mubr.msk.bf16.mxu1 %vm20148_vm1, %v20147_v15 }
0x1871   : > { %v18328_v4 = vpop.f32.mrf.mxu1 }
0x1872   : > { %v8414_v46 = vadd.f32 %v18328_v4, %v16735_v16 }
0x1873   : > { %v8405_v22 = vpop.f32.mrf.mxu1 }
0x1874   : > { %v8406_v41 = vadd.f32 %v16735_v16, %v8405_v22  ;;  %v8438_v36 = vmax.f32 %v8414_v46, 0.0 }
0x1875   : > { %v18329_v35 = vpop.f32.mrf.mxu1 }
0x1876   : > { %v8417_v49 = vadd.f32 %v18329_v35, %v16735_v16  ;;  %v8436_v17 = vmax.f32 %v8406_v41, 0.0  ;;  %v8446_v42 = vadd.f32 %v8438_v36, %v8331_v21  ;;  %v16745_v21 = vld [vmem:[%s24268_s5 + $0x1] ss:$0 sm:$0xff] }
0x1877   : > { %v8408_v61 = vpop.f32.mrf.mxu1 }
0x1878   : > { %v8439_v23 = vmax.f32 %v8417_v49, 0.0  ;;  %v8409_v57 = vadd.f32 %v16735_v16, %v8408_v61  ;;  %v8444_v31 = vadd.f32 %v8436_v17, %v22304_v60 }
0x187a   : > { %v8437_v25 = vmax.f32 %v8409_v57, 0.0  ;;  %v8447_v52 = vadd.f32 %v8439_v23, %v8332_v53 }
0x187c   : > { %v8445_v55 = vadd.f32 %v8437_v25, %v22306_v29  ;;  %v22348_v43 = vpack.c.bf16 %v8447_v52, %v8446_v42 }
0x187e   : > { %v22346_v62 = vpack.c.bf16 %v8445_v55, %v8444_v31 }
0x1880   : > { %18338 = vmatprep.mubr.msk.bf16.mxu0 %vm636_vm0, %v22346_v62 }
0x1881   : > { %18339 = vmatmul.mubr.msk.bf16.vlgmr.msra.gmra.mxu0 %vm636_vm0, %v22348_v43 }
0x1885   : > { %v18332_v33 = vpop.f32.mrf.mxu1 }
0x1886   : > { %v8430_v14 = vadd.f32 %v18332_v33, %v16735_v16 }
0x1887   : > { %v8421_v44 = vpop.f32.mrf.mxu1 }
0x1888   : > { %v8422_v24 = vadd.f32 %v16735_v16, %v8421_v44  ;;  %v8442_v29 = vmax.f32 %v8430_v14, 0.0 }
0x1889   : > { %v18333_v39 = vpop.f32.mrf.mxu1 }
0x188a   : > { %v8433_v54 = vadd.f32 %v18333_v39, %v16735_v16  ;;  %v8440_v28 = vmax.f32 %v8422_v24, 0.0  ;;  %v8450_v50 = vadd.f32 %v8442_v29, %v8335_v20 }
0x188b   : > { %v8424_v48 = vpop.f32.mrf.mxu1 }
0x188c   : > { %v8443_v32 = vmax.f32 %v8433_v54, 0.0  ;;  %v8425_v60 = vadd.f32 %v16735_v16, %v8424_v48  ;;  %v8448_v19 = vadd.f32 %v8440_v28, %v8333_v47 }
0x188d   : > { %v8637_v30 = vpop.f32.mrf.mxu1 }
0x188e   : > { %v8441_v56 = vmax.f32 %v8425_v60, 0.0  ;;  %v8451_v59 = vadd.f32 %v8443_v32, %v8336_v9  ;;  %v22372_v8 = vadd.f32 %v16752_v1, %v8637_v30 }
0x188f   : > { %v18352_v0 = vpop.f32.mrf.mxu1 }
0x1890   : > { %v8449_v5 = vadd.f32 %v8441_v56, %v8334_v40  ;;  %v22356_v13 = vpack.c.bf16 %v8451_v59, %v8450_v50  ;;  %v8643_v20 = vmul.f32 0.17677669, %v22372_v8 }
0x1891   : > { %v8640_v10 = vpop.f32.mrf.mxu1 }
0x1892   : > { %v22354_v7 = vpack.c.bf16 %v8449_v5, %v8448_v19  ;;  %v22392_v37 = vpack.c.bf16 %v8643_v20, %v8643_v20 }
0x1893   : > { %v18353_v18 = vpop.f32.mrf.mxu1 }
0x1894   : > { %18342 = vmatprep.mubr.msk.bf16.mxu0 %vm636_vm0, %v22354_v7 }
0x1895   : > { %18343 = vmatmul.mubr.msk.bf16.gmra.mxu0 %vm636_vm0, %v22356_v13 }
0x1896   : > { %18356 = vmatprep.mubr.msk.bf16.mxu0 %vm20148_vm1, %v20147_v15 }
0x1941   : > { %v18340_v53 = vpop.f32.mrf.mxu0 }
0x1942   : > { %v8552_v12 = vadd.f32 %v18340_v53, %v16745_v21 }
0x1943   : > { %v8543_v2 = vpop.f32.mrf.mxu0 }
0x1944   : > { %v22370_v26 = vpack.c.bf16 %v8552_v12, %v8552_v12  ;;  %v8544_v11 = vadd.f32 %v16745_v21, %v8543_v2 }
0x1945   : > { %v18341_v27 = vpop.f32.mrf.mxu0 }
0x1946   : > { %v22374_v6 = vpack.c.bf16 %v8544_v11, %v8544_v11  ;;  %9187 = vrot.lane.b32.xlu1 %v22370_v26, %s20149_s20  ;;  %v8555_v47 = vadd.f32 %v18341_v27, %v16745_v21  ;;  %v8735_v51 = vsel %vm785_vm2, %v22370_v26, 0 }
0x1947   : > { %v8546_v38 = vpop.f32.mrf.mxu0 }
0x1948   : > { %v8547_v40 = vadd.f32 %v16745_v21, %v8546_v38  ;;  %v8649_v45 = vsel %vm785_vm2, %v22374_v6, 0  ;;  %v22386_v3 = vpack.c.bf16 %v8555_v47, %v8555_v47 }
0x1949   : > { %18355 = vmatpush3.bf16.xpose.msra.mxu0 %v8649_v45 }
0x194a   : > { %v22381_v9 = vpack.c.bf16 %v8547_v40, %v8547_v40  ;;  %9089 = vrot.lane.b32.xlu1 %v22374_v6, %s20149_s20  ;;  %18366 = vmatprep.subr.bf16.mxu0 %v20147_v15  ;;  %v8778_v34 = vsel %vm785_vm2, %v22386_v3, 0 }
0x194c   : > { %9138 = vrot.lane.b32.xlu0 %v22381_v9, %s20149_s20  ;;  %v8692_v63 = vsel %vm785_vm2, %v22381_v9, 0 }
0x194d   : > { %18361 = vmatpush3.bf16.xpose.msra.mxu1 %v8692_v63 }
0x194e   : > { %9236 = vrot.lane.b32.xlu1 %v22386_v3, %s20149_s20  ;;  %18372 = vmatprep.subr.bf16.mxu1 %v20147_v15 }
0x1950   : > { %18357 = vmatmul.mubr.msk.bf16.vlgmr.msra.gmra.mxu0 %vm785_vm2, %v22392_v37 }
0x1951   : > { %18367 = vmatpush3.bf16.xpose.msra.mxu0 %v8735_v51  ;;  %18368 = vmatprep.mubr.msk.bf16.mxu0 %vm20148_vm1, %v20147_v15 }
0x1952   : > { %18378 = vmatprep.subr.bf16.mxu0 %v20147_v15 }
0x1954   : > { %18363 = vmatmul.mubr.msk.bf16.vlgmr.msra.gmra.mxu1 %vm785_vm2, %v22392_v37 }
0x1955   : > { %v18344_v58 = vpop.f32.mrf.mxu0  ;;  %18373 = vmatpush3.bf16.xpose.msra.mxu1 %v8778_v34  ;;  %18374 = vmatprep.mubr.msk.bf16.mxu1 %vm20148_vm1, %v20147_v15 }
0x1956   : > { %18384 = vmatprep.subr.bf16.mxu1 %v20147_v15  ;;  %v8568_v35 = vadd.f32 %v18344_v58, %v16745_v21 }
0x1957   : > { %v8559_v4 = vpop.f32.mrf.mxu0 }
0x1958   : > { %v8560_v16 = vadd.f32 %v16745_v21, %v8559_v4  ;;  %18369 = vmatmul.mubr.msk.bf16.vlgmr.msra.gmra.mxu0 %vm785_vm2, %v22392_v37  ;;  %v22428_v23 = vpack.c.bf16 %v8568_v35, %v8568_v35 }
0x1959   : > { %v18345_v22 = vpop.f32.mrf.mxu0  ;;  %18380 = vmatprep.mubr.msk.bf16.mxu0 %vm20148_vm1, %v20147_v15 }
0x195a   : > { %v22415_v41 = vpack.c.bf16 %v8560_v16, %v8560_v16  ;;  %v8571_v57 = vadd.f32 %v18345_v22, %v16745_v21  ;;  %v8907_v52 = vsel %vm785_vm2, %v22428_v23, 0 }
0x195b   : > { %v8562_v46 = vpop.f32.mrf.mxu0 }
0x195c   : > { %v8563_v49 = vadd.f32 %v16745_v21, %v8562_v46  ;;  %18375 = vmatmul.mubr.msk.bf16.vlgmr.msra.gmra.mxu1 %vm785_vm2, %v22392_v37  ;;  %9285 = vrot.lane.b32.xlu1 %v22415_v41, %s20149_s20  ;;  %v8821_v61 = vsel %vm785_vm2, %v22415_v41, 0  ;;  %v22433_v25 = vpack.c.bf16 %v8571_v57, %v8571_v57 }
0x195d   : > { %18379 = vmatpush3.bf16.xpose.msra.mxu0 %v8821_v61  ;;  %18386 = vmatprep.mubr.msk.bf16.mxu1 %vm20148_vm1, %v20147_v15 }
0x195e   : > { %v22425_v17 = vpack.c.bf16 %v8563_v49, %v8563_v49  ;;  %18390 = vmatprep.subr.bf16.mxu0 %v20147_v15  ;;  %v8950_v31 = vsel %vm785_vm2, %v22433_v25, 0 }
0x1960   : > { %v8864_v36 = vsel %vm785_vm2, %v22425_v17, 0 }
0x1961   : > { %18385 = vmatpush3.bf16.xpose.msra.mxu1 %v8864_v36 }
0x1962   : > { %18396 = vmatprep.subr.bf16.mxu1 %v20147_v15 }
0x1964   : > { %18381 = vmatmul.mubr.msk.bf16.vlgmr.msra.gmra.mxu0 %vm785_vm2, %v22392_v37 }
0x1965   : > { %18391 = vmatpush3.bf16.xpose.msra.mxu0 %v8907_v52  ;;  %18392 = vmatprep.mubr.msk.bf16.mxu0 %vm20148_vm1, %v20147_v15 }
0x1966   : > { %18402 = vmatprep.subr.bf16.mxu0 %v20147_v15 }
0x1968   : > { %18387 = vmatmul.mubr.msk.bf16.vlgmr.msra.gmra.mxu1 %vm785_vm2, %v22392_v37 }
0x1969   : > { %18397 = vmatpush3.bf16.xpose.msra.mxu1 %v8950_v31  ;;  %18398 = vmatprep.mubr.msk.bf16.mxu1 %vm20148_vm1, %v20147_v15 }
0x196a   : > { %18408 = vmatprep.subr.bf16.mxu1 %v20147_v15 }
0x196c   : > { %18393 = vmatmul.mubr.msk.bf16.vlgmr.msra.gmra.mxu0 %vm785_vm2, %v22392_v37 }
0x196d   : > { %18404 = vmatprep.mubr.msk.bf16.mxu0 %vm20148_vm1, %v20147_v15 }
0x1970   : > { %18399 = vmatmul.mubr.msk.bf16.vlgmr.msra.gmra.mxu1 %vm785_vm2, %v22392_v37 }
0x1971   : > { %18410 = vmatprep.mubr.msk.bf16.mxu1 %vm20148_vm1, %v20147_v15 }
0x19b8   : > { %v22457_v55 = vpop.permute.xlu1 %9187 }
0x19bc   : > { %v9090_v42 = vpop.permute.xlu1 %9089 }
0x19bd   : > { %v9095_v33 = vsel %vm1235_vm3, %v9090_v42, 0 }
0x19be   : > { %v9139_v44 = vpop.permute.xlu0 %9138  ;;  %18403 = vmatpush3.bf16.msra.mxu0 %v9095_v33 }
0x19bf   : > { %v9144_v24 = vsel %vm1235_vm3, %v9139_v44, 0  ;;  %18414 = vmatprep.subr.bf16.mxu0 %v20147_v15 }
0x19c0   : > { %18409 = vmatpush3.bf16.msra.mxu1 %v9144_v24  ;;  %v22478_v57 = vpop.permute.xlu1 %9236 }
0x19c1   : > { %18420 = vmatprep.subr.bf16.mxu1 %v20147_v15 }
0x19ce   : > { %v22480_v36 = vpop.permute.xlu1 %9285 }
0x1a10   : > { %v8685_v14 = vpop.f32.mrf.mxu0 }
0x1a11   : > { %v8992_v39 = vsel %vm785_vm2, %v8685_v14, -inf }
0x1a12   : > { %8993 = vmax.xlane.f32.xlu1 %v8992_v39  ;;  %v18358_v54 = vpop.f32.mrf.mxu0 }
0x1a14   : > { %v8688_v48 = vpop.f32.mrf.mxu0  ;;  %v8728_v28 = vpop.f32.mrf.mxu1 }
0x1a15   : > { %v8995_v32 = vsel %vm785_vm2, %v8728_v28, -inf }
0x1a16   : > { %8996 = vmax.xlane.f32.xlu0 %v8995_v32  ;;  %v18359_v60 = vpop.f32.mrf.mxu0  ;;  %v18364_v29 = vpop.f32.mrf.mxu1 }
0x1a18   : > { %v8731_v56 = vpop.f32.mrf.mxu1  ;;  %v8771_v59 = vpop.f32.mrf.mxu0 }
0x1a19   : > { %v8998_v19 = vsel %vm785_vm2, %v8771_v59, -inf }
0x1a1a   : > { %v18365_v5 = vpop.f32.mrf.mxu1  ;;  %8999 = vmax.xlane.f32.xlu0 %v8998_v19  ;;  %v18370_v50 = vpop.f32.mrf.mxu0 }
0x1a1c   : > { %v8774_v30 = vpop.f32.mrf.mxu0  ;;  %v8814_v0 = vpop.f32.mrf.mxu1 }
0x1a1d   : > { %v9001_v10 = vsel %vm785_vm2, %v8814_v0, -inf }
0x1a1e   : > { %v18376_v18 = vpop.f32.mrf.mxu1  ;;  %9002 = vmax.xlane.f32.xlu0 %v9001_v10  ;;  %v18371_v21 = vpop.f32.mrf.mxu0 }
0x1a20   : > { %v8817_v53 = vpop.f32.mrf.mxu1 }
0x1a22   : > { %v18377_v1 = vpop.f32.mrf.mxu1 }
0x1a24   : > { %v8857_v12 = vpop.f32.mrf.mxu0 }
0x1a25   : > { %v9004_v2 = vsel %vm785_vm2, %v8857_v12, -inf }
0x1a26   : > { %9005 = vmax.xlane.f32.xlu1 %v9004_v2  ;;  %v18382_v11 = vpop.f32.mrf.mxu0 }
0x1a28   : > { %v8860_v27 = vpop.f32.mrf.mxu0  ;;  %v8900_v38 = vpop.f32.mrf.mxu1 }
0x1a29   : > { %v9007_v47 = vsel %vm785_vm2, %v8900_v38, -inf }
0x1a2a   : > { %v18388_v40 = vpop.f32.mrf.mxu1  ;;  %9008 = vmax.xlane.f32.xlu0 %v9007_v47  ;;  %v18383_v45 = vpop.f32.mrf.mxu0 }
0x1a2c   : > { %v8903_v20 = vpop.f32.mrf.mxu1  ;;  %v22469_v63 = vpop.f32.mrf.mxu0 }
0x1a2d   : > { %v9010_v51 = vsel %vm785_vm2, %v22469_v63, -inf }
0x1a2e   : > { %v18389_v34 = vpop.f32.mrf.mxu1  ;;  %9011 = vmax.xlane.f32.xlu1 %v9010_v51  ;;  %v18394_v58 = vpop.f32.mrf.mxu0 }
0x1a30   : > { %v8946_v4 = vpop.f32.mrf.mxu0  ;;  %v8986_v16 = vpop.f32.mrf.mxu1 }
0x1a31   : > { %v9013_v22 = vsel %vm785_vm2, %v8986_v16, -inf }
0x1a32   : > { %v18400_v46 = vpop.f32.mrf.mxu1  ;;  %9014 = vmax.xlane.f32.xlu0 %v9013_v22  ;;  %v18395_v35 = vpop.f32.mrf.mxu0 }
0x1a34   : > { %v8989_v49 = vpop.f32.mrf.mxu1 }
0x1a36   : > { %v18401_v61 = vpop.f32.mrf.mxu1 }
0x1a3f   : > { %9383 = vrot.lane.b32.xlu1 %v22428_v23, %s20149_s20 }
0x1a48   : > { %9334 = vrot.lane.b32.xlu0 %v22425_v17, %s20149_s20 }
0x1a9b   : > { %v8994_v52 = vpop.xlane.xlu1 %8993 }
0x1a9c   : > { %v9016_v31 = vsub.f32 %v8685_v14, %v8994_v52 }
0x1a9e   : > { %v9024_v42 = vmul.f32 1.442695, %v9016_v31 }
0x1a9f   : > { %v8997_v33 = vpop.xlane.xlu0 %8996 }
0x1aa0   : > { %19587 = vpow2.f32 %v9024_v42  ;;  %v9017_v44 = vsub.f32 %v8728_v28, %v8997_v33 }
0x1aa2   : > { %v9026_v24 = vmul.f32 1.442695, %v9017_v44  ;;  %v9193_v44 = vsel %vm1235_vm3, %v22457_v55, 0 }
0x1aa3   : > { %v9000_v39 = vpop.xlane.xlu0 %8999 }
0x1aa4   : > { %19589 = vpow2.f32 %v9026_v24  ;;  %v9018_v54 = vsub.f32 %v8771_v59, %v9000_v39 }
0x1aa6   : > { %v9028_v48 = vmul.f32 1.442695, %v9018_v54 }
0x1aa7   : > { %v9003_v32 = vpop.xlane.xlu0 %9002 }
0x1aa8   : > { %19591 = vpow2.f32 %v9028_v48  ;;  %v9019_v60 = vsub.f32 %v8814_v0, %v9003_v32  ;;  %v9242_v32 = vsel %vm1235_vm3, %v22478_v57, 0 }
0x1aaa   : > { %v9030_v29 = vmul.f32 1.442695, %v9019_v60 }
0x1aac   : > { %19593 = vpow2.f32 %v9030_v29 }
0x1aad   : > { %v22482_v56 = vpop.eup %19587 }
0x1aae   : > { %v9040_v19 = vsel %vm785_vm2, %v22482_v56, 0.0 }
0x1aaf   : > { %v9006_v14 = vpop.xlane.xlu1 %9005  ;;  %9041 = vadd.xlane.f32.xlu1 %v9040_v19  ;;  %v9291_v19 = vsel %vm1235_vm3, %v22480_v36, 0 }
0x1ab0   : > { %v9020_v5 = vsub.f32 %v8857_v12, %v9006_v14 }
0x1ab1   : > { %v22486_v50 = vpop.eup %19589 }
0x1ab2   : > { %v9032_v28 = vmul.f32 1.442695, %v9020_v5  ;;  %v9043_v59 = vsel %vm785_vm2, %v22486_v50, 0.0 }
0x1ab3   : > { %9044 = vadd.xlane.f32.xlu0 %v9043_v59  ;;  %v9009_v30 = vpop.xlane.xlu0 %9008 }
0x1ab4   : > { %19595 = vpow2.f32 %v9032_v28  ;;  %v9021_v0 = vsub.f32 %v8900_v38, %v9009_v30 }
0x1ab5   : > { %v22490_v10 = vpop.eup %19591 }
0x1ab6   : > { %v9034_v18 = vmul.f32 1.442695, %v9021_v0  ;;  %v9046_v21 = vsel %vm785_vm2, %v22490_v10, 0.0 }
0x1ab7   : > { %9047 = vadd.xlane.f32.xlu1 %v9046_v21  ;;  %v9012_v38 = vpop.xlane.xlu1 %9011 }
0x1ab8   : > { %19597 = vpow2.f32 %v9034_v18  ;;  %v9022_v47 = vsub.f32 %v22469_v63, %v9012_v38 }
0x1ab9   : > { %v22494_v53 = vpop.eup %19593 }
0x1aba   : > { %v9049_v1 = vsel %vm785_vm2, %v22494_v53, 0.0  ;;  %v9036_v45 = vmul.f32 1.442695, %v9022_v47 }
0x1abb   : > { %9050 = vadd.xlane.f32.xlu0 %v9049_v1  ;;  %v9015_v40 = vpop.xlane.xlu0 %9014  ;;  %v9384_v63 = vpop.permute.xlu1 %9383 }
0x1abc   : > { %v9023_v20 = vsub.f32 %v8986_v16, %v9015_v40  ;;  %19599 = vpow2.f32 %v9036_v45  ;;  %v9389_v30 = vsel %vm1235_vm3, %v9384_v63, 0 }
0x1abe   : > { %v9038_v51 = vmul.f32 1.442695, %v9023_v20 }
0x1abf   : > { %v9335_v16 = vpop.permute.xlu0 %9334 }
0x1ac0   : > { %19601 = vpow2.f32 %v9038_v51  ;;  %v9340_v5 = vsel %vm1235_vm3, %v9335_v16, 0 }
0x1ac1   : > { %v22498_v12 = vpop.eup %19595 }
0x1ac2   : > { %v9052_v2 = vsel %vm785_vm2, %v22498_v12, 0.0 }
0x1ac3   : > { %9053 = vadd.xlane.f32.xlu1 %v9052_v2 }
0x1ac5   : > { %v22502_v11 = vpop.eup %19597 }
0x1ac6   : > { %v9055_v27 = vsel %vm785_vm2, %v22502_v11, 0.0 }
0x1ac7   : > { %9056 = vadd.xlane.f32.xlu0 %v9055_v27 }
0x1ac9   : > { %v22511_v34 = vpop.eup %19599 }
0x1aca   : > { %v9058_v58 = vsel %vm785_vm2, %v22511_v34, 0.0 }
0x1acd   : > { %v22515_v4 = vpop.eup %19601 }
0x1ace   : > { %v9061_v22 = vsel %vm785_vm2, %v22515_v4, 0.0 }
0x1ad4   : > { %9499 = vrot.lane.b32.xlu1 %v22374_v6, %s20150_s23 }
0x1add   : > { %9432 = vrot.lane.b32.xlu0 %v22433_v25, %s20149_s20 }
0x1af8   : > { %9059 = vadd.xlane.f32.xlu1 %v9058_v58 }
0x1afc   : > { %9062 = vadd.xlane.f32.xlu0 %v9061_v22 }
0x1b09   : > { %9497 = vrot.lane.b32.xlu1 %v22392_v37, %s20150_s23 }
0x1b0d   : > { %9637 = vrot.lane.b32.xlu1 %v22386_v3, %s20150_s23 }
0x1b11   : > { %9727 = vrot.lane.b32.xlu1 %v22425_v17, %s20150_s23 }
0x1b12   : > { %9547 = vrot.lane.b32.xlu0 %v22381_v9, %s20150_s23 }
0x1b15   : > { %9817 = vrot.lane.b32.xlu1 %v22433_v25, %s20150_s23 }
0x1b16   : > { %9592 = vrot.lane.b32.xlu0 %v22370_v26, %s20150_s23 }
0x1b19   : > { %10006 = vrot.lane.b32.xlu1 %v22381_v9, %s20151_s18 }
0x1b1a   : > { %9682 = vrot.lane.b32.xlu0 %v22415_v41, %s20150_s23 }
0x1b1d   : > { %10054 = vrot.lane.b32.xlu1 %v22370_v26, %s20151_s18 }
0x1b1e   : > { %9772 = vrot.lane.b32.xlu0 %v22428_v23, %s20150_s23 }
0x1b21   : > { %10102 = vrot.lane.b32.xlu1 %v22386_v3, %s20151_s18 }
0x1b22   : > { %9958 = vrot.lane.b32.xlu0 %v22374_v6, %s20151_s18 }
0x1b38   : > { %v9042_v46 = vpop.xlane.xlu1 %9041 }
0x1b39   : > { %19603 = vrcp.f32 %v9042_v46 }
0x1b3c   : > { %v9045_v35 = vpop.xlane.xlu0 %9044 }
0x1b3d   : > { %19605 = vrcp.f32 %v9045_v35 }
0x1b40   : > { %v9048_v49 = vpop.xlane.xlu1 %9047 }
0x1b41   : > { %19607 = vrcp.f32 %v9048_v49 }
0x1b44   : > { %v9051_v61 = vpop.xlane.xlu0 %9050 }
0x1b45   : > { %19609 = vrcp.f32 %v9051_v61 }
0x1b46   : > { %v19604_v52 = vpop.eup %19603 }
0x1b47   : > { %v9072_v31 = vmul.f32 %v19604_v52, %v22482_v56 }
0x1b49   : > { %v9080_v42 = vpack.c.bf16 %v9072_v31, %v9072_v31 }
0x1b4a   : > { %v19606_v33 = vpop.eup %19605 }
0x1b4b   : > { %v9073_v24 = vmul.f32 %v19606_v33, %v22486_v50  ;;  %18405 = vmatmul.mubr.msk.bf16.vlgmr.msra.gmra.mxu0 %vm785_vm2, %v9080_v42 }
0x1b4c   : > { %18415 = vmatpush3.bf16.msra.mxu0 %v9193_v44  ;;  %v9054_v39 = vpop.xlane.xlu1 %9053  ;;  %18416 = vmatprep.mubr.msk.bf16.mxu0 %vm20148_vm1, %v20147_v15 }
0x1b4d   : > { %v9081_v54 = vpack.c.bf16 %v9073_v24, %v9073_v24  ;;  %19611 = vrcp.f32 %v9054_v39  ;;  %18426 = vmatprep.subr.bf16.mxu0 %v20147_v15 }
0x1b4e   : > { %v19608_v48 = vpop.eup %19607 }
0x1b4f   : > { %v9074_v60 = vmul.f32 %v19608_v48, %v22490_v10  ;;  %18411 = vmatmul.mubr.msk.bf16.vlgmr.msra.gmra.mxu1 %vm785_vm2, %v9081_v54 }
0x1b50   : > { %18421 = vmatpush3.bf16.msra.mxu1 %v9242_v32  ;;  %v9057_v55 = vpop.xlane.xlu0 %9056  ;;  %18422 = vmatprep.mubr.msk.bf16.mxu1 %vm20148_vm1, %v20147_v15 }
0x1b51   : > { %v9082_v29 = vpack.c.bf16 %v9074_v60, %v9074_v60  ;;  %19613 = vrcp.f32 %v9057_v55  ;;  %18432 = vmatprep.subr.bf16.mxu1 %v20147_v15 }
0x1b52   : > { %v19610_v56 = vpop.eup %19609 }
0x1b53   : > { %v9075_v14 = vmul.f32 %v19610_v56, %v22494_v53  ;;  %18417 = vmatmul.mubr.msk.bf16.vlgmr.msra.gmra.mxu0 %vm785_vm2, %v9082_v29  ;;  %v9500_v53 = vpop.permute.xlu1 %9499 }
0x1b54   : > { %18427 = vmatpush3.bf16.msra.mxu0 %v9291_v19  ;;  %18428 = vmatprep.mubr.msk.bf16.mxu0 %vm20148_vm1, %v20147_v15  ;;  %v9433_v10 = vpop.permute.xlu0 %9432  ;;  %v9505_v40 = vsel %vm785_vm2, %v9500_v53, 0 }
0x1b55   : > { %v9083_v57 = vpack.c.bf16 %v9075_v14, %v9075_v14  ;;  %18438 = vmatprep.subr.bf16.mxu0 %v20147_v15  ;;  %v9438_v21 = vsel %vm1235_vm3, %v9433_v10, 0 }
0x1b57   : > { %18423 = vmatmul.mubr.msk.bf16.vlgmr.msra.gmra.mxu1 %vm785_vm2, %v9083_v57 }
0x1b58   : > { %18433 = vmatpush3.bf16.msra.mxu1 %v9340_v5  ;;  %18434 = vmatprep.mubr.msk.bf16.mxu1 %vm20148_vm1, %v20147_v15 }
0x1b59   : > { %18444 = vmatprep.subr.bf16.mxu1 %v20147_v15 }
0x1b5a   : > { %v19612_v36 = vpop.eup %19611 }
0x1b5b   : > { %v9076_v50 = vmul.f32 %v19612_v36, %v22498_v12 }
0x1b5d   : > { %v9084_v28 = vpack.c.bf16 %v9076_v50, %v9076_v50 }
0x1b5e   : > { %v19614_v59 = vpop.eup %19613 }
0x1b5f   : > { %v9077_v0 = vmul.f32 %v19614_v59, %v22502_v11  ;;  %18429 = vmatmul.mubr.msk.bf16.vlgmr.msra.gmra.mxu0 %vm785_vm2, %v9084_v28 }
0x1b60   : > { %18439 = vmatpush3.bf16.msra.mxu0 %v9389_v30  ;;  %18440 = vmatprep.mubr.msk.bf16.mxu0 %vm20148_vm1, %v20147_v15 }
0x1b61   : > { %v9085_v18 = vpack.c.bf16 %v9077_v0, %v9077_v0  ;;  %18450 = vmatprep.subr.bf16.mxu0 %v20147_v15 }
0x1b63   : > { %18435 = vmatmul.mubr.msk.bf16.vlgmr.msra.gmra.mxu1 %vm785_vm2, %v9085_v18 }
0x1b64   : > { %18445 = vmatpush3.bf16.msra.mxu1 %v9438_v21  ;;  %18446 = vmatprep.mubr.msk.bf16.mxu1 %vm20148_vm1, %v20147_v15 }
0x1b65   : > { %18456 = vmatprep.subr.bf16.mxu1 %v20147_v15 }
0x1b81   : > { %v9060_v1 = vpop.xlane.xlu1 %9059 }
0x1b82   : > { %19615 = vrcp.f32 %v9060_v1 }
0x1b85   : > { %v9063_v12 = vpop.xlane.xlu0 %9062  ;;  %v9498_v51 = vpop.permute.xlu1 %9497 }
0x1b86   : > { %19617 = vrcp.f32 %v9063_v12 }
0x1b89   : > { %v9548_v47 = vpop.permute.xlu0 %9547  ;;  %v9638_v22 = vpop.permute.xlu1 %9637 }
0x1b8a   : > { %v9550_v58 = vsel %vm785_vm2, %v9548_v47, 0  ;;  %v9640_v63 = vsel %vm785_vm2, %v9638_v22, 0 }
0x1b8d   : > { %v9728_v35 = vpop.permute.xlu1 %9727 }
0x1b8e   : > { %v9730_v49 = vsel %vm785_vm2, %v9728_v35, 0 }
0x1b8f   : > { %v19616_v2 = vpop.eup %19615 }
0x1b90   : > { %v9078_v11 = vmul.f32 %v19616_v2, %v22511_v34  ;;  %v9593_v34 = vpop.permute.xlu0 %9592 }
0x1b91   : > { %v9818_v31 = vpop.permute.xlu1 %9817 }
0x1b92   : > { %v9086_v27 = vpack.c.bf16 %v9078_v11, %v9078_v11  ;;  %v9820_v42 = vsel %vm785_vm2, %v9818_v31, 0 }
0x1b93   : > { %v19618_v38 = vpop.eup %19617 }
0x1b94   : > { %v9079_v45 = vmul.f32 %v19618_v38, %v22515_v4  ;;  %18441 = vmatmul.mubr.msk.bf16.vlgmr.msra.gmra.mxu0 %vm785_vm2, %v9086_v27  ;;  %v9595_v4 = vsel %vm785_vm2, %v9593_v34, 0  ;;  %v9683_v16 = vpop.permute.xlu0 %9682 }
0x1b95   : > { %18451 = vmatpush3.bf16.xpose.msra.mxu0 %v9505_v40  ;;  %18452 = vmatprep.mubr.msk.bf16.mxu0 %vm20148_vm1, %v20147_v15  ;;  %v9685_v46 = vsel %vm785_vm2, %v9683_v16, 0  ;;  %v10007_v24 = vpop.permute.xlu1 %10006 }
0x1b96   : > { %v9087_v20 = vpack.c.bf16 %v9079_v45, %v9079_v45  ;;  %18462 = vmatprep.subr.bf16.mxu0 %v20147_v15  ;;  %v10012_v39 = vsel %vm1235_vm3, %v10007_v24, 0 }
0x1b98   : > { %18447 = vmatmul.mubr.msk.bf16.vlgmr.msra.gmra.mxu1 %vm785_vm2, %v9087_v20  ;;  %v9773_v61 = vpop.permute.xlu0 %9772 }
0x1b99   : > { %18457 = vmatpush3.bf16.xpose.msra.mxu1 %v9550_v58  ;;  %18458 = vmatprep.mubr.msk.bf16.mxu1 %vm20148_vm1, %v20147_v15  ;;  %v9775_v52 = vsel %vm785_vm2, %v9773_v61, 0 }
0x1b9a   : > { %18468 = vmatprep.subr.bf16.mxu1 %v20147_v15 }
0x1b9c   : > { %18453 = vmatmul.mubr.msk.bf16.vlgmr.msra.gmra.mxu0 %vm785_vm2, %v9498_v51  ;;  %v9959_v33 = vpop.permute.xlu0 %9958 }
0x1b9d   : > { %18463 = vmatpush3.bf16.xpose.msra.mxu0 %v9595_v4  ;;  %18464 = vmatprep.mubr.msk.bf16.mxu0 %vm20148_vm1, %v20147_v15  ;;  %v9964_v44 = vsel %vm1235_vm3, %v9959_v33, 0 }
0x1b9e   : > { %18474 = vmatprep.subr.bf16.mxu0 %v20147_v15 }
0x1ba0   : > { %18459 = vmatmul.mubr.msk.bf16.vlgmr.msra.gmra.mxu1 %vm785_vm2, %v9498_v51 }
0x1ba1   : > { %18469 = vmatpush3.bf16.xpose.msra.mxu1 %v9640_v63  ;;  %18470 = vmatprep.mubr.msk.bf16.mxu1 %vm20148_vm1, %v20147_v15 }
0x1ba2   : > { %18480 = vmatprep.subr.bf16.mxu1 %v20147_v15 }
0x1ba4   : > { %18465 = vmatmul.mubr.msk.bf16.vlgmr.msra.gmra.mxu0 %vm785_vm2, %v9498_v51 }
0x1ba5   : > { %18475 = vmatpush3.bf16.xpose.msra.mxu0 %v9685_v46  ;;  %18476 = vmatprep.mubr.msk.bf16.mxu0 %vm20148_vm1, %v20147_v15 }
0x1ba6   : > { %18486 = vmatprep.subr.bf16.mxu0 %v20147_v15 }
0x1ba8   : > { %18471 = vmatmul.mubr.msk.bf16.vlgmr.msra.gmra.mxu1 %vm785_vm2, %v9498_v51 }
0x1ba9   : > { %18481 = vmatpush3.bf16.xpose.msra.mxu1 %v9730_v49  ;;  %18482 = vmatprep.mubr.msk.bf16.mxu1 %vm20148_vm1, %v20147_v15 }
0x1baa   : > { %18492 = vmatprep.subr.bf16.mxu1 %v20147_v15 }
0x1bac   : > { %18477 = vmatmul.mubr.msk.bf16.vlgmr.msra.gmra.mxu0 %vm785_vm2, %v9498_v51 }
0x1bad   : > { %18487 = vmatpush3.bf16.xpose.msra.mxu0 %v9775_v52  ;;  %18488 = vmatprep.mubr.msk.bf16.mxu0 %vm20148_vm1, %v20147_v15 }
0x1bae   : > { %18498 = vmatprep.subr.bf16.mxu0 %v20147_v15 }
0x1bb0   : > { %18483 = vmatmul.mubr.msk.bf16.vlgmr.msra.gmra.mxu1 %vm785_vm2, %v9498_v51 }
0x1bb1   : > { %18493 = vmatpush3.bf16.xpose.msra.mxu1 %v9820_v42  ;;  %18494 = vmatprep.mubr.msk.bf16.mxu1 %vm20148_vm1, %v20147_v15 }
0x1bb2   : > { %18504 = vmatprep.subr.bf16.mxu1 %v20147_v15 }
0x1bb4   : > { %18489 = vmatmul.mubr.msk.bf16.vlgmr.msra.gmra.mxu0 %vm785_vm2, %v9498_v51 }
0x1bb5   : > { %18499 = vmatpush3.bf16.msra.mxu0 %v9964_v44  ;;  %18500 = vmatprep.mubr.msk.bf16.mxu0 %vm20148_vm1, %v20147_v15 }
0x1bb6   : > { %18510 = vmatprep.subr.bf16.mxu0 %v20147_v15 }
0x1bb8   : > { %18495 = vmatmul.mubr.msk.bf16.vlgmr.msra.gmra.mxu1 %vm785_vm2, %v9498_v51 }
0x1bb9   : > { %18505 = vmatpush3.bf16.msra.mxu1 %v10012_v39  ;;  %18506 = vmatprep.mubr.msk.bf16.mxu1 %vm20148_vm1, %v20147_v15 }
0x1bba   : > { %18516 = vmatprep.subr.bf16.mxu1 %v20147_v15 }
0x1c0b   : > { %v9131_v54 = vpop.f32.mrf.mxu0 }
0x1c0c   : > { %v9480_v48 = vadd.f32 %v9131_v54, %v22372_v8 }
0x1c0d   : > { %v18406_v32 = vpop.f32.mrf.mxu0 }
0x1c0e   : > { %9488 = vst.msk [vmem:[#allocation2] sm:$0xff] %vm785_vm2, %v9480_v48 }
0x1c0f   : > { %v9134_v60 = vpop.f32.mrf.mxu0  ;;  %v9180_v55 = vpop.f32.mrf.mxu1 }
0x1c10   : > { %v9481_v29 = vadd.f32 %v9180_v55, %v22372_v8 }
0x1c11   : > { %v18407_v56 = vpop.f32.mrf.mxu0  ;;  %v18412_v19 = vpop.f32.mrf.mxu1 }
0x1c12   : > { %9489 = vst.msk [vmem:[#allocation2 + $0x8] sm:$0xff] %vm785_vm2, %v9481_v29 }
0x1c13   : > { %v9183_v14 = vpop.f32.mrf.mxu1  ;;  %v9229_v57 = vpop.f32.mrf.mxu0 }
0x1c14   : > { %v9482_v5 = vadd.f32 %v9229_v57, %v22372_v8 }
0x1c15   : > { %v18413_v36 = vpop.f32.mrf.mxu1  ;;  %v18418_v50 = vpop.f32.mrf.mxu0 }
0x1c16   : > { %9490 = vst.msk [vmem:[#allocation2 + $0x10] sm:$0xff] %vm785_vm2, %v9482_v5 }
0x1c17   : > { %v9232_v28 = vpop.f32.mrf.mxu0  ;;  %v9278_v59 = vpop.f32.mrf.mxu1 }
0x1c18   : > { %v9483_v30 = vadd.f32 %v9278_v59, %v22372_v8 }
0x1c19   : > { %v18419_v0 = vpop.f32.mrf.mxu0  ;;  %v18424_v10 = vpop.f32.mrf.mxu1 }
0x1c1a   : > { %9491 = vst.msk [vmem:[#allocation2 + $0x18] sm:$0xff] %vm785_vm2, %v9483_v30 }
0x1c1b   : > { %v9281_v18 = vpop.f32.mrf.mxu1 }
0x1c1d   : > { %v18425_v21 = vpop.f32.mrf.mxu1 }
0x1c1f   : > { %v9327_v53 = vpop.f32.mrf.mxu0 }
0x1c20   : > { %v9484_v1 = vadd.f32 %v9327_v53, %v22372_v8 }
0x1c21   : > { %v18430_v12 = vpop.f32.mrf.mxu0 }
0x1c22   : > { %9492 = vst.msk [vmem:[#allocation2 + $0x20] sm:$0xff] %vm785_vm2, %v9484_v1 }
0x1c23   : > { %v9330_v2 = vpop.f32.mrf.mxu0  ;;  %v9376_v11 = vpop.f32.mrf.mxu1 }
0x1c24   : > { %v9485_v27 = vadd.f32 %v9376_v11, %v22372_v8 }
0x1c25   : > { %v18431_v38 = vpop.f32.mrf.mxu0  ;;  %v18436_v47 = vpop.f32.mrf.mxu1 }
0x1c26   : > { %9493 = vst.msk [vmem:[#allocation2 + $0x28] sm:$0xff] %vm785_vm2, %v9485_v27 }
0x1c27   : > { %v9379_v40 = vpop.f32.mrf.mxu1 }
0x1c29   : > { %v18437_v45 = vpop.f32.mrf.mxu1 }
0x1c54   : > { %v9425_v20 = vpop.f32.mrf.mxu0 }
0x1c55   : > { %v9486_v51 = vadd.f32 %v9425_v20, %v22372_v8 }
0x1c56   : > { %v18442_v58 = vpop.f32.mrf.mxu0 }
0x1c57   : > { %9494 = vst.msk [vmem:[#allocation2 + $0x30] sm:$0xff] %vm785_vm2, %v9486_v51  ;;  %v22665_v51 = vpop.permute.xlu1 %10054 }
0x1c58   : > { %v9428_v34 = vpop.f32.mrf.mxu0  ;;  %v9474_v4 = vpop.f32.mrf.mxu1 }
0x1c59   : > { %v9487_v22 = vadd.f32 %v9474_v4, %v22372_v8 }
0x1c5a   : > { %v18443_v63 = vpop.f32.mrf.mxu0  ;;  %v18448_v16 = vpop.f32.mrf.mxu1 }
0x1c5b   : > { %9495 = vst.msk [vmem:[#allocation2 + $0x38] sm:$0xff] %vm785_vm2, %v9487_v22  ;;  %v22667_v58 = vpop.permute.xlu1 %10102 }
0x1c5c   : > { %v9477_v46 = vpop.f32.mrf.mxu1  ;;  %v9541_v35 = vpop.f32.mrf.mxu0 }
0x1c5d   : > { %v9862_v49 = vsel %vm785_vm2, %v9541_v35, -inf }
0x1c5e   : > { %v18449_v61 = vpop.f32.mrf.mxu1  ;;  %9863 = vmax.xlane.f32.xlu0 %v9862_v49  ;;  %v18454_v52 = vpop.f32.mrf.mxu0 }
0x1c60   : > { %v9544_v31 = vpop.f32.mrf.mxu0  ;;  %v9586_v42 = vpop.f32.mrf.mxu1 }
0x1c61   : > { %v9865_v33 = vsel %vm785_vm2, %v9586_v42, -inf }
0x1c62   : > { %9866 = vmax.xlane.f32.xlu1 %v9865_v33  ;;  %v18455_v44 = vpop.f32.mrf.mxu0  ;;  %v18460_v24 = vpop.f32.mrf.mxu1 }
0x1c64   : > { %v9589_v39 = vpop.f32.mrf.mxu1  ;;  %v9631_v54 = vpop.f32.mrf.mxu0 }
0x1c65   : > { %v9868_v48 = vsel %vm785_vm2, %v9631_v54, -inf }
0x1c66   : > { %v18461_v32 = vpop.f32.mrf.mxu1  ;;  %9869 = vmax.xlane.f32.xlu0 %v9868_v48  ;;  %v18466_v60 = vpop.f32.mrf.mxu0 }
0x1c68   : > { %v9634_v55 = vpop.f32.mrf.mxu0  ;;  %v9676_v29 = vpop.f32.mrf.mxu1 }
0x1c69   : > { %v9871_v56 = vsel %vm785_vm2, %v9676_v29, -inf }
0x1c6a   : > { %v18472_v19 = vpop.f32.mrf.mxu1  ;;  %9872 = vmax.xlane.f32.xlu0 %v9871_v56  ;;  %v18467_v14 = vpop.f32.mrf.mxu0 }
0x1c6c   : > { %v9679_v57 = vpop.f32.mrf.mxu1  ;;  %v9721_v5 = vpop.f32.mrf.mxu0 }
0x1c6d   : > { %v9874_v36 = vsel %vm785_vm2, %v9721_v5, -inf }
0x1c6e   : > { %v18473_v50 = vpop.f32.mrf.mxu1  ;;  %9875 = vmax.xlane.f32.xlu0 %v9874_v36  ;;  %v18478_v28 = vpop.f32.mrf.mxu0 }
0x1c70   : > { %v9724_v59 = vpop.f32.mrf.mxu0  ;;  %v22655_v30 = vpop.f32.mrf.mxu1 }
0x1c71   : > { %v9877_v0 = vsel %vm785_vm2, %v22655_v30, -inf }
0x1c72   : > { %9878 = vmax.xlane.f32.xlu1 %v9877_v0  ;;  %v18479_v10 = vpop.f32.mrf.mxu0  ;;  %v18484_v18 = vpop.f32.mrf.mxu1 }
0x1c74   : > { %v9769_v21 = vpop.f32.mrf.mxu1  ;;  %v9811_v53 = vpop.f32.mrf.mxu0 }
0x1c75   : > { %v9880_v1 = vsel %vm785_vm2, %v9811_v53, -inf }
0x1c76   : > { %v18485_v12 = vpop.f32.mrf.mxu1  ;;  %9881 = vmax.xlane.f32.xlu0 %v9880_v1  ;;  %v18490_v2 = vpop.f32.mrf.mxu0 }
0x1c78   : > { %v9814_v11 = vpop.f32.mrf.mxu0  ;;  %v9856_v27 = vpop.f32.mrf.mxu1 }
0x1c79   : > { %v9883_v38 = vsel %vm785_vm2, %v9856_v27, -inf }
0x1c7a   : > { %9884 = vmax.xlane.f32.xlu1 %v9883_v38  ;;  %v18491_v47 = vpop.f32.mrf.mxu0  ;;  %v18496_v40 = vpop.f32.mrf.mxu1 }
0x1c7c   : > { %v9859_v45 = vpop.f32.mrf.mxu1 }
0x1c7e   : > { %v18497_v20 = vpop.f32.mrf.mxu1 }
0x1c8b   : > { %10198 = vrot.lane.b32.xlu1 %v22425_v17, %s20151_s18 }
0x1c8c   : > { %10150 = vrot.lane.b32.xlu0 %v22415_v41, %s20151_s18 }
0x1ce7   : > { %v9864_v34 = vpop.xlane.xlu0 %9863 }
0x1ce8   : > { %v9886_v4 = vsub.f32 %v9541_v35, %v9864_v34 }
0x1cea   : > { %v9894_v22 = vmul.f32 1.442695, %v9886_v4 }
0x1ceb   : > { %v9867_v63 = vpop.xlane.xlu1 %9866 }
0x1cec   : > { %19619 = vpow2.f32 %v9894_v22  ;;  %v9887_v16 = vsub.f32 %v9586_v42, %v9867_v63 }
0x1cee   : > { %v9896_v46 = vmul.f32 1.442695, %v9887_v16  ;;  %v10060_v16 = vsel %vm1235_vm3, %v22665_v51, 0 }
0x1cef   : > { %v9870_v49 = vpop.xlane.xlu0 %9869 }
0x1cf0   : > { %19621 = vpow2.f32 %v9896_v46  ;;  %v9888_v61 = vsub.f32 %v9631_v54, %v9870_v49 }
0x1cf2   : > { %v9898_v52 = vmul.f32 1.442695, %v9888_v61 }
0x1cf3   : > { %v9873_v31 = vpop.xlane.xlu0 %9872 }
0x1cf4   : > { %19623 = vpow2.f32 %v9898_v52  ;;  %v9889_v33 = vsub.f32 %v9676_v29, %v9873_v31  ;;  %v10108_v52 = vsel %vm1235_vm3, %v22667_v58, 0 }
0x1cf6   : > { %v9900_v44 = vmul.f32 1.442695, %v9889_v33 }
0x1cf7   : > { %v9876_v24 = vpop.xlane.xlu0 %9875 }
0x1cf8   : > { %19625 = vpow2.f32 %v9900_v44  ;;  %v9890_v39 = vsub.f32 %v9721_v5, %v9876_v24 }
0x1cf9   : > { %v22669_v48 = vpop.eup %19619 }
0x1cfa   : > { %v9902_v32 = vmul.f32 1.442695, %v9890_v39  ;;  %v9910_v35 = vsel %vm785_vm2, %v22669_v48, 0.0 }
0x1cfb   : > { %9911 = vadd.xlane.f32.xlu0 %v9910_v35  ;;  %v9879_v57 = vpop.xlane.xlu1 %9878 }
0x1cfc   : > { %19627 = vpow2.f32 %v9902_v32  ;;  %v9891_v5 = vsub.f32 %v22655_v30, %v9879_v57 }
0x1cfd   : > { %v22673_v42 = vpop.eup %19621 }
0x1cfe   : > { %v9913_v54 = vsel %vm785_vm2, %v22673_v42, 0.0  ;;  %v9904_v59 = vmul.f32 1.442695, %v9891_v5 }
0x1cff   : > { %9914 = vadd.xlane.f32.xlu1 %v9913_v54  ;;  %v9882_v36 = vpop.xlane.xlu0 %9881 }
0x1d00   : > { %v9892_v28 = vsub.f32 %v9811_v53, %v9882_v36  ;;  %19629 = vpow2.f32 %v9904_v59 }
0x1d01   : > { %v22677_v60 = vpop.eup %19623 }
0x1d02   : > { %v9916_v55 = vsel %vm785_vm2, %v22677_v60, 0.0  ;;  %v9906_v10 = vmul.f32 1.442695, %v9892_v28 }
0x1d03   : > { %9917 = vadd.xlane.f32.xlu0 %v9916_v55  ;;  %v9885_v50 = vpop.xlane.xlu1 %9884  ;;  %v10151_v11 = vpop.permute.xlu0 %10150 }
0x1d04   : > { %v9893_v0 = vsub.f32 %v9856_v27, %v9885_v50  ;;  %19631 = vpow2.f32 %v9906_v10  ;;  %v10156_v44 = vsel %vm1235_vm3, %v10151_v11, 0 }
0x1d05   : > { %v22681_v29 = vpop.eup %19625 }
0x1d06   : > { %v9919_v56 = vsel %vm785_vm2, %v22681_v29, 0.0  ;;  %v9908_v18 = vmul.f32 1.442695, %v9893_v0 }
0x1d07   : > { %9920 = vadd.xlane.f32.xlu1 %v9919_v56  ;;  %v10199_v27 = vpop.permute.xlu1 %10198 }
0x1d08   : > { %19633 = vpow2.f32 %v9908_v18 }
0x1d09   : > { %v22685_v19 = vpop.eup %19627 }
0x1d0a   : > { %v9922_v14 = vsel %vm785_vm2, %v22685_v19, 0.0 }
0x1d0b   : > { %9923 = vadd.xlane.f32.xlu0 %v9922_v14 }
0x1d0d   : > { %v22694_v21 = vpop.eup %19629 }
0x1d0e   : > { %v9925_v12 = vsel %vm785_vm2, %v22694_v21, 0.0 }
0x1d11   : > { %v22696_v1 = vpop.eup %19631 }
0x1d12   : > { %v9928_v53 = vsel %vm785_vm2, %v22696_v1, 0.0 }
0x1d15   : > { %v22700_v2 = vpop.eup %19633 }
0x1d16   : > { %v9931_v30 = vsel %vm785_vm2, %v22700_v2, 0.0 }
0x1d18   : > { %10294 = vrot.lane.b32.xlu1 %v22433_v25, %s20151_s18 }
0x1d21   : > { %10246 = vrot.lane.b32.xlu0 %v22428_v23, %s20151_s18 }
0x1d3c   : > { %9926 = vadd.xlane.f32.xlu1 %v9925_v12 }
0x1d40   : > { %9932 = vadd.xlane.f32.xlu1 %v9931_v30  ;;  %9929 = vadd.xlane.f32.xlu0 %v9928_v53 }
0x1d51   : > { %10440 = vrot.lane.b32.xlu1 %v22381_v9, %s20152_s17 }
0x1d55   : > { %10485 = vrot.lane.b32.xlu1 %v22370_v26, %s20152_s17 }
0x1d56   : > { %10392 = vrot.lane.b32.xlu0 %v22374_v6, %s20152_s17 }
0x1d59   : > { %10575 = vrot.lane.b32.xlu1 %v22415_v41, %s20152_s17 }
0x1d5a   : > { %10390 = vrot.lane.b32.xlu0 %v22392_v37, %s20152_s17 }
0x1d5d   : > { %10665 = vrot.lane.b32.xlu1 %v22428_v23, %s20152_s17 }
0x1d5e   : > { %10530 = vrot.lane.b32.xlu0 %v22386_v3, %s20152_s17 }
0x1d61   : > { %10851 = vrot.lane.b32.xlu1 %v22374_v6, %s20153_s22 }
0x1d62   : > { %10620 = vrot.lane.b32.xlu0 %v22425_v17, %s20152_s17 }
0x1d65   : > { %10947 = vrot.lane.b32.xlu1 %v22370_v26, %s20153_s22 }
0x1d66   : > { %10710 = vrot.lane.b32.xlu0 %v22433_v25, %s20152_s17 }
0x1d69   : > { %10995 = vrot.lane.b32.xlu1 %v22386_v3, %s20153_s22 }
0x1d6a   : > { %10899 = vrot.lane.b32.xlu0 %v22381_v9, %s20153_s22 }
0x1d6d   : > { %11043 = vrot.lane.b32.xlu1 %v22415_v41, %s20153_s22 }
0x1d84   : > { %v9912_v38 = vpop.xlane.xlu0 %9911 }
0x1d85   : > { %19635 = vrcp.f32 %v9912_v38 }
0x1d88   : > { %v9915_v47 = vpop.xlane.xlu1 %9914 }
0x1d89   : > { %19637 = vrcp.f32 %v9915_v47 }
0x1d8c   : > { %v9918_v40 = vpop.xlane.xlu0 %9917 }
0x1d8d   : > { %19639 = vrcp.f32 %v9918_v40 }
0x1d90   : > { %v9921_v45 = vpop.xlane.xlu1 %9920 }
0x1d91   : > { %19641 = vrcp.f32 %v9921_v45 }
0x1d92   : > { %v19636_v20 = vpop.eup %19635 }
0x1d93   : > { %v9942_v34 = vmul.f32 %v19636_v20, %v22669_v48  ;;  %v10204_v48 = vsel %vm1235_vm3, %v10199_v27, 0 }
0x1d94   : > { %v9924_v4 = vpop.xlane.xlu0 %9923 }
0x1d95   : > { %v9950_v22 = vpack.c.bf16 %v9942_v34, %v9942_v34  ;;  %19643 = vrcp.f32 %v9924_v4 }
0x1d96   : > { %v19638_v63 = vpop.eup %19637 }
0x1d97   : > { %v9943_v46 = vmul.f32 %v19638_v63, %v22673_v42  ;;  %18501 = vmatmul.mubr.msk.bf16.vlgmr.msra.gmra.mxu0 %vm785_vm2, %v9950_v22 }
0x1d98   : > { %18511 = vmatpush3.bf16.msra.mxu0 %v10060_v16  ;;  %18512 = vmatprep.mubr.msk.bf16.mxu0 %vm20148_vm1, %v20147_v15  ;;  %v10247_v35 = vpop.permute.xlu0 %10246 }
0x1d99   : > { %v9951_v49 = vpack.c.bf16 %v9943_v46, %v9943_v46  ;;  %18522 = vmatprep.subr.bf16.mxu0 %v20147_v15  ;;  %v10252_v54 = vsel %vm1235_vm3, %v10247_v35, 0 }
0x1d9a   : > { %v19640_v61 = vpop.eup %19639 }
0x1d9b   : > { %v9944_v31 = vmul.f32 %v19640_v61, %v22677_v60  ;;  %18507 = vmatmul.mubr.msk.bf16.vlgmr.msra.gmra.mxu1 %vm785_vm2, %v9951_v49  ;;  %v10295_v60 = vpop.permute.xlu1 %10294 }
0x1d9c   : > { %18517 = vmatpush3.bf16.msra.mxu1 %v10108_v52  ;;  %18518 = vmatprep.mubr.msk.bf16.mxu1 %vm20148_vm1, %v20147_v15  ;;  %v10300_v50 = vsel %vm1235_vm3, %v10295_v60, 0 }
0x1d9d   : > { %v9952_v51 = vpack.c.bf16 %v9944_v31, %v9944_v31  ;;  %18528 = vmatprep.subr.bf16.mxu1 %v20147_v15 }
0x1d9e   : > { %v19642_v33 = vpop.eup %19641 }
0x1d9f   : > { %v9945_v24 = vmul.f32 %v19642_v33, %v22681_v29  ;;  %18513 = vmatmul.mubr.msk.bf16.vlgmr.msra.gmra.mxu0 %vm785_vm2, %v9952_v51 }
0x1da0   : > { %18523 = vmatpush3.bf16.msra.mxu0 %v10156_v44  ;;  %18524 = vmatprep.mubr.msk.bf16.mxu0 %vm20148_vm1, %v20147_v15 }
0x1da1   : > { %v9953_v58 = vpack.c.bf16 %v9945_v24, %v9945_v24  ;;  %18534 = vmatprep.subr.bf16.mxu0 %v20147_v15 }
0x1da2   : > { %v19644_v39 = vpop.eup %19643 }
0x1da3   : > { %v9946_v32 = vmul.f32 %v19644_v39, %v22685_v19  ;;  %18519 = vmatmul.mubr.msk.bf16.vlgmr.msra.gmra.mxu1 %vm785_vm2, %v9953_v58 }
0x1da4   : > { %18529 = vmatpush3.bf16.msra.mxu1 %v10204_v48  ;;  %18530 = vmatprep.mubr.msk.bf16.mxu1 %vm20148_vm1, %v20147_v15 }
0x1da5   : > { %v9954_v42 = vpack.c.bf16 %v9946_v32, %v9946_v32  ;;  %18540 = vmatprep.subr.bf16.mxu1 %v20147_v15 }
0x1da7   : > { %18525 = vmatmul.mubr.msk.bf16.vlgmr.msra.gmra.mxu0 %vm785_vm2, %v9954_v42 }
0x1da8   : > { %18535 = vmatpush3.bf16.msra.mxu0 %v10252_v54  ;;  %18536 = vmatprep.mubr.msk.bf16.mxu0 %vm20148_vm1, %v20147_v15 }
0x1da9   : > { %18546 = vmatprep.subr.bf16.mxu0 %v20147_v15 }
0x1dc5   : > { %v9927_v55 = vpop.xlane.xlu1 %9926 }
0x1dc6   : > { %19645 = vrcp.f32 %v9927_v55 }
0x1dc9   : > { %v9933_v29 = vpop.xlane.xlu1 %9932  ;;  %v9930_v56 = vpop.xlane.xlu0 %9929 }
0x1dca   : > { %19647 = vrcp.f32 %v9933_v29 }
0x1dcb   : > { %19649 = vrcp.f32 %v9930_v56 }
0x1dcd   : > { %v10393_v59 = vpop.permute.xlu0 %10392  ;;  %v10441_v18 = vpop.permute.xlu1 %10440 }
0x1dce   : > { %v10443_v30 = vsel %vm785_vm2, %v10441_v18, 0 }
0x1dd3   : > { %v19646_v19 = vpop.eup %19645 }
0x1dd4   : > { %v9947_v14 = vmul.f32 %v19646_v19, %v22694_v21  ;;  %v10398_v21 = vsel %vm785_vm2, %v10393_v59, 0 }
0x1dd6   : > { %v9955_v57 = vpack.c.bf16 %v9947_v14, %v9947_v14 }
0x1dd7   : > { %v19648_v5 = vpop.eup %19647 }
0x1dd8   : > { %v19650_v36 = vpop.eup %19649  ;;  %18531 = vmatmul.mubr.msk.bf16.vlgmr.msra.gmra.mxu1 %vm785_vm2, %v9955_v57  ;;  %v9949_v0 = vmul.f32 %v19648_v5, %v22700_v2  ;;  %v10486_v2 = vpop.permute.xlu1 %10485 }
0x1dd9   : > { %v9948_v28 = vmul.f32 %v19650_v36, %v22696_v1  ;;  %18541 = vmatpush3.bf16.msra.mxu1 %v10300_v50  ;;  %18542 = vmatprep.mubr.msk.bf16.mxu1 %vm20148_vm1, %v20147_v15  ;;  %v10391_v1 = vpop.permute.xlu0 %10390  ;;  %v10488_v53 = vsel %vm785_vm2, %v10486_v2, 0 }
0x1dda   : > { %18552 = vmatprep.subr.bf16.mxu1 %v20147_v15  ;;  %v9957_v12 = vpack.c.bf16 %v9949_v0, %v9949_v0 }
0x1ddb   : > { %v9956_v10 = vpack.c.bf16 %v9948_v28, %v9948_v28 }
0x1ddc   : > { %v10576_v38 = vpop.permute.xlu1 %10575 }
0x1ddd   : > { %18537 = vmatmul.mubr.msk.bf16.vlgmr.msra.gmra.mxu0 %vm785_vm2, %v9956_v10  ;;  %v10531_v11 = vpop.permute.xlu0 %10530  ;;  %v10578_v47 = vsel %vm785_vm2, %v10576_v38, 0 }
0x1dde   : > { %18547 = vmatpush3.bf16.xpose.msra.mxu0 %v10398_v21  ;;  %18548 = vmatprep.mubr.msk.bf16.mxu0 %vm20148_vm1, %v20147_v15  ;;  %v10533_v27 = vsel %vm785_vm2, %v10531_v11, 0 }
0x1ddf   : > { %18558 = vmatprep.subr.bf16.mxu0 %v20147_v15 }
0x1de0   : > { %18543 = vmatmul.mubr.msk.bf16.vlgmr.msra.gmra.mxu1 %vm785_vm2, %v9957_v12  ;;  %v10666_v20 = vpop.permute.xlu1 %10665 }
0x1de1   : > { %18553 = vmatpush3.bf16.xpose.msra.mxu1 %v10443_v30  ;;  %18554 = vmatprep.mubr.msk.bf16.mxu1 %vm20148_vm1, %v20147_v15  ;;  %v10621_v40 = vpop.permute.xlu0 %10620  ;;  %v10668_v34 = vsel %vm785_vm2, %v10666_v20, 0 }
0x1de2   : > { %18564 = vmatprep.subr.bf16.mxu1 %v20147_v15  ;;  %v10623_v45 = vsel %vm785_vm2, %v10621_v40, 0 }
0x1de4   : > { %v10852_v63 = vpop.permute.xlu1 %10851 }
0x1de5   : > { %18549 = vmatmul.mubr.msk.bf16.vlgmr.msra.gmra.mxu0 %vm785_vm2, %v10391_v1  ;;  %v10711_v4 = vpop.permute.xlu0 %10710  ;;  %v10857_v16 = vsel %vm1235_vm3, %v10852_v63, 0 }
0x1de6   : > { %18559 = vmatpush3.bf16.xpose.msra.mxu0 %v10488_v53  ;;  %18560 = vmatprep.mubr.msk.bf16.mxu0 %vm20148_vm1, %v20147_v15  ;;  %v10713_v22 = vsel %vm785_vm2, %v10711_v4, 0 }
0x1de7   : > { %18570 = vmatprep.subr.bf16.mxu0 %v20147_v15 }
0x1de8   : > { %18555 = vmatmul.mubr.msk.bf16.vlgmr.msra.gmra.mxu1 %vm785_vm2, %v10391_v1 }
0x1de9   : > { %18565 = vmatpush3.bf16.xpose.msra.mxu1 %v10533_v27  ;;  %18566 = vmatprep.mubr.msk.bf16.mxu1 %vm20148_vm1, %v20147_v15  ;;  %v10900_v46 = vpop.permute.xlu0 %10899 }
0x1dea   : > { %18576 = vmatprep.subr.bf16.mxu1 %v20147_v15  ;;  %v10905_v49 = vsel %vm1235_vm3, %v10900_v46, 0 }
0x1ded   : > { %18561 = vmatmul.mubr.msk.bf16.vlgmr.msra.gmra.mxu0 %vm785_vm2, %v10391_v1 }
0x1dee   : > { %18571 = vmatpush3.bf16.xpose.msra.mxu0 %v10578_v47  ;;  %18572 = vmatprep.mubr.msk.bf16.mxu0 %vm20148_vm1, %v20147_v15 }
0x1def   : > { %18582 = vmatprep.subr.bf16.mxu0 %v20147_v15 }
0x1df0   : > { %18567 = vmatmul.mubr.msk.bf16.vlgmr.msra.gmra.mxu1 %vm785_vm2, %v10391_v1 }
0x1df1   : > { %18577 = vmatpush3.bf16.xpose.msra.mxu1 %v10623_v45  ;;  %18578 = vmatprep.mubr.msk.bf16.mxu1 %vm20148_vm1, %v20147_v15 }
0x1df2   : > { %18588 = vmatprep.subr.bf16.mxu1 %v20147_v15 }
0x1df5   : > { %18573 = vmatmul.mubr.msk.bf16.vlgmr.msra.gmra.mxu0 %vm785_vm2, %v10391_v1 }
0x1df6   : > { %18583 = vmatpush3.bf16.xpose.msra.mxu0 %v10668_v34  ;;  %18584 = vmatprep.mubr.msk.bf16.mxu0 %vm20148_vm1, %v20147_v15 }
0x1df7   : > { %18594 = vmatprep.subr.bf16.mxu0 %v20147_v15 }
0x1df8   : > { %18579 = vmatmul.mubr.msk.bf16.vlgmr.msra.gmra.mxu1 %vm785_vm2, %v10391_v1 }
0x1df9   : > { %18589 = vmatpush3.bf16.xpose.msra.mxu1 %v10713_v22  ;;  %18590 = vmatprep.mubr.msk.bf16.mxu1 %vm20148_vm1, %v20147_v15 }
0x1dfa   : > { %18600 = vmatprep.subr.bf16.mxu1 %v20147_v15 }
0x1dfd   : > { %18585 = vmatmul.mubr.msk.bf16.vlgmr.msra.gmra.mxu0 %vm785_vm2, %v10391_v1 }
0x1dfe   : > { %18595 = vmatpush3.bf16.msra.mxu0 %v10857_v16  ;;  %18596 = vmatprep.mubr.msk.bf16.mxu0 %vm20148_vm1, %v20147_v15 }
0x1dff   : > { %18606 = vmatprep.subr.bf16.mxu0 %v20147_v15 }
0x1e00   : > { %18591 = vmatmul.mubr.msk.bf16.vlgmr.msra.gmra.mxu1 %vm785_vm2, %v10391_v1 }
0x1e01   : > { %18601 = vmatpush3.bf16.msra.mxu1 %v10905_v49  ;;  %18602 = vmatprep.mubr.msk.bf16.mxu1 %vm20148_vm1, %v20147_v15 }
0x1e02   : > { %18612 = vmatprep.subr.bf16.mxu1 %v20147_v15 }
0x1e57   : > { %v22824_v61 = vpop.f32.mrf.mxu0 }
0x1e59   : > { %v18502_v52 = vpop.f32.mrf.mxu0 }
0x1e5b   : > { %v10003_v31 = vpop.f32.mrf.mxu0  ;;  %v22826_v51 = vpop.f32.mrf.mxu1 }
0x1e5d   : > { %v18503_v33 = vpop.f32.mrf.mxu0  ;;  %v18508_v44 = vpop.f32.mrf.mxu1 }
0x1e5f   : > { %v10051_v24 = vpop.f32.mrf.mxu1  ;;  %v22828_v58 = vpop.f32.mrf.mxu0 }
0x1e61   : > { %v18509_v39 = vpop.f32.mrf.mxu1  ;;  %v18514_v48 = vpop.f32.mrf.mxu0 }
0x1e63   : > { %v10099_v32 = vpop.f32.mrf.mxu0  ;;  %v22830_v35 = vpop.f32.mrf.mxu1 }
0x1e65   : > { %v18515_v42 = vpop.f32.mrf.mxu0  ;;  %v18520_v54 = vpop.f32.mrf.mxu1 }
0x1e67   : > { %v10147_v60 = vpop.f32.mrf.mxu1  ;;  %v22832_v55 = vpop.f32.mrf.mxu0 }
0x1e69   : > { %v18521_v29 = vpop.f32.mrf.mxu1  ;;  %v18526_v56 = vpop.f32.mrf.mxu0 }
0x1e6b   : > { %v10195_v19 = vpop.f32.mrf.mxu0 }
0x1e6d   : > { %v18527_v14 = vpop.f32.mrf.mxu0 }
0x1e98   : > { %v22834_v57 = vpop.f32.mrf.mxu1 }
0x1e9a   : > { %v18532_v5 = vpop.f32.mrf.mxu1 }
0x1e9c   : > { %v10243_v36 = vpop.f32.mrf.mxu1 }
0x1e9d   : > { %v22836_v50 = vpop.f32.mrf.mxu0 }
0x1e9e   : > { %v18533_v28 = vpop.f32.mrf.mxu1 }
0x1e9f   : > { %v18538_v59 = vpop.f32.mrf.mxu0 }
0x1ea0   : > { %v22838_v0 = vpop.f32.mrf.mxu1 }
0x1ea1   : > { %v10291_v10 = vpop.f32.mrf.mxu0 }
0x1ea2   : > { %v18544_v18 = vpop.f32.mrf.mxu1 }
0x1ea3   : > { %v18539_v21 = vpop.f32.mrf.mxu0 }
0x1ea4   : > { %v10339_v12 = vpop.f32.mrf.mxu1 }
0x1ea5   : > { %v10434_v1 = vpop.f32.mrf.mxu0 }
0x1ea6   : > { %v18545_v30 = vpop.f32.mrf.mxu1  ;;  %v10755_v2 = vsel %vm785_vm2, %v10434_v1, -inf }
0x1ea7   : > { %10756 = vmax.xlane.f32.xlu1 %v10755_v2  ;;  %v18550_v53 = vpop.f32.mrf.mxu0  ;;  %v22855_v30 = vpop.permute.xlu1 %10947 }
0x1ea8   : > { %v10479_v11 = vpop.f32.mrf.mxu1 }
0x1ea9   : > { %v10437_v27 = vpop.f32.mrf.mxu0  ;;  %v10758_v38 = vsel %vm785_vm2, %v10479_v11, -inf }
0x1eaa   : > { %10759 = vmax.xlane.f32.xlu0 %v10758_v38  ;;  %v18556_v47 = vpop.f32.mrf.mxu1 }
0x1eab   : > { %v18551_v40 = vpop.f32.mrf.mxu0  ;;  %v22857_v2 = vpop.permute.xlu1 %10995 }
0x1eac   : > { %v10482_v45 = vpop.f32.mrf.mxu1 }
0x1ead   : > { %v10524_v20 = vpop.f32.mrf.mxu0 }
0x1eae   : > { %v18557_v34 = vpop.f32.mrf.mxu1  ;;  %v10761_v4 = vsel %vm785_vm2, %v10524_v20, -inf }
0x1eaf   : > { %10762 = vmax.xlane.f32.xlu0 %v10761_v4  ;;  %v18562_v22 = vpop.f32.mrf.mxu0  ;;  %v22859_v53 = vpop.permute.xlu1 %11043 }
0x1eb0   : > { %v10569_v63 = vpop.f32.mrf.mxu1 }
0x1eb1   : > { %v10527_v16 = vpop.f32.mrf.mxu0  ;;  %v10764_v46 = vsel %vm785_vm2, %v10569_v63, -inf }
0x1eb2   : > { %v18568_v49 = vpop.f32.mrf.mxu1 }
0x1eb3   : > { %10765 = vmax.xlane.f32.xlu0 %v10764_v46  ;;  %v18563_v52 = vpop.f32.mrf.mxu0 }
0x1eb4   : > { %v10572_v31 = vpop.f32.mrf.mxu1 }
0x1eb5   : > { %v10614_v33 = vpop.f32.mrf.mxu0 }
0x1eb6   : > { %v18569_v44 = vpop.f32.mrf.mxu1  ;;  %v10767_v24 = vsel %vm785_vm2, %v10614_v33, -inf }
0x1eb7   : > { %10768 = vmax.xlane.f32.xlu1 %v10767_v24  ;;  %v18574_v39 = vpop.f32.mrf.mxu0 }
0x1eb8   : > { %v10659_v48 = vpop.f32.mrf.mxu1 }
0x1eb9   : > { %v10617_v32 = vpop.f32.mrf.mxu0  ;;  %v10770_v42 = vsel %vm785_vm2, %v10659_v48, -inf }
0x1eba   : > { %v18580_v54 = vpop.f32.mrf.mxu1  ;;  %10771 = vmax.xlane.f32.xlu0 %v10770_v42 }
0x1ebb   : > { %v18575_v60 = vpop.f32.mrf.mxu0 }
0x1ebc   : > { %v10662_v29 = vpop.f32.mrf.mxu1 }
0x1ebd   : > { %v22846_v56 = vpop.f32.mrf.mxu0 }
0x1ebe   : > { %v18581_v19 = vpop.f32.mrf.mxu1  ;;  %v10773_v14 = vsel %vm785_vm2, %v22846_v56, -inf }
0x1ebf   : > { %10774 = vmax.xlane.f32.xlu1 %v10773_v14  ;;  %v18586_v5 = vpop.f32.mrf.mxu0 }
0x1ec0   : > { %v10749_v36 = vpop.f32.mrf.mxu1 }
0x1ec1   : > { %v10707_v28 = vpop.f32.mrf.mxu0  ;;  %v10776_v59 = vsel %vm785_vm2, %v10749_v36, -inf }
0x1ec2   : > { %v18592_v10 = vpop.f32.mrf.mxu1  ;;  %10777 = vmax.xlane.f32.xlu0 %v10776_v59 }
0x1ec3   : > { %v18587_v18 = vpop.f32.mrf.mxu0 }
0x1ec4   : > { %v10752_v21 = vpop.f32.mrf.mxu1 }
0x1ec6   : > { %v18593_v12 = vpop.f32.mrf.mxu1 }
0x1ed0   : > { %11139 = vrot.lane.b32.xlu1 %v22428_v23, %s20153_s22 }
0x1ed8   : > { %11091 = vrot.lane.b32.xlu0 %v22425_v17, %s20153_s22 }
0x1f30   : > { %v10757_v27 = vpop.xlane.xlu1 %10756 }
0x1f31   : > { %v10779_v38 = vsub.f32 %v10434_v1, %v10757_v27 }
0x1f33   : > { %v10787_v47 = vmul.f32 1.442695, %v10779_v38  ;;  %v10760_v40 = vpop.xlane.xlu0 %10759 }
0x1f34   : > { %v10780_v45 = vsub.f32 %v10479_v11, %v10760_v40 }
0x1f35   : > { %19651 = vpow2.f32 %v10787_v47 }
0x1f36   : > { %v10789_v34 = vmul.f32 1.442695, %v10780_v45 }
0x1f38   : > { %19653 = vpow2.f32 %v10789_v34  ;;  %v10763_v4 = vpop.xlane.xlu0 %10762 }
0x1f39   : > { %v10781_v22 = vsub.f32 %v10524_v20, %v10763_v4 }
0x1f3b   : > { %v10791_v16 = vmul.f32 1.442695, %v10781_v22 }
0x1f3c   : > { %v10766_v46 = vpop.xlane.xlu0 %10765 }
0x1f3d   : > { %19655 = vpow2.f32 %v10791_v16  ;;  %v10782_v49 = vsub.f32 %v10569_v63, %v10766_v46 }
0x1f3f   : > { %v10793_v52 = vmul.f32 1.442695, %v10782_v49 }
0x1f40   : > { %v10769_v31 = vpop.xlane.xlu1 %10768 }
0x1f41   : > { %19657 = vpow2.f32 %v10793_v52  ;;  %v10783_v44 = vsub.f32 %v10614_v33, %v10769_v31 }
0x1f42   : > { %v19652_v24 = vpop.eup %19651 }
0x1f43   : > { %v10795_v39 = vmul.f32 1.442695, %v10783_v44  ;;  %v10772_v32 = vpop.xlane.xlu0 %10771  ;;  %v10803_v1 = vsel %vm785_vm2, %v19652_v24, 0.0  ;;  %v10953_v44 = vsel %vm1235_vm3, %v22855_v30, 0 }
0x1f44   : > { %v10784_v42 = vsub.f32 %v10659_v48, %v10772_v32  ;;  %10804 = vadd.xlane.f32.xlu1 %v10803_v1  ;;  %v11001_v1 = vsel %vm1235_vm3, %v22857_v2, 0 }
0x1f45   : > { %v19654_v11 = vpop.eup %19653  ;;  %19659 = vpow2.f32 %v10795_v39 }
0x1f46   : > { %v10797_v54 = vmul.f32 1.442695, %v10784_v42  ;;  %v10806_v20 = vsel %vm785_vm2, %v19654_v11, 0.0 }
0x1f47   : > { %10807 = vadd.xlane.f32.xlu0 %v10806_v20 }
0x1f48   : > { %19661 = vpow2.f32 %v10797_v54  ;;  %v10775_v28 = vpop.xlane.xlu1 %10774  ;;  %v11049_v54 = vsel %vm1235_vm3, %v22859_v53, 0 }
0x1f49   : > { %v10785_v59 = vsub.f32 %v22846_v56, %v10775_v28 }
0x1f4a   : > { %v22863_v60 = vpop.eup %19655 }
0x1f4b   : > { %v10809_v63 = vsel %vm785_vm2, %v22863_v60, 0.0  ;;  %v10778_v10 = vpop.xlane.xlu0 %10777  ;;  %v10799_v21 = vmul.f32 1.442695, %v10785_v59 }
0x1f4c   : > { %10810 = vadd.xlane.f32.xlu1 %v10809_v63  ;;  %v10786_v18 = vsub.f32 %v10749_v36, %v10778_v10 }
0x1f4d   : > { %19663 = vpow2.f32 %v10799_v21 }
0x1f4e   : > { %v22867_v33 = vpop.eup %19657  ;;  %v10801_v12 = vmul.f32 1.442695, %v10786_v18 }
0x1f4f   : > { %v10812_v29 = vsel %vm785_vm2, %v22867_v33, 0.0  ;;  %v11092_v56 = vpop.permute.xlu0 %11091 }
0x1f50   : > { %10813 = vadd.xlane.f32.xlu0 %v10812_v29  ;;  %19665 = vpow2.f32 %v10801_v12  ;;  %v11097_v63 = vsel %vm1235_vm3, %v11092_v56, 0 }
0x1f52   : > { %v22871_v48 = vpop.eup %19659 }
0x1f53   : > { %v10815_v19 = vsel %vm785_vm2, %v22871_v48, 0.0 }
0x1f54   : > { %10816 = vadd.xlane.f32.xlu1 %v10815_v19 }
0x1f55   : > { %v22875_v14 = vpop.eup %19661 }
0x1f56   : > { %v10818_v5 = vsel %vm785_vm2, %v22875_v14, 0.0 }
0x1f57   : > { %10819 = vadd.xlane.f32.xlu0 %v10818_v5 }
0x1f5a   : > { %v22884_v27 = vpop.eup %19663 }
0x1f5b   : > { %v10821_v47 = vsel %vm785_vm2, %v22884_v27, 0.0 }
0x1f5d   : > { %v22886_v38 = vpop.eup %19665 }
0x1f5e   : > { %v10824_v40 = vsel %vm785_vm2, %v22886_v38, 0.0 }
0x1f65   : > { %11285 = vrot.lane.b32.xlu1 %v22374_v6, %s20154_s8 }
0x1f6d   : > { %11187 = vrot.lane.b32.xlu0 %v22433_v25, %s20153_s22 }
0x1f89   : > { %10822 = vadd.xlane.f32.xlu1 %v10821_v47 }
0x1f8c   : > { %10825 = vadd.xlane.f32.xlu0 %v10824_v40 }
0x1f9a   : > { %11283 = vrot.lane.b32.xlu1 %v22392_v37, %s20154_s8  ;;  %v11140_v37 = vpop.permute.xlu1 %11139 }
0x1f9b   : > { %v11145_v5 = vsel %vm1235_vm3, %v11140_v37, 0 }
0x1f9e   : > { %11423 = vrot.lane.b32.xlu1 %v22386_v3, %s20154_s8 }
0x1fa2   : > { %11513 = vrot.lane.b32.xlu1 %v22425_v17, %s20154_s8  ;;  %11333 = vrot.lane.b32.xlu0 %v22381_v9, %s20154_s8 }
0x1fa6   : > { %11603 = vrot.lane.b32.xlu1 %v22433_v25, %s20154_s8  ;;  %11378 = vrot.lane.b32.xlu0 %v22370_v26, %s20154_s8 }
0x1faa   : > { %11468 = vrot.lane.b32.xlu0 %v22415_v41, %s20154_s8 }
0x1fae   : > { %11558 = vrot.lane.b32.xlu0 %v22428_v23, %s20154_s8 }
0x1fcd   : > { %v10805_v36 = vpop.xlane.xlu1 %10804 }
0x1fce   : > { %19667 = vrcp.f32 %v10805_v36 }
0x1fd0   : > { %v10808_v45 = vpop.xlane.xlu0 %10807 }
0x1fd1   : > { %19669 = vrcp.f32 %v10808_v45 }
0x1fd5   : > { %v10811_v34 = vpop.xlane.xlu1 %10810 }
0x1fd6   : > { %19671 = vrcp.f32 %v10811_v34 }
0x1fd9   : > { %v10814_v4 = vpop.xlane.xlu0 %10813 }
0x1fda   : > { %19673 = vrcp.f32 %v10814_v4 }
0x1fdb   : > { %v19668_v22 = vpop.eup %19667 }
0x1fdc   : > { %v10835_v16 = vmul.f32 %v19668_v22, %v19652_v24 }
0x1fdd   : > { %v10817_v46 = vpop.xlane.xlu1 %10816 }
0x1fde   : > { %v19670_v49 = vpop.eup %19669  ;;  %v10843_v52 = vpack.c.bf16 %v10835_v16, %v10835_v16  ;;  %19675 = vrcp.f32 %v10817_v46 }
0x1fdf   : > { %v10836_v31 = vmul.f32 %v19670_v49, %v19654_v11 }
0x1fe0   : > { %18597 = vmatmul.mubr.msk.bf16.vlgmr.msra.gmra.mxu0 %vm785_vm2, %v10843_v52  ;;  %v10820_v39 = vpop.xlane.xlu0 %10819 }
0x1fe1   : > { %v10844_v32 = vpack.c.bf16 %v10836_v31, %v10836_v31  ;;  %18607 = vmatpush3.bf16.msra.mxu0 %v10953_v44  ;;  %19677 = vrcp.f32 %v10820_v39  ;;  %18608 = vmatprep.mubr.msk.bf16.mxu0 %vm20148_vm1, %v20147_v15 }
0x1fe2   : > { %18618 = vmatprep.subr.bf16.mxu0 %v20147_v15 }
0x1fe3   : > { %v19672_v24 = vpop.eup %19671  ;;  %18603 = vmatmul.mubr.msk.bf16.vlgmr.msra.gmra.mxu1 %vm785_vm2, %v10844_v32 }
0x1fe4   : > { %v10837_v42 = vmul.f32 %v19672_v24, %v22863_v60  ;;  %18613 = vmatpush3.bf16.msra.mxu1 %v11001_v1  ;;  %18614 = vmatprep.mubr.msk.bf16.mxu1 %vm20148_vm1, %v20147_v15  ;;  %v11188_v59 = vpop.permute.xlu0 %11187 }
0x1fe5   : > { %18624 = vmatprep.subr.bf16.mxu1 %v20147_v15 }
0x1fe6   : > { %v10845_v30 = vpack.c.bf16 %v10837_v42, %v10837_v42 }
0x1fe7   : > { %v19674_v11 = vpop.eup %19673 }
0x1fe8   : > { %v10838_v20 = vmul.f32 %v19674_v11, %v22867_v33  ;;  %18609 = vmatmul.mubr.msk.bf16.vlgmr.msra.gmra.mxu0 %vm785_vm2, %v10845_v30 }
0x1fe9   : > { %18619 = vmatpush3.bf16.msra.mxu0 %v11049_v54  ;;  %18620 = vmatprep.mubr.msk.bf16.mxu0 %vm20148_vm1, %v20147_v15 }
0x1fea   : > { %v10846_v2 = vpack.c.bf16 %v10838_v20, %v10838_v20  ;;  %18630 = vmatprep.subr.bf16.mxu0 %v20147_v15 }
0x1feb   : > { %v19676_v60 = vpop.eup %19675 }
0x1fec   : > { %v10839_v29 = vmul.f32 %v19676_v60, %v22871_v48  ;;  %18615 = vmatmul.mubr.msk.bf16.vlgmr.msra.gmra.mxu1 %vm785_vm2, %v10846_v2  ;;  %v11193_v48 = vsel %vm1235_vm3, %v11188_v59, 0 }
0x1fed   : > { %18625 = vmatpush3.bf16.msra.mxu1 %v11097_v63  ;;  %18626 = vmatprep.mubr.msk.bf16.mxu1 %vm20148_vm1, %v20147_v15 }
0x1fee   : > { %v19678_v53 = vpop.eup %19677  ;;  %v10847_v33 = vpack.c.bf16 %v10839_v29, %v10839_v29  ;;  %18636 = vmatprep.subr.bf16.mxu1 %v20147_v15 }
0x1fef   : > { %v10840_v19 = vmul.f32 %v19678_v53, %v22875_v14  ;;  %v11286_v14 = vpop.permute.xlu1 %11285 }
0x1ff0   : > { %18621 = vmatmul.mubr.msk.bf16.vlgmr.msra.gmra.mxu0 %vm785_vm2, %v10847_v33  ;;  %v11291_v36 = vsel %vm785_vm2, %v11286_v14, 0 }
0x1ff1   : > { %v10848_v28 = vpack.c.bf16 %v10840_v19, %v10840_v19  ;;  %18631 = vmatpush3.bf16.msra.mxu0 %v11145_v5  ;;  %18632 = vmatprep.mubr.msk.bf16.mxu0 %vm20148_vm1, %v20147_v15 }
0x1ff2   : > { %18642 = vmatprep.subr.bf16.mxu0 %v20147_v15 }
0x1ff4   : > { %18627 = vmatmul.mubr.msk.bf16.vlgmr.msra.gmra.mxu1 %vm785_vm2, %v10848_v28 }
0x1ff5   : > { %18637 = vmatpush3.bf16.msra.mxu1 %v11193_v48  ;;  %18638 = vmatprep.mubr.msk.bf16.mxu1 %vm20148_vm1, %v20147_v15 }
0x1ff6   : > { %18648 = vmatprep.subr.bf16.mxu1 %v20147_v15 }
0x2012   : > { %v10823_v10 = vpop.xlane.xlu1 %10822 }
0x2013   : > { %19679 = vrcp.f32 %v10823_v10 }
0x2015   : > { %v10826_v18 = vpop.xlane.xlu0 %10825 }
0x2016   : > { %19681 = vrcp.f32 %v10826_v18  ;;  %v11284_v34 = vpop.permute.xlu1 %11283 }
0x2019   : > { %v11334_v56 = vpop.permute.xlu0 %11333 }
0x201a   : > { %v11336_v4 = vsel %vm785_vm2, %v11334_v56, 0 }
0x2020   : > { %v19680_v21 = vpop.eup %19679 }
0x2021   : > { %v10841_v12 = vmul.f32 %v19680_v21, %v22884_v27  ;;  %v11379_v27 = vpop.permute.xlu0 %11378 }
0x2022   : > { %v11381_v22 = vsel %vm785_vm2, %v11379_v27, 0 }
0x2023   : > { %v19682_v47 = vpop.eup %19681  ;;  %v10849_v40 = vpack.c.bf16 %v10841_v12, %v10841_v12 }
0x2024   : > { %v10842_v37 = vmul.f32 %v19682_v47, %v22886_v38  ;;  %v11424_v38 = vpop.permute.xlu1 %11423 }
0x2025   : > { %18633 = vmatmul.mubr.msk.bf16.vlgmr.msra.gmra.mxu0 %vm785_vm2, %v10849_v40  ;;  %v11426_v16 = vsel %vm785_vm2, %v11424_v38, 0  ;;  %v11469_v46 = vpop.permute.xlu0 %11468 }
0x2026   : > { %v10850_v45 = vpack.c.bf16 %v10842_v37, %v10842_v37  ;;  %18643 = vmatpush3.bf16.xpose.msra.mxu0 %v11291_v36  ;;  %18644 = vmatprep.mubr.msk.bf16.mxu0 %vm20148_vm1, %v20147_v15  ;;  %v11471_v52 = vsel %vm785_vm2, %v11469_v46, 0 }
0x2027   : > { %18654 = vmatprep.subr.bf16.mxu0 %v20147_v15 }
0x2028   : > { %18639 = vmatmul.mubr.msk.bf16.vlgmr.msra.gmra.mxu1 %vm785_vm2, %v10850_v45  ;;  %v11514_v49 = vpop.permute.xlu1 %11513 }
0x2029   : > { %18649 = vmatpush3.bf16.xpose.msra.mxu1 %v11336_v4  ;;  %18650 = vmatprep.mubr.msk.bf16.mxu1 %vm20148_vm1, %v20147_v15  ;;  %v11516_v31 = vsel %vm785_vm2, %v11514_v49, 0  ;;  %v11559_v44 = vpop.permute.xlu0 %11558 }
0x202a   : > { %18660 = vmatprep.subr.bf16.mxu1 %v20147_v15  ;;  %v11561_v32 = vsel %vm785_vm2, %v11559_v44, 0 }
0x202c   : > { %v11604_v39 = vpop.permute.xlu1 %11603 }
0x202d   : > { %18645 = vmatmul.mubr.msk.bf16.vlgmr.msra.gmra.mxu0 %vm785_vm2, %v11284_v34  ;;  %v11606_v24 = vsel %vm785_vm2, %v11604_v39, 0 }
0x202e   : > { %18655 = vmatpush3.bf16.xpose.msra.mxu0 %v11381_v22  ;;  %18656 = vmatprep.mubr.msk.bf16.mxu0 %vm20148_vm1, %v20147_v15 }
0x202f   : > { %18666 = vmatprep.subr.bf16.mxu0 %v20147_v15 }
0x2030   : > { %18651 = vmatmul.mubr.msk.bf16.vlgmr.msra.gmra.mxu1 %vm785_vm2, %v11284_v34 }
0x2031   : > { %18661 = vmatpush3.bf16.xpose.msra.mxu1 %v11426_v16  ;;  %18662 = vmatprep.mubr.msk.bf16.mxu1 %vm20148_vm1, %v20147_v15 }
0x2032   : > { %18672 = vmatprep.subr.bf16.mxu1 %v20147_v15 }
0x2035   : > { %18657 = vmatmul.mubr.msk.bf16.vlgmr.msra.gmra.mxu0 %vm785_vm2, %v11284_v34 }
0x2036   : > { %18667 = vmatpush3.bf16.xpose.msra.mxu0 %v11471_v52  ;;  %18668 = vmatprep.mubr.msk.bf16.mxu0 %vm20148_vm1, %v20147_v15 }
0x2037   : > { %18678 = vmatprep.subr.bf16.mxu0 %v20147_v15 }
0x2038   : > { %18663 = vmatmul.mubr.msk.bf16.vlgmr.msra.gmra.mxu1 %vm785_vm2, %v11284_v34 }
0x2039   : > { %18673 = vmatpush3.bf16.xpose.msra.mxu1 %v11516_v31  ;;  %18674 = vmatprep.mubr.msk.bf16.mxu1 %vm20148_vm1, %v20147_v15 }
0x203a   : > { %18684 = vmatprep.subr.bf16.mxu1 %v20147_v15 }
0x203d   : > { %18669 = vmatmul.mubr.msk.bf16.vlgmr.msra.gmra.mxu0 %vm785_vm2, %v11284_v34 }
0x203e   : > { %18679 = vmatpush3.bf16.xpose.msra.mxu0 %v11561_v32  ;;  %18680 = vmatprep.mubr.msk.bf16.mxu0 %vm20148_vm1, %v20147_v15 }
0x203f   : > { %18690 = vmatprep.subr.bf16.mxu0 %v20147_v15 }
0x2040   : > { %18675 = vmatmul.mubr.msk.bf16.vlgmr.msra.gmra.mxu1 %vm785_vm2, %v11284_v34 }
0x2041   : > { %18685 = vmatpush3.bf16.xpose.msra.mxu1 %v11606_v24  ;;  %18686 = vmatprep.mubr.msk.bf16.mxu1 %vm20148_vm1, %v20147_v15 }
0x2042   : > { %18696 = vmatprep.subr.bf16.mxu1 %v20147_v15 }
0x2045   : > { %18681 = vmatmul.mubr.msk.bf16.vlgmr.msra.gmra.mxu0 %vm785_vm2, %v11284_v34 }
0x2046   : > { %18692 = vmatprep.mubr.msk.bf16.mxu0 %vm20148_vm1, %v20147_v15 }
0x2048   : > { %18687 = vmatmul.mubr.msk.bf16.vlgmr.msra.gmra.mxu1 %vm785_vm2, %v11284_v34 }
0x2049   : > { %18698 = vmatprep.mubr.msk.bf16.mxu1 %vm20148_vm1, %v20147_v15 }
0x20a0   : > { %v22993_v1 = vpop.f32.mrf.mxu0 }
0x20a2   : > { %v18598_v42 = vpop.f32.mrf.mxu0 }
0x20a3   : > { %v22995_v30 = vpop.f32.mrf.mxu1 }
0x20a4   : > { %v10896_v11 = vpop.f32.mrf.mxu0 }
0x20a5   : > { %v18604_v54 = vpop.f32.mrf.mxu1 }
0x20a6   : > { %v18599_v20 = vpop.f32.mrf.mxu0 }
0x20a7   : > { %v10944_v2 = vpop.f32.mrf.mxu1 }
0x20a8   : > { %v22997_v60 = vpop.f32.mrf.mxu0 }
0x20a9   : > { %v18605_v63 = vpop.f32.mrf.mxu1 }
0x20aa   : > { %v18610_v29 = vpop.f32.mrf.mxu0 }
0x20ac   : > { %v10992_v53 = vpop.f32.mrf.mxu0  ;;  %v22999_v33 = vpop.f32.mrf.mxu1 }
0x20ae   : > { %v18611_v19 = vpop.f32.mrf.mxu0  ;;  %v18616_v5 = vpop.f32.mrf.mxu1 }
0x20b0   : > { %v11040_v28 = vpop.f32.mrf.mxu1  ;;  %v23001_v59 = vpop.f32.mrf.mxu0 }
0x20b2   : > { %v18617_v48 = vpop.f32.mrf.mxu1  ;;  %v18622_v14 = vpop.f32.mrf.mxu0 }
0x20b4   : > { %v11088_v10 = vpop.f32.mrf.mxu0  ;;  %v23003_v18 = vpop.f32.mrf.mxu1 }
0x20b6   : > { %v18623_v21 = vpop.f32.mrf.mxu0  ;;  %v18628_v12 = vpop.f32.mrf.mxu1 }
0x20b8   : > { %v11136_v47 = vpop.f32.mrf.mxu1 }
0x20ba   : > { %v18629_v40 = vpop.f32.mrf.mxu1 }
0x20e5   : > { %v23005_v37 = vpop.f32.mrf.mxu0 }
0x20e7   : > { %v18634_v56 = vpop.f32.mrf.mxu0 }
0x20e8   : > { %v23007_v36 = vpop.f32.mrf.mxu1 }
0x20e9   : > { %v11184_v45 = vpop.f32.mrf.mxu0 }
0x20ea   : > { %v18640_v34 = vpop.f32.mrf.mxu1 }
0x20eb   : > { %v18635_v4 = vpop.f32.mrf.mxu0 }
0x20ec   : > { %v11232_v27 = vpop.f32.mrf.mxu1 }
0x20ed   : > { %v11327_v38 = vpop.f32.mrf.mxu0 }
0x20ee   : > { %v18641_v22 = vpop.f32.mrf.mxu1  ;;  %v11648_v16 = vsel %vm785_vm2, %v11327_v38, -inf }
0x20ef   : > { %11649 = vmax.xlane.f32.xlu0 %v11648_v16  ;;  %v18646_v46 = vpop.f32.mrf.mxu0 }
0x20f0   : > { %v11372_v49 = vpop.f32.mrf.mxu1 }
0x20f1   : > { %v11330_v52 = vpop.f32.mrf.mxu0  ;;  %v11651_v31 = vsel %vm785_vm2, %v11372_v49, -inf }
0x20f2   : > { %11652 = vmax.xlane.f32.xlu1 %v11651_v31  ;;  %v18652_v44 = vpop.f32.mrf.mxu1 }
0x20f3   : > { %v18647_v39 = vpop.f32.mrf.mxu0 }
0x20f4   : > { %v11375_v32 = vpop.f32.mrf.mxu1 }
0x20f5   : > { %v11417_v24 = vpop.f32.mrf.mxu0 }
0x20f6   : > { %v18653_v42 = vpop.f32.mrf.mxu1  ;;  %v11654_v11 = vsel %vm785_vm2, %v11417_v24, -inf }
0x20f7   : > { %11655 = vmax.xlane.f32.xlu0 %v11654_v11  ;;  %v18658_v54 = vpop.f32.mrf.mxu0 }
0x20f8   : > { %v23012_v20 = vpop.f32.mrf.mxu1 }
0x20f9   : > { %v11420_v2 = vpop.f32.mrf.mxu0  ;;  %v11657_v63 = vsel %vm785_vm2, %v23012_v20, -inf }
0x20fa   : > { %v18664_v29 = vpop.f32.mrf.mxu1 }
0x20fb   : > { %11658 = vmax.xlane.f32.xlu0 %v11657_v63  ;;  %v18659_v53 = vpop.f32.mrf.mxu0 }
0x20fc   : > { %v11465_v19 = vpop.f32.mrf.mxu1 }
0x20fd   : > { %v23016_v5 = vpop.f32.mrf.mxu0 }
0x20fe   : > { %v18665_v28 = vpop.f32.mrf.mxu1  ;;  %v11660_v48 = vsel %vm785_vm2, %v23016_v5, -inf }
0x20ff   : > { %11661 = vmax.xlane.f32.xlu0 %v11660_v48  ;;  %v18670_v14 = vpop.f32.mrf.mxu0 }
0x2100   : > { %v23020_v10 = vpop.f32.mrf.mxu1 }
0x2101   : > { %v11510_v21 = vpop.f32.mrf.mxu0  ;;  %v11663_v12 = vsel %vm785_vm2, %v23020_v10, -inf }
0x2102   : > { %11664 = vmax.xlane.f32.xlu1 %v11663_v12  ;;  %v18676_v47 = vpop.f32.mrf.mxu1 }
0x2103   : > { %v18671_v40 = vpop.f32.mrf.mxu0 }
0x2104   : > { %v11555_v56 = vpop.f32.mrf.mxu1 }
0x2105   : > { %v23024_v45 = vpop.f32.mrf.mxu0 }
0x2106   : > { %v18677_v34 = vpop.f32.mrf.mxu1  ;;  %v11666_v4 = vsel %vm785_vm2, %v23024_v45, -inf }
0x2107   : > { %11667 = vmax.xlane.f32.xlu0 %v11666_v4  ;;  %v18682_v27 = vpop.f32.mrf.mxu0 }
0x2108   : > { %v11642_v22 = vpop.f32.mrf.mxu1 }
0x2109   : > { %v11600_v16 = vpop.f32.mrf.mxu0  ;;  %v11669_v39 = vsel %vm785_vm2, %v11642_v22, -inf }
0x210a   : > { %v18688_v46 = vpop.f32.mrf.mxu1 }
0x210b   : > { %v18683_v52 = vpop.f32.mrf.mxu0 }
0x210c   : > { %v11645_v31 = vpop.f32.mrf.mxu1 }
0x210e   : > { %v18689_v44 = vpop.f32.mrf.mxu1 }
0x2113   : > { %11792 = vrot.lane.b32.xlu1 %v22381_v9, %s20155_s2 }
0x211d   : > { %11744 = vrot.lane.b32.xlu0 %v22374_v6, %s20155_s2 }
0x2137   : > { %11670 = vmax.xlane.f32.xlu1 %v11669_v39 }
0x2178   : > { %v11650_v32 = vpop.xlane.xlu0 %11649 }
0x2179   : > { %v11672_v42 = vsub.f32 %v11327_v38, %v11650_v32 }
0x217b   : > { %v11680_v11 = vmul.f32 1.442695, %v11672_v42  ;;  %v11653_v54 = vpop.xlane.xlu1 %11652 }
0x217c   : > { %v11673_v2 = vsub.f32 %v11372_v49, %v11653_v54 }
0x217d   : > { %19683 = vpow2.f32 %v11680_v11 }
0x217e   : > { %v11682_v63 = vmul.f32 1.442695, %v11673_v2 }
0x2180   : > { %19685 = vpow2.f32 %v11682_v63  ;;  %v11656_v29 = vpop.xlane.xlu0 %11655 }
0x2181   : > { %v11674_v53 = vsub.f32 %v11417_v24, %v11656_v29 }
0x2183   : > { %v11684_v19 = vmul.f32 1.442695, %v11674_v53 }
0x2184   : > { %v11659_v28 = vpop.xlane.xlu0 %11658 }
0x2185   : > { %19687 = vpow2.f32 %v11684_v19  ;;  %v11675_v4 = vsub.f32 %v23012_v20, %v11659_v28 }
0x2187   : > { %v11686_v16 = vmul.f32 1.442695, %v11675_v4 }
0x2188   : > { %v11662_v14 = vpop.xlane.xlu0 %11661 }
0x2189   : > { %v11676_v27 = vsub.f32 %v23016_v5, %v11662_v14  ;;  %19689 = vpow2.f32 %v11686_v16 }
0x218a   : > { %v23033_v9 = vpop.eup %19683 }
0x218b   : > { %v11665_v48 = vpop.xlane.xlu1 %11664  ;;  %v11696_v6 = vsel %vm785_vm2, %v23033_v9, 0.0  ;;  %v11688_v46 = vmul.f32 1.442695, %v11676_v27 }
0x218c   : > { %11697 = vadd.xlane.f32.xlu0 %v11696_v6 }
0x218d   : > { %v23037_v38 = vpop.eup %19685  ;;  %19691 = vpow2.f32 %v11688_v46 }
0x218e   : > { %v11699_v49 = vsel %vm785_vm2, %v23037_v38, 0.0 }
0x218f   : > { %11700 = vadd.xlane.f32.xlu1 %v11699_v49  ;;  %v11793_v21 = vpop.permute.xlu1 %11792 }
0x2190   : > { %v11798_v24 = vsel %vm1235_vm3, %v11793_v21, 0  ;;  %v11668_v12 = vpop.xlane.xlu0 %11667 }
0x2191   : > { %18697 = vmatpush3.bf16.msra.mxu1 %v11798_v24  ;;  %v11678_v42 = vsub.f32 %v23024_v45, %v11668_v12 }
0x2192   : > { %v23042_v47 = vpop.eup %19687  ;;  %18708 = vmatprep.subr.bf16.mxu1 %v20147_v15 }
0x2193   : > { %v11702_v40 = vsel %vm785_vm2, %v23042_v47, 0.0  ;;  %v11692_v11 = vmul.f32 1.442695, %v11678_v42 }
0x2194   : > { %11703 = vadd.xlane.f32.xlu0 %v11702_v40  ;;  %v11745_v56 = vpop.permute.xlu0 %11744 }
0x2195   : > { %v11750_v34 = vsel %vm1235_vm3, %v11745_v56, 0 }
0x2196   : > { %18691 = vmatpush3.bf16.msra.mxu0 %v11750_v34  ;;  %v23057_v39 = vpop.eup %19689 }
0x2197   : > { %18702 = vmatprep.subr.bf16.mxu0 %v20147_v15 }
0x21a0   : > { %11888 = vrot.lane.b32.xlu1 %v22386_v3, %s20155_s2  ;;  %v23059_v3 = vpop.eup %19691 }
0x21a4   : > { %11936 = vrot.lane.b32.xlu1 %v22415_v41, %s20155_s2  ;;  %v11705_v41 = vsel %vm785_vm2, %v23057_v39, 0.0 }
0x21aa   : > { %11840 = vrot.lane.b32.xlu0 %v22370_v26, %s20155_s2  ;;  %v11708_v26 = vsel %vm785_vm2, %v23059_v3, 0.0 }
0x21c0   : > { %v11671_v52 = vpop.xlane.xlu1 %11670 }
0x21c1   : > { %v11679_v31 = vsub.f32 %v11642_v22, %v11671_v52  ;;  %v11677_v22 = vsub.f32 %v23020_v10, %v11665_v48 }
0x21c3   : > { %v11694_v44 = vmul.f32 1.442695, %v11679_v31  ;;  %v11690_v32 = vmul.f32 1.442695, %v11677_v22 }
0x21c5   : > { %19693 = vpow2.f32 %v11694_v44 }
0x21c6   : > { %19695 = vpow2.f32 %v11690_v32 }
0x21c7   : > { %19697 = vpow2.f32 %v11692_v11 }
0x21c8   : > { %11706 = vadd.xlane.f32.xlu1 %v11705_v41 }
0x21c9   : > { %11709 = vadd.xlane.f32.xlu0 %v11708_v26 }
0x21d2   : > { %v23065_v20 = vpop.eup %19693 }
0x21d3   : > { %v11717_v5 = vsel %vm785_vm2, %v23065_v20, 0.0 }
0x21d4   : > { %11718 = vadd.xlane.f32.xlu0 %v11717_v5 }
0x21d9   : > { %11984 = vrot.lane.b32.xlu1 %v22425_v17, %s20155_s2  ;;  %v23081_v17 = vpop.eup %19695 }
0x21da   : > { %v23087_v10 = vpop.eup %19697 }
0x21ea   : > { %12032 = vrot.lane.b32.xlu0 %v22428_v23, %s20155_s2  ;;  %v11711_v23 = vsel %vm785_vm2, %v23081_v17, 0.0 }
0x21ee   : > { %10350 = vrot.lane.b32.xlu0 %v22824_v61, %s20156_s12  ;;  %v11714_v61 = vsel %vm785_vm2, %v23087_v10, 0.0 }
0x21f2   : > { %10354 = vrot.lane.b32.xlu0 %v22828_v58, %s20156_s12 }
0x21f6   : > { %11243 = vrot.lane.b32.xlu0 %v22993_v1, %s20157_s24 }
0x21fa   : > { %11247 = vrot.lane.b32.xlu0 %v22997_v60, %s20157_s24 }
0x21fd   : > { %11712 = vadd.xlane.f32.xlu1 %v11711_v23 }
0x21fe   : > { %10358 = vrot.lane.b32.xlu0 %v22832_v55, %s20156_s12 }
0x2201   : > { %11715 = vadd.xlane.f32.xlu1 %v11714_v61 }
0x2212   : > { %12080 = vrot.lane.b32.xlu1 %v22433_v25, %s20155_s2 }
0x2215   : > { %v11698_v58 = vpop.xlane.xlu0 %11697 }
0x2216   : > { %19699 = vrcp.f32 %v11698_v58  ;;  %10352 = vrot.lane.b32.xlu1 %v22826_v51, %s20156_s12 }
0x2218   : > { %v11701_v1 = vpop.xlane.xlu1 %11700 }
0x2219   : > { %19701 = vrcp.f32 %v11701_v1 }
0x221a   : > { %10356 = vrot.lane.b32.xlu1 %v22830_v35, %s20156_s12 }
0x221c   : > { %v11889_v35 = vpop.permute.xlu1 %11888 }
0x221d   : > { %v11704_v60 = vpop.xlane.xlu0 %11703  ;;  %v11894_v29 = vsel %vm1235_vm3, %v11889_v35, 0 }
0x221e   : > { %19703 = vrcp.f32 %v11704_v60  ;;  %11245 = vrot.lane.b32.xlu1 %v22995_v30, %s20157_s24 }
0x2220   : > { %v11937_v53 = vpop.permute.xlu1 %11936 }
0x2221   : > { %v11841_v45 = vpop.permute.xlu0 %11840  ;;  %v11942_v28 = vsel %vm1235_vm3, %v11937_v53, 0 }
0x2222   : > { %11249 = vrot.lane.b32.xlu1 %v22999_v33, %s20157_s24  ;;  %v11846_v63 = vsel %vm1235_vm3, %v11841_v45, 0 }
0x2223   : > { %v19700_v55 = vpop.eup %19699 }
0x2224   : > { %v11728_v25 = vmul.f32 %v19700_v55, %v23033_v9 }
0x2226   : > { %v19702_v54 = vpop.eup %19701  ;;  %v11736_v2 = vpack.c.bf16 %v11728_v25, %v11728_v25  ;;  %10360 = vrot.lane.b32.xlu1 %v22834_v57, %s20156_s12 }
0x2227   : > { %v11729_v51 = vmul.f32 %v19702_v54, %v23037_v38 }
0x2228   : > { %18693 = vmatmul.mubr.msk.bf16.vlgmr.msra.gmra.mxu0 %vm785_vm2, %v11736_v2 }
0x2229   : > { %v11737_v30 = vpack.c.bf16 %v11729_v51, %v11729_v51  ;;  %18703 = vmatpush3.bf16.msra.mxu0 %v11846_v63  ;;  %18704 = vmatprep.mubr.msk.bf16.mxu0 %vm20148_vm1, %v20147_v15 }
0x222a   : > { %18714 = vmatprep.subr.bf16.mxu0 %v20147_v15 }
0x222b   : > { %v19704_v33 = vpop.eup %19703  ;;  %18699 = vmatmul.mubr.msk.bf16.vlgmr.msra.gmra.mxu1 %vm785_vm2, %v11737_v30 }
0x222c   : > { %v11730_v57 = vmul.f32 %v19704_v33, %v23042_v47  ;;  %18709 = vmatpush3.bf16.msra.mxu1 %v11894_v29  ;;  %18710 = vmatprep.mubr.msk.bf16.mxu1 %vm20148_vm1, %v20147_v15 }
0x222d   : > { %18720 = vmatprep.subr.bf16.mxu1 %v20147_v15 }
0x222e   : > { %v11738_v19 = vpack.c.bf16 %v11730_v57, %v11730_v57 }
0x2230   : > { %18705 = vmatmul.mubr.msk.bf16.vlgmr.msra.gmra.mxu0 %vm785_vm2, %v11738_v19 }
0x2231   : > { %18715 = vmatpush3.bf16.msra.mxu0 %v11942_v28  ;;  %18716 = vmatprep.mubr.msk.bf16.mxu0 %vm20148_vm1, %v20147_v15 }
0x2232   : > { %18726 = vmatprep.subr.bf16.mxu0 %v20147_v15 }
0x2251   : > { %v11707_v9 = vpop.xlane.xlu1 %11706 }
0x2252   : > { %19705 = vrcp.f32 %v11707_v9  ;;  %v11710_v48 = vpop.xlane.xlu0 %11709 }
0x2253   : > { %19707 = vrcp.f32 %v11710_v48 }
0x2255   : > { %v11985_v24 = vpop.permute.xlu1 %11984 }
0x2256   : > { %v11990_v34 = vsel %vm1235_vm3, %v11985_v24, 0  ;;  %v19324_v24 = vld [vmem:[#allocation12 + $0x10] sm:$0xff]  }
0x225d   : > { %v11719_v6 = vpop.xlane.xlu0 %11718 }
0x225f   : > { %v19706_v14 = vpop.eup %19705 }
0x2260   : > { %v19708_v38 = vpop.eup %19707  ;;  %v11731_v49 = vmul.f32 %v19706_v14, %v23057_v39 }
0x2261   : > { %v11732_v21 = vmul.f32 %v19708_v38, %v23059_v3  ;;  %v12033_v12 = vpop.permute.xlu0 %12032 }
0x2262   : > { %v11739_v47 = vpack.c.bf16 %v11731_v49, %v11731_v49  ;;  %v12038_v56 = vsel %vm1235_vm3, %v12033_v12, 0 }
0x2263   : > { %v11740_v40 = vpack.c.bf16 %v11732_v21, %v11732_v21  ;;  %v19323_v21 = vld [vmem:[#allocation12 + $0x18] sm:$0xff]  }
0x2264   : > { %18711 = vmatmul.mubr.msk.bf16.vlgmr.msra.gmra.mxu1 %vm785_vm2, %v11739_v47 }
0x2265   : > { %18717 = vmatmul.mubr.msk.bf16.vlgmr.msra.gmra.mxu0 %vm785_vm2, %v11740_v40  ;;  %18721 = vmatpush3.bf16.msra.mxu1 %v11990_v34  ;;  %v10351_v4 = vpop.permute.xlu0 %10350 }
0x2266   : > { %18727 = vmatpush3.bf16.msra.mxu0 %v12038_v56  ;;  %v10374_v27 = vadd.f32 %v10351_v4, %v22372_v8  ;;  %18722 = vmatprep.mubr.msk.bf16.mxu1 %vm20148_vm1, %v20147_v15 }
0x2267   : > { %18732 = vmatprep.subr.bf16.mxu1 %v20147_v15  ;;  %18728 = vmatprep.mubr.msk.bf16.mxu0 %vm20148_vm1, %v20147_v15 }
0x2268   : > { %10382 = vst.msk [vmem:[#allocation2] sm:$0xff] %vm2524_vm4, %v10374_v27  ;;  %18738 = vmatprep.subr.bf16.mxu0 %v19323_v21 }
0x2269   : > { %v10355_v16 = vpop.permute.xlu0 %10354 }
0x226a   : > { %v10376_v46 = vadd.f32 %v10355_v16, %v22372_v8 }
0x226c   : > { %10384 = vst.msk [vmem:[#allocation2 + $0x10] sm:$0xff] %vm2524_vm4, %v10376_v46 }
0x226d   : > { %v11244_v52 = vpop.permute.xlu0 %11243 }
0x226e   : > { %v11267_v31 = vadd.f32 %v11244_v52, %v22372_v8 }
0x2270   : > { %11275 = vst.msk [vmem:[#allocation2] sm:$0xff] %vm3418_vm5, %v11267_v31 }
0x2271   : > { %v11248_v44 = vpop.permute.xlu0 %11247 }
0x2272   : > { %v11269_v39 = vadd.f32 %v11248_v44, %v22372_v8 }
0x2274   : > { %11277 = vst.msk [vmem:[#allocation2 + $0x10] sm:$0xff] %vm3418_vm5, %v11269_v39 }
0x2275   : > { %v10359_v3 = vpop.permute.xlu0 %10358 }
0x2276   : > { %v10378_v41 = vadd.f32 %v10359_v3, %v22372_v8 }
0x2278   : > { %10386 = vst.msk [vmem:[#allocation2 + $0x20] sm:$0xff] %vm2524_vm4, %v10378_v41  ;;  %v19325_v41 = vld [vmem:[#allocation13 + $0x18] sm:$0xff]  }
0x2286   : > { %v11713_v26 = vpop.xlane.xlu1 %11712 }
0x2287   : > { %19709 = vrcp.f32 %v11713_v26 }
0x2288   : > { %19711 = vrcp.f32 %v11719_v6 }
0x228a   : > { %v11716_v5 = vpop.xlane.xlu1 %11715 }
0x228b   : > { %19713 = vrcp.f32 %v11716_v5 }
0x228e   : > { %v12081_v22 = vpop.permute.xlu1 %12080 }
0x228f   : > { %v12086_v45 = vsel %vm1235_vm3, %v12081_v22, 0 }
0x2292   : > { %v10353_v32 = vpop.permute.xlu1 %10352 }
0x2293   : > { %v10375_v42 = vadd.f32 %v10353_v32, %v22372_v8 }
0x2294   : > { %v19710_v11 = vpop.eup %19709 }
0x2295   : > { %v11733_v23 = vmul.f32 %v19710_v11, %v23081_v17  ;;  %10383 = vst.msk [vmem:[#allocation2 + $0x8] sm:$0xff] %vm2524_vm4, %v10375_v42  ;;  %v19712_v58 = vpop.eup %19711 }
0x2296   : > { %v10357_v61 = vpop.permute.xlu1 %10356  ;;  %v11735_v17 = vmul.f32 %v19712_v58, %v23065_v20 }
0x2297   : > { %v11741_v1 = vpack.c.bf16 %v11733_v23, %v11733_v23  ;;  %v10377_v60 = vadd.f32 %v10357_v61, %v22372_v8 }
0x2298   : > { %v19714_v55 = vpop.eup %19713  ;;  %v11743_v35 = vpack.c.bf16 %v11735_v17, %v11735_v17 }
0x2299   : > { %v11734_v25 = vmul.f32 %v19714_v55, %v23087_v10  ;;  %10385 = vst.msk [vmem:[#allocation2 + $0x18] sm:$0xff] %vm2524_vm4, %v10377_v60  ;;  %18723 = vmatmul.mubr.msk.bf16.vlgmr.msra.gmra.mxu1 %vm785_vm2, %v11741_v1 }
0x229a   : > { %18733 = vmatpush3.bf16.msra.mxu1 %v12086_v45  ;;  %v11246_v54 = vpop.permute.xlu1 %11245  ;;  %18734 = vmatprep.mubr.msk.bf16.mxu1 %vm20148_vm1, %v20147_v15 }
0x229b   : > { %v11742_v2 = vpack.c.bf16 %v11734_v25, %v11734_v25  ;;  %v11268_v51 = vadd.f32 %v11246_v54, %v22372_v8 }
0x229d   : > { %11276 = vst.msk [vmem:[#allocation2 + $0x8] sm:$0xff] %vm3418_vm5, %v11268_v51  ;;  %18729 = vmatmul.mubr.msk.bf16.vlgmr.msra.gmra.mxu0 %vm785_vm2, %v11742_v2 }
0x229e   : > { %v11250_v10 = vpop.permute.xlu1 %11249  ;;  %18739 = vmatpush3.bf16.msra.mxu0 %v19323_v21 }
0x229f   : > { %v11270_v63 = vadd.f32 %v11250_v10, %v22372_v8  ;;  %18740 = vmatprep.subr.bf16.mxu0 %v19324_v24 }
0x22a1   : > { %11278 = vst.msk [vmem:[#allocation2 + $0x18] sm:$0xff] %vm3418_vm5, %v11270_v63  ;;  %18735 = vmatmul.mubr.msk.bf16.vlgmr.msra.gmra.mxu1 %vm785_vm2, %v11743_v35 }
0x22a2   : > { %v10361_v30 = vpop.permute.xlu1 %10360  ;;  %18741 = vmatpush3.bf16.msra.mxu0 %v19324_v24 }
0x22a3   : > { %v10379_v33 = vadd.f32 %v10361_v30, %v22372_v8  ;;  %18762 = vmatprep.subr.bf16.mxu0 %v19325_v41 }
0x22a5   : > { %10387 = vst.msk [vmem:[#allocation2 + $0x28] sm:$0xff] %vm2524_vm4, %v10379_v33 }
0x22e8   : > { %v11786_v20 = vpop.f32.mrf.mxu0 }
0x22e9   : > { %12136 = vrot.lane.b32.xlu0 %v11786_v20, %s20158_s21 }
0x22ea   : > { %v18694_v29 = vpop.f32.mrf.mxu0 }
0x22eb   : > { %v11834_v57 = vpop.f32.mrf.mxu1 }
0x22ec   : > { %v11789_v53 = vpop.f32.mrf.mxu0  ;;  %12138 = vrot.lane.b32.xlu1 %v11834_v57, %s20158_s21 }
0x22ed   : > { %v18700_v19 = vpop.f32.mrf.mxu1  ;;  %v19326_v53 = vld [vmem:[#allocation13 + $0x10] sm:$0xff]  }
0x22ee   : > { %v18695_v28 = vpop.f32.mrf.mxu0 }
0x22ef   : > { %v11837_v9 = vpop.f32.mrf.mxu1 }
0x22f0   : > { %v11882_v48 = vpop.f32.mrf.mxu0 }
0x22f1   : > { %12140 = vrot.lane.b32.xlu0 %v11882_v48, %s20158_s21  ;;  %v18701_v6 = vpop.f32.mrf.mxu1 }
0x22f2   : > { %v18706_v14 = vpop.f32.mrf.mxu0 }
0x22f4   : > { %v11885_v38 = vpop.f32.mrf.mxu0 }
0x22f5   : > { %10362 = vrot.lane.b32.xlu0 %v22836_v50, %s20156_s12 }
0x22f6   : > { %v18707_v49 = vpop.f32.mrf.mxu0 }
0x22f9   : > { %11251 = vrot.lane.b32.xlu0 %v23001_v59, %s20157_s24 }
0x22fd   : > { %11255 = vrot.lane.b32.xlu0 %v23005_v37, %s20157_s24 }
0x2324   : > { %v11930_v12 = vpop.f32.mrf.mxu1 }
0x2325   : > { %v11978_v47 = vpop.f32.mrf.mxu0  ;;  %12142 = vrot.lane.b32.xlu1 %v11930_v12, %s20158_s21 }
0x2326   : > { %12144 = vrot.lane.b32.xlu0 %v11978_v47, %s20158_s21  ;;  %v18712_v50 = vpop.f32.mrf.mxu1 }
0x2327   : > { %v18718_v40 = vpop.f32.mrf.mxu0 }
0x2328   : > { %v11933_v56 = vpop.f32.mrf.mxu1 }
0x2329   : > { %v11981_v34 = vpop.f32.mrf.mxu0  ;;  %10364 = vrot.lane.b32.xlu1 %v22838_v0, %s20156_s12  ;;  %v19328_v56 = vld [vmem:[#allocation15 + $0x10] sm:$0xff]  }
0x232a   : > { %v18713_v59 = vpop.f32.mrf.mxu1 }
0x232b   : > { %v18719_v37 = vpop.f32.mrf.mxu0 }
0x232d   : > { %11253 = vrot.lane.b32.xlu1 %v23003_v18, %s20157_s24 }
0x2331   : > { %11257 = vrot.lane.b32.xlu1 %v23007_v36, %s20157_s24 }
0x2359   : > { %v12026_v4 = vpop.f32.mrf.mxu1 }
0x235a   : > { %12146 = vrot.lane.b32.xlu1 %v12026_v4, %s20158_s21 }
0x235b   : > { %v12137_v27 = vpop.permute.xlu0 %12136  ;;  %v18724_v16 = vpop.f32.mrf.mxu1 }
0x235c   : > { %v12160_v46 = vadd.f32 %v12137_v27, %v22372_v8 }
0x235d   : > { %v12029_v52 = vpop.f32.mrf.mxu1  ;;  %v12074_v31 = vpop.f32.mrf.mxu0 }
0x235e   : > { %12168 = vst.msk [vmem:[#allocation2] sm:$0xff] %vm4312_vm6, %v12160_v46  ;;  %v12139_v0 = vpop.permute.xlu1 %12138  ;;  %12148 = vrot.lane.b32.xlu0 %v12074_v31, %s20158_s21 }
0x235f   : > { %v12161_v44 = vadd.f32 %v12139_v0, %v22372_v8  ;;  %v18725_v18 = vpop.f32.mrf.mxu1  ;;  %v18730_v39 = vpop.f32.mrf.mxu0 }
0x2361   : > { %12169 = vst.msk [vmem:[#allocation2 + $0x8] sm:$0xff] %vm4312_vm6, %v12161_v44  ;;  %v12077_v36 = vpop.f32.mrf.mxu0  ;;  %v12122_v3 = vpop.f32.mrf.mxu1 }
0x2362   : > { %12150 = vrot.lane.b32.xlu1 %v12122_v3, %s20158_s21 }
0x2363   : > { %v12141_v26 = vpop.permute.xlu0 %12140  ;;  %v18731_v5 = vpop.f32.mrf.mxu0 }
0x2364   : > { %v12162_v22 = vadd.f32 %v12141_v26, %v22372_v8  ;;  %v18736_v32 = vpop.f32.mrf.mxu1 }
0x2365   : > { %v23190_v58 = vld [vmem:[#allocation2] sm:$0xff] }
0x2366   : > { %12170 = vst.msk [vmem:[#allocation2 + $0x10] sm:$0xff] %vm4312_vm6, %v12162_v22  ;;  %v12125_v42 = vpop.f32.mrf.mxu1 }
0x2367   : > { %v10363_v11 = vpop.permute.xlu0 %10362 }
0x2368   : > { %v10380_v23 = vadd.f32 %v10363_v11, %v22372_v8  ;;  %v18737_v61 = vpop.f32.mrf.mxu1  ;;  %v23192_v1 = vld [vmem:[#allocation2 + $0x8] sm:$0xff] }
0x2369   : > { %v12184_v60 = vpack.c.bf16 %v23192_v1, %v23190_v58 }
0x236a   : > { %10388 = vst.msk [vmem:[#allocation2 + $0x30] sm:$0xff] %vm2524_vm4, %v10380_v23 }
0x236b   : > { %v11252_v55 = vpop.permute.xlu0 %11251  ;;  %18742 = vmatprep.mubr.msk.bf16.mxu0 %vm636_vm0, %v12184_v60 }
0x236c   : > { %v11271_v25 = vadd.f32 %v11252_v55, %v22372_v8 }
0x236d   : > { %v12178_v20 = vld [vmem:[#allocation2 + $0x10] sm:$0xff] }
0x236e   : > { %11279 = vst.msk [vmem:[#allocation2 + $0x20] sm:$0xff] %vm3418_vm5, %v11271_v25 }
0x236f   : > { %v11256_v45 = vpop.permute.xlu0 %11255 }
0x2370   : > { %v11273_v54 = vadd.f32 %v11256_v45, %v22372_v8 }
0x2372   : > { %11281 = vst.msk [vmem:[#allocation2 + $0x30] sm:$0xff] %vm3418_vm5, %v11273_v54 }
0x2397   : > { %v12143_v17 = vpop.permute.xlu1 %12142 }
0x2398   : > { %v12163_v2 = vadd.f32 %v12143_v17, %v22372_v8  ;;  %v12145_v51 = vpop.permute.xlu0 %12144 }
0x2399   : > { %v12164_v10 = vadd.f32 %v12145_v51, %v22372_v8 }
0x239a   : > { %12171 = vst.msk [vmem:[#allocation2 + $0x18] sm:$0xff] %vm4312_vm6, %v12163_v2 }
0x239b   : > { %12172 = vst.msk [vmem:[#allocation2 + $0x20] sm:$0xff] %vm4312_vm6, %v12164_v10  ;;  %v10365_v35 = vpop.permute.xlu1 %10364  ;;  %v23247_v10 = vld [vmem:[%s24274_s11 + $0x1] ss:$0 sm:$0xff] }
0x239c   : > { %v10381_v63 = vadd.f32 %v10365_v35, %v22372_v8  ;;  %v23252_v35 = vld [vmem:[%s24272_s9 + $0x1] ss:$0 sm:$0xff] }
0x239e   : > { %10389 = vst.msk [vmem:[#allocation2 + $0x38] sm:$0xff] %vm2524_vm4, %v10381_v63 }
0x239f   : > { %v11254_v30 = vpop.permute.xlu1 %11253 }
0x23a0   : > { %v11272_v33 = vadd.f32 %v11254_v30, %v22372_v8 }
0x23a1   : > { %v12179_v29 = vld [vmem:[#allocation2 + $0x18] sm:$0xff] }
0x23a2   : > { %11280 = vst.msk [vmem:[#allocation2 + $0x28] sm:$0xff] %vm3418_vm5, %v11272_v33  ;;  %v12185_v57 = vpack.c.bf16 %v12179_v29, %v12178_v20  ;;  %v12180_v21 = vld [vmem:[#allocation2 + $0x20] sm:$0xff] }
0x23a3   : > { %v11258_v19 = vpop.permute.xlu1 %11257 }
0x23a4   : > { %v11274_v28 = vadd.f32 %v11258_v19, %v22372_v8  ;;  %18743 = vmatmul.mubr.msk.bf16.vlgmr.msra.gmra.mxu0 %vm636_vm0, %v12185_v57 }
0x23a5   : > { %18763 = vmatpush3.bf16.msra.mxu0 %v19325_v41 }
0x23a6   : > { %11282 = vst.msk [vmem:[#allocation2 + $0x38] sm:$0xff] %vm3418_vm5, %v11274_v28  ;;  %18764 = vmatprep.subr.bf16.mxu0 %v19326_v53 }
0x23a9   : > { %18765 = vmatpush3.bf16.msra.mxu0 %v19326_v53 }
0x23aa   : > { %18786 = vmatprep.subr.bf16.mxu0 %v20147_v15 }
0x23cc   : > { %v12147_v9 = vpop.permute.xlu1 %12146 }
0x23cd   : > { %v12165_v48 = vadd.f32 %v12147_v9, %v22372_v8 }
0x23cf   : > { %12173 = vst.msk [vmem:[#allocation2 + $0x28] sm:$0xff] %vm4312_vm6, %v12165_v48 }
0x23d0   : > { %v12149_v6 = vpop.permute.xlu0 %12148 }
0x23d1   : > { %v12166_v14 = vadd.f32 %v12149_v6, %v22372_v8 }
0x23d3   : > { %12174 = vst.msk [vmem:[#allocation2 + $0x30] sm:$0xff] %vm4312_vm6, %v12166_v14 }
0x23d4   : > { %v12151_v38 = vpop.permute.xlu1 %12150 }
0x23d5   : > { %v12167_v49 = vadd.f32 %v12151_v38, %v22372_v8  ;;  %v19327_v8 = vld [vmem:[#allocation15 + $0x18] sm:$0xff]  }
0x23d6   : > { %v12181_v24 = vld [vmem:[#allocation2 + $0x28] sm:$0xff]  ;;  %18750 = vmatprep.subr.bf16.mxu1 %v19327_v8 }
0x23d7   : > { %12175 = vst.msk [vmem:[#allocation2 + $0x38] sm:$0xff] %vm4312_vm6, %v12167_v49  ;;  %v12186_v12 = vpack.c.bf16 %v12181_v24, %v12180_v21  ;;  %18751 = vmatpush3.bf16.msra.mxu1 %v19327_v8 }
0x23d8   : > { %18752 = vmatprep.subr.bf16.mxu1 %v19328_v56 }
0x23d9   : > { %18746 = vmatprep.mubr.msk.bf16.mxu0 %vm636_vm0, %v12186_v12 }
0x23da   : > { %v12182_v47 = vld [vmem:[#allocation2 + $0x30] sm:$0xff] }
0x23db   : > { %18753 = vmatpush3.bf16.msra.mxu1 %v19328_v56 }
0x23dc   : > { %18774 = vmatprep.subr.bf16.mxu1 %v20147_v15 }
0x23de   : > { %v12183_v50 = vld [vmem:[#allocation2 + $0x38] sm:$0xff] }
0x23df   : > { %v12187_v40 = vpack.c.bf16 %v12183_v50, %v12182_v47 }
0x23e1   : > { %18747 = vmatmul.mubr.msk.bf16.gmra.mxu0 %vm636_vm0, %v12187_v40 }
0x23e2   : > { %18766 = vmatprep.mubr.msk.bf16.mxu0 %vm636_vm0, %v22346_v62 }
0x23e9   : > { %18767 = vmatmul.mubr.msk.bf16.vlgmr.msra.gmra.mxu0 %vm636_vm0, %v22348_v43  ;;  %v16820_v43 = vld [vmem:[%s24270_s7 + $0x1] ss:$0 sm:$0xff] }
0x23ea   : > { %18770 = vmatprep.mubr.msk.bf16.mxu0 %vm636_vm0, %v22354_v7 }
0x23f1   : > { %18771 = vmatmul.mubr.msk.bf16.gmra.mxu0 %vm636_vm0, %v22356_v13 }
0x23f2   : > { %18788 = vmatprep.mubr.msk.bf16.mxu0 %vm20148_vm1, %v20147_v15 }
0x2464   : > { %v18744_v62 = vpop.f32.mrf.mxu0 }
0x2465   : > { %v12261_v59 = vadd.f32 %v18744_v62, %v16820_v43 }
0x2466   : > { %v12252_v7 = vpop.f32.mrf.mxu0 }
0x2467   : > { %v12253_v34 = vadd.f32 %v16820_v43, %v12252_v7  ;;  %v12285_v52 = vmax.f32 %v12261_v59, 0.0 }
0x2468   : > { %v18745_v37 = vpop.f32.mrf.mxu0 }
0x2469   : > { %v12264_v4 = vadd.f32 %v18745_v37, %v16820_v43  ;;  %v12283_v16 = vmax.f32 %v12253_v34, 0.0  ;;  %v12293_v39 = vadd.f32 %v12285_v52, %v12178_v20 }
0x246a   : > { %v12255_v27 = vpop.f32.mrf.mxu0 }
0x246b   : > { %v12286_v13 = vmax.f32 %v12264_v4, 0.0  ;;  %v12256_v46 = vadd.f32 %v16820_v43, %v12255_v27  ;;  %v12291_v44 = vadd.f32 %v12283_v16, %v23190_v58 }
0x246d   : > { %v12284_v31 = vmax.f32 %v12256_v46, 0.0  ;;  %v12294_v0 = vadd.f32 %v12286_v13, %v12179_v29 }
0x246f   : > { %v12292_v18 = vadd.f32 %v12284_v31, %v23192_v1  ;;  %v12321_v3 = vpack.c.bf16 %v12294_v0, %v12293_v39 }
0x2471   : > { %v12320_v36 = vpack.c.bf16 %v12292_v18, %v12291_v44 }
0x2473   : > { %18754 = vmatprep.mubr.msk.bf16.mxu1 %vm636_vm0, %v12320_v36 }
0x2474   : > { %18755 = vmatmul.mubr.msk.bf16.vlgmr.msra.gmra.mxu1 %vm636_vm0, %v12321_v3 }
0x24a1   : > { %v18748_v41 = vpop.f32.mrf.mxu0 }
0x24a2   : > { %v12277_v22 = vadd.f32 %v18748_v41, %v16820_v43 }
0x24a3   : > { %v12268_v26 = vpop.f32.mrf.mxu0 }
0x24a4   : > { %v12269_v5 = vadd.f32 %v16820_v43, %v12268_v26  ;;  %v12289_v58 = vmax.f32 %v12277_v22, 0.0 }
0x24a5   : > { %v18749_v32 = vpop.f32.mrf.mxu0 }
0x24a6   : > { %v12280_v42 = vadd.f32 %v18749_v32, %v16820_v43  ;;  %v12287_v23 = vmax.f32 %v12269_v5, 0.0  ;;  %v12297_v54 = vadd.f32 %v12289_v58, %v12182_v47 }
0x24a7   : > { %v12271_v11 = vpop.f32.mrf.mxu0 }
0x24a8   : > { %v12290_v61 = vmax.f32 %v12280_v42, 0.0  ;;  %v12272_v60 = vadd.f32 %v16820_v43, %v12271_v11  ;;  %v12295_v25 = vadd.f32 %v12287_v23, %v12180_v21 }
0x24a9   : > { %v18768_v51 = vpop.f32.mrf.mxu0 }
0x24aa   : > { %v12288_v55 = vmax.f32 %v12272_v60, 0.0  ;;  %v12298_v1 = vadd.f32 %v12290_v61, %v12183_v50  ;;  %v23256_v29 = vadd.f32 %v18768_v51, %v23252_v35 }
0x24ab   : > { %v12479_v33 = vpop.f32.mrf.mxu0 }
0x24ac   : > { %v12296_v45 = vadd.f32 %v12288_v55, %v12181_v24  ;;  %v12323_v2 = vpack.c.bf16 %v12298_v1, %v12297_v54  ;;  %v23262_v28 = vadd.f32 %v23252_v35, %v12479_v33  ;;  %v12512_v49 = vmul.f32 0.17677669, %v23256_v29 }
0x24ad   : > { %v18769_v14 = vpop.f32.mrf.mxu0 }
0x24ae   : > { %v12322_v17 = vpack.c.bf16 %v12296_v45, %v12295_v25  ;;  %v12510_v47 = vmul.f32 0.17677669, %v23262_v28  ;;  %v23284_v40 = vpack.c.bf16 %v12512_v49, %v12512_v49  ;;  %v23308_v34 = vadd.f32 %v18769_v14, %v23252_v35 }
0x24af   : > { %v12482_v50 = vpop.f32.mrf.mxu0 }
0x24b0   : > { %18758 = vmatprep.mubr.msk.bf16.mxu1 %vm636_vm0, %v12322_v17  ;;  %v23288_v56 = vpack.c.bf16 %v12510_v47, %v12510_v47  ;;  %v23291_v62 = vadd.f32 %v23252_v35, %v12482_v50  ;;  %v12513_v4 = vmul.f32 0.17677669, %v23308_v34 }
0x24b1   : > { %18759 = vmatmul.mubr.msk.bf16.gmra.mxu1 %vm636_vm0, %v12323_v2  ;;  %v18772_v16 = vpop.f32.mrf.mxu0 }
0x24b2   : > { %18776 = vmatprep.mubr.msk.bf16.mxu1 %vm20148_vm1, %v20147_v15  ;;  %v12511_v7 = vmul.f32 0.17677669, %v23291_v62  ;;  %v23320_v27 = vpack.c.bf16 %v12513_v4, %v12513_v4  ;;  %v23349_v60 = vadd.f32 %v18772_v16, %v23252_v35 }
0x24b3   : > { %v12495_v13 = vpop.f32.mrf.mxu0 }
0x24b4   : > { %v23310_v59 = vpack.c.bf16 %v12511_v7, %v12511_v7  ;;  %v23328_v18 = vadd.f32 %v23252_v35, %v12495_v13  ;;  %v12516_v45 = vmul.f32 0.17677669, %v23349_v60 }
0x24b5   : > { %v18773_v52 = vpop.f32.mrf.mxu0 }
0x24b6   : > { %v12514_v22 = vmul.f32 0.17677669, %v23328_v18  ;;  %v23365_v54 = vadd.f32 %v18773_v52, %v23252_v35  ;;  %v23376_v51 = vpack.c.bf16 %v12516_v45, %v12516_v45 }
0x24b7   : > { %v12498_v36 = vpop.f32.mrf.mxu0 }
0x24b8   : > { %v23338_v32 = vadd.f32 %v23252_v35, %v12498_v36  ;;  %v23351_v58 = vpack.c.bf16 %v12514_v22, %v12514_v22 }
0x24ba   : > { %v12515_v55 = vmul.f32 0.17677669, %v23338_v32 }
0x24bc   : > { %v23367_v17 = vpack.c.bf16 %v12515_v55, %v12515_v55 }
0x2534   : > { %v18756_v63 = vpop.f32.mrf.mxu1 }
0x2535   : > { %v12397_v30 = vadd.f32 %v18756_v63, %v23247_v10 }
0x2536   : > { %v12388_v20 = vpop.f32.mrf.mxu1 }
0x2537   : > { %v23258_v57 = vpack.c.bf16 %v12397_v30, %v12397_v30  ;;  %v12389_v53 = vadd.f32 %v23247_v10, %v12388_v20 }
0x2538   : > { %v18757_v19 = vpop.f32.mrf.mxu1 }
0x2539   : > { %v23264_v9 = vpack.c.bf16 %v12389_v53, %v12389_v53  ;;  %v12400_v48 = vadd.f32 %v18757_v19, %v23247_v10  ;;  %13089 = vrot.lane.b32.xlu1 %v23258_v57, %s20149_s20  ;;  %v12622_v6 = vsel %vm785_vm2, %v23258_v57, 0 }
0x253a   : > { %v12391_v38 = vpop.f32.mrf.mxu1  ;;  %18787 = vmatpush3.bf16.xpose.msra.mxu0 %v12622_v6 }
0x253b   : > { %v23272_v21 = vpack.c.bf16 %v12400_v48, %v12400_v48  ;;  %v12392_v24 = vadd.f32 %v23247_v10, %v12391_v38  ;;  %12991 = vrot.lane.b32.xlu0 %v23264_v9, %s20149_s20  ;;  %v12530_v12 = vsel %vm785_vm2, %v23264_v9, 0  ;;  %18798 = vmatprep.subr.bf16.mxu0 %v20147_v15 }
0x253c   : > { %18775 = vmatpush3.bf16.xpose.msra.mxu1 %v12530_v12 }
0x253d   : > { %13138 = vrot.lane.b32.xlu1 %v23272_v21, %s20149_s20  ;;  %18780 = vmatprep.subr.bf16.mxu1 %v20147_v15  ;;  %v23286_v8 = vpack.c.bf16 %v12392_v24, %v12392_v24  ;;  %v12668_v37 = vsel %vm785_vm2, %v23272_v21, 0 }
0x253f   : > { %v12576_v43 = vsel %vm785_vm2, %v23286_v8, 0 }
0x2541   : > { %18789 = vmatmul.mubr.msk.bf16.vlgmr.msra.gmra.mxu0 %vm785_vm2, %v23284_v40  ;;  %13040 = vrot.lane.b32.xlu1 %v23286_v8, %s20149_s20 }
0x2542   : > { %18800 = vmatprep.mubr.msk.bf16.mxu0 %vm20148_vm1, %v20147_v15 }
0x2543   : > { %18777 = vmatmul.mubr.msk.bf16.vlgmr.msra.gmra.mxu1 %vm785_vm2, %v23288_v56 }
0x2544   : > { %18781 = vmatpush3.bf16.xpose.msra.mxu1 %v12576_v43  ;;  %18782 = vmatprep.mubr.msk.bf16.mxu1 %vm20148_vm1, %v20147_v15 }
0x2545   : > { %18792 = vmatprep.subr.bf16.mxu1 %v20147_v15 }
0x254b   : > { %18783 = vmatmul.mubr.msk.bf16.vlgmr.msra.gmra.mxu1 %vm785_vm2, %v23310_v59 }
0x254c   : > { %18793 = vmatpush3.bf16.xpose.msra.mxu1 %v12668_v37  ;;  %18794 = vmatprep.mubr.msk.bf16.mxu1 %vm20148_vm1, %v20147_v15 }
0x254d   : > { %18804 = vmatprep.subr.bf16.mxu1 %v20147_v15 }
0x2553   : > { %18795 = vmatmul.mubr.msk.bf16.vlgmr.msra.gmra.mxu1 %vm785_vm2, %v23320_v27 }
0x2554   : > { %18806 = vmatprep.mubr.msk.bf16.mxu1 %vm20148_vm1, %v20147_v15 }
0x2571   : > { %v18760_v46 = vpop.f32.mrf.mxu1 }
0x2572   : > { %v12413_v41 = vadd.f32 %v18760_v46, %v23247_v10 }
0x2573   : > { %v12404_v31 = vpop.f32.mrf.mxu1 }
0x2574   : > { %v12405_v0 = vadd.f32 %v23247_v10, %v12404_v31  ;;  %v23343_v11 = vpack.c.bf16 %v12413_v41, %v12413_v41 }
0x2575   : > { %v18761_v44 = vpop.f32.mrf.mxu1 }
0x2576   : > { %v23330_v39 = vpack.c.bf16 %v12405_v0, %v12405_v0  ;;  %v12416_v23 = vadd.f32 %v18761_v44, %v23247_v10  ;;  %v12806_v25 = vsel %vm785_vm2, %v23343_v11, 0 }
0x2577   : > { %v12407_v3 = vpop.f32.mrf.mxu1 }
0x2578   : > { %v12408_v26 = vadd.f32 %v23247_v10, %v12407_v3  ;;  %v12714_v5 = vsel %vm785_vm2, %v23330_v39, 0  ;;  %v23355_v1 = vpack.c.bf16 %v12416_v23, %v12416_v23  ;;  %v12517_v10 = vmul.f32 0.17677669, %v23365_v54 }
0x2579   : > { %18799 = vmatpush3.bf16.xpose.msra.mxu0 %v12714_v5 }
0x257a   : > { %v23340_v42 = vpack.c.bf16 %v12408_v26, %v12408_v26  ;;  %18810 = vmatprep.subr.bf16.mxu0 %v20147_v15  ;;  %v12852_v2 = vsel %vm785_vm2, %v23355_v1, 0  ;;  %v23384_v35 = vpack.c.bf16 %v12517_v10, %v12517_v10 }
0x257c   : > { %v12760_v61 = vsel %vm785_vm2, %v23340_v42, 0 }
0x257d   : > { %18805 = vmatpush3.bf16.xpose.msra.mxu1 %v12760_v61 }
0x257e   : > { %18816 = vmatprep.subr.bf16.mxu1 %v20147_v15 }
0x2580   : > { %18801 = vmatmul.mubr.msk.bf16.vlgmr.msra.gmra.mxu0 %vm785_vm2, %v23351_v58 }
0x2581   : > { %18811 = vmatpush3.bf16.xpose.msra.mxu0 %v12806_v25  ;;  %18812 = vmatprep.mubr.msk.bf16.mxu0 %vm20148_vm1, %v20147_v15 }
0x2582   : > { %18822 = vmatprep.subr.bf16.mxu0 %v20147_v15 }
0x2584   : > { %18807 = vmatmul.mubr.msk.bf16.vlgmr.msra.gmra.mxu1 %vm785_vm2, %v23367_v17 }
0x2585   : > { %18817 = vmatpush3.bf16.xpose.msra.mxu1 %v12852_v2  ;;  %18818 = vmatprep.mubr.msk.bf16.mxu1 %vm20148_vm1, %v20147_v15 }
0x2586   : > { %18828 = vmatprep.subr.bf16.mxu1 %v20147_v15 }
0x2588   : > { %18813 = vmatmul.mubr.msk.bf16.vlgmr.msra.gmra.mxu0 %vm785_vm2, %v23376_v51 }
0x2589   : > { %18824 = vmatprep.mubr.msk.bf16.mxu0 %vm20148_vm1, %v20147_v15 }
0x258c   : > { %18819 = vmatmul.mubr.msk.bf16.vlgmr.msra.gmra.mxu1 %vm785_vm2, %v23384_v35 }
0x258d   : > { %18830 = vmatprep.mubr.msk.bf16.mxu1 %vm20148_vm1, %v20147_v15 }
0x25ab   : > { %v23390_v63 = vpop.permute.xlu1 %13089 }
0x25ad   : > { %v12992_v30 = vpop.permute.xlu0 %12991 }
0x25ae   : > { %v12997_v33 = vsel %vm1235_vm3, %v12992_v30, 0 }
0x25af   : > { %v23393_v20 = vpop.permute.xlu1 %13138  ;;  %18823 = vmatpush3.bf16.msra.mxu0 %v12997_v33 }
0x25b0   : > { %18834 = vmatprep.subr.bf16.mxu0 %v20147_v15 }
0x25b3   : > { %v13041_v53 = vpop.permute.xlu1 %13040 }
0x25b4   : > { %v13046_v19 = vsel %vm1235_vm3, %v13041_v53, 0 }
0x25b5   : > { %18829 = vmatpush3.bf16.msra.mxu1 %v13046_v19 }
0x25b6   : > { %18840 = vmatprep.subr.bf16.mxu1 %v20147_v15 }
0x2601   : > { %v12658_v48 = vpop.f32.mrf.mxu0 }
0x2602   : > { %v12900_v6 = vsel %vm785_vm2, %v12658_v48, -inf }
0x2603   : > { %v18790_v14 = vpop.f32.mrf.mxu0  ;;  %12901 = vmax.xlane.f32.xlu0 %v12900_v6  ;;  %v12566_v38 = vpop.f32.mrf.mxu1 }
0x2604   : > { %v12894_v12 = vsel %vm785_vm2, %v12566_v38, -inf }
0x2605   : > { %v18778_v49 = vpop.f32.mrf.mxu1  ;;  %v12661_v24 = vpop.f32.mrf.mxu0 }
0x2607   : > { %v18791_v47 = vpop.f32.mrf.mxu0  ;;  %12895 = vmax.xlane.f32.xlu0 %v12894_v12  ;;  %v12569_v50 = vpop.f32.mrf.mxu1 }
0x2609   : > { %v18779_v43 = vpop.f32.mrf.mxu1 }
0x260b   : > { %v12612_v7 = vpop.f32.mrf.mxu1 }
0x260c   : > { %v12897_v37 = vsel %vm785_vm2, %v12612_v7, -inf }
0x260d   : > { %12898 = vmax.xlane.f32.xlu1 %v12897_v37  ;;  %v18784_v4 = vpop.f32.mrf.mxu1 }
0x260f   : > { %v12615_v16 = vpop.f32.mrf.mxu1 }
0x2611   : > { %v18785_v13 = vpop.f32.mrf.mxu1 }
0x2613   : > { %v12704_v46 = vpop.f32.mrf.mxu1 }
0x2614   : > { %v12903_v52 = vsel %vm785_vm2, %v12704_v46, -inf }
0x2615   : > { %12904 = vmax.xlane.f32.xlu0 %v12903_v52  ;;  %v18796_v31 = vpop.f32.mrf.mxu1 }
0x2617   : > { %v12707_v0 = vpop.f32.mrf.mxu1 }
0x2619   : > { %v18797_v44 = vpop.f32.mrf.mxu1 }
0x2640   : > { %v12750_v36 = vpop.f32.mrf.mxu0 }
0x2641   : > { %v12906_v3 = vsel %vm785_vm2, %v12750_v36, -inf }
0x2642   : > { %v18802_v41 = vpop.f32.mrf.mxu0  ;;  %12907 = vmax.xlane.f32.xlu0 %v12906_v3 }
0x2644   : > { %v12753_v26 = vpop.f32.mrf.mxu0  ;;  %v12796_v5 = vpop.f32.mrf.mxu1 }
0x2645   : > { %v12909_v22 = vsel %vm785_vm2, %v12796_v5, -inf }
0x2646   : > { %v18803_v23 = vpop.f32.mrf.mxu0  ;;  %12910 = vmax.xlane.f32.xlu1 %v12909_v22  ;;  %v18808_v61 = vpop.f32.mrf.mxu1 }
0x2648   : > { %v12799_v55 = vpop.f32.mrf.mxu1  ;;  %v12842_v25 = vpop.f32.mrf.mxu0 }
0x2649   : > { %v12912_v45 = vsel %vm785_vm2, %v12842_v25, -inf }
0x264a   : > { %v18814_v2 = vpop.f32.mrf.mxu0  ;;  %12913 = vmax.xlane.f32.xlu0 %v12912_v45  ;;  %v18809_v10 = vpop.f32.mrf.mxu1 }
0x264c   : > { %v12845_v30 = vpop.f32.mrf.mxu0  ;;  %v12888_v33 = vpop.f32.mrf.mxu1 }
0x264d   : > { %v12915_v49 = vsel %vm785_vm2, %v12888_v33, -inf }
0x264e   : > { %v18815_v53 = vpop.f32.mrf.mxu0  ;;  %v18820_v19 = vpop.f32.mrf.mxu1 }
0x2650   : > { %v12891_v6 = vpop.f32.mrf.mxu1 }
0x2652   : > { %v18821_v14 = vpop.f32.mrf.mxu1 }
0x2657   : > { %13236 = vrot.lane.b32.xlu1 %v23340_v42, %s20149_s20 }
0x2660   : > { %13187 = vrot.lane.b32.xlu0 %v23330_v39, %s20149_s20 }
0x267b   : > { %12916 = vmax.xlane.f32.xlu1 %v12915_v49 }
0x268c   : > { %v12902_v24 = vpop.xlane.xlu0 %12901 }
0x268d   : > { %v12920_v12 = vsub.f32 %v12658_v48, %v12902_v24 }
0x268f   : > { %v12930_v47 = vmul.f32 1.442695, %v12920_v12 }
0x2690   : > { %v12896_v50 = vpop.xlane.xlu0 %12895 }
0x2691   : > { %19715 = vpow2.f32 %v12930_v47  ;;  %v12918_v43 = vsub.f32 %v12566_v38, %v12896_v50 }
0x2693   : > { %v12926_v37 = vmul.f32 1.442695, %v12918_v43 }
0x2695   : > { %19717 = vpow2.f32 %v12926_v37 }
0x2696   : > { %v12899_v4 = vpop.xlane.xlu1 %12898 }
0x2697   : > { %v12919_v16 = vsub.f32 %v12612_v7, %v12899_v4 }
0x2699   : > { %v12928_v13 = vmul.f32 1.442695, %v12919_v16 }
0x269b   : > { %19719 = vpow2.f32 %v12928_v13 }
0x269e   : > { %v23410_v52 = vpop.eup %19715  ;;  %v12905_v31 = vpop.xlane.xlu0 %12904 }
0x269f   : > { %v12921_v0 = vsub.f32 %v12704_v46, %v12905_v31  ;;  %v12948_v44 = vsel %vm785_vm2, %v23410_v52, 0.0 }
0x26a0   : > { %12949 = vadd.xlane.f32.xlu0 %v12948_v44 }
0x26a1   : > { %v12932_v3 = vmul.f32 1.442695, %v12921_v0 }
0x26a2   : > { %v19718_v48 = vpop.eup %19717 }
0x26a3   : > { %19721 = vpow2.f32 %v12932_v3  ;;  %v12942_v41 = vsel %vm785_vm2, %v19718_v48, 0.0 }
0x26a4   : > { %12943 = vadd.xlane.f32.xlu0 %v12942_v41  ;;  %v13095_v41 = vsel %vm1235_vm3, %v23390_v63, 0 }
0x26a8   : > { %v23415_v38 = vpop.eup %19719 }
0x26a9   : > { %v12945_v7 = vsel %vm785_vm2, %v23415_v38, 0.0 }
0x26aa   : > { %12946 = vadd.xlane.f32.xlu1 %v12945_v7 }
0x26b0   : > { %v23419_v26 = vpop.eup %19721 }
0x26b1   : > { %v12951_v46 = vsel %vm785_vm2, %v23419_v26, 0.0 }
0x26b2   : > { %12952 = vadd.xlane.f32.xlu1 %v12951_v46 }
0x26c3   : > { %13334 = vrot.lane.b32.xlu1 %v23355_v1, %s20149_s20 }
0x26cb   : > { %v12908_v22 = vpop.xlane.xlu0 %12907 }
0x26cc   : > { %v12922_v23 = vsub.f32 %v12750_v36, %v12908_v22  ;;  %v13144_v22 = vsel %vm1235_vm3, %v23393_v20, 0 }
0x26ce   : > { %v12934_v61 = vmul.f32 1.442695, %v12922_v23 }
0x26cf   : > { %v12911_v55 = vpop.xlane.xlu1 %12910 }
0x26d0   : > { %19723 = vpow2.f32 %v12934_v61  ;;  %v12923_v45 = vsub.f32 %v12796_v5, %v12911_v55 }
0x26d2   : > { %v12936_v2 = vmul.f32 1.442695, %v12923_v45 }
0x26d3   : > { %v12914_v36 = vpop.xlane.xlu0 %12913  ;;  %v23437_v14 = vpop.permute.xlu1 %13236 }
0x26d4   : > { %19725 = vpow2.f32 %v12936_v2  ;;  %v12924_v5 = vsub.f32 %v12842_v25, %v12914_v36  ;;  %v13242_v55 = vsel %vm1235_vm3, %v23437_v14, 0 }
0x26d6   : > { %v12938_v6 = vmul.f32 1.442695, %v12924_v5 }
0x26d7   : > { %v13188_v25 = vpop.permute.xlu0 %13187 }
0x26d8   : > { %19727 = vpow2.f32 %v12938_v6 }
0x26dd   : > { %v23425_v10 = vpop.eup %19723 }
0x26de   : > { %v12954_v30 = vsel %vm785_vm2, %v23425_v10, 0.0 }
0x26df   : > { %12955 = vadd.xlane.f32.xlu0 %v12954_v30 }
0x26e1   : > { %v23429_v53 = vpop.eup %19725 }
0x26e2   : > { %v12957_v19 = vsel %vm785_vm2, %v23429_v53, 0.0 }
0x26e5   : > { %v23439_v47 = vpop.eup %19727 }
0x26e6   : > { %v12960_v50 = vsel %vm785_vm2, %v23439_v47, 0.0 }
0x26e7   : > { %12958 = vadd.xlane.f32.xlu1 %v12957_v19 }
0x26f5   : > { %13285 = vrot.lane.b32.xlu0 %v23343_v11, %s20149_s20 }
0x26f8   : > { %13452 = vrot.lane.b32.xlu1 %v23286_v8, %s20150_s23 }
0x2704   : > { %v12917_v49 = vpop.xlane.xlu1 %12916 }
0x2705   : > { %v12925_v24 = vsub.f32 %v12888_v33, %v12917_v49 }
0x2707   : > { %v12940_v12 = vmul.f32 1.442695, %v12925_v24 }
0x2709   : > { %19729 = vpow2.f32 %v12940_v12 }
0x2714   : > { %12961 = vadd.xlane.f32.xlu0 %v12960_v50 }
0x2716   : > { %v23443_v43 = vpop.eup %19729 }
0x2717   : > { %v12963_v37 = vsel %vm785_vm2, %v23443_v43, 0.0 }
0x271c   : > { %12964 = vadd.xlane.f32.xlu1 %v12963_v37 }
0x2729   : > { %v12950_v4 = vpop.xlane.xlu0 %12949 }
0x272a   : > { %13401 = vrot.lane.b32.xlu0 %v23264_v9, %s20150_s23 }
0x272d   : > { %v12944_v33 = vpop.xlane.xlu0 %12943  ;;  %13450 = vrot.lane.b32.xlu1 %v23310_v59, %s20150_s23 }
0x272e   : > { %19731 = vrcp.f32 %v12944_v33  ;;  %13399 = vrot.lane.b32.xlu0 %v23288_v56, %s20150_s23 }
0x272f   : > { %19733 = vrcp.f32 %v12950_v4 }
0x2731   : > { %13554 = vrot.lane.b32.xlu1 %v23272_v21, %s20150_s23 }
0x2732   : > { %13503 = vrot.lane.b32.xlu0 %v23258_v57, %s20150_s23 }
0x2733   : > { %v12947_v16 = vpop.xlane.xlu1 %12946 }
0x2734   : > { %19735 = vrcp.f32 %v12947_v16 }
0x2735   : > { %13552 = vrot.lane.b32.xlu1 %v23320_v27, %s20150_s23 }
0x2736   : > { %13501 = vrot.lane.b32.xlu0 %v23284_v40, %s20150_s23 }
0x2739   : > { %13656 = vrot.lane.b32.xlu1 %v23340_v42, %s20150_s23 }
0x273a   : > { %13605 = vrot.lane.b32.xlu0 %v23330_v39, %s20150_s23 }
0x273b   : > { %v19732_v13 = vpop.eup %19731  ;;  %v12953_v31 = vpop.xlane.xlu1 %12952 }
0x273c   : > { %v12974_v0 = vmul.f32 %v19732_v13, %v19718_v48  ;;  %19737 = vrcp.f32 %v12953_v31  ;;  %v19734_v3 = vpop.eup %19733 }
0x273d   : > { %13654 = vrot.lane.b32.xlu1 %v23367_v17, %s20150_s23  ;;  %v12976_v48 = vmul.f32 %v19734_v3, %v23410_v52  ;;  %v13193_v52 = vsel %vm1235_vm3, %v13188_v25, 0 }
0x273e   : > { %v12982_v44 = vpack.c.bf16 %v12974_v0, %v12974_v0  ;;  %13603 = vrot.lane.b32.xlu0 %v23351_v58, %s20150_s23 }
0x273f   : > { %v12984_v23 = vpack.c.bf16 %v12976_v48, %v12976_v48  ;;  %v13335_v45 = vpop.permute.xlu1 %13334 }
0x2740   : > { %18825 = vmatmul.mubr.msk.bf16.vlgmr.msra.gmra.mxu0 %vm785_vm2, %v12982_v44  ;;  %v13340_v12 = vsel %vm1235_vm3, %v13335_v45, 0 }
0x2741   : > { %v19736_v7 = vpop.eup %19735  ;;  %18835 = vmatpush3.bf16.msra.mxu0 %v13095_v41  ;;  %13758 = vrot.lane.b32.xlu1 %v23355_v1, %s20150_s23 }
0x2742   : > { %v12975_v46 = vmul.f32 %v19736_v7, %v23415_v38  ;;  %13707 = vrot.lane.b32.xlu0 %v23343_v11, %s20150_s23  ;;  %18836 = vmatprep.mubr.msk.bf16.mxu0 %vm20148_vm1, %v20147_v15 }
0x2743   : > { %18846 = vmatprep.subr.bf16.mxu0 %v20147_v15 }
0x2744   : > { %v12983_v63 = vpack.c.bf16 %v12975_v46, %v12975_v46 }
0x2745   : > { %13756 = vrot.lane.b32.xlu1 %v23384_v35, %s20150_s23 }
0x2746   : > { %13705 = vrot.lane.b32.xlu0 %v23376_v51, %s20150_s23  ;;  %18831 = vmatmul.mubr.msk.bf16.vlgmr.msra.gmra.mxu1 %vm785_vm2, %v12983_v63 }
0x2747   : > { %18841 = vmatpush3.bf16.msra.mxu1 %v13144_v22  ;;  %18842 = vmatprep.mubr.msk.bf16.mxu1 %vm20148_vm1, %v20147_v15 }
0x2748   : > { %18837 = vmatmul.mubr.msk.bf16.vlgmr.msra.gmra.mxu0 %vm785_vm2, %v12984_v23  ;;  %18852 = vmatprep.subr.bf16.mxu1 %v20147_v15 }
0x2749   : > { %v19738_v38 = vpop.eup %19737  ;;  %18847 = vmatpush3.bf16.msra.mxu0 %v13193_v52  ;;  %13950 = vrot.lane.b32.xlu1 %v23286_v8, %s20151_s18 }
0x274a   : > { %v12977_v20 = vmul.f32 %v19738_v38, %v23419_v26  ;;  %13902 = vrot.lane.b32.xlu0 %v23264_v9, %s20151_s18  ;;  %18848 = vmatprep.mubr.msk.bf16.mxu0 %vm20148_vm1, %v20147_v15 }
0x274b   : > { %18858 = vmatprep.subr.bf16.mxu0 %v20147_v15 }
0x274c   : > { %v12985_v61 = vpack.c.bf16 %v12977_v20, %v12977_v20 }
0x274d   : > { %13998 = vrot.lane.b32.xlu1 %v23258_v57, %s20151_s18 }
0x274e   : > { %18843 = vmatmul.mubr.msk.bf16.vlgmr.msra.gmra.mxu1 %vm785_vm2, %v12985_v61 }
0x274f   : > { %18853 = vmatpush3.bf16.msra.mxu1 %v13242_v55  ;;  %18854 = vmatprep.mubr.msk.bf16.mxu1 %vm20148_vm1, %v20147_v15 }
0x2750   : > { %18864 = vmatprep.subr.bf16.mxu1 %v20147_v15 }
0x2751   : > { %14046 = vrot.lane.b32.xlu1 %v23272_v21, %s20151_s18 }
0x2768   : > { %v12956_v26 = vpop.xlane.xlu0 %12955 }
0x2769   : > { %19739 = vrcp.f32 %v12956_v26 }
0x276c   : > { %v13286_v36 = vpop.permute.xlu0 %13285 }
0x276d   : > { %v13291_v6 = vsel %vm1235_vm3, %v13286_v36, 0 }
0x2770   : > { %v12959_v2 = vpop.xlane.xlu1 %12958 }
0x2771   : > { %19741 = vrcp.f32 %v12959_v2 }
0x2774   : > { %v13453_v50 = vpop.permute.xlu1 %13452 }
0x2776   : > { %v19740_v30 = vpop.eup %19739 }
0x2777   : > { %v12978_v19 = vmul.f32 %v19740_v30, %v23425_v10 }
0x2779   : > { %v12986_v5 = vpack.c.bf16 %v12978_v19, %v12978_v19 }
0x277b   : > { %18849 = vmatmul.mubr.msk.bf16.vlgmr.msra.gmra.mxu0 %vm785_vm2, %v12986_v5 }
0x277c   : > { %18859 = vmatpush3.bf16.msra.mxu0 %v13291_v6  ;;  %18860 = vmatprep.mubr.msk.bf16.mxu0 %vm20148_vm1, %v20147_v15 }
0x277d   : > { %18870 = vmatprep.subr.bf16.mxu0 %v20147_v15 }
0x277e   : > { %v19742_v14 = vpop.eup %19741 }
0x277f   : > { %v12979_v49 = vmul.f32 %v19742_v14, %v23429_v53 }
0x2781   : > { %v12987_v24 = vpack.c.bf16 %v12979_v49, %v12979_v49 }
0x2783   : > { %18855 = vmatmul.mubr.msk.bf16.vlgmr.msra.gmra.mxu1 %vm785_vm2, %v12987_v24 }
0x2784   : > { %18865 = vmatpush3.bf16.msra.mxu1 %v13340_v12  ;;  %18866 = vmatprep.mubr.msk.bf16.mxu1 %vm20148_vm1, %v20147_v15 }
0x2785   : > { %18876 = vmatprep.subr.bf16.mxu1 %v20147_v15 }
0x279d   : > { %v12962_v10 = vpop.xlane.xlu0 %12961 }
0x279e   : > { %19743 = vrcp.f32 %v12962_v10 }
0x27a1   : > { %v13402_v37 = vpop.permute.xlu0 %13401 }
0x27a2   : > { %v13407_v44 = vsel %vm785_vm2, %v13402_v37, 0 }
0x27a5   : > { %v13400_v25 = vpop.permute.xlu0 %13399  ;;  %v12965_v4 = vpop.xlane.xlu1 %12964 }
0x27a6   : > { %19745 = vrcp.f32 %v12965_v4 }
0x27a9   : > { %v13504_v33 = vpop.permute.xlu0 %13503  ;;  %v13451_v16 = vpop.permute.xlu1 %13450 }
0x27aa   : > { %v13509_v22 = vsel %vm785_vm2, %v13504_v33, 0 }
0x27ab   : > { %v19744_v53 = vpop.eup %19743 }
0x27ac   : > { %v12980_v13 = vmul.f32 %v19744_v53, %v23439_v47  ;;  %v13458_v47 = vsel %vm785_vm2, %v13453_v50, 0 }
0x27ad   : > { %v13502_v0 = vpop.permute.xlu0 %13501  ;;  %v13555_v3 = vpop.permute.xlu1 %13554 }
0x27ae   : > { %v12988_v31 = vpack.c.bf16 %v12980_v13, %v12980_v13  ;;  %v13560_v52 = vsel %vm785_vm2, %v13555_v3, 0 }
0x27b0   : > { %18861 = vmatmul.mubr.msk.bf16.vlgmr.msra.gmra.mxu0 %vm785_vm2, %v12988_v31 }
0x27b1   : > { %18871 = vmatpush3.bf16.xpose.msra.mxu0 %v13407_v44  ;;  %18872 = vmatprep.mubr.msk.bf16.mxu0 %vm20148_vm1, %v20147_v15  ;;  %v13606_v48 = vpop.permute.xlu0 %13605  ;;  %v13553_v63 = vpop.permute.xlu1 %13552 }
0x27b2   : > { %18882 = vmatprep.subr.bf16.mxu0 %v20147_v15  ;;  %v13611_v38 = vsel %vm785_vm2, %v13606_v48, 0 }
0x27b3   : > { %v19746_v41 = vpop.eup %19745 }
0x27b4   : > { %v12981_v7 = vmul.f32 %v19746_v41, %v23443_v43 }
0x27b5   : > { %v13604_v43 = vpop.permute.xlu0 %13603  ;;  %v13657_v23 = vpop.permute.xlu1 %13656 }
0x27b6   : > { %v12989_v46 = vpack.c.bf16 %v12981_v7, %v12981_v7  ;;  %v13662_v26 = vsel %vm785_vm2, %v13657_v23, 0 }
0x27b8   : > { %18867 = vmatmul.mubr.msk.bf16.vlgmr.msra.gmra.mxu1 %vm785_vm2, %v12989_v46  ;;  %18873 = vmatmul.mubr.msk.bf16.vlgmr.msra.gmra.mxu0 %vm785_vm2, %v13400_v25 }
0x27b9   : > { %18877 = vmatpush3.bf16.xpose.msra.mxu1 %v13458_v47  ;;  %18883 = vmatpush3.bf16.xpose.msra.mxu0 %v13509_v22  ;;  %v13708_v20 = vpop.permute.xlu0 %13707  ;;  %v13655_v61 = vpop.permute.xlu1 %13654 }
0x27ba   : > { %18878 = vmatprep.mubr.msk.bf16.mxu1 %vm20148_vm1, %v20147_v15  ;;  %18884 = vmatprep.mubr.msk.bf16.mxu0 %vm20148_vm1, %v20147_v15  ;;  %v13713_v45 = vsel %vm785_vm2, %v13708_v20, 0 }
0x27bb   : > { %18888 = vmatprep.subr.bf16.mxu1 %v20147_v15  ;;  %18894 = vmatprep.subr.bf16.mxu0 %v20147_v15 }
0x27bd   : > { %v13706_v55 = vpop.permute.xlu0 %13705  ;;  %v13759_v2 = vpop.permute.xlu1 %13758 }
0x27be   : > { %v13764_v36 = vsel %vm785_vm2, %v13759_v2, 0 }
0x27c0   : > { %18879 = vmatmul.mubr.msk.bf16.vlgmr.msra.gmra.mxu1 %vm785_vm2, %v13451_v16  ;;  %18885 = vmatmul.mubr.msk.bf16.vlgmr.msra.gmra.mxu0 %vm785_vm2, %v13502_v0 }
0x27c1   : > { %18889 = vmatpush3.bf16.xpose.msra.mxu1 %v13560_v52  ;;  %18895 = vmatpush3.bf16.xpose.msra.mxu0 %v13611_v38  ;;  %v13903_v30 = vpop.permute.xlu0 %13902  ;;  %v13757_v19 = vpop.permute.xlu1 %13756 }
0x27c2   : > { %18890 = vmatprep.mubr.msk.bf16.mxu1 %vm20148_vm1, %v20147_v15  ;;  %18896 = vmatprep.mubr.msk.bf16.mxu0 %vm20148_vm1, %v20147_v15  ;;  %v13908_v5 = vsel %vm1235_vm3, %v13903_v30, 0 }
0x27c3   : > { %18900 = vmatprep.subr.bf16.mxu1 %v20147_v15  ;;  %18906 = vmatprep.subr.bf16.mxu0 %v20147_v15 }
0x27c5   : > { %v13951_v6 = vpop.permute.xlu1 %13950 }
0x27c6   : > { %v13956_v14 = vsel %vm1235_vm3, %v13951_v6, 0 }
0x27c8   : > { %18891 = vmatmul.mubr.msk.bf16.vlgmr.msra.gmra.mxu1 %vm785_vm2, %v13553_v63  ;;  %18897 = vmatmul.mubr.msk.bf16.vlgmr.msra.gmra.mxu0 %vm785_vm2, %v13604_v43 }
0x27c9   : > { %18901 = vmatpush3.bf16.xpose.msra.mxu1 %v13662_v26  ;;  %18907 = vmatpush3.bf16.xpose.msra.mxu0 %v13713_v45 }
0x27ca   : > { %18902 = vmatprep.mubr.msk.bf16.mxu1 %vm20148_vm1, %v20147_v15  ;;  %18908 = vmatprep.mubr.msk.bf16.mxu0 %vm20148_vm1, %v20147_v15 }
0x27cb   : > { %18912 = vmatprep.subr.bf16.mxu1 %v20147_v15  ;;  %18918 = vmatprep.subr.bf16.mxu0 %v20147_v15 }
0x27d0   : > { %18903 = vmatmul.mubr.msk.bf16.vlgmr.msra.gmra.mxu1 %vm785_vm2, %v13655_v61  ;;  %18909 = vmatmul.mubr.msk.bf16.vlgmr.msra.gmra.mxu0 %vm785_vm2, %v13706_v55 }
0x27d1   : > { %18913 = vmatpush3.bf16.xpose.msra.mxu1 %v13764_v36  ;;  %18919 = vmatpush3.bf16.msra.mxu0 %v13908_v5 }
0x27d2   : > { %18914 = vmatprep.mubr.msk.bf16.mxu1 %vm20148_vm1, %v20147_v15  ;;  %18924 = vmatprep.subr.bf16.mxu1 %v20147_v15 }
0x27d3   : > { %18920 = vmatprep.mubr.msk.bf16.mxu0 %vm20148_vm1, %v20147_v15  ;;  %18930 = vmatprep.subr.bf16.mxu0 %v20147_v15 }
0x27d8   : > { %18915 = vmatmul.mubr.msk.bf16.vlgmr.msra.gmra.mxu1 %vm785_vm2, %v13757_v19 }
0x27d9   : > { %18925 = vmatpush3.bf16.msra.mxu1 %v13956_v14  ;;  %18926 = vmatprep.mubr.msk.bf16.mxu1 %vm20148_vm1, %v20147_v15 }
0x27da   : > { %18936 = vmatprep.subr.bf16.mxu1 %v20147_v15 }
0x2800   : > { %v13033_v49 = vpop.f32.mrf.mxu0 }
0x2801   : > { %v13382_v24 = vadd.f32 %v13033_v49, %v23262_v28 }
0x2802   : > { %v18826_v12 = vpop.f32.mrf.mxu0 }
0x2803   : > { %13390 = vst.msk [vmem:[#allocation3] sm:$0xff] %vm785_vm2, %v13382_v24 }
0x2804   : > { %v13036_v10 = vpop.f32.mrf.mxu0 }
0x2806   : > { %v18827_v50 = vpop.f32.mrf.mxu0  ;;  %v13082_v37 = vpop.f32.mrf.mxu1 }
0x2807   : > { %v13383_v25 = vadd.f32 %v13082_v37, %v23291_v62 }
0x2808   : > { %v18832_v4 = vpop.f32.mrf.mxu1  ;;  %v13131_v33 = vpop.f32.mrf.mxu0 }
0x2809   : > { %13391 = vst.msk [vmem:[#allocation3 + $0x8] sm:$0xff] %vm785_vm2, %v13383_v25  ;;  %v13384_v53 = vadd.f32 %v13131_v33, %v23256_v29 }
0x280a   : > { %v13085_v16 = vpop.f32.mrf.mxu1  ;;  %v18838_v13 = vpop.f32.mrf.mxu0 }
0x280b   : > { %13392 = vst.msk [vmem:[#allocation3 + $0x10] sm:$0xff] %vm785_vm2, %v13384_v53 }
0x280c   : > { %v18833_v31 = vpop.f32.mrf.mxu1  ;;  %v13134_v0 = vpop.f32.mrf.mxu0 }
0x280e   : > { %v18839_v44 = vpop.f32.mrf.mxu0  ;;  %v13180_v3 = vpop.f32.mrf.mxu1 }
0x280f   : > { %v13385_v41 = vadd.f32 %v13180_v3, %v23308_v34 }
0x2810   : > { %v18844_v7 = vpop.f32.mrf.mxu1 }
0x2811   : > { %13393 = vst.msk [vmem:[#allocation3 + $0x18] sm:$0xff] %vm785_vm2, %v13385_v41 }
0x2812   : > { %v13183_v48 = vpop.f32.mrf.mxu1 }
0x2814   : > { %v18845_v46 = vpop.f32.mrf.mxu1 }
0x283b   : > { %v13229_v63 = vpop.f32.mrf.mxu0 }
0x283c   : > { %v13386_v47 = vadd.f32 %v13229_v63, %v23328_v18 }
0x283d   : > { %v18850_v22 = vpop.f32.mrf.mxu0 }
0x283e   : > { %13394 = vst.msk [vmem:[#allocation3 + $0x20] sm:$0xff] %vm785_vm2, %v13386_v47 }
0x283f   : > { %v13232_v43 = vpop.f32.mrf.mxu0 }
0x2841   : > { %v18851_v23 = vpop.f32.mrf.mxu0 }
0x2843   : > { %v13278_v52 = vpop.f32.mrf.mxu1 }
0x2844   : > { %v13387_v38 = vadd.f32 %v13278_v52, %v23338_v32 }
0x2845   : > { %v18856_v20 = vpop.f32.mrf.mxu1 }
0x2846   : > { %13395 = vst.msk [vmem:[#allocation3 + $0x28] sm:$0xff] %vm785_vm2, %v13387_v38 }
0x2847   : > { %v13281_v61 = vpop.f32.mrf.mxu1 }
0x2849   : > { %v18857_v55 = vpop.f32.mrf.mxu1 }
0x2870   : > { %v13327_v26 = vpop.f32.mrf.mxu0 }
0x2871   : > { %v13388_v45 = vadd.f32 %v13327_v26, %v23349_v60 }
0x2872   : > { %v18862_v2 = vpop.f32.mrf.mxu0 }
0x2873   : > { %13396 = vst.msk [vmem:[#allocation3 + $0x30] sm:$0xff] %vm785_vm2, %v13388_v45 }
0x2874   : > { %v13330_v30 = vpop.f32.mrf.mxu0 }
0x2876   : > { %v18863_v19 = vpop.f32.mrf.mxu0 }
0x2878   : > { %v13376_v36 = vpop.f32.mrf.mxu1  ;;  %v13443_v5 = vpop.f32.mrf.mxu0 }
0x2879   : > { %v13389_v6 = vadd.f32 %v13376_v36, %v23365_v54  ;;  %v13806_v14 = vsel %vm785_vm2, %v13443_v5, -inf }
0x287a   : > { %13807 = vmax.xlane.f32.xlu0 %v13806_v14  ;;  %v18868_v49 = vpop.f32.mrf.mxu1  ;;  %v18874_v24 = vpop.f32.mrf.mxu0 }
0x287b   : > { %13397 = vst.msk [vmem:[#allocation3 + $0x38] sm:$0xff] %vm785_vm2, %v13389_v6 }
0x287c   : > { %v13379_v12 = vpop.f32.mrf.mxu1  ;;  %v13446_v10 = vpop.f32.mrf.mxu0 }
0x287d   : > { %v23612_v10 = vpop.permute.xlu1 %13998 }
0x287e   : > { %v18869_v50 = vpop.f32.mrf.mxu1  ;;  %v18875_v37 = vpop.f32.mrf.mxu0 }
0x2880   : > { %v13494_v25 = vpop.f32.mrf.mxu1  ;;  %v13545_v4 = vpop.f32.mrf.mxu0 }
0x2881   : > { %v13812_v33 = vsel %vm785_vm2, %v13545_v4, -inf  ;;  %v13809_v53 = vsel %vm785_vm2, %v13494_v25, -inf }
0x2882   : > { %13813 = vmax.xlane.f32.xlu0 %v13812_v33  ;;  %v18886_v16 = vpop.f32.mrf.mxu0  ;;  %13810 = vmax.xlane.f32.xlu1 %v13809_v53  ;;  %v18880_v13 = vpop.f32.mrf.mxu1 }
0x2883   : > { %v23614_v53 = vpop.permute.xlu1 %14046 }
0x2884   : > { %v13497_v31 = vpop.f32.mrf.mxu1  ;;  %v13548_v0 = vpop.f32.mrf.mxu0 }
0x2886   : > { %v18881_v44 = vpop.f32.mrf.mxu1  ;;  %v18887_v3 = vpop.f32.mrf.mxu0 }
0x2888   : > { %v13596_v41 = vpop.f32.mrf.mxu1  ;;  %v13647_v7 = vpop.f32.mrf.mxu0 }
0x2889   : > { %v13815_v48 = vsel %vm785_vm2, %v13596_v41, -inf  ;;  %v13818_v43 = vsel %vm785_vm2, %v13647_v7, -inf }
0x288a   : > { %v18898_v46 = vpop.f32.mrf.mxu0  ;;  %13816 = vmax.xlane.f32.xlu0 %v13815_v48  ;;  %v18892_v63 = vpop.f32.mrf.mxu1 }
0x288c   : > { %v13599_v47 = vpop.f32.mrf.mxu1  ;;  %v13650_v22 = vpop.f32.mrf.mxu0 }
0x288e   : > { %v18899_v23 = vpop.f32.mrf.mxu0  ;;  %13819 = vmax.xlane.f32.xlu0 %v13818_v43  ;;  %v18893_v52 = vpop.f32.mrf.mxu1 }
0x2890   : > { %v23596_v38 = vpop.f32.mrf.mxu1  ;;  %v23598_v20 = vpop.f32.mrf.mxu0 }
0x2891   : > { %v13824_v61 = vsel %vm785_vm2, %v23598_v20, -inf  ;;  %v13821_v55 = vsel %vm785_vm2, %v23596_v38, -inf }
0x2892   : > { %v18910_v26 = vpop.f32.mrf.mxu0  ;;  %13825 = vmax.xlane.f32.xlu0 %v13824_v61  ;;  %13822 = vmax.xlane.f32.xlu1 %v13821_v55  ;;  %v18904_v45 = vpop.f32.mrf.mxu1 }
0x2894   : > { %v13701_v2 = vpop.f32.mrf.mxu1  ;;  %v13752_v30 = vpop.f32.mrf.mxu0 }
0x2896   : > { %v18905_v19 = vpop.f32.mrf.mxu1  ;;  %v18911_v36 = vpop.f32.mrf.mxu0 }
0x2898   : > { %v23604_v6 = vpop.f32.mrf.mxu1 }
0x2899   : > { %v13827_v12 = vsel %vm785_vm2, %v23604_v6, -inf }
0x289a   : > { %v18916_v14 = vpop.f32.mrf.mxu1 }
0x289c   : > { %v13803_v49 = vpop.f32.mrf.mxu1 }
0x289e   : > { %v18917_v24 = vpop.f32.mrf.mxu1 }
0x28a3   : > { %14142 = vrot.lane.b32.xlu1 %v23340_v42, %s20151_s18 }
0x28a8   : > { %14094 = vrot.lane.b32.xlu0 %v23330_v39, %s20151_s18 }
0x28c7   : > { %13828 = vmax.xlane.f32.xlu1 %v13827_v12 }
0x2903   : > { %v13808_v50 = vpop.xlane.xlu0 %13807 }
0x2904   : > { %v13830_v37 = vsub.f32 %v13443_v5, %v13808_v50 }
0x2906   : > { %v13838_v33 = vmul.f32 1.442695, %v13830_v37 }
0x2908   : > { %19747 = vpow2.f32 %v13838_v33 }
0x290b   : > { %v13814_v16 = vpop.xlane.xlu0 %13813  ;;  %v13811_v13 = vpop.xlane.xlu1 %13810 }
0x290c   : > { %v13832_v31 = vsub.f32 %v13545_v4, %v13814_v16  ;;  %v13831_v0 = vsub.f32 %v13494_v25, %v13811_v13 }
0x290e   : > { %v13842_v44 = vmul.f32 1.442695, %v13832_v31  ;;  %v13840_v3 = vmul.f32 1.442695, %v13831_v0 }
0x2910   : > { %19749 = vpow2.f32 %v13842_v44 }
0x2911   : > { %19751 = vpow2.f32 %v13840_v3 }
0x2913   : > { %v13817_v48 = vpop.xlane.xlu0 %13816 }
0x2914   : > { %v13833_v46 = vsub.f32 %v13596_v41, %v13817_v48 }
0x2915   : > { %v23616_v63 = vpop.eup %19747 }
0x2916   : > { %v13844_v47 = vmul.f32 1.442695, %v13833_v46  ;;  %v13854_v5 = vsel %vm785_vm2, %v23616_v63, 0.0 }
0x2917   : > { %13855 = vadd.xlane.f32.xlu0 %v13854_v5  ;;  %v13820_v22 = vpop.xlane.xlu0 %13819  ;;  %v14004_v5 = vsel %vm1235_vm3, %v23612_v10, 0 }
0x2918   : > { %19753 = vpow2.f32 %v13844_v47  ;;  %v13834_v43 = vsub.f32 %v13647_v7, %v13820_v22 }
0x291a   : > { %v13846_v23 = vmul.f32 1.442695, %v13834_v43 }
0x291b   : > { %v13823_v45 = vpop.xlane.xlu1 %13822  ;;  %v13826_v30 = vpop.xlane.xlu0 %13825 }
0x291c   : > { %19755 = vpow2.f32 %v13846_v23  ;;  %v13835_v2 = vsub.f32 %v23596_v38, %v13823_v45  ;;  %v13836_v19 = vsub.f32 %v23598_v20, %v13826_v30 }
0x291d   : > { %v23620_v4 = vpop.eup %19749 }
0x291e   : > { %v23622_v25 = vpop.eup %19751  ;;  %v13860_v52 = vsel %vm785_vm2, %v23620_v4, 0.0  ;;  %v13848_v36 = vmul.f32 1.442695, %v13835_v2  ;;  %v13850_v14 = vmul.f32 1.442695, %v13836_v19 }
0x291f   : > { %13861 = vadd.xlane.f32.xlu0 %v13860_v52  ;;  %v13857_v41 = vsel %vm785_vm2, %v23622_v25, 0.0  ;;  %v23652_v38 = vpop.permute.xlu1 %14142  ;;  %v14095_v13 = vpop.permute.xlu0 %14094 }
0x2920   : > { %13858 = vadd.xlane.f32.xlu1 %v13857_v41  ;;  %19757 = vpow2.f32 %v13848_v36  ;;  %v14148_v30 = vsel %vm1235_vm3, %v23652_v38, 0 }
0x2921   : > { %19759 = vpow2.f32 %v13850_v14 }
0x2925   : > { %v23628_v61 = vpop.eup %19753 }
0x2926   : > { %v13863_v55 = vsel %vm785_vm2, %v23628_v61, 0.0 }
0x2927   : > { %13864 = vadd.xlane.f32.xlu1 %v13863_v55  ;;  %v14100_v55 = vsel %vm1235_vm3, %v14095_v13, 0 }
0x2929   : > { %v23632_v7 = vpop.eup %19755 }
0x292a   : > { %v13866_v26 = vsel %vm785_vm2, %v23632_v7, 0.0 }
0x292b   : > { %13867 = vadd.xlane.f32.xlu0 %v13866_v26  ;;  %v14052_v26 = vsel %vm1235_vm3, %v23614_v53, 0 }
0x292d   : > { %v23642_v49 = vpop.eup %19757 }
0x292e   : > { %v13869_v24 = vsel %vm785_vm2, %v23642_v49, 0.0  ;;  %v23646_v12 = vpop.eup %19759 }
0x292f   : > { %v13872_v50 = vsel %vm785_vm2, %v23646_v12, 0.0 }
0x2938   : > { %14238 = vrot.lane.b32.xlu1 %v23355_v1, %s20151_s18 }
0x2941   : > { %14190 = vrot.lane.b32.xlu0 %v23343_v11, %s20151_s18  ;;  %s16574_s18 = sshll.u32 %s20432_s10, 3 }
0x2950   : > { %v13829_v20 = vpop.xlane.xlu1 %13828 }
0x2951   : > { %v13837_v37 = vsub.f32 %v23604_v6, %v13829_v20 }
0x2953   : > { %v13852_v33 = vmul.f32 1.442695, %v13837_v37 }
0x2955   : > { %19761 = vpow2.f32 %v13852_v33 }
0x295c   : > { %13870 = vadd.xlane.f32.xlu1 %v13869_v24 }
0x2960   : > { %13873 = vadd.xlane.f32.xlu0 %v13872_v50 }
0x2962   : > { %v23667_v16 = vpop.eup %19761 }
0x2963   : > { %v13875_v6 = vsel %vm785_vm2, %v23667_v16, 0.0 }
0x296d   : > { %14386 = vrot.lane.b32.xlu1 %v23286_v8, %s20152_s17 }
0x2976   : > { %14336 = vrot.lane.b32.xlu0 %v23264_v9, %s20152_s17 }
0x297a   : > { %14334 = vrot.lane.b32.xlu0 %v23288_v56, %s20152_s17 }
0x297e   : > { %14436 = vrot.lane.b32.xlu0 %v23258_v57, %s20152_s17 }
0x2982   : > { %14434 = vrot.lane.b32.xlu0 %v23284_v40, %s20152_s17 }
0x2986   : > { %14536 = vrot.lane.b32.xlu0 %v23330_v39, %s20152_s17 }
0x298a   : > { %14534 = vrot.lane.b32.xlu0 %v23351_v58, %s20152_s17 }
0x298e   : > { %14636 = vrot.lane.b32.xlu0 %v23343_v11, %s20152_s17 }
0x2991   : > { %13876 = vadd.xlane.f32.xlu1 %v13875_v6 }
0x2992   : > { %14634 = vrot.lane.b32.xlu0 %v23376_v51, %s20152_s17 }
0x2996   : > { %14830 = vrot.lane.b32.xlu0 %v23264_v9, %s20153_s22 }
0x29a0   : > { %v13856_v31 = vpop.xlane.xlu0 %13855 }
0x29a1   : > { %19763 = vrcp.f32 %v13856_v31 }
0x29a2   : > { %14384 = vrot.lane.b32.xlu1 %v23310_v59, %s20152_s17 }
0x29a6   : > { %14486 = vrot.lane.b32.xlu1 %v23272_v21, %s20152_s17 }
0x29a8   : > { %v13862_v0 = vpop.xlane.xlu0 %13861 }
0x29a9   : > { %19765 = vrcp.f32 %v13862_v0  ;;  %v13859_v44 = vpop.xlane.xlu1 %13858 }
0x29aa   : > { %19767 = vrcp.f32 %v13859_v44  ;;  %14484 = vrot.lane.b32.xlu1 %v23320_v27, %s20152_s17 }
0x29ae   : > { %v19764_v3 = vpop.eup %19763  ;;  %14586 = vrot.lane.b32.xlu1 %v23340_v42, %s20152_s17 }
0x29af   : > { %v13886_v48 = vmul.f32 %v19764_v3, %v23616_v63 }
0x29b0   : > { %v13865_v46 = vpop.xlane.xlu1 %13864 }
0x29b1   : > { %v13894_v47 = vpack.c.bf16 %v13886_v48, %v13886_v48  ;;  %19769 = vrcp.f32 %v13865_v46 }
0x29b2   : > { %14584 = vrot.lane.b32.xlu1 %v23367_v17, %s20152_s17 }
0x29b3   : > { %18921 = vmatmul.mubr.msk.bf16.vlgmr.msra.gmra.mxu0 %vm785_vm2, %v13894_v47 }
0x29b4   : > { %18931 = vmatpush3.bf16.msra.mxu0 %v14004_v5  ;;  %v13868_v22 = vpop.xlane.xlu0 %13867  ;;  %18932 = vmatprep.mubr.msk.bf16.mxu0 %vm20148_vm1, %v20147_v15 }
0x29b5   : > { %19771 = vrcp.f32 %v13868_v22  ;;  %18942 = vmatprep.subr.bf16.mxu0 %v20147_v15 }
0x29b6   : > { %v19766_v63 = vpop.eup %19765  ;;  %14686 = vrot.lane.b32.xlu1 %v23355_v1, %s20152_s17 }
0x29b7   : > { %v19768_v43 = vpop.eup %19767  ;;  %v13888_v23 = vmul.f32 %v19766_v63, %v23620_v4 }
0x29b8   : > { %v13887_v52 = vmul.f32 %v19768_v43, %v23622_v25  ;;  %v14191_v19 = vpop.permute.xlu0 %14190 }
0x29b9   : > { %v13896_v10 = vpack.c.bf16 %v13888_v23, %v13888_v23 }
0x29ba   : > { %v13895_v41 = vpack.c.bf16 %v13887_v52, %v13887_v52  ;;  %14684 = vrot.lane.b32.xlu1 %v23384_v35, %s20152_s17  ;;  %s16916_s17 = sshll.u32 %s20256_s19, 7 }
0x29bb   : > { %18933 = vmatmul.mubr.msk.bf16.vlgmr.msra.gmra.mxu0 %vm785_vm2, %v13896_v10 }
0x29bc   : > { %18927 = vmatmul.mubr.msk.bf16.vlgmr.msra.gmra.mxu1 %vm785_vm2, %v13895_v41  ;;  %18943 = vmatpush3.bf16.msra.mxu0 %v14100_v55 }
0x29bd   : > { %18937 = vmatpush3.bf16.msra.mxu1 %v14052_v26  ;;  %18938 = vmatprep.mubr.msk.bf16.mxu1 %vm20148_vm1, %v20147_v15 }
0x29be   : > { %v19770_v4 = vpop.eup %19769  ;;  %14878 = vrot.lane.b32.xlu1 %v23286_v8, %s20153_s22  ;;  %18948 = vmatprep.subr.bf16.mxu1 %v20147_v15 }
0x29bf   : > { %v13889_v25 = vmul.f32 %v19770_v4, %v23628_v61  ;;  %18944 = vmatprep.mubr.msk.bf16.mxu0 %vm20148_vm1, %v20147_v15  ;;  %18954 = vmatprep.subr.bf16.mxu0 %v20147_v15  ;;  %v14196_v61 = vsel %vm1235_vm3, %v14191_v19, 0 }
0x29c1   : > { %v13897_v53 = vpack.c.bf16 %v13889_v25, %v13889_v25 }
0x29c2   : > { %v19772_v45 = vpop.eup %19771  ;;  %14926 = vrot.lane.b32.xlu1 %v23258_v57, %s20153_s22 }
0x29c3   : > { %v13890_v2 = vmul.f32 %v19772_v45, %v23632_v7  ;;  %v14239_v7 = vpop.permute.xlu1 %14238 }
0x29c4   : > { %18939 = vmatmul.mubr.msk.bf16.vlgmr.msra.gmra.mxu1 %vm785_vm2, %v13897_v53  ;;  %v14244_v31 = vsel %vm1235_vm3, %v14239_v7, 0 }
0x29c5   : > { %v13898_v36 = vpack.c.bf16 %v13890_v2, %v13890_v2  ;;  %18949 = vmatpush3.bf16.msra.mxu1 %v14148_v30  ;;  %18950 = vmatprep.mubr.msk.bf16.mxu1 %vm20148_vm1, %v20147_v15 }
0x29c6   : > { %14974 = vrot.lane.b32.xlu1 %v23272_v21, %s20153_s22  ;;  %18960 = vmatprep.subr.bf16.mxu1 %v20147_v15 }
0x29c7   : > { %18945 = vmatmul.mubr.msk.bf16.vlgmr.msra.gmra.mxu0 %vm785_vm2, %v13898_v36 }
0x29c8   : > { %18955 = vmatpush3.bf16.msra.mxu0 %v14196_v61  ;;  %18956 = vmatprep.mubr.msk.bf16.mxu0 %vm20148_vm1, %v20147_v15 }
0x29c9   : > { %18966 = vmatprep.subr.bf16.mxu0 %v20147_v15 }
0x29e5   : > { %v13871_v14 = vpop.xlane.xlu1 %13870 }
0x29e6   : > { %19773 = vrcp.f32 %v13871_v14 }
0x29e9   : > { %v13874_v24 = vpop.xlane.xlu0 %13873  ;;  %v14387_v43 = vpop.permute.xlu1 %14386 }
0x29ea   : > { %19775 = vrcp.f32 %v13874_v24  ;;  %v14392_v45 = vsel %vm785_vm2, %v14387_v43, 0 }
0x29ed   : > { %v14337_v50 = vpop.permute.xlu0 %14336 }
0x29ee   : > { %v14342_v48 = vsel %vm785_vm2, %v14337_v50, 0 }
0x29f1   : > { %v14335_v38 = vpop.permute.xlu0 %14334 }
0x29f3   : > { %v19774_v20 = vpop.eup %19773 }
0x29f4   : > { %v13891_v37 = vmul.f32 %v19774_v20, %v23642_v49 }
0x29f5   : > { %v14437_v33 = vpop.permute.xlu0 %14436 }
0x29f6   : > { %v13899_v6 = vpack.c.bf16 %v13891_v37, %v13891_v37 }
0x29f7   : > { %v19776_v13 = vpop.eup %19775 }
0x29f8   : > { %v13892_v0 = vmul.f32 %v19776_v13, %v23646_v12  ;;  %18951 = vmatmul.mubr.msk.bf16.vlgmr.msra.gmra.mxu1 %vm785_vm2, %v13899_v6  ;;  %v14442_v12 = vsel %vm785_vm2, %v14437_v33, 0 }
0x29f9   : > { %18961 = vmatpush3.bf16.msra.mxu1 %v14244_v31  ;;  %18962 = vmatprep.mubr.msk.bf16.mxu1 %vm20148_vm1, %v20147_v15  ;;  %v14435_v3 = vpop.permute.xlu0 %14434 }
0x29fa   : > { %v13900_v44 = vpack.c.bf16 %v13892_v0, %v13892_v0  ;;  %18972 = vmatprep.subr.bf16.mxu1 %v20147_v15 }
0x29fc   : > { %18957 = vmatmul.mubr.msk.bf16.vlgmr.msra.gmra.mxu0 %vm785_vm2, %v13900_v44 }
0x29fd   : > { %18967 = vmatpush3.bf16.xpose.msra.mxu0 %v14342_v48  ;;  %18968 = vmatprep.mubr.msk.bf16.mxu0 %vm20148_vm1, %v20147_v15  ;;  %v14537_v49 = vpop.permute.xlu0 %14536 }
0x29fe   : > { %18978 = vmatprep.subr.bf16.mxu0 %v20147_v15  ;;  %v14542_v47 = vsel %vm785_vm2, %v14537_v49, 0 }
0x2a01   : > { %v14535_v46 = vpop.permute.xlu0 %14534 }
0x2a04   : > { %18969 = vmatmul.mubr.msk.bf16.vlgmr.msra.gmra.mxu0 %vm785_vm2, %v14335_v38 }
0x2a05   : > { %18979 = vmatpush3.bf16.xpose.msra.mxu0 %v14442_v12  ;;  %18980 = vmatprep.mubr.msk.bf16.mxu0 %vm20148_vm1, %v20147_v15  ;;  %v14637_v5 = vpop.permute.xlu0 %14636 }
0x2a06   : > { %18990 = vmatprep.subr.bf16.mxu0 %v20147_v15  ;;  %v14642_v63 = vsel %vm785_vm2, %v14637_v5, 0 }
0x2a09   : > { %v14635_v22 = vpop.permute.xlu0 %14634 }
0x2a0c   : > { %18981 = vmatmul.mubr.msk.bf16.vlgmr.msra.gmra.mxu0 %vm785_vm2, %v14435_v3 }
0x2a0d   : > { %18991 = vmatpush3.bf16.xpose.msra.mxu0 %v14542_v47  ;;  %18992 = vmatprep.mubr.msk.bf16.mxu0 %vm20148_vm1, %v20147_v15  ;;  %v14831_v23 = vpop.permute.xlu0 %14830 }
0x2a0e   : > { %19002 = vmatprep.subr.bf16.mxu0 %v20147_v15  ;;  %v14836_v10 = vsel %vm1235_vm3, %v14831_v23, 0 }
0x2a14   : > { %18993 = vmatmul.mubr.msk.bf16.vlgmr.msra.gmra.mxu0 %vm785_vm2, %v14535_v46 }
0x2a15   : > { %19003 = vmatpush3.bf16.xpose.msra.mxu0 %v14642_v63  ;;  %19004 = vmatprep.mubr.msk.bf16.mxu0 %vm20148_vm1, %v20147_v15 }
0x2a16   : > { %19014 = vmatprep.subr.bf16.mxu0 %v20147_v15 }
0x2a1a   : > { %v13877_v52 = vpop.xlane.xlu1 %13876 }
0x2a1b   : > { %19777 = vrcp.f32 %v13877_v52 }
0x2a1c   : > { %19005 = vmatmul.mubr.msk.bf16.vlgmr.msra.gmra.mxu0 %vm785_vm2, %v14635_v22 }
0x2a1d   : > { %19015 = vmatpush3.bf16.msra.mxu0 %v14836_v10  ;;  %19016 = vmatprep.mubr.msk.bf16.mxu0 %vm20148_vm1, %v20147_v15 }
0x2a1e   : > { %19026 = vmatprep.subr.bf16.mxu0 %v20147_v15  ;;  %v14385_v41 = vpop.permute.xlu1 %14384 }
0x2a22   : > { %v14487_v55 = vpop.permute.xlu1 %14486 }
0x2a23   : > { %v14492_v30 = vsel %vm785_vm2, %v14487_v55, 0 }
0x2a26   : > { %v14485_v53 = vpop.permute.xlu1 %14484 }
0x2a28   : > { %v19778_v26 = vpop.eup %19777 }
0x2a29   : > { %v13893_v4 = vmul.f32 %v19778_v26, %v23667_v16 }
0x2a2a   : > { %v14587_v2 = vpop.permute.xlu1 %14586 }
0x2a2b   : > { %v13901_v25 = vpack.c.bf16 %v13893_v4, %v13893_v4  ;;  %v14592_v19 = vsel %vm785_vm2, %v14587_v2, 0 }
0x2a2d   : > { %18963 = vmatmul.mubr.msk.bf16.vlgmr.msra.gmra.mxu1 %vm785_vm2, %v13901_v25 }
0x2a2e   : > { %18973 = vmatpush3.bf16.xpose.msra.mxu1 %v14392_v45  ;;  %18974 = vmatprep.mubr.msk.bf16.mxu1 %vm20148_vm1, %v20147_v15  ;;  %v14585_v16 = vpop.permute.xlu1 %14584 }
0x2a2f   : > { %18984 = vmatprep.subr.bf16.mxu1 %v20147_v15 }
0x2a32   : > { %v14687_v36 = vpop.permute.xlu1 %14686 }
0x2a33   : > { %v14692_v7 = vsel %vm785_vm2, %v14687_v36, 0 }
0x2a35   : > { %18975 = vmatmul.mubr.msk.bf16.vlgmr.msra.gmra.mxu1 %vm785_vm2, %v14385_v41 }
0x2a36   : > { %18985 = vmatpush3.bf16.xpose.msra.mxu1 %v14492_v30  ;;  %18986 = vmatprep.mubr.msk.bf16.mxu1 %vm20148_vm1, %v20147_v15  ;;  %v14685_v61 = vpop.permute.xlu1 %14684 }
0x2a37   : > { %18996 = vmatprep.subr.bf16.mxu1 %v20147_v15 }
0x2a3a   : > { %v14879_v14 = vpop.permute.xlu1 %14878 }
0x2a3b   : > { %v14884_v24 = vsel %vm1235_vm3, %v14879_v14, 0 }
0x2a3d   : > { %18987 = vmatmul.mubr.msk.bf16.vlgmr.msra.gmra.mxu1 %vm785_vm2, %v14485_v53 }
0x2a3e   : > { %18997 = vmatpush3.bf16.xpose.msra.mxu1 %v14592_v19  ;;  %18998 = vmatprep.mubr.msk.bf16.mxu1 %vm20148_vm1, %v20147_v15 }
0x2a3f   : > { %19008 = vmatprep.subr.bf16.mxu1 %v20147_v15 }
0x2a45   : > { %18999 = vmatmul.mubr.msk.bf16.vlgmr.msra.gmra.mxu1 %vm785_vm2, %v14585_v16 }
0x2a46   : > { %19009 = vmatpush3.bf16.xpose.msra.mxu1 %v14692_v7  ;;  %19010 = vmatprep.mubr.msk.bf16.mxu1 %vm20148_vm1, %v20147_v15 }
0x2a47   : > { %19020 = vmatprep.subr.bf16.mxu1 %v20147_v15 }
0x2a4d   : > { %19011 = vmatmul.mubr.msk.bf16.vlgmr.msra.gmra.mxu1 %vm785_vm2, %v14685_v61 }
0x2a4e   : > { %19021 = vmatpush3.bf16.msra.mxu1 %v14884_v24  ;;  %19022 = vmatprep.mubr.msk.bf16.mxu1 %vm20148_vm1, %v20147_v15 }
0x2a4f   : > { %19032 = vmatprep.subr.bf16.mxu1 %v20147_v15 }
0x2a73   : > { %v23788_v50 = vpop.f32.mrf.mxu0 }
0x2a75   : > { %v18922_v38 = vpop.f32.mrf.mxu0 }
0x2a77   : > { %v13947_v20 = vpop.f32.mrf.mxu0 }
0x2a79   : > { %v18923_v37 = vpop.f32.mrf.mxu0 }
0x2a7b   : > { %v23790_v33 = vpop.f32.mrf.mxu0 }
0x2a7c   : > { %v23792_v6 = vpop.f32.mrf.mxu1 }
0x2a7d   : > { %v18934_v13 = vpop.f32.mrf.mxu0 }
0x2a7e   : > { %v18928_v31 = vpop.f32.mrf.mxu1 }
0x2a7f   : > { %v14043_v0 = vpop.f32.mrf.mxu0 }
0x2a80   : > { %v13995_v44 = vpop.f32.mrf.mxu1 }
0x2a81   : > { %v18935_v3 = vpop.f32.mrf.mxu0 }
0x2a82   : > { %v18929_v48 = vpop.f32.mrf.mxu1 }
0x2a84   : > { %v23794_v49 = vpop.f32.mrf.mxu1 }
0x2a86   : > { %v18940_v12 = vpop.f32.mrf.mxu1 }
0x2a87   : > { %v23796_v46 = vpop.f32.mrf.mxu0 }
0x2a88   : > { %v14091_v47 = vpop.f32.mrf.mxu1 }
0x2a89   : > { %v18946_v5 = vpop.f32.mrf.mxu0 }
0x2a8a   : > { %v18941_v22 = vpop.f32.mrf.mxu1 }
0x2a8b   : > { %v14139_v63 = vpop.f32.mrf.mxu0 }
0x2a8d   : > { %v18947_v43 = vpop.f32.mrf.mxu0 }
0x2ab8   : > { %v23798_v23 = vpop.f32.mrf.mxu1 }
0x2aba   : > { %v18952_v52 = vpop.f32.mrf.mxu1 }
0x2abc   : > { %v14187_v10 = vpop.f32.mrf.mxu1  ;;  %v23800_v41 = vpop.f32.mrf.mxu0 }
0x2abe   : > { %v18953_v55 = vpop.f32.mrf.mxu1  ;;  %v18958_v26 = vpop.f32.mrf.mxu0 }
0x2ac0   : > { %v14235_v4 = vpop.f32.mrf.mxu0 }
0x2ac2   : > { %v18959_v25 = vpop.f32.mrf.mxu0 }
0x2ac4   : > { %v14378_v53 = vpop.f32.mrf.mxu0 }
0x2ac5   : > { %v14734_v45 = vsel %vm785_vm2, %v14378_v53, -inf }
0x2ac6   : > { %14735 = vmax.xlane.f32.xlu0 %v14734_v45  ;;  %v18970_v2 = vpop.f32.mrf.mxu0 }
0x2ac8   : > { %v14381_v30 = vpop.f32.mrf.mxu0 }
0x2aca   : > { %v18971_v16 = vpop.f32.mrf.mxu0 }
0x2acc   : > { %v14478_v19 = vpop.f32.mrf.mxu0 }
0x2acd   : > { %v14740_v36 = vsel %vm785_vm2, %v14478_v19, -inf }
0x2ace   : > { %14741 = vmax.xlane.f32.xlu0 %v14740_v36  ;;  %v18982_v61 = vpop.f32.mrf.mxu0 }
0x2ad0   : > { %v14481_v7 = vpop.f32.mrf.mxu0 }
0x2ad2   : > { %v18983_v14 = vpop.f32.mrf.mxu0 }
0x2ad4   : > { %v23804_v24 = vpop.f32.mrf.mxu0 }
0x2ad5   : > { %v14746_v25 = vsel %vm785_vm2, %v23804_v24, -inf }
0x2ad6   : > { %v18994_v38 = vpop.f32.mrf.mxu0 }
0x2ad8   : > { %v14581_v20 = vpop.f32.mrf.mxu0 }
0x2ada   : > { %v18995_v37 = vpop.f32.mrf.mxu0 }
0x2adc   : > { %v23806_v13 = vpop.f32.mrf.mxu0 }
0x2add   : > { %v14752_v30 = vsel %vm785_vm2, %v23806_v13, -inf }
0x2ade   : > { %v19006_v31 = vpop.f32.mrf.mxu0 }
0x2ae0   : > { %v14681_v0 = vpop.f32.mrf.mxu0 }
0x2ae2   : > { %v19007_v44 = vpop.f32.mrf.mxu0 }
0x2aed   : > { %v23808_v3 = vpop.f32.mrf.mxu1 }
0x2aef   : > { %v18964_v48 = vpop.f32.mrf.mxu1 }
0x2af1   : > { %v14283_v12 = vpop.f32.mrf.mxu1 }
0x2af3   : > { %v18965_v47 = vpop.f32.mrf.mxu1 }
0x2af5   : > { %v14428_v5 = vpop.f32.mrf.mxu1 }
0x2af6   : > { %v14737_v22 = vsel %vm785_vm2, %v14428_v5, -inf }
0x2af7   : > { %14738 = vmax.xlane.f32.xlu1 %v14737_v22  ;;  %v18976_v63 = vpop.f32.mrf.mxu1 }
0x2af9   : > { %v14431_v43 = vpop.f32.mrf.mxu1 }
0x2afb   : > { %v18977_v52 = vpop.f32.mrf.mxu1 }
0x2afd   : > { %v14528_v10 = vpop.f32.mrf.mxu1 }
0x2afe   : > { %v14743_v55 = vsel %vm785_vm2, %v14528_v10, -inf }
0x2aff   : > { %14744 = vmax.xlane.f32.xlu0 %v14743_v55  ;;  %v18988_v26 = vpop.f32.mrf.mxu1 }
0x2b00   : > { %v14927_v26 = vpop.permute.xlu1 %14926 }
0x2b01   : > { %v14531_v4 = vpop.f32.mrf.mxu1 }
0x2b03   : > { %14747 = vmax.xlane.f32.xlu0 %v14746_v25  ;;  %v18989_v45 = vpop.f32.mrf.mxu1 }
0x2b04   : > { %v23830_v4 = vpop.permute.xlu1 %14974 }
0x2b05   : > { %v14628_v2 = vpop.f32.mrf.mxu1 }
0x2b06   : > { %v14749_v16 = vsel %vm785_vm2, %v14628_v2, -inf }
0x2b07   : > { %14753 = vmax.xlane.f32.xlu0 %v14752_v30  ;;  %14750 = vmax.xlane.f32.xlu1 %v14749_v16  ;;  %v19000_v36 = vpop.f32.mrf.mxu1 }
0x2b09   : > { %v14631_v61 = vpop.f32.mrf.mxu1 }
0x2b0b   : > { %v19001_v7 = vpop.f32.mrf.mxu1 }
0x2b0d   : > { %v23817_v14 = vpop.f32.mrf.mxu1 }
0x2b0e   : > { %v14755_v31 = vsel %vm785_vm2, %v23817_v14, -inf }
0x2b0f   : > { %v19012_v38 = vpop.f32.mrf.mxu1 }
0x2b11   : > { %v14731_v20 = vpop.f32.mrf.mxu1 }
0x2b13   : > { %v19013_v37 = vpop.f32.mrf.mxu1 }
0x2b18   : > { %15070 = vrot.lane.b32.xlu1 %v23340_v42, %s20153_s22 }
0x2b1d   : > { %15022 = vrot.lane.b32.xlu0 %v23330_v39, %s20153_s22 }
0x2b3c   : > { %14756 = vmax.xlane.f32.xlu1 %v14755_v31 }
0x2b4f   : > { %v14736_v0 = vpop.xlane.xlu0 %14735 }
0x2b50   : > { %v14758_v44 = vsub.f32 %v14378_v53, %v14736_v0 }
0x2b52   : > { %v14766_v48 = vmul.f32 1.442695, %v14758_v44 }
0x2b54   : > { %19779 = vpow2.f32 %v14766_v48 }
0x2b57   : > { %v14742_v12 = vpop.xlane.xlu0 %14741 }
0x2b58   : > { %v14760_v47 = vsub.f32 %v14478_v19, %v14742_v12 }
0x2b5a   : > { %v14770_v22 = vmul.f32 1.442695, %v14760_v47 }
0x2b5c   : > { %19781 = vpow2.f32 %v14770_v22 }
0x2b61   : > { %v19780_v63 = vpop.eup %19779 }
0x2b62   : > { %v14782_v43 = vsel %vm785_vm2, %v19780_v63, 0.0 }
0x2b63   : > { %14783 = vadd.xlane.f32.xlu0 %v14782_v43 }
0x2b69   : > { %v23826_v52 = vpop.eup %19781 }
0x2b6a   : > { %v14788_v55 = vsel %vm785_vm2, %v23826_v52, 0.0 }
0x2b6b   : > { %14789 = vadd.xlane.f32.xlu0 %v14788_v55 }
0x2b80   : > { %v14739_v53 = vpop.xlane.xlu1 %14738 }
0x2b81   : > { %v14759_v25 = vsub.f32 %v14428_v5, %v14739_v53 }
0x2b83   : > { %v14768_v45 = vmul.f32 1.442695, %v14759_v25 }
0x2b85   : > { %19783 = vpow2.f32 %v14768_v45 }
0x2b88   : > { %v14745_v19 = vpop.xlane.xlu0 %14744 }
0x2b89   : > { %v14761_v30 = vsub.f32 %v14528_v10, %v14745_v19 }
0x2b8b   : > { %v14772_v16 = vmul.f32 1.442695, %v14761_v30 }
0x2b8c   : > { %v14748_v36 = vpop.xlane.xlu0 %14747 }
0x2b8d   : > { %19785 = vpow2.f32 %v14772_v16  ;;  %v14762_v61 = vsub.f32 %v23804_v24, %v14748_v36 }
0x2b8f   : > { %v14774_v7 = vmul.f32 1.442695, %v14762_v61 }
0x2b90   : > { %v14751_v24 = vpop.xlane.xlu1 %14750  ;;  %v14754_v44 = vpop.xlane.xlu0 %14753 }
0x2b91   : > { %19787 = vpow2.f32 %v14774_v7  ;;  %v14763_v0 = vsub.f32 %v14628_v2, %v14751_v24  ;;  %v14764_v48 = vsub.f32 %v23806_v13, %v14754_v44  ;;  %v14932_v7 = vsel %vm1235_vm3, %v14927_v26, 0 }
0x2b92   : > { %v23833_v38 = vpop.eup %19783 }
0x2b93   : > { %v14785_v20 = vsel %vm785_vm2, %v23833_v38, 0.0  ;;  %v14776_v12 = vmul.f32 1.442695, %v14763_v0  ;;  %v14778_v47 = vmul.f32 1.442695, %v14764_v48 }
0x2b94   : > { %14786 = vadd.xlane.f32.xlu1 %v14785_v20  ;;  %v15071_v13 = vpop.permute.xlu1 %15070  ;;  %v15023_v2 = vpop.permute.xlu0 %15022 }
0x2b95   : > { %19789 = vpow2.f32 %v14776_v12  ;;  %v15028_v20 = vsel %vm1235_vm3, %v15023_v2, 0  ;;  %v15076_v48 = vsel %vm1235_vm3, %v15071_v13, 0 }
0x2b96   : > { %19791 = vpow2.f32 %v14778_v47 }
0x2b9a   : > { %v23837_v37 = vpop.eup %19785 }
0x2b9b   : > { %v14791_v5 = vsel %vm785_vm2, %v23837_v37, 0.0 }
0x2b9c   : > { %14792 = vadd.xlane.f32.xlu1 %v14791_v5 }
0x2b9e   : > { %v23841_v10 = vpop.eup %19787 }
0x2b9f   : > { %v14794_v31 = vsel %vm785_vm2, %v23841_v10, 0.0 }
0x2ba0   : > { %14795 = vadd.xlane.f32.xlu0 %v14794_v31 }
0x2ba2   : > { %v23850_v22 = vpop.eup %19789 }
0x2ba3   : > { %v14797_v43 = vsel %vm785_vm2, %v23850_v22, 0.0  ;;  %v23854_v55 = vpop.eup %19791 }
0x2ba4   : > { %v14800_v53 = vsel %vm785_vm2, %v23854_v55, 0.0 }
0x2bad   : > { %15166 = vrot.lane.b32.xlu1 %v23355_v1, %s20153_s22 }
0x2bb6   : > { %15118 = vrot.lane.b32.xlu0 %v23343_v11, %s20153_s22  ;;  %s587_s22 = scalar_lea.vmem [#allocation18], %s16574_s18 }
0x2bc5   : > { %v14757_v25 = vpop.xlane.xlu1 %14756 }
0x2bc6   : > { %v14765_v45 = vsub.f32 %v23817_v14, %v14757_v25 }
0x2bc8   : > { %v14780_v30 = vmul.f32 1.442695, %v14765_v45 }
0x2bd1   : > { %14798 = vadd.xlane.f32.xlu1 %v14797_v43 }
0x2bd5   : > { %14801 = vadd.xlane.f32.xlu0 %v14800_v53 }
0x2be2   : > { %15314 = vrot.lane.b32.xlu1 %v23286_v8, %s20154_s8 }
0x2beb   : > { %15264 = vrot.lane.b32.xlu0 %v23264_v9, %s20154_s8 }
0x2bec   : > { %v14784_v19 = vpop.xlane.xlu0 %14783 }
0x2bed   : > { %19793 = vrcp.f32 %v14784_v19 }
0x2bee   : > { %19795 = vpow2.f32 %v14780_v30 }
0x2bef   : > { %15262 = vrot.lane.b32.xlu0 %v23288_v56, %s20154_s8 }
0x2bf3   : > { %15364 = vrot.lane.b32.xlu0 %v23258_v57, %s20154_s8 }
0x2bf4   : > { %v14790_v16 = vpop.xlane.xlu0 %14789 }
0x2bf5   : > { %19797 = vrcp.f32 %v14790_v16 }
0x2bf7   : > { %15362 = vrot.lane.b32.xlu0 %v23284_v40, %s20154_s8 }
0x2bfa   : > { %v19794_v36 = vpop.eup %19793 }
0x2bfb   : > { %v14814_v61 = vmul.f32 %v19794_v36, %v19780_v63  ;;  %15464 = vrot.lane.b32.xlu0 %v23330_v39, %s20154_s8  ;;  %v23877_v56 = vpop.eup %19795 }
0x2bfd   : > { %v14822_v14 = vpack.c.bf16 %v14814_v61, %v14814_v61 }
0x2bff   : > { %15462 = vrot.lane.b32.xlu0 %v23351_v58, %s20154_s8  ;;  %19017 = vmatmul.mubr.msk.bf16.vlgmr.msra.gmra.mxu0 %vm785_vm2, %v14822_v14  ;;  %v14803_v58 = vsel %vm785_vm2, %v23877_v56, 0.0 }
0x2c00   : > { %19027 = vmatpush3.bf16.msra.mxu0 %v14932_v7  ;;  %19028 = vmatprep.mubr.msk.bf16.mxu0 %vm20148_vm1, %v20147_v15 }
0x2c01   : > { %19038 = vmatprep.subr.bf16.mxu0 %v20147_v15 }
0x2c02   : > { %v19798_v40 = vpop.eup %19797 }
0x2c03   : > { %v14816_v63 = vmul.f32 %v19798_v40, %v23826_v52  ;;  %15564 = vrot.lane.b32.xlu0 %v23343_v11, %s20154_s8 }
0x2c05   : > { %v14824_v26 = vpack.c.bf16 %v14816_v63, %v14816_v63 }
0x2c06   : > { %14804 = vadd.xlane.f32.xlu1 %v14803_v58 }
0x2c07   : > { %15562 = vrot.lane.b32.xlu0 %v23376_v51, %s20154_s8  ;;  %19029 = vmatmul.mubr.msk.bf16.vlgmr.msra.gmra.mxu0 %vm785_vm2, %v14824_v26 }
0x2c08   : > { %19039 = vmatpush3.bf16.msra.mxu0 %v15028_v20  ;;  %19040 = vmatprep.mubr.msk.bf16.mxu0 %vm20148_vm1, %v20147_v15 }
0x2c09   : > { %19050 = vmatprep.subr.bf16.mxu0 %v20147_v15 }
0x2c17   : > { %15312 = vrot.lane.b32.xlu1 %v23310_v59, %s20154_s8 }
0x2c1b   : > { %15414 = vrot.lane.b32.xlu1 %v23272_v21, %s20154_s8 }
0x2c1d   : > { %v14787_v52 = vpop.xlane.xlu1 %14786 }
0x2c1e   : > { %19799 = vrcp.f32 %v14787_v52 }
0x2c1f   : > { %15412 = vrot.lane.b32.xlu1 %v23320_v27, %s20154_s8  ;;  %v14980_v27 = vsel %vm1235_vm3, %v23830_v4, 0 }
0x2c23   : > { %15514 = vrot.lane.b32.xlu1 %v23340_v42, %s20154_s8 }
0x2c25   : > { %v14793_v51 = vpop.xlane.xlu1 %14792 }
0x2c26   : > { %19801 = vrcp.f32 %v14793_v51 }
0x2c27   : > { %15512 = vrot.lane.b32.xlu1 %v23367_v17, %s20154_s8 }
0x2c29   : > { %v14796_v5 = vpop.xlane.xlu0 %14795 }
0x2c2a   : > { %19803 = vrcp.f32 %v14796_v5 }
0x2c2b   : > { %v19800_v31 = vpop.eup %19799  ;;  %15614 = vrot.lane.b32.xlu1 %v23355_v1, %s20154_s8 }
0x2c2c   : > { %v14815_v59 = vmul.f32 %v19800_v31, %v23833_v38 }
0x2c2d   : > { %v15119_v4 = vpop.permute.xlu0 %15118 }
0x2c2e   : > { %v14823_v24 = vpack.c.bf16 %v14815_v59, %v14815_v59  ;;  %v15124_v47 = vsel %vm1235_vm3, %v15119_v4, 0 }
0x2c2f   : > { %15612 = vrot.lane.b32.xlu1 %v23384_v35, %s20154_s8  ;;  %s16415_s8 = sshll.u32 %s587_s22, 4  ;;  %s16416_s8 = int_to_ptr.vmem [resolvable:$true] %s16415_s8 }
0x2c30   : > { %19023 = vmatmul.mubr.msk.bf16.vlgmr.msra.gmra.mxu1 %vm785_vm2, %v14823_v24  ;;  %s20053_s19 = scalar_lea.vmem %s16416_s8, 128  ;;  %p20060_p1 = scmp.lt.s32.totalorder %s16416_s8, %s20058_s4 }
0x2c31   : > { %19033 = vmatpush3.bf16.msra.mxu1 %v14980_v27  ;;  %19034 = vmatprep.mubr.msk.bf16.mxu1 %vm20148_vm1, %v20147_v15  ;;  %p20054_p10 = scmp.ne.s32.totalorder %s16416_s8, %s20053_s19  ;;  %p20061_p3 = scmp.lt.s32.totalorder %s20059_s6, %s20053_s19 }
0x2c32   : > { %19044 = vmatprep.subr.bf16.mxu1 %v20147_v15 }
0x2c33   : > { %v19802_v17 = vpop.eup %19801  ;;  %p20055_p12 = pnand %p20054_p10, %p24316_p9  ;;  %p20062_p4 = por %p20061_p3, %p20060_p1 }
0x2c34   : > { %v14817_v0 = vmul.f32 %v19802_v17, %v23837_v37  ;;  %v15167_v37 = vpop.permute.xlu1 %15166 }
0x2c35   : > { %v15172_v30 = vsel %vm1235_vm3, %v15167_v37, 0  ;;  %p20056_p13 = pneg %p20055_p12 }
0x2c36   : > { %v14825_v44 = vpack.c.bf16 %v14817_v0, %v14817_v0 }
0x2c37   : > { %v19804_v38 = vpop.eup %19803  ;;  %p20063_p8 = pnand %p20062_p4, %p20056_p13 }
0x2c38   : > { %v14818_v35 = vmul.f32 %v19804_v38, %v23841_v10  ;;  %19035 = vmatmul.mubr.msk.bf16.vlgmr.msra.gmra.mxu1 %vm785_vm2, %v14825_v44 }
0x2c39   : > { %19045 = vmatpush3.bf16.msra.mxu1 %v15076_v48  ;;  %19046 = vmatprep.mubr.msk.bf16.mxu1 %vm20148_vm1, %v20147_v15 }
0x2c3a   : > { %v14826_v12 = vpack.c.bf16 %v14818_v35, %v14818_v35  ;;  %19056 = vmatprep.subr.bf16.mxu1 %v20147_v15 }
0x2c3c   : > { %19041 = vmatmul.mubr.msk.bf16.vlgmr.msra.gmra.mxu0 %vm785_vm2, %v14826_v12 }
0x2c3d   : > { %19051 = vmatpush3.bf16.msra.mxu0 %v15124_v47  ;;  %19052 = vmatprep.mubr.msk.bf16.mxu0 %vm20148_vm1, %v20147_v15 }
0x2c3e   : > { %19062 = vmatprep.subr.bf16.mxu0 %v20147_v15 }
0x2c5a   : > { %v14799_v10 = vpop.xlane.xlu1 %14798 }
0x2c5b   : > { %19805 = vrcp.f32 %v14799_v10 }
0x2c5e   : > { %v14802_v43 = vpop.xlane.xlu0 %14801  ;;  %v15315_v20 = vpop.permute.xlu1 %15314 }
0x2c5f   : > { %19807 = vrcp.f32 %v14802_v43  ;;  %v15320_v17 = vsel %vm785_vm2, %v15315_v20, 0 }
0x2c62   : > { %v15265_v53 = vpop.permute.xlu0 %15264 }
0x2c63   : > { %v15270_v14 = vsel %vm785_vm2, %v15265_v53, 0 }
0x2c66   : > { %v15263_v2 = vpop.permute.xlu0 %15262 }
0x2c68   : > { %v19806_v13 = vpop.eup %19805 }
0x2c69   : > { %v14819_v25 = vmul.f32 %v19806_v13, %v23850_v22 }
0x2c6a   : > { %v15365_v36 = vpop.permute.xlu0 %15364 }
0x2c6b   : > { %v14827_v45 = vpack.c.bf16 %v14819_v25, %v14819_v25 }
0x2c6c   : > { %v19808_v19 = vpop.eup %19807 }
0x2c6d   : > { %v14820_v16 = vmul.f32 %v19808_v19, %v23854_v55  ;;  %19047 = vmatmul.mubr.msk.bf16.vlgmr.msra.gmra.mxu1 %vm785_vm2, %v14827_v45  ;;  %v15370_v55 = vsel %vm785_vm2, %v15365_v36, 0 }
0x2c6e   : > { %19057 = vmatpush3.bf16.msra.mxu1 %v15172_v30  ;;  %19058 = vmatprep.mubr.msk.bf16.mxu1 %vm20148_vm1, %v20147_v15  ;;  %v15363_v22 = vpop.permute.xlu0 %15362 }
0x2c6f   : > { %v14828_v61 = vpack.c.bf16 %v14820_v16, %v14820_v16  ;;  %19068 = vmatprep.subr.bf16.mxu1 %v20147_v15 }
0x2c71   : > { %19053 = vmatmul.mubr.msk.bf16.vlgmr.msra.gmra.mxu0 %vm785_vm2, %v14828_v61 }
0x2c72   : > { %19063 = vmatpush3.bf16.xpose.msra.mxu0 %v15270_v14  ;;  %19064 = vmatprep.mubr.msk.bf16.mxu0 %vm20148_vm1, %v20147_v15  ;;  %v15465_v7 = vpop.permute.xlu0 %15464 }
0x2c73   : > { %19074 = vmatprep.subr.bf16.mxu0 %v20147_v15  ;;  %v15470_v63 = vsel %vm785_vm2, %v15465_v7, 0 }
0x2c76   : > { %v15463_v40 = vpop.permute.xlu0 %15462 }
0x2c79   : > { %19065 = vmatmul.mubr.msk.bf16.vlgmr.msra.gmra.mxu0 %vm785_vm2, %v15263_v2 }
0x2c7a   : > { %19075 = vmatpush3.bf16.xpose.msra.mxu0 %v15370_v55  ;;  %19076 = vmatprep.mubr.msk.bf16.mxu0 %vm20148_vm1, %v20147_v15  ;;  %v15565_v26 = vpop.permute.xlu0 %15564 }
0x2c7b   : > { %19086 = vmatprep.subr.bf16.mxu0 %v20147_v15  ;;  %v15570_v58 = vsel %vm785_vm2, %v15565_v26, 0 }
0x2c7e   : > { %v15563_v51 = vpop.permute.xlu0 %15562 }
0x2c81   : > { %19077 = vmatmul.mubr.msk.bf16.vlgmr.msra.gmra.mxu0 %vm785_vm2, %v15363_v22 }
0x2c82   : > { %19087 = vmatpush3.bf16.xpose.msra.mxu0 %v15470_v63  ;;  %19088 = vmatprep.mubr.msk.bf16.mxu0 %vm20148_vm1, %v20147_v15 }
0x2c83   : > { %19098 = vmatprep.subr.bf16.mxu0 %v20147_v15 }
0x2c89   : > { %19089 = vmatmul.mubr.msk.bf16.vlgmr.msra.gmra.mxu0 %vm785_vm2, %v15463_v40 }
0x2c8a   : > { %19099 = vmatpush3.bf16.xpose.msra.mxu0 %v15570_v58  ;;  %19100 = vmatprep.mubr.msk.bf16.mxu0 %vm20148_vm1, %v20147_v15 }
0x2c8b   : > { %19110 = vmatprep.subr.bf16.mxu0 %v20147_v15 }
0x2c8f   : > { %v14805_v52 = vpop.xlane.xlu1 %14804 }
0x2c90   : > { %19809 = vrcp.f32 %v14805_v52 }
0x2c91   : > { %19101 = vmatmul.mubr.msk.bf16.vlgmr.msra.gmra.mxu0 %vm785_vm2, %v15563_v51 }
0x2c92   : > { %19112 = vmatprep.mubr.msk.bf16.mxu0 %vm20148_vm1, %v20147_v15 }
0x2c93   : > { %v15313_v5 = vpop.permute.xlu1 %15312 }
0x2c97   : > { %v15415_v24 = vpop.permute.xlu1 %15414 }
0x2c98   : > { %v15420_v44 = vsel %vm785_vm2, %v15415_v24, 0 }
0x2c9b   : > { %v15413_v0 = vpop.permute.xlu1 %15412 }
0x2c9d   : > { %v19810_v31 = vpop.eup %19809 }
0x2c9e   : > { %v14821_v59 = vmul.f32 %v19810_v31, %v23877_v56 }
0x2c9f   : > { %v15515_v38 = vpop.permute.xlu1 %15514 }
0x2ca0   : > { %v14829_v27 = vpack.c.bf16 %v14821_v59, %v14821_v59  ;;  %v15520_v48 = vsel %vm785_vm2, %v15515_v38, 0 }
0x2ca2   : > { %19059 = vmatmul.mubr.msk.bf16.vlgmr.msra.gmra.mxu1 %vm785_vm2, %v14829_v27 }
0x2ca3   : > { %19069 = vmatpush3.bf16.xpose.msra.mxu1 %v15320_v17  ;;  %19070 = vmatprep.mubr.msk.bf16.mxu1 %vm20148_vm1, %v20147_v15  ;;  %v15513_v56 = vpop.permute.xlu1 %15512 }
0x2ca4   : > { %19080 = vmatprep.subr.bf16.mxu1 %v20147_v15 }
0x2ca7   : > { %v15615_v35 = vpop.permute.xlu1 %15614 }
0x2ca8   : > { %v15620_v4 = vsel %vm785_vm2, %v15615_v35, 0 }
0x2caa   : > { %19071 = vmatmul.mubr.msk.bf16.vlgmr.msra.gmra.mxu1 %vm785_vm2, %v15313_v5 }
0x2cab   : > { %19081 = vmatpush3.bf16.xpose.msra.mxu1 %v15420_v44  ;;  %19082 = vmatprep.mubr.msk.bf16.mxu1 %vm20148_vm1, %v20147_v15  ;;  %v15613_v47 = vpop.permute.xlu1 %15612 }
0x2cac   : > { %19092 = vmatprep.subr.bf16.mxu1 %v20147_v15 }
0x2cb2   : > { %19083 = vmatmul.mubr.msk.bf16.vlgmr.msra.gmra.mxu1 %vm785_vm2, %v15413_v0 }
0x2cb3   : > { %19093 = vmatpush3.bf16.xpose.msra.mxu1 %v15520_v48  ;;  %19094 = vmatprep.mubr.msk.bf16.mxu1 %vm20148_vm1, %v20147_v15 }
0x2cb4   : > { %19104 = vmatprep.subr.bf16.mxu1 %v20147_v15 }
0x2cba   : > { %19095 = vmatmul.mubr.msk.bf16.vlgmr.msra.gmra.mxu1 %vm785_vm2, %v15513_v56 }
0x2cbb   : > { %19105 = vmatpush3.bf16.xpose.msra.mxu1 %v15620_v4  ;;  %19106 = vmatprep.mubr.msk.bf16.mxu1 %vm20148_vm1, %v20147_v15 }
0x2cbc   : > { %19116 = vmatprep.subr.bf16.mxu1 %v20147_v15 }
0x2cbf   : > { %v23976_v12 = vpop.f32.mrf.mxu0 }
0x2cc1   : > { %v19018_v37 = vpop.f32.mrf.mxu0 }
0x2cc2   : > { %19107 = vmatmul.mubr.msk.bf16.vlgmr.msra.gmra.mxu1 %vm785_vm2, %v15613_v47 }
0x2cc3   : > { %v14875_v10 = vpop.f32.mrf.mxu0  ;;  %19118 = vmatprep.mubr.msk.bf16.mxu1 %vm20148_vm1, %v20147_v15 }
0x2cc5   : > { %v19019_v43 = vpop.f32.mrf.mxu0 }
0x2cc7   : > { %v23981_v53 = vpop.f32.mrf.mxu0 }
0x2cc9   : > { %v19030_v13 = vpop.f32.mrf.mxu0 }
0x2ccb   : > { %v14971_v2 = vpop.f32.mrf.mxu0 }
0x2ccd   : > { %v19031_v25 = vpop.f32.mrf.mxu0 }
0x2cf0   : > { %v23983_v45 = vpop.f32.mrf.mxu1 }
0x2cf2   : > { %v19024_v19 = vpop.f32.mrf.mxu1 }
0x2cf4   : > { %v14923_v30 = vpop.f32.mrf.mxu1 }
0x2cf6   : > { %v19025_v16 = vpop.f32.mrf.mxu1 }
0x2cf8   : > { %v23985_v36 = vpop.f32.mrf.mxu1 }
0x2cfa   : > { %v19036_v61 = vpop.f32.mrf.mxu1 }
0x2cfc   : > { %v15019_v14 = vpop.f32.mrf.mxu1  ;;  %v23987_v22 = vpop.f32.mrf.mxu0 }
0x2cfe   : > { %v19037_v55 = vpop.f32.mrf.mxu1  ;;  %v19042_v7 = vpop.f32.mrf.mxu0 }
0x2d00   : > { %v15067_v40 = vpop.f32.mrf.mxu0 }
0x2d02   : > { %v19043_v63 = vpop.f32.mrf.mxu0 }
0x2d2d   : > { %v23989_v26 = vpop.f32.mrf.mxu1 }
0x2d2f   : > { %v19048_v58 = vpop.f32.mrf.mxu1 }
0x2d31   : > { %v15115_v20 = vpop.f32.mrf.mxu1  ;;  %v23991_v52 = vpop.f32.mrf.mxu0 }
0x2d33   : > { %v19049_v51 = vpop.f32.mrf.mxu1  ;;  %v19054_v5 = vpop.f32.mrf.mxu0 }
0x2d35   : > { %v15163_v31 = vpop.f32.mrf.mxu0 }
0x2d37   : > { %v19055_v59 = vpop.f32.mrf.mxu0 }
0x2d39   : > { %v15306_v24 = vpop.f32.mrf.mxu0 }
0x2d3a   : > { %v15662_v27 = vsel %vm785_vm2, %v15306_v24, -inf }
0x2d3b   : > { %15663 = vmax.xlane.f32.xlu0 %v15662_v27  ;;  %v19066_v17 = vpop.f32.mrf.mxu0 }
0x2d3d   : > { %v15309_v0 = vpop.f32.mrf.mxu0 }
0x2d3f   : > { %v19067_v44 = vpop.f32.mrf.mxu0 }
0x2d41   : > { %v15406_v38 = vpop.f32.mrf.mxu0 }
0x2d42   : > { %v15668_v56 = vsel %vm785_vm2, %v15406_v38, -inf }
0x2d43   : > { %15669 = vmax.xlane.f32.xlu0 %v15668_v56  ;;  %v19078_v48 = vpop.f32.mrf.mxu0 }
0x2d45   : > { %v15409_v35 = vpop.f32.mrf.mxu0 }
0x2d47   : > { %v19079_v4 = vpop.f32.mrf.mxu0 }
0x2d49   : > { %v23995_v47 = vpop.f32.mrf.mxu0 }
0x2d4a   : > { %v15674_v59 = vsel %vm785_vm2, %v23995_v47, -inf }
0x2d4b   : > { %v19090_v37 = vpop.f32.mrf.mxu0 }
0x2d4d   : > { %v15509_v10 = vpop.f32.mrf.mxu0 }
0x2d4f   : > { %v19091_v43 = vpop.f32.mrf.mxu0 }
0x2d51   : > { %v23997_v13 = vpop.f32.mrf.mxu0 }
0x2d52   : > { %v15680_v0 = vsel %vm785_vm2, %v23997_v13, -inf }
0x2d53   : > { %v19102_v2 = vpop.f32.mrf.mxu0 }
0x2d55   : > { %v15609_v25 = vpop.f32.mrf.mxu0 }
0x2d57   : > { %v19103_v19 = vpop.f32.mrf.mxu0 }
0x2d62   : > { %v23999_v30 = vpop.f32.mrf.mxu1 }
0x2d64   : > { %v19060_v16 = vpop.f32.mrf.mxu1 }
0x2d66   : > { %v15211_v61 = vpop.f32.mrf.mxu1 }
0x2d68   : > { %v19061_v14 = vpop.f32.mrf.mxu1 }
0x2d6a   : > { %v15356_v55 = vpop.f32.mrf.mxu1 }
0x2d6b   : > { %v15665_v7 = vsel %vm785_vm2, %v15356_v55, -inf }
0x2d6c   : > { %15666 = vmax.xlane.f32.xlu1 %v15665_v7  ;;  %v19072_v40 = vpop.f32.mrf.mxu1 }
0x2d6e   : > { %v15359_v63 = vpop.f32.mrf.mxu1 }
0x2d70   : > { %v19073_v58 = vpop.f32.mrf.mxu1 }
0x2d72   : > { %v24002_v20 = vpop.f32.mrf.mxu1 }
0x2d73   : > { %v15671_v51 = vsel %vm785_vm2, %v24002_v20, -inf }
0x2d74   : > { %15672 = vmax.xlane.f32.xlu0 %v15671_v51  ;;  %v19084_v5 = vpop.f32.mrf.mxu1 }
0x2d76   : > { %v15459_v31 = vpop.f32.mrf.mxu1 }
0x2d78   : > { %15675 = vmax.xlane.f32.xlu0 %v15674_v59  ;;  %v19085_v27 = vpop.f32.mrf.mxu1 }
0x2d7a   : > { %v24008_v17 = vpop.f32.mrf.mxu1 }
0x2d7b   : > { %v15677_v44 = vsel %vm785_vm2, %v24008_v17, -inf }
0x2d7c   : > { %15681 = vmax.xlane.f32.xlu0 %v15680_v0  ;;  %15678 = vmax.xlane.f32.xlu1 %v15677_v44  ;;  %v19096_v56 = vpop.f32.mrf.mxu1 }
0x2d7e   : > { %v15559_v48 = vpop.f32.mrf.mxu1 }
0x2d80   : > { %v19097_v35 = vpop.f32.mrf.mxu1 }
0x2d82   : > { %v24014_v4 = vpop.f32.mrf.mxu1 }
0x2d83   : > { %v15683_v2 = vsel %vm785_vm2, %v24014_v4, -inf }
0x2d84   : > { %v19108_v37 = vpop.f32.mrf.mxu1 }
0x2d86   : > { %v15659_v10 = vpop.f32.mrf.mxu1 }
0x2d88   : > { %v19109_v43 = vpop.f32.mrf.mxu1 }
0x2d8d   : > { %15806 = vrot.lane.b32.xlu1 %v23286_v8, %s20155_s2 }
0x2d91   : > { %15854 = vrot.lane.b32.xlu1 %v23258_v57, %s20155_s2 }
0x2d92   : > { %15758 = vrot.lane.b32.xlu0 %v23264_v9, %s20155_s2 }
0x2db5   : > { %15684 = vmax.xlane.f32.xlu1 %v15683_v2 }
0x2dc4   : > { %v15664_v25 = vpop.xlane.xlu0 %15663 }
0x2dc5   : > { %v15686_v19 = vsub.f32 %v15306_v24, %v15664_v25 }
0x2dc6   : > { %15902 = vrot.lane.b32.xlu1 %v23272_v21, %s20155_s2 }
0x2dc7   : > { %v15694_v16 = vmul.f32 1.442695, %v15686_v19 }
0x2dc9   : > { %19811 = vpow2.f32 %v15694_v16 }
0x2dcc   : > { %v15670_v61 = vpop.xlane.xlu0 %15669 }
0x2dcd   : > { %v15688_v14 = vsub.f32 %v15406_v38, %v15670_v61 }
0x2dcf   : > { %v15698_v8 = vmul.f32 1.442695, %v15688_v14 }
0x2dd1   : > { %19813 = vpow2.f32 %v15698_v8 }
0x2dd6   : > { %v24026_v7 = vpop.eup %19811 }
0x2dd7   : > { %v15710_v57 = vsel %vm785_vm2, %v24026_v7, 0.0 }
0x2dd8   : > { %15711 = vadd.xlane.f32.xlu0 %v15710_v57 }
0x2dde   : > { %v24030_v9 = vpop.eup %19813 }
0x2ddf   : > { %v15716_v24 = vsel %vm785_vm2, %v24030_v9, 0.0 }
0x2de0   : > { %15717 = vadd.xlane.f32.xlu0 %v15716_v24 }
0x2df5   : > { %v15667_v40 = vpop.xlane.xlu1 %15666 }
0x2df6   : > { %v15687_v21 = vsub.f32 %v15356_v55, %v15667_v40  ;;  %15950 = vrot.lane.b32.xlu0 %v23330_v39, %s20155_s2 }
0x2df8   : > { %v15696_v38 = vmul.f32 1.442695, %v15687_v21 }
0x2dfa   : > { %19815 = vpow2.f32 %v15696_v38 }
0x2dfd   : > { %v15673_v63 = vpop.xlane.xlu0 %15672 }
0x2dfe   : > { %v15689_v43 = vsub.f32 %v24002_v20, %v15673_v63 }
0x2e00   : > { %v15700_v2 = vmul.f32 1.442695, %v15689_v43 }
0x2e01   : > { %v15676_v58 = vpop.xlane.xlu0 %15675 }
0x2e02   : > { %v15690_v51 = vsub.f32 %v23995_v47, %v15676_v58 }
0x2e04   : > { %v15702_v5 = vmul.f32 1.442695, %v15690_v51 }
0x2e05   : > { %v15682_v31 = vpop.xlane.xlu0 %15681  ;;  %v15679_v59 = vpop.xlane.xlu1 %15678 }
0x2e06   : > { %19817 = vpow2.f32 %v15702_v5  ;;  %v15692_v27 = vsub.f32 %v23997_v13, %v15682_v31  ;;  %v15691_v25 = vsub.f32 %v24008_v17, %v15679_v59 }
0x2e07   : > { %v24038_v0 = vpop.eup %19815 }
0x2e08   : > { %v15706_v44 = vmul.f32 1.442695, %v15692_v27  ;;  %v15713_v55 = vsel %vm785_vm2, %v24038_v0, 0.0  ;;  %v15704_v19 = vmul.f32 1.442695, %v15691_v25 }
0x2e09   : > { %v15759_v56 = vpop.permute.xlu0 %15758  ;;  %v15807_v39 = vpop.permute.xlu1 %15806  ;;  %15714 = vadd.xlane.f32.xlu1 %v15713_v55 }
0x2e0a   : > { %19819 = vpow2.f32 %v15706_v44  ;;  %v15764_v48 = vsel %vm1235_vm3, %v15759_v56, 0  ;;  %v15812_v47 = vsel %vm1235_vm3, %v15807_v39, 0 }
0x2e0b   : > { %19111 = vmatpush3.bf16.msra.mxu0 %v15764_v48  ;;  %19117 = vmatpush3.bf16.msra.mxu1 %v15812_v47  ;;  %19821 = vpow2.f32 %v15700_v2 }
0x2e0c   : > { %19122 = vmatprep.subr.bf16.mxu0 %v20147_v15  ;;  %19128 = vmatprep.subr.bf16.mxu1 %v20147_v15  ;;  %19823 = vpow2.f32 %v15704_v19 }
0x2e13   : > { %v24046_v13 = vpop.eup %19817 }
0x2e14   : > { %v15722_v35 = vsel %vm785_vm2, %v24046_v13, 0.0 }
0x2e15   : > { %15723 = vadd.xlane.f32.xlu0 %v15722_v35 }
0x2e17   : > { %v24050_v37 = vpop.eup %19819 }
0x2e18   : > { %v15728_v10 = vsel %vm785_vm2, %v24050_v37, 0.0  ;;  %v24064_v16 = vpop.eup %19821 }
0x2e19   : > { %15729 = vadd.xlane.f32.xlu0 %v15728_v10  ;;  %v15719_v20 = vsel %vm785_vm2, %v24064_v16, 0.0  ;;  %v24070_v17 = vpop.eup %19823 }
0x2e1a   : > { %15998 = vrot.lane.b32.xlu1 %v23340_v42, %s20155_s2  ;;  %v15855_v42 = vpop.permute.xlu1 %15854 }
0x2e2f   : > { %16046 = vrot.lane.b32.xlu0 %v23343_v11, %s20155_s2 }
0x2e33   : > { %14294 = vrot.lane.b32.xlu0 %v23788_v50, %s20156_s12 }
0x2e37   : > { %14298 = vrot.lane.b32.xlu0 %v23790_v33, %s20156_s12  ;;  %v15725_v33 = vsel %vm785_vm2, %v24070_v17, 0.0 }
0x2e3b   : > { %15222 = vrot.lane.b32.xlu0 %v23976_v12, %s20157_s24 }
0x2e3e   : > { %15720 = vadd.xlane.f32.xlu1 %v15719_v20  ;;  %v15685_v11 = vpop.xlane.xlu1 %15684 }
0x2e3f   : > { %v15693_v61 = vsub.f32 %v24014_v4, %v15685_v11  ;;  %15226 = vrot.lane.b32.xlu0 %v23981_v53, %s20157_s24 }
0x2e41   : > { %v15708_v50 = vmul.f32 1.442695, %v15693_v61 }
0x2e42   : > { %15726 = vadd.xlane.f32.xlu1 %v15725_v33 }
0x2e43   : > { %19825 = vpow2.f32 %v15708_v50  ;;  %14302 = vrot.lane.b32.xlu0 %v23796_v46, %s20156_s12 }
0x2e47   : > { %14306 = vrot.lane.b32.xlu0 %v23800_v41, %s20156_s12 }
0x2e4b   : > { %15230 = vrot.lane.b32.xlu0 %v23987_v22, %s20157_s24 }
0x2e4f   : > { %15234 = vrot.lane.b32.xlu0 %v23991_v52, %s20157_s24 }
0x2e50   : > { %v24085_v12 = vpop.eup %19825 }
0x2e51   : > { %v15731_v53 = vsel %vm785_vm2, %v24085_v12, 0.0 }
0x2e52   : > { %15732 = vadd.xlane.f32.xlu1 %v15731_v53 }
0x2e61   : > { %v15712_v4 = vpop.xlane.xlu0 %15711 }
0x2e62   : > { %19827 = vrcp.f32 %v15712_v4 }
0x2e63   : > { %16094 = vrot.lane.b32.xlu1 %v23355_v1, %s20155_s2  ;;  %v15860_v1 = vsel %vm1235_vm3, %v15855_v42, 0 }
0x2e67   : > { %14296 = vrot.lane.b32.xlu1 %v23792_v6, %s20156_s12 }
0x2e69   : > { %v15718_v46 = vpop.xlane.xlu0 %15717 }
0x2e6a   : > { %19829 = vrcp.f32 %v15718_v46 }
0x2e6b   : > { %14300 = vrot.lane.b32.xlu1 %v23794_v49, %s20156_s12 }
0x2e6f   : > { %v19828_v41 = vpop.eup %19827  ;;  %15224 = vrot.lane.b32.xlu1 %v23983_v45, %s20157_s24  ;;  %v15951_v45 = vpop.permute.xlu0 %15950 }
0x2e70   : > { %v15742_v22 = vmul.f32 %v19828_v41, %v24026_v7 }
0x2e72   : > { %v15750_v52 = vpack.c.bf16 %v15742_v22, %v15742_v22 }
0x2e73   : > { %15228 = vrot.lane.b32.xlu1 %v23985_v36, %s20157_s24  ;;  %v15956_v36 = vsel %vm1235_vm3, %v15951_v45, 0 }
0x2e74   : > { %19113 = vmatmul.mubr.msk.bf16.vlgmr.msra.gmra.mxu0 %vm785_vm2, %v15750_v52 }
0x2e75   : > { %19123 = vmatpush3.bf16.msra.mxu0 %v15860_v1  ;;  %19124 = vmatprep.mubr.msk.bf16.mxu0 %vm20148_vm1, %v20147_v15 }
0x2e76   : > { %19134 = vmatprep.subr.bf16.mxu0 %v20147_v15 }
0x2e77   : > { %v19830_v6 = vpop.eup %19829  ;;  %14304 = vrot.lane.b32.xlu1 %v23798_v23, %s20156_s12  ;;  %v15903_v23 = vpop.permute.xlu1 %15902 }
0x2e78   : > { %v15744_v49 = vmul.f32 %v19830_v6, %v24030_v9  ;;  %v15908_v40 = vsel %vm1235_vm3, %v15903_v23, 0 }
0x2e7a   : > { %v15752_v14 = vpack.c.bf16 %v15744_v49, %v15744_v49 }
0x2e7b   : > { %14308 = vrot.lane.b32.xlu1 %v23808_v3, %s20156_s12 }
0x2e7c   : > { %19125 = vmatmul.mubr.msk.bf16.vlgmr.msra.gmra.mxu0 %vm785_vm2, %v15752_v14 }
0x2e7d   : > { %19135 = vmatpush3.bf16.msra.mxu0 %v15956_v36  ;;  %19136 = vmatprep.mubr.msk.bf16.mxu0 %vm20148_vm1, %v20147_v15 }
0x2e7e   : > { %19146 = vmatprep.subr.bf16.mxu0 %v20147_v15 }
0x2e7f   : > { %15232 = vrot.lane.b32.xlu1 %v23989_v26, %s20157_s24 }
0x2e83   : > { %15236 = vrot.lane.b32.xlu1 %v23999_v30, %s20157_s24  ;;  %s24315_s24 = sld [smem:[#allocation32_spill]] }
0x2e92   : > { %v15715_v8 = vpop.xlane.xlu1 %15714 }
0x2e93   : > { %19831 = vrcp.f32 %v15715_v8 }
0x2e96   : > { %v15999_v10 = vpop.permute.xlu1 %15998 }
0x2e97   : > { %v16004_v33 = vsel %vm1235_vm3, %v15999_v10, 0  ;;  %v19330_v10 = vld [vmem:[#allocation16 + $0x10] sm:$0xff]  }
0x2e9e   : > { %v15724_v3 = vpop.xlane.xlu0 %15723 }
0x2e9f   : > { %19833 = vrcp.f32 %v15724_v3 }
0x2ea0   : > { %v19832_v7 = vpop.eup %19831 }
0x2ea1   : > { %v15743_v57 = vmul.f32 %v19832_v7, %v24038_v0 }
0x2ea2   : > { %v15730_v9 = vpop.xlane.xlu0 %15729 }
0x2ea3   : > { %v15751_v24 = vpack.c.bf16 %v15743_v57, %v15743_v57  ;;  %19835 = vrcp.f32 %v15730_v9 }
0x2ea5   : > { %19119 = vmatmul.mubr.msk.bf16.vlgmr.msra.gmra.mxu1 %vm785_vm2, %v15751_v24 }
0x2ea6   : > { %19129 = vmatpush3.bf16.msra.mxu1 %v15908_v40  ;;  %v16047_v26 = vpop.permute.xlu0 %16046  ;;  %19130 = vmatprep.mubr.msk.bf16.mxu1 %vm20148_vm1, %v20147_v15 }
0x2ea7   : > { %19140 = vmatprep.subr.bf16.mxu1 %v20147_v15  ;;  %v16052_v59 = vsel %vm1235_vm3, %v16047_v26, 0 }
0x2eaa   : > { %v14295_v30 = vpop.permute.xlu0 %14294 }
0x2eab   : > { %v14318_v21 = vadd.f32 %v14295_v30, %v23262_v28 }
0x2eac   : > { %v19834_v38 = vpop.eup %19833 }
0x2ead   : > { %v15746_v63 = vmul.f32 %v19834_v38, %v24046_v13  ;;  %14326 = vst.msk [vmem:[#allocation3] sm:$0xff] %vm2524_vm4, %v14318_v21 }
0x2eae   : > { %v14299_v58 = vpop.permute.xlu0 %14298 }
0x2eaf   : > { %v15754_v51 = vpack.c.bf16 %v15746_v63, %v15746_v63  ;;  %v14320_v5 = vadd.f32 %v14299_v58, %v23256_v29 }
0x2eb0   : > { %v19836_v31 = vpop.eup %19835 }
0x2eb1   : > { %14328 = vst.msk [vmem:[#allocation3 + $0x10] sm:$0xff] %vm2524_vm4, %v14320_v5  ;;  %19137 = vmatmul.mubr.msk.bf16.vlgmr.msra.gmra.mxu0 %vm785_vm2, %v15754_v51  ;;  %v15748_v0 = vmul.f32 %v19836_v31, %v24050_v37 }
0x2eb2   : > { %19147 = vmatpush3.bf16.msra.mxu0 %v16052_v59  ;;  %v15223_v27 = vpop.permute.xlu0 %15222  ;;  %19148 = vmatprep.mubr.msk.bf16.mxu0 %vm20148_vm1, %v20147_v15 }
0x2eb3   : > { %v15246_v44 = vadd.f32 %v15223_v27, %v23262_v28  ;;  %v15756_v56 = vpack.c.bf16 %v15748_v0, %v15748_v0 }
0x2eb5   : > { %15254 = vst.msk [vmem:[#allocation3] sm:$0xff] %vm3418_vm5, %v15246_v44 }
0x2eb6   : > { %v15227_v55 = vpop.permute.xlu0 %15226 }
0x2eb7   : > { %v15248_v39 = vadd.f32 %v15227_v55, %v23256_v29 }
0x2eb9   : > { %15256 = vst.msk [vmem:[#allocation3 + $0x10] sm:$0xff] %vm3418_vm5, %v15248_v39  ;;  %19149 = vmatmul.mubr.msk.bf16.vlgmr.msra.gmra.mxu0 %vm785_vm2, %v15756_v56 }
0x2eba   : > { %v14303_v48 = vpop.permute.xlu0 %14302 }
0x2ebb   : > { %v14322_v47 = vadd.f32 %v14303_v48, %v23328_v18 }
0x2ebd   : > { %14330 = vst.msk [vmem:[#allocation3 + $0x20] sm:$0xff] %vm2524_vm4, %v14322_v47 }
0x2ebe   : > { %v14307_v13 = vpop.permute.xlu0 %14306 }
0x2ebf   : > { %v14324_v35 = vadd.f32 %v14307_v13, %v23349_v60 }
0x2ec1   : > { %14332 = vst.msk [vmem:[#allocation3 + $0x30] sm:$0xff] %vm2524_vm4, %v14324_v35 }
0x2ec2   : > { %v15231_v37 = vpop.permute.xlu0 %15230 }
0x2ec3   : > { %v15250_v43 = vadd.f32 %v15231_v37, %v23328_v18  ;;  %v19329_v37 = vld [vmem:[#allocation16 + $0x18] sm:$0xff]  }
0x2ec4   : > { %19158 = vmatprep.subr.bf16.mxu0 %v19329_v37 }
0x2ec5   : > { %15258 = vst.msk [vmem:[#allocation3 + $0x20] sm:$0xff] %vm3418_vm5, %v15250_v43  ;;  %19159 = vmatpush3.bf16.msra.mxu0 %v19329_v37 }
0x2ec6   : > { %v15235_v2 = vpop.permute.xlu0 %15234  ;;  %19160 = vmatprep.subr.bf16.mxu0 %v19330_v10 }
0x2ec7   : > { %v15252_v25 = vadd.f32 %v15235_v2, %v23349_v60  ;;  %v15721_v19 = vpop.xlane.xlu1 %15720 }
0x2ec8   : > { %19837 = vrcp.f32 %v15721_v19 }
0x2ec9   : > { %15260 = vst.msk [vmem:[#allocation3 + $0x30] sm:$0xff] %vm3418_vm5, %v15252_v25  ;;  %19161 = vmatpush3.bf16.msra.mxu0 %v19330_v10 }
0x2ecb   : > { %v15727_v42 = vpop.xlane.xlu1 %15726 }
0x2ecc   : > { %19839 = vrcp.f32 %v15727_v42 }
0x2ed5   : > { %v19838_v20 = vpop.eup %19837 }
0x2ed6   : > { %v15745_v11 = vmul.f32 %v19838_v20, %v24064_v16 }
0x2ed8   : > { %v15753_v61 = vpack.c.bf16 %v15745_v11, %v15745_v11 }
0x2ed9   : > { %v19840_v50 = vpop.eup %19839 }
0x2eda   : > { %19131 = vmatmul.mubr.msk.bf16.vlgmr.msra.gmra.mxu1 %vm785_vm2, %v15753_v61  ;;  %v15747_v4 = vmul.f32 %v19840_v50, %v24070_v17 }
0x2edb   : > { %19141 = vmatpush3.bf16.msra.mxu1 %v16004_v33  ;;  %v15733_v53 = vpop.xlane.xlu1 %15732  ;;  %19142 = vmatprep.mubr.msk.bf16.mxu1 %vm20148_vm1, %v20147_v15 }
0x2edc   : > { %19841 = vrcp.f32 %v15733_v53  ;;  %19152 = vmatprep.subr.bf16.mxu1 %v20147_v15  ;;  %v15755_v41 = vpack.c.bf16 %v15747_v4, %v15747_v4 }
0x2edf   : > { %v16095_v46 = vpop.permute.xlu1 %16094 }
0x2ee0   : > { %v16100_v16 = vsel %vm1235_vm3, %v16095_v46, 0 }
0x2ee2   : > { %19143 = vmatmul.mubr.msk.bf16.vlgmr.msra.gmra.mxu1 %vm785_vm2, %v15755_v41 }
0x2ee3   : > { %19153 = vmatpush3.bf16.msra.mxu1 %v16100_v16  ;;  %v14297_v22 = vpop.permute.xlu1 %14296  ;;  %19154 = vmatprep.mubr.msk.bf16.mxu1 %vm20148_vm1, %v20147_v15 }
0x2ee4   : > { %v14319_v52 = vadd.f32 %v14297_v22, %v23291_v62 }
0x2ee6   : > { %14327 = vst.msk [vmem:[#allocation3 + $0x8] sm:$0xff] %vm2524_vm4, %v14319_v52 }
0x2ee7   : > { %v14301_v1 = vpop.permute.xlu1 %14300 }
0x2ee8   : > { %v14321_v17 = vadd.f32 %v14301_v1, %v23308_v34 }
0x2ee9   : > { %v19842_v6 = vpop.eup %19841 }
0x2eea   : > { %v15749_v49 = vmul.f32 %v19842_v6, %v24085_v12  ;;  %14329 = vst.msk [vmem:[#allocation3 + $0x18] sm:$0xff] %vm2524_vm4, %v14321_v17 }
0x2eeb   : > { %v15225_v45 = vpop.permute.xlu1 %15224 }
0x2eec   : > { %v15757_v14 = vpack.c.bf16 %v15749_v49, %v15749_v49  ;;  %v15247_v36 = vadd.f32 %v15225_v45, %v23291_v62 }
0x2eee   : > { %15255 = vst.msk [vmem:[#allocation3 + $0x8] sm:$0xff] %vm3418_vm5, %v15247_v36  ;;  %19155 = vmatmul.mubr.msk.bf16.vlgmr.msra.gmra.mxu1 %vm785_vm2, %v15757_v14 }
0x2eef   : > { %v15229_v15 = vpop.permute.xlu1 %15228 }
0x2ef0   : > { %v15249_v23 = vadd.f32 %v15229_v15, %v23308_v34 }
0x2ef2   : > { %15257 = vst.msk [vmem:[#allocation3 + $0x18] sm:$0xff] %vm3418_vm5, %v15249_v23 }
0x2ef3   : > { %v14305_v8 = vpop.permute.xlu1 %14304 }
0x2ef4   : > { %v14323_v3 = vadd.f32 %v14305_v8, %v23338_v32 }
0x2ef6   : > { %14331 = vst.msk [vmem:[#allocation3 + $0x28] sm:$0xff] %vm2524_vm4, %v14323_v3 }
0x2ef7   : > { %v14309_v12 = vpop.permute.xlu1 %14308 }
0x2ef8   : > { %v14325_v7 = vadd.f32 %v14309_v12, %v23365_v54 }
0x2efa   : > { %14333 = vst.msk [vmem:[#allocation3 + $0x38] sm:$0xff] %vm2524_vm4, %v14325_v7 }
0x2efb   : > { %v15233_v57 = vpop.permute.xlu1 %15232 }
0x2efc   : > { %v15251_v9 = vadd.f32 %v15233_v57, %v23338_v32 }
0x2efe   : > { %15259 = vst.msk [vmem:[#allocation3 + $0x28] sm:$0xff] %vm3418_vm5, %v15251_v9 }
0x2eff   : > { %v15237_v24 = vpop.permute.xlu1 %15236 }
0x2f00   : > { %v15253_v40 = vadd.f32 %v15237_v24, %v23365_v54 }
0x2f02   : > { %15261 = vst.msk [vmem:[#allocation3 + $0x38] sm:$0xff] %vm3418_vm5, %v15253_v40  ;;  %v16908_v40 = vld [vmem:[%s24276_s13 + $0x1] ss:$0 sm:$0xff] }
0x2f34   : > { %v15800_v26 = vpop.f32.mrf.mxu0 }
0x2f35   : > { %16150 = vrot.lane.b32.xlu0 %v15800_v26, %s20158_s21 }
0x2f36   : > { %v19114_v30 = vpop.f32.mrf.mxu0 }
0x2f38   : > { %v15803_v21 = vpop.f32.mrf.mxu0 }
0x2f3a   : > { %v19115_v38 = vpop.f32.mrf.mxu0 }
0x2f3c   : > { %v15896_v63 = vpop.f32.mrf.mxu0 }
0x2f3d   : > { %16154 = vrot.lane.b32.xlu0 %v15896_v63, %s20158_s21 }
0x2f3e   : > { %v19126_v58 = vpop.f32.mrf.mxu0 }
0x2f40   : > { %v15899_v51 = vpop.f32.mrf.mxu0 }
0x2f42   : > { %v19127_v5 = vpop.f32.mrf.mxu0 }
0x2f65   : > { %v15848_v31 = vpop.f32.mrf.mxu1 }
0x2f66   : > { %16152 = vrot.lane.b32.xlu1 %v15848_v31, %s20158_s21 }
0x2f67   : > { %v19120_v59 = vpop.f32.mrf.mxu1 }
0x2f69   : > { %v15851_v27 = vpop.f32.mrf.mxu1 }
0x2f6b   : > { %v19121_v0 = vpop.f32.mrf.mxu1 }
0x2f71   : > { %v15992_v44 = vpop.f32.mrf.mxu0 }
0x2f72   : > { %16158 = vrot.lane.b32.xlu0 %v15992_v44, %s20158_s21 }
0x2f73   : > { %v19138_v55 = vpop.f32.mrf.mxu0 }
0x2f75   : > { %v15995_v56 = vpop.f32.mrf.mxu0 }
0x2f77   : > { %v19139_v39 = vpop.f32.mrf.mxu0 }
0x2f79   : > { %v16088_v48 = vpop.f32.mrf.mxu0 }
0x2f7a   : > { %16162 = vrot.lane.b32.xlu0 %v16088_v48, %s20158_s21 }
0x2f7b   : > { %v19150_v47 = vpop.f32.mrf.mxu0 }
0x2f7d   : > { %v16091_v13 = vpop.f32.mrf.mxu0 }
0x2f7f   : > { %v19151_v35 = vpop.f32.mrf.mxu0 }
0x2f9a   : > { %v15944_v43 = vpop.f32.mrf.mxu1 }
0x2f9b   : > { %16156 = vrot.lane.b32.xlu1 %v15944_v43, %s20158_s21 }
0x2f9c   : > { %v19132_v2 = vpop.f32.mrf.mxu1 }
0x2f9e   : > { %v15947_v25 = vpop.f32.mrf.mxu1 }
0x2fa0   : > { %v19133_v19 = vpop.f32.mrf.mxu1 }
0x2fa2   : > { %v16040_v42 = vpop.f32.mrf.mxu1 }
0x2fa3   : > { %16160 = vrot.lane.b32.xlu1 %v16040_v42, %s20158_s21 }
0x2fa4   : > { %v19144_v20 = vpop.f32.mrf.mxu1 }
0x2fa6   : > { %v16043_v11 = vpop.f32.mrf.mxu1 }
0x2fa7   : > { %v16151_v61 = vpop.permute.xlu0 %16150 }
0x2fa8   : > { %v16174_v50 = vadd.f32 %v16151_v61, %v23262_v28  ;;  %v19145_v33 = vpop.f32.mrf.mxu1 }
0x2faa   : > { %16182 = vst.msk [vmem:[#allocation3] sm:$0xff] %vm4312_vm6, %v16174_v50 }
0x2fae   : > { %v16136_v53 = vpop.f32.mrf.mxu1 }
0x2faf   : > { %v16155_v4 = vpop.permute.xlu0 %16154  ;;  %16164 = vrot.lane.b32.xlu1 %v16136_v53, %s20158_s21  ;;  %s24225_s21 = scalar_lea.hbm %s24315_s24, %s16916_s17 }
0x2fb0   : > { %v16176_v46 = vadd.f32 %v16155_v4, %v23256_v29  ;;  %v19156_v41 = vpop.f32.mrf.mxu1 }
0x2fb1   : > { %v16190_v28 = vld [vmem:[#allocation3] sm:$0xff] }
0x2fb2   : > { %16184 = vst.msk [vmem:[#allocation3 + $0x10] sm:$0xff] %vm4312_vm6, %v16176_v46  ;;  %v16139_v16 = vpop.f32.mrf.mxu1 }
0x2fb4   : > { %v19157_v22 = vpop.f32.mrf.mxu1 }
0x2fb9   : > { %v16192_v8 = vld [vmem:[#allocation3 + $0x10] sm:$0xff] }
0x2fd8   : > { %v16153_v52 = vpop.permute.xlu1 %16152 }
0x2fd9   : > { %v16175_v1 = vadd.f32 %v16153_v52, %v23291_v62 }
0x2fdb   : > { %16183 = vst.msk [vmem:[#allocation3 + $0x8] sm:$0xff] %vm4312_vm6, %v16175_v1 }
0x2fe2   : > { %v16191_v17 = vld [vmem:[#allocation3 + $0x8] sm:$0xff] }
0x2fe3   : > { %v16198_v6 = vpack.c.bf16 %v16191_v17, %v16190_v28 }
0x2fe4   : > { %v16159_v49 = vpop.permute.xlu0 %16158 }
0x2fe5   : > { %v16178_v45 = vadd.f32 %v16159_v49, %v23328_v18  ;;  %19162 = vmatprep.mubr.msk.bf16.mxu0 %vm636_vm0, %v16198_v6 }
0x2fe7   : > { %16186 = vst.msk [vmem:[#allocation3 + $0x20] sm:$0xff] %vm4312_vm6, %v16178_v45 }
0x2fec   : > { %v16163_v29 = vpop.permute.xlu0 %16162 }
0x2fed   : > { %v16180_v14 = vadd.f32 %v16163_v29, %v23349_v60 }
0x2fee   : > { %v16194_v12 = vld [vmem:[#allocation3 + $0x20] sm:$0xff] }
0x2fef   : > { %16188 = vst.msk [vmem:[#allocation3 + $0x30] sm:$0xff] %vm4312_vm6, %v16180_v14 }
0x300d   : > { %v16157_v36 = vpop.permute.xlu1 %16156 }
0x300e   : > { %v16177_v62 = vadd.f32 %v16157_v36, %v23308_v34 }
0x3010   : > { %16185 = vst.msk [vmem:[#allocation3 + $0x18] sm:$0xff] %vm4312_vm6, %v16177_v62 }
0x3015   : > { %v16161_v15 = vpop.permute.xlu1 %16160 }
0x3016   : > { %v16179_v23 = vadd.f32 %v16161_v15, %v23338_v32  ;;  %v16196_v32 = vld [vmem:[#allocation3 + $0x30] sm:$0xff] }
0x3017   : > { %v16193_v3 = vld [vmem:[#allocation3 + $0x18] sm:$0xff] }
0x3018   : > { %16187 = vst.msk [vmem:[#allocation3 + $0x28] sm:$0xff] %vm4312_vm6, %v16179_v23  ;;  %v16199_v18 = vpack.c.bf16 %v16193_v3, %v16192_v8 }
0x301a   : > { %19163 = vmatmul.mubr.msk.bf16.vlgmr.msra.gmra.mxu0 %vm636_vm0, %v16199_v18 }
0x301f   : > { %v24201_v7 = vld [vmem:[#allocation3 + $0x28] sm:$0xff] }
0x3020   : > { %v16200_v60 = vpack.c.bf16 %v24201_v7, %v16194_v12 }
0x3021   : > { %v16165_v57 = vpop.permute.xlu1 %16164 }
0x3022   : > { %v16181_v34 = vadd.f32 %v16165_v57, %v23365_v54  ;;  %19166 = vmatprep.mubr.msk.bf16.mxu0 %vm636_vm0, %v16200_v60 }
0x3024   : > { %16189 = vst.msk [vmem:[#allocation3 + $0x38] sm:$0xff] %vm4312_vm6, %v16181_v34 }
0x302b   : > { %v16197_v9 = vld [vmem:[#allocation3 + $0x38] sm:$0xff] }
0x302c   : > { %v16201_v24 = vpack.c.bf16 %v16197_v9, %v16196_v32 }
0x302e   : > { %19167 = vmatmul.mubr.msk.bf16.gmra.mxu0 %vm636_vm0, %v16201_v24 }
0x30da   : > { %v19164_v26 = vpop.f32.mrf.mxu0 }
0x30db   : > { %v16275_v30 = vadd.f32 %v19164_v26, %v16908_v40 }
0x30dc   : > { %v16266_v21 = vpop.f32.mrf.mxu0 }
0x30dd   : > { %v16267_v38 = vadd.f32 %v16908_v40, %v16266_v21  ;;  %v16299_v51 = vmax.f32 %v16275_v30, 0.0 }
0x30de   : > { %v19165_v63 = vpop.f32.mrf.mxu0 }
0x30df   : > { %v16297_v58 = vmax.f32 %v16267_v38, 0.0  ;;  %v16278_v54 = vadd.f32 %v19165_v63, %v16908_v40  ;;  %v16307_v44 = vadd.f32 %v16299_v51, %v16192_v8 }
0x30e0   : > { %v16269_v5 = vpop.f32.mrf.mxu0 }
0x30e1   : > { %v16305_v31 = vadd.f32 %v16297_v58, %v16190_v28  ;;  %v16300_v59 = vmax.f32 %v16278_v54, 0.0  ;;  %v16270_v27 = vadd.f32 %v16908_v40, %v16269_v5  ;;  %v16327_v47 = vsel %vm636_vm0, %v16307_v44, 0.0 }
0x30e2   : > { %v16328_v43 = vrot.slane %v16327_v47, 4 }
0x30e3   : > { %v16298_v0 = vmax.f32 %v16270_v27, 0.0  ;;  %v16313_v55 = vsel %vm636_vm0, %v16305_v31, 0.0  ;;  %v16308_v56 = vadd.f32 %v16300_v59, %v16193_v3 }
0x30e4   : > { %v16314_v13 = vrot.slane %v16313_v55, 4  ;;  %v16329_v20 = vadd.f32 %v16328_v43, %v16327_v47 }
0x30e5   : > { %v16306_v39 = vadd.f32 %v16298_v0, %v16191_v17  ;;  %v16334_v37 = vsel %vm636_vm0, %v16308_v56, 0.0 }
0x30e6   : > { %v16315_v2 = vadd.f32 %v16314_v13, %v16313_v55  ;;  %v16335_v25 = vrot.slane %v16334_v37, 4  ;;  %v16330_v16 = vrot.slane %v16329_v20, 2 }
0x30e7   : > { %v16320_v48 = vsel %vm636_vm0, %v16306_v39, 0.0 }
0x30e8   : > { %v16321_v35 = vrot.slane %v16320_v48, 4  ;;  %v16316_v61 = vrot.slane %v16315_v2, 2  ;;  %v16336_v50 = vadd.f32 %v16335_v25, %v16334_v37  ;;  %v16331_v15 = vadd.f32 %v16330_v16, %v16329_v20 }
0x30ea   : > { %v16322_v10 = vadd.f32 %v16321_v35, %v16320_v48  ;;  %v16317_v28 = vadd.f32 %v16316_v61, %v16315_v2  ;;  %v16337_v17 = vrot.slane %v16336_v50, 2 }
0x30ec   : > { %v16323_v19 = vrot.slane %v16322_v10, 2  ;;  %v16318_v18 = vrot.slane %v16317_v28, 1  ;;  %v16338_v34 = vadd.f32 %v16337_v17, %v16336_v50 }
0x30ee   : > { %v19168_v42 = vpop.f32.mrf.mxu0  ;;  %v16324_v46 = vadd.f32 %v16323_v19, %v16322_v10  ;;  %v16319_v63 = vadd.f32 %v16318_v18, %v16317_v28  ;;  %v16339_v51 = vrot.slane %v16338_v34, 1 }
0x30ef   : > { %v16291_v11 = vadd.f32 %v19168_v42, %v16908_v40 }
0x30f0   : > { %v16282_v33 = vpop.f32.mrf.mxu0  ;;  %v16325_v36 = vrot.slane %v16324_v46, 1  ;;  %v16340_v48 = vadd.f32 %v16339_v51, %v16338_v34 }
0x30f1   : > { %v16303_v53 = vmax.f32 %v16291_v11, 0.0  ;;  %v16283_v4 = vadd.f32 %v16908_v40, %v16282_v33 }
0x30f2   : > { %v19169_v41 = vpop.f32.mrf.mxu0  ;;  %v16326_v26 = vadd.f32 %v16325_v36, %v16324_v46  ;;  %v16372_v20 = vmul.f32 0.125, %v16340_v48 }
0x30f3   : > { %v16311_v22 = vadd.f32 %v16303_v53, %v16196_v32  ;;  %v16301_v52 = vmax.f32 %v16283_v4, 0.0  ;;  %v16294_v1 = vadd.f32 %v19169_v41, %v16908_v40 }
0x30f4   : > { %v16285_v6 = vpop.f32.mrf.mxu0  ;;  %v16370_v31 = vmul.f32 0.125, %v16326_v26 }
0x30f5   : > { %v16355_v49 = vsel %vm636_vm0, %v16311_v22, 0.0  ;;  %v16309_v45 = vadd.f32 %v16301_v52, %v16194_v12  ;;  %v16304_v29 = vmax.f32 %v16294_v1, 0.0  ;;  %v16286_v14 = vadd.f32 %v16908_v40, %v16285_v6 }
0x30f6   : > { %v16356_v62 = vrot.slane %v16355_v49, 4  ;;  %v16332_v40 = vrot.slane %v16331_v15, 1 }
0x30f7   : > { %v16341_v23 = vsel %vm636_vm0, %v16309_v45, 0.0  ;;  %v16312_v8 = vadd.f32 %v16304_v29, %v16197_v9  ;;  %v16302_v3 = vmax.f32 %v16286_v14, 0.0 }
0x30f8   : > { %v16357_v60 = vadd.f32 %v16356_v62, %v16355_v49  ;;  %v16342_v57 = vrot.slane %v16341_v23, 4  ;;  %v16333_v44 = vadd.f32 %v16332_v40, %v16331_v15 }
0x30f9   : > { %v16362_v32 = vsel %vm636_vm0, %v16312_v8, 0.0  ;;  %v16310_v24 = vadd.f32 %v16302_v3, %v24201_v7  ;;  %v16369_v7 = vmul.f32 0.125, %v16319_v63 }
0x30fa   : > { %v16358_v30 = vrot.slane %v16357_v60, 2  ;;  %v16343_v12 = vadd.f32 %v16342_v57, %v16341_v23  ;;  %v16363_v21 = vrot.slane %v16362_v32, 4  ;;  %v16371_v43 = vmul.f32 0.125, %v16333_v44 }
0x30fb   : > { %v16348_v38 = vsel %vm636_vm0, %v16310_v24, 0.0  ;;  %v16386_v13 = vsel %vm16385_vm7, %v16370_v31, %v16369_v7 }
0x30fc   : > { %v16344_v58 = vrot.slane %v16343_v12, 2  ;;  %v16364_v54 = vadd.f32 %v16363_v21, %v16362_v32  ;;  %v16349_v9 = vrot.slane %v16348_v38, 4  ;;  %v16359_v5 = vadd.f32 %v16358_v30, %v16357_v60 }
0x30fd   : > { %v16388_v25 = vsel %vm16387_vm8, %v16371_v43, %v16386_v13 }
0x30fe   : > { %v16345_v59 = vadd.f32 %v16344_v58, %v16343_v12  ;;  %v16365_v27 = vrot.slane %v16364_v54, 2  ;;  %v16350_v0 = vadd.f32 %v16349_v9, %v16348_v38  ;;  %v16360_v47 = vrot.slane %v16359_v5, 1 }
0x30ff   : > { %v16390_v50 = vsel %vm16389_vm9, %v16372_v20, %v16388_v25 }
0x3100   : > { %v16346_v55 = vrot.slane %v16345_v59, 1  ;;  %v16366_v56 = vadd.f32 %v16365_v27, %v16364_v54  ;;  %v16351_v39 = vrot.slane %v16350_v0, 2  ;;  %v16361_v19 = vadd.f32 %v16360_v47, %v16359_v5 }
0x3102   : > { %v16347_v35 = vadd.f32 %v16346_v55, %v16345_v59  ;;  %v16367_v37 = vrot.slane %v16366_v56, 1  ;;  %v16352_v10 = vadd.f32 %v16351_v39, %v16350_v0  ;;  %v16375_v53 = vmul.f32 0.125, %v16361_v19 }
0x3104   : > { %v16353_v2 = vrot.slane %v16352_v10, 1  ;;  %v16373_v42 = vmul.f32 0.125, %v16347_v35  ;;  %v16368_v11 = vadd.f32 %v16367_v37, %v16366_v56 }
0x3106   : > { %v16354_v61 = vadd.f32 %v16353_v2, %v16352_v10  ;;  %v16392_v4 = vsel %vm16391_vm10, %v16373_v42, %v16390_v50  ;;  %v16376_v46 = vmul.f32 0.125, %v16368_v11 }
0x3108   : > { %v16374_v33 = vmul.f32 0.125, %v16354_v61 }
0x310a   : > { %v16394_v41 = vsel %vm16393_vm11, %v16374_v33, %v16392_v4 }
0x310b   : > { %v16396_v16 = vsel %vm16395_vm12, %v16375_v53, %v16394_v41 }
0x310c   : > { %v16398_v22 = vsel %vm16397_vm13, %v16376_v46, %v16396_v16 }
0x310d   : > { %16400 = vst.msk [vmem:[%s587_s22] sm:$0xff] %vm636_vm0, %v16398_v22 }
0x310e   : > { %20066 = shalt.err (!%p20063_p8)
}
0x310f   : > { %s20067_s20 = scalar_lea.hbm %s24225_s21, 128  ;;  %s20071_s18 = scalar_lea.hbm %s24315_s24, 256 }
0x3110   : > { %p20068_p6 = scmp.ne.s32.totalorder %s24225_s21, %s20067_s20  ;;  %p20072_p0 = scmp.lt.s32.totalorder %s24225_s21, %s24315_s24 }
0x3111   : > { %p20073_p2 = scmp.lt.s32.totalorder %s20071_s18, %s20067_s20 }
0x3112   : > { %p20069_p11 = pnand %p20068_p6, %p24316_p9 }
0x3113   : > { %p20074_p5 = por %p20073_p2, %p20072_p0 }
0x3114   : > { %p20070_p7 = pneg %p20069_p11 }
0x3116   : > { %p20075_p10 = pnand %p20074_p5, %p20070_p7 }
0x3118   : > { %20078 = shalt.err (!%p20075_p10)
}
0x3119   : > { %19204 = dma.vmem_to_hbm [thread:$0]  (%p24316_p9), %s16416_s8, 128, %s24225_s21, %s16402_s1  }
0x311a PF: > { %s16427_s2 = sand.u32 1, %s20121_s29   ;;  %p24317_p12 = scmp.ne.s32.totalorder %s24303_s14, 0 }
0x311b   : > { %p24318_p13 = scmp.ge.s32.totalorder %s20133_s16, 2  ;;  %s16428_s12 = scalar_lea.sflag [#allocation6], %s16427_s2 }
0x311d   : > { %p19233_p1 = pnand %p24318_p13, %p24317_p12 }
0x311f   : > { %p19234_p3 = pneg %p19233_p1 }
0x3121   : > { %20116 = dma.done.wait (%p19234_p3), %s16428_s12, 128  }
0x3122   : > { %20118 = vsyncadd (%p19234_p3), %s16428_s12, 4294967168  ;;  %p31_p4 = scmp.ge.s32.totalorder %s20366_s26, 4   ;;  %s24319_s29 = smov %s20125_s30 }
0x3123   : > { %s24320_s30 = smov %s20129_s15  ;;  %s24321_s15 = smov %s20378_s25 }
0x3124   : > { %s24322_s16 = smov %s20366_s26  ;;  %33 = sbr.rel (!%p31_p4) target bundleno = 18 (0x12), region = 162 }
0x3129   :  { %16433 = vsyncpa [#allocation5], 1 }
0x312a   :  { %16435 = vsyncpa [#allocation5 + $0x1], 1 }
0x312b   :  { %16436 = vsyncpa [#allocation8], 1 }
0x312c   :  { %16437 = vsyncpa [#allocation11], 1 }
0x312d   :  { %16438 = vsyncpa [#allocation14], 1 }
0x312e   :  { %16439 = vsyncpa [#allocation17], 1 }
0x312f   :  { %16440 = vsyncpa [#allocation6], 1 }
0x3130   :  { %16442 = vsyncpa [#allocation6 + $0x1], 1 }

</bundles_post_ra>
